<compile_context>
chip_gen: v7x
topology: tpu7x:2x2x1
jax: 0.10.0
libtpu: 0.0.40
codegen_flags: <defaults>
</compile_context>

<pallas_src>
from functools import partial

import jax
import jax.numpy as jnp
from jax import lax
from jax.experimental import pallas as pl
from jax.experimental.pallas import tpu as pltpu

INPUT_SIZE = 42
HIDDEN = 100
NUM_CLASSES = 10
NUM_LAYERS = 3
NUM_FC = 7

HP = 128            # padded hidden size (lane-aligned)
GP = 4 * HP         # 512 padded gate width
H3 = 3 * HP         # sigmoid slab width (i, f, o)
FEAT_PAD = 128      # padded input feature dim
GATE_PERM = (0, 1, 3, 2)   # new gate order (i, f, o, g) from PyTorch (i, f, g, o)


# --------------------------------------------------------------------------
# Kernel
# --------------------------------------------------------------------------
def rnn_kernel(x_ref,                       # (T*BP, 128) bf16 padded inputs, time-major
               wih0_ref, whh0_ref, b0_ref,  # (128,512)bf16 (128,512)bf16 (1,512)f32
               wih1_ref, whh1_ref, b1_ref,  # (128,512)bf16 (128,512)bf16 (1,512)f32
               wih2_ref, whh2_ref, b2_ref,  # (128,512)bf16 (128,512)bf16 (1,512)f32
               fcw_ref, fcb_ref,            # (7,128,128) (7,1,128)  f32
               headw_ref, headb_ref,        # (128,128) (1,128)      f32 fused heads
               out_ref,                     # (BP,128)
               pre0_ref,                    # scratch (T*BP, 512) f32
               *, T, BP):
    # ---- Hoisted layer-0 input projection + bias: one big bf16 MXU call,
    # ---- off the recurrent critical path. Accumulation in f32.
    pre0_ref[...] = (
        jnp.dot(x_ref[...], wih0_ref[...], preferred_element_type=jnp.float32)
        + b0_ref[...])

    def lstm_act(gates, c_prev):
        # Gate blocks (128 lanes each, aligned): [ i | f | o | g ]
        sg = jax.nn.sigmoid(gates[:, :H3])      # one wide sigmoid (i, f, o)
        g = jnp.tanh(gates[:, H3:])
        i_g = sg[:, 0:HP]
        f_g = sg[:, HP:2 * HP]
        o_g = sg[:, 2 * HP:H3]
        c = f_g * c_prev + i_g * g
        h = o_g * jnp.tanh(c)
        return h, c

    def step(t, carry):
        h0, c0, h1, c1, h2, c2 = carry
        row = pl.multiple_of(t * BP, BP)
        pre_t = pre0_ref[pl.ds(row, BP), :]                       # (BP, 512) f32

        # Layer 0: only the recurrent half remains on the chain (bf16 weights).
        g0 = pre_t + jnp.dot(h0.astype(jnp.bfloat16), whh0_ref[...],
                             preferred_element_type=jnp.float32)
        h0, c0 = lstm_act(g0, c0)

        # Layer 1: two dots on separate weight refs (no concat copy on the
        # serial path); bias added from the (1,512) ref per step.
        g1 = (jnp.dot(h0.astype(jnp.bfloat16), wih1_ref[...],
                      preferred_element_type=jnp.float32)
              + jnp.dot(h1.astype(jnp.bfloat16), whh1_ref[...],
                        preferred_element_type=jnp.float32)
              + b1_ref[...])
        h1, c1 = lstm_act(g1, c1)

        # Layer 2.
        g2 = (jnp.dot(h1.astype(jnp.bfloat16), wih2_ref[...],
                      preferred_element_type=jnp.float32)
              + jnp.dot(h2.astype(jnp.bfloat16), whh2_ref[...],
                        preferred_element_type=jnp.float32)
              + b2_ref[...])
        h2, c2 = lstm_act(g2, c2)
        return (h0, c0, h1, c1, h2, c2)

    z = jnp.zeros((BP, HP), jnp.float32)
    # Bounded unroll: full unroll only for short sequences (code-size guard).
    unroll = True if T <= 16 else 8
    carry = lax.fori_loop(0, T, step, (z, z, z, z, z, z), unroll=unroll)
    out = carry[4]                     # top-layer h at the last time step

    # 7x Linear + ReLU (dropout_rate == 0 -> identity). Runs once, kept f32.
    for i in range(NUM_FC):
        out = jax.nn.relu(
            jnp.dot(out, fcw_ref[i], preferred_element_type=jnp.float32)
            + fcb_ref[i])

    # Fused heads: columns [0:10] classification, [10:11] regression.
    out_ref[...] = (
        jnp.dot(out, headw_ref[...], preferred_element_type=jnp.float32)
        + headb_ref[...])


# --------------------------------------------------------------------------
# Parameter preparation (pad / permute / cast / stack for the kernel)
# --------------------------------------------------------------------------
def _pad_gates(w, rows_src, rows_pad, dtype=jnp.float32):
    """(rows_src, 4*H) in PyTorch gate order (i,f,g,o) -> (rows_pad, 4*HP) in (i,f,o,g).

    Padded rows/cols are zero so padded lanes of h/c stay exactly 0.
    """
    out = jnp.zeros((rows_pad, GP), jnp.float32)
    for nk, ok in enumerate(GATE_PERM):
        out = out.at[:rows_src, nk * HP:nk * HP + HIDDEN].set(
            w[:, ok * HIDDEN:(ok + 1) * HIDDEN])
    return out.astype(dtype)


def prepare_params(p):
    bf = jnp.bfloat16
    kp = {}
    # Recurrent weights in bf16 (halved vld traffic on the serial recurrence).
    kp['wih0'] = _pad_gates(p['wih0'], INPUT_SIZE, FEAT_PAD, bf)      # (128, 512)
    kp['whh0'] = _pad_gates(p['whh0'], HIDDEN, HP, bf)                # (128, 512)
    kp['b0'] = _pad_gates(p['b0'], 1, 1)                              # (1, 512) f32

    kp['wih1'] = _pad_gates(p['wih1'], HIDDEN, HP, bf)                # (128, 512)
    kp['whh1'] = _pad_gates(p['whh1'], HIDDEN, HP, bf)                # (128, 512)
    kp['b1'] = _pad_gates(p['b1'], 1, 1)

    kp['wih2'] = _pad_gates(p['wih2'], HIDDEN, HP, bf)                # (128, 512)
    kp['whh2'] = _pad_gates(p['whh2'], HIDDEN, HP, bf)                # (128, 512)
    kp['b2'] = _pad_gates(p['b2'], 1, 1)

    # FC / head weights run once at the end -> keep f32 for accuracy.
    kp['fcw'] = jnp.zeros((NUM_FC, HP, HP), jnp.float32).at[
        :, :HIDDEN, :HIDDEN].set(p['fcw'])                            # (7,128,128)
    kp['fcb'] = jnp.zeros((NUM_FC, 1, HP), jnp.float32).at[
        :, :, :HIDDEN].set(p['fcb'])                                  # (7,1,128)

    headw = jnp.zeros((HP, HP), jnp.float32)
    headw = headw.at[:HIDDEN, :NUM_CLASSES].set(p['clsw'])
    headw = headw.at[:HIDDEN, NUM_CLASSES:NUM_CLASSES + 1].set(p['regw'])
    headb = jnp.zeros((1, HP), jnp.float32)
    headb = headb.at[:, :NUM_CLASSES].set(p['clsb'])
    headb = headb.at[:, NUM_CLASSES:NUM_CLASSES + 1].set(p['regb'])
    kp['headw'], kp['headb'] = headw, headb
    return kp


# --------------------------------------------------------------------------
# Wrapper
# --------------------------------------------------------------------------
def rnn_forward(x, p):
    B, T, F = x.shape
    BP = max(8, ((B + 7) // 8) * 8)        # pad batch to a sublane multiple
    kp = prepare_params(p)

    # batch-first -> time-major, pad batch and features, flatten to (T*BP, 128).
    # Stored bf16: pairs with the bf16 wih0 for the hoisted projection.
    x_tm = jnp.transpose(x, (1, 0, 2)).astype(jnp.float32)            # (T, B, F)
    x_pad = jnp.zeros((T, BP, FEAT_PAD), jnp.float32).at[:, :B, :F].set(x_tm)
    x2d = x_pad.reshape(T * BP, FEAT_PAD).astype(jnp.bfloat16)

    vmem = pl.BlockSpec(memory_space=pltpu.MemorySpace.VMEM)
    inputs = (x2d,
              kp['wih0'], kp['whh0'], kp['b0'],
              kp['wih1'], kp['whh1'], kp['b1'],
              kp['wih2'], kp['whh2'], kp['b2'],
              kp['fcw'], kp['fcb'],
              kp['headw'], kp['headb'])

    head = pl.pallas_call(
        partial(rnn_kernel, T=T, BP=BP),
        out_shape=jax.ShapeDtypeStruct((BP, HP), jnp.float32),
        in_specs=[vmem] * len(inputs),
        out_specs=vmem,
        scratch_shapes=[pltpu.VMEM((T * BP, GP), jnp.float32)],
    )(*inputs)

    cls_out = head[:B, :NUM_CLASSES]
    reg_out = head[:B, NUM_CLASSES:NUM_CLASSES + 1]
    return cls_out, reg_out


# --------------------------------------------------------------------------
# Params (PyTorch-semantics, unpadded) and pure-JAX f32 reference
# --------------------------------------------------------------------------
def init_params(key):
    H = HIDDEN
    ks = iter(jax.random.split(key, 24))

    def u(k, shape, fan_in):
        bound = 1.0 / float(fan_in) ** 0.5
        return jax.random.uniform(k, shape, jnp.float32, -bound, bound)

    p = {}
    # LSTM layer 0 (input_size -> H), layers 1-2 (H -> H); gate order i,f,g,o.
    p['wih0'] = u(next(ks), (INPUT_SIZE, 4 * H), H)
    p['whh0'] = u(next(ks), (H, 4 * H), H)
    p['b0'] = u(next(ks), (1, 4 * H), H) + u(next(ks), (1, 4 * H), H)   # b_ih + b_hh
    p['wih1'] = u(next(ks), (H, 4 * H), H)
    p['whh1'] = u(next(ks), (H, 4 * H), H)
    p['b1'] = u(next(ks), (1, 4 * H), H) + u(next(ks), (1, 4 * H), H)
    p['wih2'] = u(next(ks), (H, 4 * H), H)
    p['whh2'] = u(next(ks), (H, 4 * H), H)
    p['b2'] = u(next(ks), (1, 4 * H), H) + u(next(ks), (1, 4 * H), H)
    # 7 hidden FC layers, stacked.
    p['fcw'] = u(next(ks), (NUM_FC, H, H), H)
    p['fcb'] = u(next(ks), (NUM_FC, 1, H), H)
    # Heads.
    p['clsw'] = u(next(ks), (H, NUM_CLASSES), H)
    p['clsb'] = u(next(ks), (1, NUM_CLASSES), H)
    p['regw'] = u(next(ks), (H, 1), H)
    p['regb'] = u(next(ks), (1, 1), H)
    return p


def reference_forward(x, p):
    """Pure-JAX f32 reference with identical semantics (for validation)."""
    B, T, _ = x.shape
    H = HIDDEN
    h = [jnp.zeros((B, H), jnp.float32) for _ in range(NUM_LAYERS)]
    c = [jnp.zeros((B, H), jnp.float32) for _ in range(NUM_LAYERS)]
    wih = [p['wih0'], p['wih1'], p['wih2']]
    whh = [p['whh0'], p['whh1'], p['whh2']]
    bb = [p['b0'], p['b1'], p['b2']]
    for t in range(T):
        inp = x[:, t, :]
        for l in range(NUM_LAYERS):
            gates = inp @ wih[l] + h[l] @ whh[l] + bb[l]
            i = jax.nn.sigmoid(gates[:, 0 * H:1 * H])
            f = jax.nn.sigmoid(gates[:, 1 * H:2 * H])
            g = jnp.tanh(gates[:, 2 * H:3 * H])
            o = jax.nn.sigmoid(gates[:, 3 * H:4 * H])
            c[l] = f * c[l] + i * g
            h[l] = o * jnp.tanh(c[l])
            inp = h[l]
    out = h[-1]
    for i in range(NUM_FC):
        out = jax.nn.relu(out @ p['fcw'][i] + p['fcb'][i])
    return out @ p['clsw'] + p['clsb'], out @ p['regw'] + p['regb']


if __name__ == "__main__":
    key = jax.random.PRNGKey(0)
    kx, kp = jax.random.split(key)
    B, T = 2, 8
    x = jax.random.normal(kx, (B, T, INPUT_SIZE), jnp.float32)
    params = init_params(kp)

    cls_out, reg_out = jax.block_until_ready(rnn_forward(x, params))
    cls_ref, reg_ref = reference_forward(x, params)

    assert cls_out.shape == (B, NUM_CLASSES) and reg_out.shape == (B, 1)
    # Tolerance loosened vs. the pure-f32 version: recurrent weights / inputs
    # are bf16 in the kernel (f32 accumulation); drift over T=8 is ~1e-3.
    assert jnp.allclose(cls_out, cls_ref, atol=3e-2, rtol=3e-2)
    assert jnp.allclose(reg_out, reg_ref, atol=3e-2, rtol=3e-2)
    print("KERNEL_OK")
</pallas_src>

<mosaic_0001>
module attributes {stable_mosaic.version = 11 : i64} {
  func.func @rnn_kernel(%arg0: memref<64x128xbf16, #tpu.memory_space<vmem>>, %arg1: memref<128x512xbf16, #tpu.memory_space<vmem>>, %arg2: memref<128x512xbf16, #tpu.memory_space<vmem>>, %arg3: memref<1x512xf32, #tpu.memory_space<vmem>>, %arg4: memref<128x512xbf16, #tpu.memory_space<vmem>>, %arg5: memref<128x512xbf16, #tpu.memory_space<vmem>>, %arg6: memref<1x512xf32, #tpu.memory_space<vmem>>, %arg7: memref<128x512xbf16, #tpu.memory_space<vmem>>, %arg8: memref<128x512xbf16, #tpu.memory_space<vmem>>, %arg9: memref<1x512xf32, #tpu.memory_space<vmem>>, %arg10: memref<7x128x128xf32, #tpu.memory_space<vmem>>, %arg11: memref<7x1x128xf32, #tpu.memory_space<vmem>>, %arg12: memref<128x128xf32, #tpu.memory_space<vmem>>, %arg13: memref<1x128xf32, #tpu.memory_space<vmem>>, %arg14: memref<8x128xf32, #tpu.memory_space<vmem>>, %arg15: memref<64x512xf32, #tpu.memory_space<vmem>>) attributes {dimension_semantics = [], scalar_prefetch = 0 : i64, scratch_operands = 1 : i64, tpu.core_type = #tpu.core_type<tc>} {
    %c0 = arith.constant 0 : index
    %c0_0 = arith.constant 0 : index
    %0 = vector.load %arg0[%c0, %c0_0] : memref<64x128xbf16, #tpu.memory_space<vmem>>, vector<64x128xbf16>
    %c0_1 = arith.constant 0 : index
    %c0_2 = arith.constant 0 : index
    %1 = vector.load %arg1[%c0_1, %c0_2] : memref<128x512xbf16, #tpu.memory_space<vmem>>, vector<128x512xbf16>
    %cst = arith.constant dense<0.000000e+00> : vector<64x512xf32>
    %2 = tpu.matmul %0, %1, %cst {dimension_numbers = #tpu.dot_dimension_numbers<[1], [0], [0], [1], [0, 0, 1, 1], [], []>} : vector<64x128xbf16>, vector<128x512xbf16>, vector<64x512xf32> -> vector<64x512xf32>
    %c0_3 = arith.constant 0 : index
    %c0_4 = arith.constant 0 : index
    %3 = vector.load %arg3[%c0_3, %c0_4] : memref<1x512xf32, #tpu.memory_space<vmem>>, vector<1x512xf32>
    %4 = vector.broadcast %3 : vector<1x512xf32> to vector<64x512xf32>
    %5 = arith.addf %2, %4 : vector<64x512xf32>
    %c0_5 = arith.constant 0 : index
    %c0_6 = arith.constant 0 : index
    %6 = vector.load %arg15[%c0_5, %c0_6] : memref<64x512xf32, #tpu.memory_space<vmem>>, vector<64x512xf32>
    tpu.vector_store %arg15[%c0_5, %c0_6], %5 {strides = array<i32>} : memref<64x512xf32, #tpu.memory_space<vmem>>, vector<64x512xf32>,
    %cst_7 = arith.constant 0.000000e+00 : f32
    %7 = vector.broadcast %cst_7 : f32 to vector<8x128xf32>
    %c0_i32 = arith.constant 0 : i32
    %c8_i32 = arith.constant 8 : i32
    %8 = arith.muli %c0_i32, %c8_i32 : i32
    %9 = tpu.assume_multiple %8, 8 : i32
    %10 = arith.index_cast %9 : i32 to index
    %c0_8 = arith.constant 0 : index
    %11 = vector.load %arg15[%10, %c0_8] : memref<64x512xf32, #tpu.memory_space<vmem>>, vector<8x512xf32>
    %12 = arith.truncf %7 : vector<8x128xf32> to vector<8x128xbf16>
    %c0_9 = arith.constant 0 : index
    %c0_10 = arith.constant 0 : index
    %13 = vector.load %arg2[%c0_9, %c0_10] : memref<128x512xbf16, #tpu.memory_space<vmem>>, vector<128x512xbf16>
    %cst_11 = arith.constant dense<0.000000e+00> : vector<8x512xf32>
    %14 = tpu.matmul %12, %13, %cst_11 {dimension_numbers = #tpu.dot_dimension_numbers<[1], [0], [0], [1], [0, 0, 1, 1], [], []>} : vector<8x128xbf16>, vector<128x512xbf16>, vector<8x512xf32> -> vector<8x512xf32>
    %15 = arith.addf %11, %14 : vector<8x512xf32>
    %16 = vector.extract_strided_slice %15 {offsets = [0, 0], sizes = [8, 384], strides = [1, 1]} : vector<8x512xf32> to vector<8x384xf32>
    %17 = arith.negf %16 : vector<8x384xf32>
    %18 = math.exp %17 : vector<8x384xf32>
    %cst_12 = arith.constant 1.000000e+00 : f32
    %19 = vector.broadcast %cst_12 : f32 to vector<8x384xf32>
    %20 = arith.addf %19, %18 : vector<8x384xf32>
    %21 = arith.divf %19, %20 : vector<8x384xf32>
    %22 = vector.extract_strided_slice %15 {offsets = [0, 384], sizes = [8, 128], strides = [1, 1]} : vector<8x512xf32> to vector<8x128xf32>
    %23 = math.tanh %22 : vector<8x128xf32>
    %24 = vector.extract_strided_slice %21 {offsets = [0, 0], sizes = [8, 128], strides = [1, 1]} : vector<8x384xf32> to vector<8x128xf32>
    %25 = vector.extract_strided_slice %21 {offsets = [0, 128], sizes = [8, 128], strides = [1, 1]} : vector<8x384xf32> to vector<8x128xf32>
    %26 = vector.extract_strided_slice %21 {offsets = [0, 256], sizes = [8, 128], strides = [1, 1]} : vector<8x384xf32> to vector<8x128xf32>
    %27 = arith.mulf %25, %7 : vector<8x128xf32>
    %28 = arith.mulf %24, %23 : vector<8x128xf32>
    %29 = arith.addf %27, %28 : vector<8x128xf32>
    %30 = math.tanh %29 : vector<8x128xf32>
    %31 = arith.mulf %26, %30 : vector<8x128xf32>
    %32 = arith.truncf %31 : vector<8x128xf32> to vector<8x128xbf16>
    %c0_13 = arith.constant 0 : index
    %c0_14 = arith.constant 0 : index
    %33 = vector.load %arg4[%c0_13, %c0_14] : memref<128x512xbf16, #tpu.memory_space<vmem>>, vector<128x512xbf16>
    %cst_15 = arith.constant dense<0.000000e+00> : vector<8x512xf32>
    %34 = tpu.matmul %32, %33, %cst_15 {dimension_numbers = #tpu.dot_dimension_numbers<[1], [0], [0], [1], [0, 0, 1, 1], [], []>} : vector<8x128xbf16>, vector<128x512xbf16>, vector<8x512xf32> -> vector<8x512xf32>
    %35 = arith.truncf %7 : vector<8x128xf32> to vector<8x128xbf16>
    %c0_16 = arith.constant 0 : index
    %c0_17 = arith.constant 0 : index
    %36 = vector.load %arg5[%c0_16, %c0_17] : memref<128x512xbf16, #tpu.memory_space<vmem>>, vector<128x512xbf16>
    %cst_18 = arith.constant dense<0.000000e+00> : vector<8x512xf32>
    %37 = tpu.matmul %35, %36, %cst_18 {dimension_numbers = #tpu.dot_dimension_numbers<[1], [0], [0], [1], [0, 0, 1, 1], [], []>} : vector<8x128xbf16>, vector<128x512xbf16>, vector<8x512xf32> -> vector<8x512xf32>
    %38 = arith.addf %34, %37 : vector<8x512xf32>
    %c0_19 = arith.constant 0 : index
    %c0_20 = arith.constant 0 : index
    %39 = vector.load %arg6[%c0_19, %c0_20] : memref<1x512xf32, #tpu.memory_space<vmem>>, vector<1x512xf32>
    %40 = vector.broadcast %39 : vector<1x512xf32> to vector<8x512xf32>
    %41 = arith.addf %38, %40 : vector<8x512xf32>
    %42 = vector.extract_strided_slice %41 {offsets = [0, 0], sizes = [8, 384], strides = [1, 1]} : vector<8x512xf32> to vector<8x384xf32>
    %43 = arith.negf %42 : vector<8x384xf32>
    %44 = math.exp %43 : vector<8x384xf32>
    %cst_21 = arith.constant 1.000000e+00 : f32
    %45 = vector.broadcast %cst_21 : f32 to vector<8x384xf32>
    %46 = arith.addf %45, %44 : vector<8x384xf32>
    %47 = arith.divf %45, %46 : vector<8x384xf32>
    %48 = vector.extract_strided_slice %41 {offsets = [0, 384], sizes = [8, 128], strides = [1, 1]} : vector<8x512xf32> to vector<8x128xf32>
    %49 = math.tanh %48 : vector<8x128xf32>
    %50 = vector.extract_strided_slice %47 {offsets = [0, 0], sizes = [8, 128], strides = [1, 1]} : vector<8x384xf32> to vector<8x128xf32>
    %51 = vector.extract_strided_slice %47 {offsets = [0, 128], sizes = [8, 128], strides = [1, 1]} : vector<8x384xf32> to vector<8x128xf32>
    %52 = vector.extract_strided_slice %47 {offsets = [0, 256], sizes = [8, 128], strides = [1, 1]} : vector<8x384xf32> to vector<8x128xf32>
    %53 = arith.mulf %51, %7 : vector<8x128xf32>
    %54 = arith.mulf %50, %49 : vector<8x128xf32>
    %55 = arith.addf %53, %54 : vector<8x128xf32>
    %56 = math.tanh %55 : vector<8x128xf32>
    %57 = arith.mulf %52, %56 : vector<8x128xf32>
    %58 = arith.truncf %57 : vector<8x128xf32> to vector<8x128xbf16>
    %c0_22 = arith.constant 0 : index
    %c0_23 = arith.constant 0 : index
    %59 = vector.load %arg7[%c0_22, %c0_23] : memref<128x512xbf16, #tpu.memory_space<vmem>>, vector<128x512xbf16>
    %cst_24 = arith.constant dense<0.000000e+00> : vector<8x512xf32>
    %60 = tpu.matmul %58, %59, %cst_24 {dimension_numbers = #tpu.dot_dimension_numbers<[1], [0], [0], [1], [0, 0, 1, 1], [], []>} : vector<8x128xbf16>, vector<128x512xbf16>, vector<8x512xf32> -> vector<8x512xf32>
    %61 = arith.truncf %7 : vector<8x128xf32> to vector<8x128xbf16>
    %c0_25 = arith.constant 0 : index
    %c0_26 = arith.constant 0 : index
    %62 = vector.load %arg8[%c0_25, %c0_26] : memref<128x512xbf16, #tpu.memory_space<vmem>>, vector<128x512xbf16>
    %cst_27 = arith.constant dense<0.000000e+00> : vector<8x512xf32>
    %63 = tpu.matmul %61, %62, %cst_27 {dimension_numbers = #tpu.dot_dimension_numbers<[1], [0], [0], [1], [0, 0, 1, 1], [], []>} : vector<8x128xbf16>, vector<128x512xbf16>, vector<8x512xf32> -> vector<8x512xf32>
    %64 = arith.addf %60, %63 : vector<8x512xf32>
    %c0_28 = arith.constant 0 : index
    %c0_29 = arith.constant 0 : index
    %65 = vector.load %arg9[%c0_28, %c0_29] : memref<1x512xf32, #tpu.memory_space<vmem>>, vector<1x512xf32>
    %66 = vector.broadcast %65 : vector<1x512xf32> to vector<8x512xf32>
    %67 = arith.addf %64, %66 : vector<8x512xf32>
    %68 = vector.extract_strided_slice %67 {offsets = [0, 0], sizes = [8, 384], strides = [1, 1]} : vector<8x512xf32> to vector<8x384xf32>
    %69 = arith.negf %68 : vector<8x384xf32>
    %70 = math.exp %69 : vector<8x384xf32>
    %cst_30 = arith.constant 1.000000e+00 : f32
    %71 = vector.broadcast %cst_30 : f32 to vector<8x384xf32>
    %72 = arith.addf %71, %70 : vector<8x384xf32>
    %73 = arith.divf %71, %72 : vector<8x384xf32>
    %74 = vector.extract_strided_slice %67 {offsets = [0, 384], sizes = [8, 128], strides = [1, 1]} : vector<8x512xf32> to vector<8x128xf32>
    %75 = math.tanh %74 : vector<8x128xf32>
    %76 = vector.extract_strided_slice %73 {offsets = [0, 0], sizes = [8, 128], strides = [1, 1]} : vector<8x384xf32> to vector<8x128xf32>
    %77 = vector.extract_strided_slice %73 {offsets = [0, 128], sizes = [8, 128], strides = [1, 1]} : vector<8x384xf32> to vector<8x128xf32>
    %78 = vector.extract_strided_slice %73 {offsets = [0, 256], sizes = [8, 128], strides = [1, 1]} : vector<8x384xf32> to vector<8x128xf32>
    %79 = arith.mulf %77, %7 : vector<8x128xf32>
    %80 = arith.mulf %76, %75 : vector<8x128xf32>
    %81 = arith.addf %79, %80 : vector<8x128xf32>
    %82 = math.tanh %81 : vector<8x128xf32>
    %83 = arith.mulf %78, %82 : vector<8x128xf32>
    %c1_i32 = arith.constant 1 : i32
    %c8_i32_31 = arith.constant 8 : i32
    %84 = arith.muli %c1_i32, %c8_i32_31 : i32
    %85 = tpu.assume_multiple %84, 8 : i32
    %86 = arith.index_cast %85 : i32 to index
    %c0_32 = arith.constant 0 : index
    %87 = vector.load %arg15[%86, %c0_32] : memref<64x512xf32, #tpu.memory_space<vmem>>, vector<8x512xf32>
    %88 = arith.truncf %31 : vector<8x128xf32> to vector<8x128xbf16>
    %c0_33 = arith.constant 0 : index
    %c0_34 = arith.constant 0 : index
    %89 = vector.load %arg2[%c0_33, %c0_34] : memref<128x512xbf16, #tpu.memory_space<vmem>>, vector<128x512xbf16>
    %cst_35 = arith.constant dense<0.000000e+00> : vector<8x512xf32>
    %90 = tpu.matmul %88, %89, %cst_35 {dimension_numbers = #tpu.dot_dimension_numbers<[1], [0], [0], [1], [0, 0, 1, 1], [], []>} : vector<8x128xbf16>, vector<128x512xbf16>, vector<8x512xf32> -> vector<8x512xf32>
    %91 = arith.addf %87, %90 : vector<8x512xf32>
    %92 = vector.extract_strided_slice %91 {offsets = [0, 0], sizes = [8, 384], strides = [1, 1]} : vector<8x512xf32> to vector<8x384xf32>
    %93 = arith.negf %92 : vector<8x384xf32>
    %94 = math.exp %93 : vector<8x384xf32>
    %cst_36 = arith.constant 1.000000e+00 : f32
    %95 = vector.broadcast %cst_36 : f32 to vector<8x384xf32>
    %96 = arith.addf %95, %94 : vector<8x384xf32>
    %97 = arith.divf %95, %96 : vector<8x384xf32>
    %98 = vector.extract_strided_slice %91 {offsets = [0, 384], sizes = [8, 128], strides = [1, 1]} : vector<8x512xf32> to vector<8x128xf32>
    %99 = math.tanh %98 : vector<8x128xf32>
    %100 = vector.extract_strided_slice %97 {offsets = [0, 0], sizes = [8, 128], strides = [1, 1]} : vector<8x384xf32> to vector<8x128xf32>
    %101 = vector.extract_strided_slice %97 {offsets = [0, 128], sizes = [8, 128], strides = [1, 1]} : vector<8x384xf32> to vector<8x128xf32>
    %102 = vector.extract_strided_slice %97 {offsets = [0, 256], sizes = [8, 128], strides = [1, 1]} : vector<8x384xf32> to vector<8x128xf32>
    %103 = arith.mulf %101, %29 : vector<8x128xf32>
    %104 = arith.mulf %100, %99 : vector<8x128xf32>
    %105 = arith.addf %103, %104 : vector<8x128xf32>
    %106 = math.tanh %105 : vector<8x128xf32>
    %107 = arith.mulf %102, %106 : vector<8x128xf32>
    %108 = arith.truncf %107 : vector<8x128xf32> to vector<8x128xbf16>
    %c0_37 = arith.constant 0 : index
    %c0_38 = arith.constant 0 : index
    %109 = vector.load %arg4[%c0_37, %c0_38] : memref<128x512xbf16, #tpu.memory_space<vmem>>, vector<128x512xbf16>
    %cst_39 = arith.constant dense<0.000000e+00> : vector<8x512xf32>
    %110 = tpu.matmul %108, %109, %cst_39 {dimension_numbers = #tpu.dot_dimension_numbers<[1], [0], [0], [1], [0, 0, 1, 1], [], []>} : vector<8x128xbf16>, vector<128x512xbf16>, vector<8x512xf32> -> vector<8x512xf32>
    %111 = arith.truncf %57 : vector<8x128xf32> to vector<8x128xbf16>
    %c0_40 = arith.constant 0 : index
    %c0_41 = arith.constant 0 : index
    %112 = vector.load %arg5[%c0_40, %c0_41] : memref<128x512xbf16, #tpu.memory_space<vmem>>, vector<128x512xbf16>
    %cst_42 = arith.constant dense<0.000000e+00> : vector<8x512xf32>
    %113 = tpu.matmul %111, %112, %cst_42 {dimension_numbers = #tpu.dot_dimension_numbers<[1], [0], [0], [1], [0, 0, 1, 1], [], []>} : vector<8x128xbf16>, vector<128x512xbf16>, vector<8x512xf32> -> vector<8x512xf32>
    %114 = arith.addf %110, %113 : vector<8x512xf32>
    %c0_43 = arith.constant 0 : index
    %c0_44 = arith.constant 0 : index
    %115 = vector.load %arg6[%c0_43, %c0_44] : memref<1x512xf32, #tpu.memory_space<vmem>>, vector<1x512xf32>
    %116 = vector.broadcast %115 : vector<1x512xf32> to vector<8x512xf32>
    %117 = arith.addf %114, %116 : vector<8x512xf32>
    %118 = vector.extract_strided_slice %117 {offsets = [0, 0], sizes = [8, 384], strides = [1, 1]} : vector<8x512xf32> to vector<8x384xf32>
    %119 = arith.negf %118 : vector<8x384xf32>
    %120 = math.exp %119 : vector<8x384xf32>
    %cst_45 = arith.constant 1.000000e+00 : f32
    %121 = vector.broadcast %cst_45 : f32 to vector<8x384xf32>
    %122 = arith.addf %121, %120 : vector<8x384xf32>
    %123 = arith.divf %121, %122 : vector<8x384xf32>
    %124 = vector.extract_strided_slice %117 {offsets = [0, 384], sizes = [8, 128], strides = [1, 1]} : vector<8x512xf32> to vector<8x128xf32>
    %125 = math.tanh %124 : vector<8x128xf32>
    %126 = vector.extract_strided_slice %123 {offsets = [0, 0], sizes = [8, 128], strides = [1, 1]} : vector<8x384xf32> to vector<8x128xf32>
    %127 = vector.extract_strided_slice %123 {offsets = [0, 128], sizes = [8, 128], strides = [1, 1]} : vector<8x384xf32> to vector<8x128xf32>
    %128 = vector.extract_strided_slice %123 {offsets = [0, 256], sizes = [8, 128], strides = [1, 1]} : vector<8x384xf32> to vector<8x128xf32>
    %129 = arith.mulf %127, %55 : vector<8x128xf32>
    %130 = arith.mulf %126, %125 : vector<8x128xf32>
    %131 = arith.addf %129, %130 : vector<8x128xf32>
    %132 = math.tanh %131 : vector<8x128xf32>
    %133 = arith.mulf %128, %132 : vector<8x128xf32>
    %134 = arith.truncf %133 : vector<8x128xf32> to vector<8x128xbf16>
    %c0_46 = arith.constant 0 : index
    %c0_47 = arith.constant 0 : index
    %135 = vector.load %arg7[%c0_46, %c0_47] : memref<128x512xbf16, #tpu.memory_space<vmem>>, vector<128x512xbf16>
    %cst_48 = arith.constant dense<0.000000e+00> : vector<8x512xf32>
    %136 = tpu.matmul %134, %135, %cst_48 {dimension_numbers = #tpu.dot_dimension_numbers<[1], [0], [0], [1], [0, 0, 1, 1], [], []>} : vector<8x128xbf16>, vector<128x512xbf16>, vector<8x512xf32> -> vector<8x512xf32>
    %137 = arith.truncf %83 : vector<8x128xf32> to vector<8x128xbf16>
    %c0_49 = arith.constant 0 : index
    %c0_50 = arith.constant 0 : index
    %138 = vector.load %arg8[%c0_49, %c0_50] : memref<128x512xbf16, #tpu.memory_space<vmem>>, vector<128x512xbf16>
    %cst_51 = arith.constant dense<0.000000e+00> : vector<8x512xf32>
    %139 = tpu.matmul %137, %138, %cst_51 {dimension_numbers = #tpu.dot_dimension_numbers<[1], [0], [0], [1], [0, 0, 1, 1], [], []>} : vector<8x128xbf16>, vector<128x512xbf16>, vector<8x512xf32> -> vector<8x512xf32>
    %140 = arith.addf %136, %139 : vector<8x512xf32>
    %c0_52 = arith.constant 0 : index
    %c0_53 = arith.constant 0 : index
    %141 = vector.load %arg9[%c0_52, %c0_53] : memref<1x512xf32, #tpu.memory_space<vmem>>, vector<1x512xf32>
    %142 = vector.broadcast %141 : vector<1x512xf32> to vector<8x512xf32>
    %143 = arith.addf %140, %142 : vector<8x512xf32>
    %144 = vector.extract_strided_slice %143 {offsets = [0, 0], sizes = [8, 384], strides = [1, 1]} : vector<8x512xf32> to vector<8x384xf32>
    %145 = arith.negf %144 : vector<8x384xf32>
    %146 = math.exp %145 : vector<8x384xf32>
    %cst_54 = arith.constant 1.000000e+00 : f32
    %147 = vector.broadcast %cst_54 : f32 to vector<8x384xf32>
    %148 = arith.addf %147, %146 : vector<8x384xf32>
    %149 = arith.divf %147, %148 : vector<8x384xf32>
    %150 = vector.extract_strided_slice %143 {offsets = [0, 384], sizes = [8, 128], strides = [1, 1]} : vector<8x512xf32> to vector<8x128xf32>
    %151 = math.tanh %150 : vector<8x128xf32>
    %152 = vector.extract_strided_slice %149 {offsets = [0, 0], sizes = [8, 128], strides = [1, 1]} : vector<8x384xf32> to vector<8x128xf32>
    %153 = vector.extract_strided_slice %149 {offsets = [0, 128], sizes = [8, 128], strides = [1, 1]} : vector<8x384xf32> to vector<8x128xf32>
    %154 = vector.extract_strided_slice %149 {offsets = [0, 256], sizes = [8, 128], strides = [1, 1]} : vector<8x384xf32> to vector<8x128xf32>
    %155 = arith.mulf %153, %81 : vector<8x128xf32>
    %156 = arith.mulf %152, %151 : vector<8x128xf32>
    %157 = arith.addf %155, %156 : vector<8x128xf32>
    %158 = math.tanh %157 : vector<8x128xf32>
    %159 = arith.mulf %154, %158 : vector<8x128xf32>
    %c2_i32 = arith.constant 2 : i32
    %c8_i32_55 = arith.constant 8 : i32
    %160 = arith.muli %c2_i32, %c8_i32_55 : i32
    %161 = tpu.assume_multiple %160, 8 : i32
    %162 = arith.index_cast %161 : i32 to index
    %c0_56 = arith.constant 0 : index
    %163 = vector.load %arg15[%162, %c0_56] : memref<64x512xf32, #tpu.memory_space<vmem>>, vector<8x512xf32>
    %164 = arith.truncf %107 : vector<8x128xf32> to vector<8x128xbf16>
    %c0_57 = arith.constant 0 : index
    %c0_58 = arith.constant 0 : index
    %165 = vector.load %arg2[%c0_57, %c0_58] : memref<128x512xbf16, #tpu.memory_space<vmem>>, vector<128x512xbf16>
    %cst_59 = arith.constant dense<0.000000e+00> : vector<8x512xf32>
    %166 = tpu.matmul %164, %165, %cst_59 {dimension_numbers = #tpu.dot_dimension_numbers<[1], [0], [0], [1], [0, 0, 1, 1], [], []>} : vector<8x128xbf16>, vector<128x512xbf16>, vector<8x512xf32> -> vector<8x512xf32>
    %167 = arith.addf %163, %166 : vector<8x512xf32>
    %168 = vector.extract_strided_slice %167 {offsets = [0, 0], sizes = [8, 384], strides = [1, 1]} : vector<8x512xf32> to vector<8x384xf32>
    %169 = arith.negf %168 : vector<8x384xf32>
    %170 = math.exp %169 : vector<8x384xf32>
    %cst_60 = arith.constant 1.000000e+00 : f32
    %171 = vector.broadcast %cst_60 : f32 to vector<8x384xf32>
    %172 = arith.addf %171, %170 : vector<8x384xf32>
    %173 = arith.divf %171, %172 : vector<8x384xf32>
    %174 = vector.extract_strided_slice %167 {offsets = [0, 384], sizes = [8, 128], strides = [1, 1]} : vector<8x512xf32> to vector<8x128xf32>
    %175 = math.tanh %174 : vector<8x128xf32>
    %176 = vector.extract_strided_slice %173 {offsets = [0, 0], sizes = [8, 128], strides = [1, 1]} : vector<8x384xf32> to vector<8x128xf32>
    %177 = vector.extract_strided_slice %173 {offsets = [0, 128], sizes = [8, 128], strides = [1, 1]} : vector<8x384xf32> to vector<8x128xf32>
    %178 = vector.extract_strided_slice %173 {offsets = [0, 256], sizes = [8, 128], strides = [1, 1]} : vector<8x384xf32> to vector<8x128xf32>
    %179 = arith.mulf %177, %105 : vector<8x128xf32>
    %180 = arith.mulf %176, %175 : vector<8x128xf32>
    %181 = arith.addf %179, %180 : vector<8x128xf32>
    %182 = math.tanh %181 : vector<8x128xf32>
    %183 = arith.mulf %178, %182 : vector<8x128xf32>
    %184 = arith.truncf %183 : vector<8x128xf32> to vector<8x128xbf16>
    %c0_61 = arith.constant 0 : index
    %c0_62 = arith.constant 0 : index
    %185 = vector.load %arg4[%c0_61, %c0_62] : memref<128x512xbf16, #tpu.memory_space<vmem>>, vector<128x512xbf16>
    %cst_63 = arith.constant dense<0.000000e+00> : vector<8x512xf32>
    %186 = tpu.matmul %184, %185, %cst_63 {dimension_numbers = #tpu.dot_dimension_numbers<[1], [0], [0], [1], [0, 0, 1, 1], [], []>} : vector<8x128xbf16>, vector<128x512xbf16>, vector<8x512xf32> -> vector<8x512xf32>
    %187 = arith.truncf %133 : vector<8x128xf32> to vector<8x128xbf16>
    %c0_64 = arith.constant 0 : index
    %c0_65 = arith.constant 0 : index
    %188 = vector.load %arg5[%c0_64, %c0_65] : memref<128x512xbf16, #tpu.memory_space<vmem>>, vector<128x512xbf16>
    %cst_66 = arith.constant dense<0.000000e+00> : vector<8x512xf32>
    %189 = tpu.matmul %187, %188, %cst_66 {dimension_numbers = #tpu.dot_dimension_numbers<[1], [0], [0], [1], [0, 0, 1, 1], [], []>} : vector<8x128xbf16>, vector<128x512xbf16>, vector<8x512xf32> -> vector<8x512xf32>
    %190 = arith.addf %186, %189 : vector<8x512xf32>
    %c0_67 = arith.constant 0 : index
    %c0_68 = arith.constant 0 : index
    %191 = vector.load %arg6[%c0_67, %c0_68] : memref<1x512xf32, #tpu.memory_space<vmem>>, vector<1x512xf32>
    %192 = vector.broadcast %191 : vector<1x512xf32> to vector<8x512xf32>
    %193 = arith.addf %190, %192 : vector<8x512xf32>
    %194 = vector.extract_strided_slice %193 {offsets = [0, 0], sizes = [8, 384], strides = [1, 1]} : vector<8x512xf32> to vector<8x384xf32>
    %195 = arith.negf %194 : vector<8x384xf32>
    %196 = math.exp %195 : vector<8x384xf32>
    %cst_69 = arith.constant 1.000000e+00 : f32
    %197 = vector.broadcast %cst_69 : f32 to vector<8x384xf32>
    %198 = arith.addf %197, %196 : vector<8x384xf32>
    %199 = arith.divf %197, %198 : vector<8x384xf32>
    %200 = vector.extract_strided_slice %193 {offsets = [0, 384], sizes = [8, 128], strides = [1, 1]} : vector<8x512xf32> to vector<8x128xf32>
    %201 = math.tanh %200 : vector<8x128xf32>
    %202 = vector.extract_strided_slice %199 {offsets = [0, 0], sizes = [8, 128], strides = [1, 1]} : vector<8x384xf32> to vector<8x128xf32>
    %203 = vector.extract_strided_slice %199 {offsets = [0, 128], sizes = [8, 128], strides = [1, 1]} : vector<8x384xf32> to vector<8x128xf32>
    %204 = vector.extract_strided_slice %199 {offsets = [0, 256], sizes = [8, 128], strides = [1, 1]} : vector<8x384xf32> to vector<8x128xf32>
    %205 = arith.mulf %203, %131 : vector<8x128xf32>
    %206 = arith.mulf %202, %201 : vector<8x128xf32>
    %207 = arith.addf %205, %206 : vector<8x128xf32>
    %208 = math.tanh %207 : vector<8x128xf32>
    %209 = arith.mulf %204, %208 : vector<8x128xf32>
    %210 = arith.truncf %209 : vector<8x128xf32> to vector<8x128xbf16>
    %c0_70 = arith.constant 0 : index
    %c0_71 = arith.constant 0 : index
    %211 = vector.load %arg7[%c0_70, %c0_71] : memref<128x512xbf16, #tpu.memory_space<vmem>>, vector<128x512xbf16>
    %cst_72 = arith.constant dense<0.000000e+00> : vector<8x512xf32>
    %212 = tpu.matmul %210, %211, %cst_72 {dimension_numbers = #tpu.dot_dimension_numbers<[1], [0], [0], [1], [0, 0, 1, 1], [], []>} : vector<8x128xbf16>, vector<128x512xbf16>, vector<8x512xf32> -> vector<8x512xf32>
    %213 = arith.truncf %159 : vector<8x128xf32> to vector<8x128xbf16>
    %c0_73 = arith.constant 0 : index
    %c0_74 = arith.constant 0 : index
    %214 = vector.load %arg8[%c0_73, %c0_74] : memref<128x512xbf16, #tpu.memory_space<vmem>>, vector<128x512xbf16>
    %cst_75 = arith.constant dense<0.000000e+00> : vector<8x512xf32>
    %215 = tpu.matmul %213, %214, %cst_75 {dimension_numbers = #tpu.dot_dimension_numbers<[1], [0], [0], [1], [0, 0, 1, 1], [], []>} : vector<8x128xbf16>, vector<128x512xbf16>, vector<8x512xf32> -> vector<8x512xf32>
    %216 = arith.addf %212, %215 : vector<8x512xf32>
    %c0_76 = arith.constant 0 : index
    %c0_77 = arith.constant 0 : index
    %217 = vector.load %arg9[%c0_76, %c0_77] : memref<1x512xf32, #tpu.memory_space<vmem>>, vector<1x512xf32>
    %218 = vector.broadcast %217 : vector<1x512xf32> to vector<8x512xf32>
    %219 = arith.addf %216, %218 : vector<8x512xf32>
    %220 = vector.extract_strided_slice %219 {offsets = [0, 0], sizes = [8, 384], strides = [1, 1]} : vector<8x512xf32> to vector<8x384xf32>
    %221 = arith.negf %220 : vector<8x384xf32>
    %222 = math.exp %221 : vector<8x384xf32>
    %cst_78 = arith.constant 1.000000e+00 : f32
    %223 = vector.broadcast %cst_78 : f32 to vector<8x384xf32>
    %224 = arith.addf %223, %222 : vector<8x384xf32>
    %225 = arith.divf %223, %224 : vector<8x384xf32>
    %226 = vector.extract_strided_slice %219 {offsets = [0, 384], sizes = [8, 128], strides = [1, 1]} : vector<8x512xf32> to vector<8x128xf32>
    %227 = math.tanh %226 : vector<8x128xf32>
    %228 = vector.extract_strided_slice %225 {offsets = [0, 0], sizes = [8, 128], strides = [1, 1]} : vector<8x384xf32> to vector<8x128xf32>
    %229 = vector.extract_strided_slice %225 {offsets = [0, 128], sizes = [8, 128], strides = [1, 1]} : vector<8x384xf32> to vector<8x128xf32>
    %230 = vector.extract_strided_slice %225 {offsets = [0, 256], sizes = [8, 128], strides = [1, 1]} : vector<8x384xf32> to vector<8x128xf32>
    %231 = arith.mulf %229, %157 : vector<8x128xf32>
    %232 = arith.mulf %228, %227 : vector<8x128xf32>
    %233 = arith.addf %231, %232 : vector<8x128xf32>
    %234 = math.tanh %233 : vector<8x128xf32>
    %235 = arith.mulf %230, %234 : vector<8x128xf32>
    %c3_i32 = arith.constant 3 : i32
    %c8_i32_79 = arith.constant 8 : i32
    %236 = arith.muli %c3_i32, %c8_i32_79 : i32
    %237 = tpu.assume_multiple %236, 8 : i32
    %238 = arith.index_cast %237 : i32 to index
    %c0_80 = arith.constant 0 : index
    %239 = vector.load %arg15[%238, %c0_80] : memref<64x512xf32, #tpu.memory_space<vmem>>, vector<8x512xf32>
    %240 = arith.truncf %183 : vector<8x128xf32> to vector<8x128xbf16>
    %c0_81 = arith.constant 0 : index
    %c0_82 = arith.constant 0 : index
    %241 = vector.load %arg2[%c0_81, %c0_82] : memref<128x512xbf16, #tpu.memory_space<vmem>>, vector<128x512xbf16>
    %cst_83 = arith.constant dense<0.000000e+00> : vector<8x512xf32>
    %242 = tpu.matmul %240, %241, %cst_83 {dimension_numbers = #tpu.dot_dimension_numbers<[1], [0], [0], [1], [0, 0, 1, 1], [], []>} : vector<8x128xbf16>, vector<128x512xbf16>, vector<8x512xf32> -> vector<8x512xf32>
    %243 = arith.addf %239, %242 : vector<8x512xf32>
    %244 = vector.extract_strided_slice %243 {offsets = [0, 0], sizes = [8, 384], strides = [1, 1]} : vector<8x512xf32> to vector<8x384xf32>
    %245 = arith.negf %244 : vector<8x384xf32>
    %246 = math.exp %245 : vector<8x384xf32>
    %cst_84 = arith.constant 1.000000e+00 : f32
    %247 = vector.broadcast %cst_84 : f32 to vector<8x384xf32>
    %248 = arith.addf %247, %246 : vector<8x384xf32>
    %249 = arith.divf %247, %248 : vector<8x384xf32>
    %250 = vector.extract_strided_slice %243 {offsets = [0, 384], sizes = [8, 128], strides = [1, 1]} : vector<8x512xf32> to vector<8x128xf32>
    %251 = math.tanh %250 : vector<8x128xf32>
    %252 = vector.extract_strided_slice %249 {offsets = [0, 0], sizes = [8, 128], strides = [1, 1]} : vector<8x384xf32> to vector<8x128xf32>
    %253 = vector.extract_strided_slice %249 {offsets = [0, 128], sizes = [8, 128], strides = [1, 1]} : vector<8x384xf32> to vector<8x128xf32>
    %254 = vector.extract_strided_slice %249 {offsets = [0, 256], sizes = [8, 128], strides = [1, 1]} : vector<8x384xf32> to vector<8x128xf32>
    %255 = arith.mulf %253, %181 : vector<8x128xf32>
    %256 = arith.mulf %252, %251 : vector<8x128xf32>
    %257 = arith.addf %255, %256 : vector<8x128xf32>
    %258 = math.tanh %257 : vector<8x128xf32>
    %259 = arith.mulf %254, %258 : vector<8x128xf32>
    %260 = arith.truncf %259 : vector<8x128xf32> to vector<8x128xbf16>
    %c0_85 = arith.constant 0 : index
    %c0_86 = arith.constant 0 : index
    %261 = vector.load %arg4[%c0_85, %c0_86] : memref<128x512xbf16, #tpu.memory_space<vmem>>, vector<128x512xbf16>
    %cst_87 = arith.constant dense<0.000000e+00> : vector<8x512xf32>
    %262 = tpu.matmul %260, %261, %cst_87 {dimension_numbers = #tpu.dot_dimension_numbers<[1], [0], [0], [1], [0, 0, 1, 1], [], []>} : vector<8x128xbf16>, vector<128x512xbf16>, vector<8x512xf32> -> vector<8x512xf32>
    %263 = arith.truncf %209 : vector<8x128xf32> to vector<8x128xbf16>
    %c0_88 = arith.constant 0 : index
    %c0_89 = arith.constant 0 : index
    %264 = vector.load %arg5[%c0_88, %c0_89] : memref<128x512xbf16, #tpu.memory_space<vmem>>, vector<128x512xbf16>
    %cst_90 = arith.constant dense<0.000000e+00> : vector<8x512xf32>
    %265 = tpu.matmul %263, %264, %cst_90 {dimension_numbers = #tpu.dot_dimension_numbers<[1], [0], [0], [1], [0, 0, 1, 1], [], []>} : vector<8x128xbf16>, vector<128x512xbf16>, vector<8x512xf32> -> vector<8x512xf32>
    %266 = arith.addf %262, %265 : vector<8x512xf32>
    %c0_91 = arith.constant 0 : index
    %c0_92 = arith.constant 0 : index
    %267 = vector.load %arg6[%c0_91, %c0_92] : memref<1x512xf32, #tpu.memory_space<vmem>>, vector<1x512xf32>
    %268 = vector.broadcast %267 : vector<1x512xf32> to vector<8x512xf32>
    %269 = arith.addf %266, %268 : vector<8x512xf32>
    %270 = vector.extract_strided_slice %269 {offsets = [0, 0], sizes = [8, 384], strides = [1, 1]} : vector<8x512xf32> to vector<8x384xf32>
    %271 = arith.negf %270 : vector<8x384xf32>
    %272 = math.exp %271 : vector<8x384xf32>
    %cst_93 = arith.constant 1.000000e+00 : f32
    %273 = vector.broadcast %cst_93 : f32 to vector<8x384xf32>
    %274 = arith.addf %273, %272 : vector<8x384xf32>
    %275 = arith.divf %273, %274 : vector<8x384xf32>
    %276 = vector.extract_strided_slice %269 {offsets = [0, 384], sizes = [8, 128], strides = [1, 1]} : vector<8x512xf32> to vector<8x128xf32>
    %277 = math.tanh %276 : vector<8x128xf32>
    %278 = vector.extract_strided_slice %275 {offsets = [0, 0], sizes = [8, 128], strides = [1, 1]} : vector<8x384xf32> to vector<8x128xf32>
    %279 = vector.extract_strided_slice %275 {offsets = [0, 128], sizes = [8, 128], strides = [1, 1]} : vector<8x384xf32> to vector<8x128xf32>
    %280 = vector.extract_strided_slice %275 {offsets = [0, 256], sizes = [8, 128], strides = [1, 1]} : vector<8x384xf32> to vector<8x128xf32>
    %281 = arith.mulf %279, %207 : vector<8x128xf32>
    %282 = arith.mulf %278, %277 : vector<8x128xf32>
    %283 = arith.addf %281, %282 : vector<8x128xf32>
    %284 = math.tanh %283 : vector<8x128xf32>
    %285 = arith.mulf %280, %284 : vector<8x128xf32>
    %286 = arith.truncf %285 : vector<8x128xf32> to vector<8x128xbf16>
    %c0_94 = arith.constant 0 : index
    %c0_95 = arith.constant 0 : index
    %287 = vector.load %arg7[%c0_94, %c0_95] : memref<128x512xbf16, #tpu.memory_space<vmem>>, vector<128x512xbf16>
    %cst_96 = arith.constant dense<0.000000e+00> : vector<8x512xf32>
    %288 = tpu.matmul %286, %287, %cst_96 {dimension_numbers = #tpu.dot_dimension_numbers<[1], [0], [0], [1], [0, 0, 1, 1], [], []>} : vector<8x128xbf16>, vector<128x512xbf16>, vector<8x512xf32> -> vector<8x512xf32>
    %289 = arith.truncf %235 : vector<8x128xf32> to vector<8x128xbf16>
    %c0_97 = arith.constant 0 : index
    %c0_98 = arith.constant 0 : index
    %290 = vector.load %arg8[%c0_97, %c0_98] : memref<128x512xbf16, #tpu.memory_space<vmem>>, vector<128x512xbf16>
    %cst_99 = arith.constant dense<0.000000e+00> : vector<8x512xf32>
    %291 = tpu.matmul %289, %290, %cst_99 {dimension_numbers = #tpu.dot_dimension_numbers<[1], [0], [0], [1], [0, 0, 1, 1], [], []>} : vector<8x128xbf16>, vector<128x512xbf16>, vector<8x512xf32> -> vector<8x512xf32>
    %292 = arith.addf %288, %291 : vector<8x512xf32>
    %c0_100 = arith.constant 0 : index
    %c0_101 = arith.constant 0 : index
    %293 = vector.load %arg9[%c0_100, %c0_101] : memref<1x512xf32, #tpu.memory_space<vmem>>, vector<1x512xf32>
    %294 = vector.broadcast %293 : vector<1x512xf32> to vector<8x512xf32>
    %295 = arith.addf %292, %294 : vector<8x512xf32>
    %296 = vector.extract_strided_slice %295 {offsets = [0, 0], sizes = [8, 384], strides = [1, 1]} : vector<8x512xf32> to vector<8x384xf32>
    %297 = arith.negf %296 : vector<8x384xf32>
    %298 = math.exp %297 : vector<8x384xf32>
    %cst_102 = arith.constant 1.000000e+00 : f32
    %299 = vector.broadcast %cst_102 : f32 to vector<8x384xf32>
    %300 = arith.addf %299, %298 : vector<8x384xf32>
    %301 = arith.divf %299, %300 : vector<8x384xf32>
    %302 = vector.extract_strided_slice %295 {offsets = [0, 384], sizes = [8, 128], strides = [1, 1]} : vector<8x512xf32> to vector<8x128xf32>
    %303 = math.tanh %302 : vector<8x128xf32>
    %304 = vector.extract_strided_slice %301 {offsets = [0, 0], sizes = [8, 128], strides = [1, 1]} : vector<8x384xf32> to vector<8x128xf32>
    %305 = vector.extract_strided_slice %301 {offsets = [0, 128], sizes = [8, 128], strides = [1, 1]} : vector<8x384xf32> to vector<8x128xf32>
    %306 = vector.extract_strided_slice %301 {offsets = [0, 256], sizes = [8, 128], strides = [1, 1]} : vector<8x384xf32> to vector<8x128xf32>
    %307 = arith.mulf %305, %233 : vector<8x128xf32>
    %308 = arith.mulf %304, %303 : vector<8x128xf32>
    %309 = arith.addf %307, %308 : vector<8x128xf32>
    %310 = math.tanh %309 : vector<8x128xf32>
    %311 = arith.mulf %306, %310 : vector<8x128xf32>
    %c4_i32 = arith.constant 4 : i32
    %c8_i32_103 = arith.constant 8 : i32
    %312 = arith.muli %c4_i32, %c8_i32_103 : i32
    %313 = tpu.assume_multiple %312, 8 : i32
    %314 = arith.index_cast %313 : i32 to index
    %c0_104 = arith.constant 0 : index
    %315 = vector.load %arg15[%314, %c0_104] : memref<64x512xf32, #tpu.memory_space<vmem>>, vector<8x512xf32>
    %316 = arith.truncf %259 : vector<8x128xf32> to vector<8x128xbf16>
    %c0_105 = arith.constant 0 : index
    %c0_106 = arith.constant 0 : index
    %317 = vector.load %arg2[%c0_105, %c0_106] : memref<128x512xbf16, #tpu.memory_space<vmem>>, vector<128x512xbf16>
    %cst_107 = arith.constant dense<0.000000e+00> : vector<8x512xf32>
    %318 = tpu.matmul %316, %317, %cst_107 {dimension_numbers = #tpu.dot_dimension_numbers<[1], [0], [0], [1], [0, 0, 1, 1], [], []>} : vector<8x128xbf16>, vector<128x512xbf16>, vector<8x512xf32> -> vector<8x512xf32>
    %319 = arith.addf %315, %318 : vector<8x512xf32>
    %320 = vector.extract_strided_slice %319 {offsets = [0, 0], sizes = [8, 384], strides = [1, 1]} : vector<8x512xf32> to vector<8x384xf32>
    %321 = arith.negf %320 : vector<8x384xf32>
    %322 = math.exp %321 : vector<8x384xf32>
    %cst_108 = arith.constant 1.000000e+00 : f32
    %323 = vector.broadcast %cst_108 : f32 to vector<8x384xf32>
    %324 = arith.addf %323, %322 : vector<8x384xf32>
    %325 = arith.divf %323, %324 : vector<8x384xf32>
    %326 = vector.extract_strided_slice %319 {offsets = [0, 384], sizes = [8, 128], strides = [1, 1]} : vector<8x512xf32> to vector<8x128xf32>
    %327 = math.tanh %326 : vector<8x128xf32>
    %328 = vector.extract_strided_slice %325 {offsets = [0, 0], sizes = [8, 128], strides = [1, 1]} : vector<8x384xf32> to vector<8x128xf32>
    %329 = vector.extract_strided_slice %325 {offsets = [0, 128], sizes = [8, 128], strides = [1, 1]} : vector<8x384xf32> to vector<8x128xf32>
    %330 = vector.extract_strided_slice %325 {offsets = [0, 256], sizes = [8, 128], strides = [1, 1]} : vector<8x384xf32> to vector<8x128xf32>
    %331 = arith.mulf %329, %257 : vector<8x128xf32>
    %332 = arith.mulf %328, %327 : vector<8x128xf32>
    %333 = arith.addf %331, %332 : vector<8x128xf32>
    %334 = math.tanh %333 : vector<8x128xf32>
    %335 = arith.mulf %330, %334 : vector<8x128xf32>
    %336 = arith.truncf %335 : vector<8x128xf32> to vector<8x128xbf16>
    %c0_109 = arith.constant 0 : index
    %c0_110 = arith.constant 0 : index
    %337 = vector.load %arg4[%c0_109, %c0_110] : memref<128x512xbf16, #tpu.memory_space<vmem>>, vector<128x512xbf16>
    %cst_111 = arith.constant dense<0.000000e+00> : vector<8x512xf32>
    %338 = tpu.matmul %336, %337, %cst_111 {dimension_numbers = #tpu.dot_dimension_numbers<[1], [0], [0], [1], [0, 0, 1, 1], [], []>} : vector<8x128xbf16>, vector<128x512xbf16>, vector<8x512xf32> -> vector<8x512xf32>
    %339 = arith.truncf %285 : vector<8x128xf32> to vector<8x128xbf16>
    %c0_112 = arith.constant 0 : index
    %c0_113 = arith.constant 0 : index
    %340 = vector.load %arg5[%c0_112, %c0_113] : memref<128x512xbf16, #tpu.memory_space<vmem>>, vector<128x512xbf16>
    %cst_114 = arith.constant dense<0.000000e+00> : vector<8x512xf32>
    %341 = tpu.matmul %339, %340, %cst_114 {dimension_numbers = #tpu.dot_dimension_numbers<[1], [0], [0], [1], [0, 0, 1, 1], [], []>} : vector<8x128xbf16>, vector<128x512xbf16>, vector<8x512xf32> -> vector<8x512xf32>
    %342 = arith.addf %338, %341 : vector<8x512xf32>
    %c0_115 = arith.constant 0 : index
    %c0_116 = arith.constant 0 : index
    %343 = vector.load %arg6[%c0_115, %c0_116] : memref<1x512xf32, #tpu.memory_space<vmem>>, vector<1x512xf32>
    %344 = vector.broadcast %343 : vector<1x512xf32> to vector<8x512xf32>
    %345 = arith.addf %342, %344 : vector<8x512xf32>
    %346 = vector.extract_strided_slice %345 {offsets = [0, 0], sizes = [8, 384], strides = [1, 1]} : vector<8x512xf32> to vector<8x384xf32>
    %347 = arith.negf %346 : vector<8x384xf32>
    %348 = math.exp %347 : vector<8x384xf32>
    %cst_117 = arith.constant 1.000000e+00 : f32
    %349 = vector.broadcast %cst_117 : f32 to vector<8x384xf32>
    %350 = arith.addf %349, %348 : vector<8x384xf32>
    %351 = arith.divf %349, %350 : vector<8x384xf32>
    %352 = vector.extract_strided_slice %345 {offsets = [0, 384], sizes = [8, 128], strides = [1, 1]} : vector<8x512xf32> to vector<8x128xf32>
    %353 = math.tanh %352 : vector<8x128xf32>
    %354 = vector.extract_strided_slice %351 {offsets = [0, 0], sizes = [8, 128], strides = [1, 1]} : vector<8x384xf32> to vector<8x128xf32>
    %355 = vector.extract_strided_slice %351 {offsets = [0, 128], sizes = [8, 128], strides = [1, 1]} : vector<8x384xf32> to vector<8x128xf32>
    %356 = vector.extract_strided_slice %351 {offsets = [0, 256], sizes = [8, 128], strides = [1, 1]} : vector<8x384xf32> to vector<8x128xf32>
    %357 = arith.mulf %355, %283 : vector<8x128xf32>
    %358 = arith.mulf %354, %353 : vector<8x128xf32>
    %359 = arith.addf %357, %358 : vector<8x128xf32>
    %360 = math.tanh %359 : vector<8x128xf32>
    %361 = arith.mulf %356, %360 : vector<8x128xf32>
    %362 = arith.truncf %361 : vector<8x128xf32> to vector<8x128xbf16>
    %c0_118 = arith.constant 0 : index
    %c0_119 = arith.constant 0 : index
    %363 = vector.load %arg7[%c0_118, %c0_119] : memref<128x512xbf16, #tpu.memory_space<vmem>>, vector<128x512xbf16>
    %cst_120 = arith.constant dense<0.000000e+00> : vector<8x512xf32>
    %364 = tpu.matmul %362, %363, %cst_120 {dimension_numbers = #tpu.dot_dimension_numbers<[1], [0], [0], [1], [0, 0, 1, 1], [], []>} : vector<8x128xbf16>, vector<128x512xbf16>, vector<8x512xf32> -> vector<8x512xf32>
    %365 = arith.truncf %311 : vector<8x128xf32> to vector<8x128xbf16>
    %c0_121 = arith.constant 0 : index
    %c0_122 = arith.constant 0 : index
    %366 = vector.load %arg8[%c0_121, %c0_122] : memref<128x512xbf16, #tpu.memory_space<vmem>>, vector<128x512xbf16>
    %cst_123 = arith.constant dense<0.000000e+00> : vector<8x512xf32>
    %367 = tpu.matmul %365, %366, %cst_123 {dimension_numbers = #tpu.dot_dimension_numbers<[1], [0], [0], [1], [0, 0, 1, 1], [], []>} : vector<8x128xbf16>, vector<128x512xbf16>, vector<8x512xf32> -> vector<8x512xf32>
    %368 = arith.addf %364, %367 : vector<8x512xf32>
    %c0_124 = arith.constant 0 : index
    %c0_125 = arith.constant 0 : index
    %369 = vector.load %arg9[%c0_124, %c0_125] : memref<1x512xf32, #tpu.memory_space<vmem>>, vector<1x512xf32>
    %370 = vector.broadcast %369 : vector<1x512xf32> to vector<8x512xf32>
    %371 = arith.addf %368, %370 : vector<8x512xf32>
    %372 = vector.extract_strided_slice %371 {offsets = [0, 0], sizes = [8, 384], strides = [1, 1]} : vector<8x512xf32> to vector<8x384xf32>
    %373 = arith.negf %372 : vector<8x384xf32>
    %374 = math.exp %373 : vector<8x384xf32>
    %cst_126 = arith.constant 1.000000e+00 : f32
    %375 = vector.broadcast %cst_126 : f32 to vector<8x384xf32>
    %376 = arith.addf %375, %374 : vector<8x384xf32>
    %377 = arith.divf %375, %376 : vector<8x384xf32>
    %378 = vector.extract_strided_slice %371 {offsets = [0, 384], sizes = [8, 128], strides = [1, 1]} : vector<8x512xf32> to vector<8x128xf32>
    %379 = math.tanh %378 : vector<8x128xf32>
    %380 = vector.extract_strided_slice %377 {offsets = [0, 0], sizes = [8, 128], strides = [1, 1]} : vector<8x384xf32> to vector<8x128xf32>
    %381 = vector.extract_strided_slice %377 {offsets = [0, 128], sizes = [8, 128], strides = [1, 1]} : vector<8x384xf32> to vector<8x128xf32>
    %382 = vector.extract_strided_slice %377 {offsets = [0, 256], sizes = [8, 128], strides = [1, 1]} : vector<8x384xf32> to vector<8x128xf32>
    %383 = arith.mulf %381, %309 : vector<8x128xf32>
    %384 = arith.mulf %380, %379 : vector<8x128xf32>
    %385 = arith.addf %383, %384 : vector<8x128xf32>
    %386 = math.tanh %385 : vector<8x128xf32>
    %387 = arith.mulf %382, %386 : vector<8x128xf32>
    %c5_i32 = arith.constant 5 : i32
    %c8_i32_127 = arith.constant 8 : i32
    %388 = arith.muli %c5_i32, %c8_i32_127 : i32
    %389 = tpu.assume_multiple %388, 8 : i32
    %390 = arith.index_cast %389 : i32 to index
    %c0_128 = arith.constant 0 : index
    %391 = vector.load %arg15[%390, %c0_128] : memref<64x512xf32, #tpu.memory_space<vmem>>, vector<8x512xf32>
    %392 = arith.truncf %335 : vector<8x128xf32> to vector<8x128xbf16>
    %c0_129 = arith.constant 0 : index
    %c0_130 = arith.constant 0 : index
    %393 = vector.load %arg2[%c0_129, %c0_130] : memref<128x512xbf16, #tpu.memory_space<vmem>>, vector<128x512xbf16>
    %cst_131 = arith.constant dense<0.000000e+00> : vector<8x512xf32>
    %394 = tpu.matmul %392, %393, %cst_131 {dimension_numbers = #tpu.dot_dimension_numbers<[1], [0], [0], [1], [0, 0, 1, 1], [], []>} : vector<8x128xbf16>, vector<128x512xbf16>, vector<8x512xf32> -> vector<8x512xf32>
    %395 = arith.addf %391, %394 : vector<8x512xf32>
    %396 = vector.extract_strided_slice %395 {offsets = [0, 0], sizes = [8, 384], strides = [1, 1]} : vector<8x512xf32> to vector<8x384xf32>
    %397 = arith.negf %396 : vector<8x384xf32>
    %398 = math.exp %397 : vector<8x384xf32>
    %cst_132 = arith.constant 1.000000e+00 : f32
    %399 = vector.broadcast %cst_132 : f32 to vector<8x384xf32>
    %400 = arith.addf %399, %398 : vector<8x384xf32>
    %401 = arith.divf %399, %400 : vector<8x384xf32>
    %402 = vector.extract_strided_slice %395 {offsets = [0, 384], sizes = [8, 128], strides = [1, 1]} : vector<8x512xf32> to vector<8x128xf32>
    %403 = math.tanh %402 : vector<8x128xf32>
    %404 = vector.extract_strided_slice %401 {offsets = [0, 0], sizes = [8, 128], strides = [1, 1]} : vector<8x384xf32> to vector<8x128xf32>
    %405 = vector.extract_strided_slice %401 {offsets = [0, 128], sizes = [8, 128], strides = [1, 1]} : vector<8x384xf32> to vector<8x128xf32>
    %406 = vector.extract_strided_slice %401 {offsets = [0, 256], sizes = [8, 128], strides = [1, 1]} : vector<8x384xf32> to vector<8x128xf32>
    %407 = arith.mulf %405, %333 : vector<8x128xf32>
    %408 = arith.mulf %404, %403 : vector<8x128xf32>
    %409 = arith.addf %407, %408 : vector<8x128xf32>
    %410 = math.tanh %409 : vector<8x128xf32>
    %411 = arith.mulf %406, %410 : vector<8x128xf32>
    %412 = arith.truncf %411 : vector<8x128xf32> to vector<8x128xbf16>
    %c0_133 = arith.constant 0 : index
    %c0_134 = arith.constant 0 : index
    %413 = vector.load %arg4[%c0_133, %c0_134] : memref<128x512xbf16, #tpu.memory_space<vmem>>, vector<128x512xbf16>
    %cst_135 = arith.constant dense<0.000000e+00> : vector<8x512xf32>
    %414 = tpu.matmul %412, %413, %cst_135 {dimension_numbers = #tpu.dot_dimension_numbers<[1], [0], [0], [1], [0, 0, 1, 1], [], []>} : vector<8x128xbf16>, vector<128x512xbf16>, vector<8x512xf32> -> vector<8x512xf32>
    %415 = arith.truncf %361 : vector<8x128xf32> to vector<8x128xbf16>
    %c0_136 = arith.constant 0 : index
    %c0_137 = arith.constant 0 : index
    %416 = vector.load %arg5[%c0_136, %c0_137] : memref<128x512xbf16, #tpu.memory_space<vmem>>, vector<128x512xbf16>
    %cst_138 = arith.constant dense<0.000000e+00> : vector<8x512xf32>
    %417 = tpu.matmul %415, %416, %cst_138 {dimension_numbers = #tpu.dot_dimension_numbers<[1], [0], [0], [1], [0, 0, 1, 1], [], []>} : vector<8x128xbf16>, vector<128x512xbf16>, vector<8x512xf32> -> vector<8x512xf32>
    %418 = arith.addf %414, %417 : vector<8x512xf32>
    %c0_139 = arith.constant 0 : index
    %c0_140 = arith.constant 0 : index
    %419 = vector.load %arg6[%c0_139, %c0_140] : memref<1x512xf32, #tpu.memory_space<vmem>>, vector<1x512xf32>
    %420 = vector.broadcast %419 : vector<1x512xf32> to vector<8x512xf32>
    %421 = arith.addf %418, %420 : vector<8x512xf32>
    %422 = vector.extract_strided_slice %421 {offsets = [0, 0], sizes = [8, 384], strides = [1, 1]} : vector<8x512xf32> to vector<8x384xf32>
    %423 = arith.negf %422 : vector<8x384xf32>
    %424 = math.exp %423 : vector<8x384xf32>
    %cst_141 = arith.constant 1.000000e+00 : f32
    %425 = vector.broadcast %cst_141 : f32 to vector<8x384xf32>
    %426 = arith.addf %425, %424 : vector<8x384xf32>
    %427 = arith.divf %425, %426 : vector<8x384xf32>
    %428 = vector.extract_strided_slice %421 {offsets = [0, 384], sizes = [8, 128], strides = [1, 1]} : vector<8x512xf32> to vector<8x128xf32>
    %429 = math.tanh %428 : vector<8x128xf32>
    %430 = vector.extract_strided_slice %427 {offsets = [0, 0], sizes = [8, 128], strides = [1, 1]} : vector<8x384xf32> to vector<8x128xf32>
    %431 = vector.extract_strided_slice %427 {offsets = [0, 128], sizes = [8, 128], strides = [1, 1]} : vector<8x384xf32> to vector<8x128xf32>
    %432 = vector.extract_strided_slice %427 {offsets = [0, 256], sizes = [8, 128], strides = [1, 1]} : vector<8x384xf32> to vector<8x128xf32>
    %433 = arith.mulf %431, %359 : vector<8x128xf32>
    %434 = arith.mulf %430, %429 : vector<8x128xf32>
    %435 = arith.addf %433, %434 : vector<8x128xf32>
    %436 = math.tanh %435 : vector<8x128xf32>
    %437 = arith.mulf %432, %436 : vector<8x128xf32>
    %438 = arith.truncf %437 : vector<8x128xf32> to vector<8x128xbf16>
    %c0_142 = arith.constant 0 : index
    %c0_143 = arith.constant 0 : index
    %439 = vector.load %arg7[%c0_142, %c0_143] : memref<128x512xbf16, #tpu.memory_space<vmem>>, vector<128x512xbf16>
    %cst_144 = arith.constant dense<0.000000e+00> : vector<8x512xf32>
    %440 = tpu.matmul %438, %439, %cst_144 {dimension_numbers = #tpu.dot_dimension_numbers<[1], [0], [0], [1], [0, 0, 1, 1], [], []>} : vector<8x128xbf16>, vector<128x512xbf16>, vector<8x512xf32> -> vector<8x512xf32>
    %441 = arith.truncf %387 : vector<8x128xf32> to vector<8x128xbf16>
    %c0_145 = arith.constant 0 : index
    %c0_146 = arith.constant 0 : index
    %442 = vector.load %arg8[%c0_145, %c0_146] : memref<128x512xbf16, #tpu.memory_space<vmem>>, vector<128x512xbf16>
    %cst_147 = arith.constant dense<0.000000e+00> : vector<8x512xf32>
    %443 = tpu.matmul %441, %442, %cst_147 {dimension_numbers = #tpu.dot_dimension_numbers<[1], [0], [0], [1], [0, 0, 1, 1], [], []>} : vector<8x128xbf16>, vector<128x512xbf16>, vector<8x512xf32> -> vector<8x512xf32>
    %444 = arith.addf %440, %443 : vector<8x512xf32>
    %c0_148 = arith.constant 0 : index
    %c0_149 = arith.constant 0 : index
    %445 = vector.load %arg9[%c0_148, %c0_149] : memref<1x512xf32, #tpu.memory_space<vmem>>, vector<1x512xf32>
    %446 = vector.broadcast %445 : vector<1x512xf32> to vector<8x512xf32>
    %447 = arith.addf %444, %446 : vector<8x512xf32>
    %448 = vector.extract_strided_slice %447 {offsets = [0, 0], sizes = [8, 384], strides = [1, 1]} : vector<8x512xf32> to vector<8x384xf32>
    %449 = arith.negf %448 : vector<8x384xf32>
    %450 = math.exp %449 : vector<8x384xf32>
    %cst_150 = arith.constant 1.000000e+00 : f32
    %451 = vector.broadcast %cst_150 : f32 to vector<8x384xf32>
    %452 = arith.addf %451, %450 : vector<8x384xf32>
    %453 = arith.divf %451, %452 : vector<8x384xf32>
    %454 = vector.extract_strided_slice %447 {offsets = [0, 384], sizes = [8, 128], strides = [1, 1]} : vector<8x512xf32> to vector<8x128xf32>
    %455 = math.tanh %454 : vector<8x128xf32>
    %456 = vector.extract_strided_slice %453 {offsets = [0, 0], sizes = [8, 128], strides = [1, 1]} : vector<8x384xf32> to vector<8x128xf32>
    %457 = vector.extract_strided_slice %453 {offsets = [0, 128], sizes = [8, 128], strides = [1, 1]} : vector<8x384xf32> to vector<8x128xf32>
    %458 = vector.extract_strided_slice %453 {offsets = [0, 256], sizes = [8, 128], strides = [1, 1]} : vector<8x384xf32> to vector<8x128xf32>
    %459 = arith.mulf %457, %385 : vector<8x128xf32>
    %460 = arith.mulf %456, %455 : vector<8x128xf32>
    %461 = arith.addf %459, %460 : vector<8x128xf32>
    %462 = math.tanh %461 : vector<8x128xf32>
    %463 = arith.mulf %458, %462 : vector<8x128xf32>
    %c6_i32 = arith.constant 6 : i32
    %c8_i32_151 = arith.constant 8 : i32
    %464 = arith.muli %c6_i32, %c8_i32_151 : i32
    %465 = tpu.assume_multiple %464, 8 : i32
    %466 = arith.index_cast %465 : i32 to index
    %c0_152 = arith.constant 0 : index
    %467 = vector.load %arg15[%466, %c0_152] : memref<64x512xf32, #tpu.memory_space<vmem>>, vector<8x512xf32>
    %468 = arith.truncf %411 : vector<8x128xf32> to vector<8x128xbf16>
    %c0_153 = arith.constant 0 : index
    %c0_154 = arith.constant 0 : index
    %469 = vector.load %arg2[%c0_153, %c0_154] : memref<128x512xbf16, #tpu.memory_space<vmem>>, vector<128x512xbf16>
    %cst_155 = arith.constant dense<0.000000e+00> : vector<8x512xf32>
    %470 = tpu.matmul %468, %469, %cst_155 {dimension_numbers = #tpu.dot_dimension_numbers<[1], [0], [0], [1], [0, 0, 1, 1], [], []>} : vector<8x128xbf16>, vector<128x512xbf16>, vector<8x512xf32> -> vector<8x512xf32>
    %471 = arith.addf %467, %470 : vector<8x512xf32>
    %472 = vector.extract_strided_slice %471 {offsets = [0, 0], sizes = [8, 384], strides = [1, 1]} : vector<8x512xf32> to vector<8x384xf32>
    %473 = arith.negf %472 : vector<8x384xf32>
    %474 = math.exp %473 : vector<8x384xf32>
    %cst_156 = arith.constant 1.000000e+00 : f32
    %475 = vector.broadcast %cst_156 : f32 to vector<8x384xf32>
    %476 = arith.addf %475, %474 : vector<8x384xf32>
    %477 = arith.divf %475, %476 : vector<8x384xf32>
    %478 = vector.extract_strided_slice %471 {offsets = [0, 384], sizes = [8, 128], strides = [1, 1]} : vector<8x512xf32> to vector<8x128xf32>
    %479 = math.tanh %478 : vector<8x128xf32>
    %480 = vector.extract_strided_slice %477 {offsets = [0, 0], sizes = [8, 128], strides = [1, 1]} : vector<8x384xf32> to vector<8x128xf32>
    %481 = vector.extract_strided_slice %477 {offsets = [0, 128], sizes = [8, 128], strides = [1, 1]} : vector<8x384xf32> to vector<8x128xf32>
    %482 = vector.extract_strided_slice %477 {offsets = [0, 256], sizes = [8, 128], strides = [1, 1]} : vector<8x384xf32> to vector<8x128xf32>
    %483 = arith.mulf %481, %409 : vector<8x128xf32>
    %484 = arith.mulf %480, %479 : vector<8x128xf32>
    %485 = arith.addf %483, %484 : vector<8x128xf32>
    %486 = math.tanh %485 : vector<8x128xf32>
    %487 = arith.mulf %482, %486 : vector<8x128xf32>
    %488 = arith.truncf %487 : vector<8x128xf32> to vector<8x128xbf16>
    %c0_157 = arith.constant 0 : index
    %c0_158 = arith.constant 0 : index
    %489 = vector.load %arg4[%c0_157, %c0_158] : memref<128x512xbf16, #tpu.memory_space<vmem>>, vector<128x512xbf16>
    %cst_159 = arith.constant dense<0.000000e+00> : vector<8x512xf32>
    %490 = tpu.matmul %488, %489, %cst_159 {dimension_numbers = #tpu.dot_dimension_numbers<[1], [0], [0], [1], [0, 0, 1, 1], [], []>} : vector<8x128xbf16>, vector<128x512xbf16>, vector<8x512xf32> -> vector<8x512xf32>
    %491 = arith.truncf %437 : vector<8x128xf32> to vector<8x128xbf16>
    %c0_160 = arith.constant 0 : index
    %c0_161 = arith.constant 0 : index
    %492 = vector.load %arg5[%c0_160, %c0_161] : memref<128x512xbf16, #tpu.memory_space<vmem>>, vector<128x512xbf16>
    %cst_162 = arith.constant dense<0.000000e+00> : vector<8x512xf32>
    %493 = tpu.matmul %491, %492, %cst_162 {dimension_numbers = #tpu.dot_dimension_numbers<[1], [0], [0], [1], [0, 0, 1, 1], [], []>} : vector<8x128xbf16>, vector<128x512xbf16>, vector<8x512xf32> -> vector<8x512xf32>
    %494 = arith.addf %490, %493 : vector<8x512xf32>
    %c0_163 = arith.constant 0 : index
    %c0_164 = arith.constant 0 : index
    %495 = vector.load %arg6[%c0_163, %c0_164] : memref<1x512xf32, #tpu.memory_space<vmem>>, vector<1x512xf32>
    %496 = vector.broadcast %495 : vector<1x512xf32> to vector<8x512xf32>
    %497 = arith.addf %494, %496 : vector<8x512xf32>
    %498 = vector.extract_strided_slice %497 {offsets = [0, 0], sizes = [8, 384], strides = [1, 1]} : vector<8x512xf32> to vector<8x384xf32>
    %499 = arith.negf %498 : vector<8x384xf32>
    %500 = math.exp %499 : vector<8x384xf32>
    %cst_165 = arith.constant 1.000000e+00 : f32
    %501 = vector.broadcast %cst_165 : f32 to vector<8x384xf32>
    %502 = arith.addf %501, %500 : vector<8x384xf32>
    %503 = arith.divf %501, %502 : vector<8x384xf32>
    %504 = vector.extract_strided_slice %497 {offsets = [0, 384], sizes = [8, 128], strides = [1, 1]} : vector<8x512xf32> to vector<8x128xf32>
    %505 = math.tanh %504 : vector<8x128xf32>
    %506 = vector.extract_strided_slice %503 {offsets = [0, 0], sizes = [8, 128], strides = [1, 1]} : vector<8x384xf32> to vector<8x128xf32>
    %507 = vector.extract_strided_slice %503 {offsets = [0, 128], sizes = [8, 128], strides = [1, 1]} : vector<8x384xf32> to vector<8x128xf32>
    %508 = vector.extract_strided_slice %503 {offsets = [0, 256], sizes = [8, 128], strides = [1, 1]} : vector<8x384xf32> to vector<8x128xf32>
    %509 = arith.mulf %507, %435 : vector<8x128xf32>
    %510 = arith.mulf %506, %505 : vector<8x128xf32>
    %511 = arith.addf %509, %510 : vector<8x128xf32>
    %512 = math.tanh %511 : vector<8x128xf32>
    %513 = arith.mulf %508, %512 : vector<8x128xf32>
    %514 = arith.truncf %513 : vector<8x128xf32> to vector<8x128xbf16>
    %c0_166 = arith.constant 0 : index
    %c0_167 = arith.constant 0 : index
    %515 = vector.load %arg7[%c0_166, %c0_167] : memref<128x512xbf16, #tpu.memory_space<vmem>>, vector<128x512xbf16>
    %cst_168 = arith.constant dense<0.000000e+00> : vector<8x512xf32>
    %516 = tpu.matmul %514, %515, %cst_168 {dimension_numbers = #tpu.dot_dimension_numbers<[1], [0], [0], [1], [0, 0, 1, 1], [], []>} : vector<8x128xbf16>, vector<128x512xbf16>, vector<8x512xf32> -> vector<8x512xf32>
    %517 = arith.truncf %463 : vector<8x128xf32> to vector<8x128xbf16>
    %c0_169 = arith.constant 0 : index
    %c0_170 = arith.constant 0 : index
    %518 = vector.load %arg8[%c0_169, %c0_170] : memref<128x512xbf16, #tpu.memory_space<vmem>>, vector<128x512xbf16>
    %cst_171 = arith.constant dense<0.000000e+00> : vector<8x512xf32>
    %519 = tpu.matmul %517, %518, %cst_171 {dimension_numbers = #tpu.dot_dimension_numbers<[1], [0], [0], [1], [0, 0, 1, 1], [], []>} : vector<8x128xbf16>, vector<128x512xbf16>, vector<8x512xf32> -> vector<8x512xf32>
    %520 = arith.addf %516, %519 : vector<8x512xf32>
    %c0_172 = arith.constant 0 : index
    %c0_173 = arith.constant 0 : index
    %521 = vector.load %arg9[%c0_172, %c0_173] : memref<1x512xf32, #tpu.memory_space<vmem>>, vector<1x512xf32>
    %522 = vector.broadcast %521 : vector<1x512xf32> to vector<8x512xf32>
    %523 = arith.addf %520, %522 : vector<8x512xf32>
    %524 = vector.extract_strided_slice %523 {offsets = [0, 0], sizes = [8, 384], strides = [1, 1]} : vector<8x512xf32> to vector<8x384xf32>
    %525 = arith.negf %524 : vector<8x384xf32>
    %526 = math.exp %525 : vector<8x384xf32>
    %cst_174 = arith.constant 1.000000e+00 : f32
    %527 = vector.broadcast %cst_174 : f32 to vector<8x384xf32>
    %528 = arith.addf %527, %526 : vector<8x384xf32>
    %529 = arith.divf %527, %528 : vector<8x384xf32>
    %530 = vector.extract_strided_slice %523 {offsets = [0, 384], sizes = [8, 128], strides = [1, 1]} : vector<8x512xf32> to vector<8x128xf32>
    %531 = math.tanh %530 : vector<8x128xf32>
    %532 = vector.extract_strided_slice %529 {offsets = [0, 0], sizes = [8, 128], strides = [1, 1]} : vector<8x384xf32> to vector<8x128xf32>
    %533 = vector.extract_strided_slice %529 {offsets = [0, 128], sizes = [8, 128], strides = [1, 1]} : vector<8x384xf32> to vector<8x128xf32>
    %534 = vector.extract_strided_slice %529 {offsets = [0, 256], sizes = [8, 128], strides = [1, 1]} : vector<8x384xf32> to vector<8x128xf32>
    %535 = arith.mulf %533, %461 : vector<8x128xf32>
    %536 = arith.mulf %532, %531 : vector<8x128xf32>
    %537 = arith.addf %535, %536 : vector<8x128xf32>
    %538 = math.tanh %537 : vector<8x128xf32>
    %539 = arith.mulf %534, %538 : vector<8x128xf32>
    %c7_i32 = arith.constant 7 : i32
    %c8_i32_175 = arith.constant 8 : i32
    %540 = arith.muli %c7_i32, %c8_i32_175 : i32
    %541 = tpu.assume_multiple %540, 8 : i32
    %542 = arith.index_cast %541 : i32 to index
    %c0_176 = arith.constant 0 : index
    %543 = vector.load %arg15[%542, %c0_176] : memref<64x512xf32, #tpu.memory_space<vmem>>, vector<8x512xf32>
    %544 = arith.truncf %487 : vector<8x128xf32> to vector<8x128xbf16>
    %c0_177 = arith.constant 0 : index
    %c0_178 = arith.constant 0 : index
    %545 = vector.load %arg2[%c0_177, %c0_178] : memref<128x512xbf16, #tpu.memory_space<vmem>>, vector<128x512xbf16>
    %cst_179 = arith.constant dense<0.000000e+00> : vector<8x512xf32>
    %546 = tpu.matmul %544, %545, %cst_179 {dimension_numbers = #tpu.dot_dimension_numbers<[1], [0], [0], [1], [0, 0, 1, 1], [], []>} : vector<8x128xbf16>, vector<128x512xbf16>, vector<8x512xf32> -> vector<8x512xf32>
    %547 = arith.addf %543, %546 : vector<8x512xf32>
    %548 = vector.extract_strided_slice %547 {offsets = [0, 0], sizes = [8, 384], strides = [1, 1]} : vector<8x512xf32> to vector<8x384xf32>
    %549 = arith.negf %548 : vector<8x384xf32>
    %550 = math.exp %549 : vector<8x384xf32>
    %cst_180 = arith.constant 1.000000e+00 : f32
    %551 = vector.broadcast %cst_180 : f32 to vector<8x384xf32>
    %552 = arith.addf %551, %550 : vector<8x384xf32>
    %553 = arith.divf %551, %552 : vector<8x384xf32>
    %554 = vector.extract_strided_slice %547 {offsets = [0, 384], sizes = [8, 128], strides = [1, 1]} : vector<8x512xf32> to vector<8x128xf32>
    %555 = math.tanh %554 : vector<8x128xf32>
    %556 = vector.extract_strided_slice %553 {offsets = [0, 0], sizes = [8, 128], strides = [1, 1]} : vector<8x384xf32> to vector<8x128xf32>
    %557 = vector.extract_strided_slice %553 {offsets = [0, 128], sizes = [8, 128], strides = [1, 1]} : vector<8x384xf32> to vector<8x128xf32>
    %558 = vector.extract_strided_slice %553 {offsets = [0, 256], sizes = [8, 128], strides = [1, 1]} : vector<8x384xf32> to vector<8x128xf32>
    %559 = arith.mulf %557, %485 : vector<8x128xf32>
    %560 = arith.mulf %556, %555 : vector<8x128xf32>
    %561 = arith.addf %559, %560 : vector<8x128xf32>
    %562 = math.tanh %561 : vector<8x128xf32>
    %563 = arith.mulf %558, %562 : vector<8x128xf32>
    %564 = arith.truncf %563 : vector<8x128xf32> to vector<8x128xbf16>
    %c0_181 = arith.constant 0 : index
    %c0_182 = arith.constant 0 : index
    %565 = vector.load %arg4[%c0_181, %c0_182] : memref<128x512xbf16, #tpu.memory_space<vmem>>, vector<128x512xbf16>
    %cst_183 = arith.constant dense<0.000000e+00> : vector<8x512xf32>
    %566 = tpu.matmul %564, %565, %cst_183 {dimension_numbers = #tpu.dot_dimension_numbers<[1], [0], [0], [1], [0, 0, 1, 1], [], []>} : vector<8x128xbf16>, vector<128x512xbf16>, vector<8x512xf32> -> vector<8x512xf32>
    %567 = arith.truncf %513 : vector<8x128xf32> to vector<8x128xbf16>
    %c0_184 = arith.constant 0 : index
    %c0_185 = arith.constant 0 : index
    %568 = vector.load %arg5[%c0_184, %c0_185] : memref<128x512xbf16, #tpu.memory_space<vmem>>, vector<128x512xbf16>
    %cst_186 = arith.constant dense<0.000000e+00> : vector<8x512xf32>
    %569 = tpu.matmul %567, %568, %cst_186 {dimension_numbers = #tpu.dot_dimension_numbers<[1], [0], [0], [1], [0, 0, 1, 1], [], []>} : vector<8x128xbf16>, vector<128x512xbf16>, vector<8x512xf32> -> vector<8x512xf32>
    %570 = arith.addf %566, %569 : vector<8x512xf32>
    %c0_187 = arith.constant 0 : index
    %c0_188 = arith.constant 0 : index
    %571 = vector.load %arg6[%c0_187, %c0_188] : memref<1x512xf32, #tpu.memory_space<vmem>>, vector<1x512xf32>
    %572 = vector.broadcast %571 : vector<1x512xf32> to vector<8x512xf32>
    %573 = arith.addf %570, %572 : vector<8x512xf32>
    %574 = vector.extract_strided_slice %573 {offsets = [0, 0], sizes = [8, 384], strides = [1, 1]} : vector<8x512xf32> to vector<8x384xf32>
    %575 = arith.negf %574 : vector<8x384xf32>
    %576 = math.exp %575 : vector<8x384xf32>
    %cst_189 = arith.constant 1.000000e+00 : f32
    %577 = vector.broadcast %cst_189 : f32 to vector<8x384xf32>
    %578 = arith.addf %577, %576 : vector<8x384xf32>
    %579 = arith.divf %577, %578 : vector<8x384xf32>
    %580 = vector.extract_strided_slice %573 {offsets = [0, 384], sizes = [8, 128], strides = [1, 1]} : vector<8x512xf32> to vector<8x128xf32>
    %581 = math.tanh %580 : vector<8x128xf32>
    %582 = vector.extract_strided_slice %579 {offsets = [0, 0], sizes = [8, 128], strides = [1, 1]} : vector<8x384xf32> to vector<8x128xf32>
    %583 = vector.extract_strided_slice %579 {offsets = [0, 128], sizes = [8, 128], strides = [1, 1]} : vector<8x384xf32> to vector<8x128xf32>
    %584 = vector.extract_strided_slice %579 {offsets = [0, 256], sizes = [8, 128], strides = [1, 1]} : vector<8x384xf32> to vector<8x128xf32>
    %585 = arith.mulf %583, %511 : vector<8x128xf32>
    %586 = arith.mulf %582, %581 : vector<8x128xf32>
    %587 = arith.addf %585, %586 : vector<8x128xf32>
    %588 = math.tanh %587 : vector<8x128xf32>
    %589 = arith.mulf %584, %588 : vector<8x128xf32>
    %590 = arith.truncf %589 : vector<8x128xf32> to vector<8x128xbf16>
    %c0_190 = arith.constant 0 : index
    %c0_191 = arith.constant 0 : index
    %591 = vector.load %arg7[%c0_190, %c0_191] : memref<128x512xbf16, #tpu.memory_space<vmem>>, vector<128x512xbf16>
    %cst_192 = arith.constant dense<0.000000e+00> : vector<8x512xf32>
    %592 = tpu.matmul %590, %591, %cst_192 {dimension_numbers = #tpu.dot_dimension_numbers<[1], [0], [0], [1], [0, 0, 1, 1], [], []>} : vector<8x128xbf16>, vector<128x512xbf16>, vector<8x512xf32> -> vector<8x512xf32>
    %593 = arith.truncf %539 : vector<8x128xf32> to vector<8x128xbf16>
    %c0_193 = arith.constant 0 : index
    %c0_194 = arith.constant 0 : index
    %594 = vector.load %arg8[%c0_193, %c0_194] : memref<128x512xbf16, #tpu.memory_space<vmem>>, vector<128x512xbf16>
    %cst_195 = arith.constant dense<0.000000e+00> : vector<8x512xf32>
    %595 = tpu.matmul %593, %594, %cst_195 {dimension_numbers = #tpu.dot_dimension_numbers<[1], [0], [0], [1], [0, 0, 1, 1], [], []>} : vector<8x128xbf16>, vector<128x512xbf16>, vector<8x512xf32> -> vector<8x512xf32>
    %596 = arith.addf %592, %595 : vector<8x512xf32>
    %c0_196 = arith.constant 0 : index
    %c0_197 = arith.constant 0 : index
    %597 = vector.load %arg9[%c0_196, %c0_197] : memref<1x512xf32, #tpu.memory_space<vmem>>, vector<1x512xf32>
    %598 = vector.broadcast %597 : vector<1x512xf32> to vector<8x512xf32>
    %599 = arith.addf %596, %598 : vector<8x512xf32>
    %600 = vector.extract_strided_slice %599 {offsets = [0, 0], sizes = [8, 384], strides = [1, 1]} : vector<8x512xf32> to vector<8x384xf32>
    %601 = arith.negf %600 : vector<8x384xf32>
    %602 = math.exp %601 : vector<8x384xf32>
    %cst_198 = arith.constant 1.000000e+00 : f32
    %603 = vector.broadcast %cst_198 : f32 to vector<8x384xf32>
    %604 = arith.addf %603, %602 : vector<8x384xf32>
    %605 = arith.divf %603, %604 : vector<8x384xf32>
    %606 = vector.extract_strided_slice %599 {offsets = [0, 384], sizes = [8, 128], strides = [1, 1]} : vector<8x512xf32> to vector<8x128xf32>
    %607 = math.tanh %606 : vector<8x128xf32>
    %608 = vector.extract_strided_slice %605 {offsets = [0, 0], sizes = [8, 128], strides = [1, 1]} : vector<8x384xf32> to vector<8x128xf32>
    %609 = vector.extract_strided_slice %605 {offsets = [0, 128], sizes = [8, 128], strides = [1, 1]} : vector<8x384xf32> to vector<8x128xf32>
    %610 = vector.extract_strided_slice %605 {offsets = [0, 256], sizes = [8, 128], strides = [1, 1]} : vector<8x384xf32> to vector<8x128xf32>
    %611 = arith.mulf %609, %537 : vector<8x128xf32>
    %612 = arith.mulf %608, %607 : vector<8x128xf32>
    %613 = arith.addf %611, %612 : vector<8x128xf32>
    %614 = math.tanh %613 : vector<8x128xf32>
    %615 = arith.mulf %610, %614 : vector<8x128xf32>
    %c8_i32_199 = arith.constant 8 : i32
    %c0_200 = arith.constant 0 : index
    %c0_201 = arith.constant 0 : index
    %c0_202 = arith.constant 0 : index
    %616 = vector.load %arg10[%c0_200, %c0_201, %c0_202] : memref<7x128x128xf32, #tpu.memory_space<vmem>>, vector<1x128x128xf32>
    %617 = vector.shape_cast %616 : vector<1x128x128xf32> to vector<128x128xf32>
    %cst_203 = arith.constant dense<0.000000e+00> : vector<8x128xf32>
    %618 = tpu.matmul %615, %617, %cst_203 {dimension_numbers = #tpu.dot_dimension_numbers<[1], [0], [0], [1], [0, 0, 1, 1], [], []>} : vector<8x128xf32>, vector<128x128xf32>, vector<8x128xf32> -> vector<8x128xf32>
    %c0_204 = arith.constant 0 : index
    %c0_205 = arith.constant 0 : index
    %c0_206 = arith.constant 0 : index
    %619 = vector.load %arg11[%c0_204, %c0_205, %c0_206] : memref<7x1x128xf32, #tpu.memory_space<vmem>>, vector<1x1x128xf32>
    %620 = vector.shape_cast %619 : vector<1x1x128xf32> to vector<1x128xf32>
    %621 = vector.broadcast %620 : vector<1x128xf32> to vector<8x128xf32>
    %622 = arith.addf %618, %621 : vector<8x128xf32>
    %cst_207 = arith.constant 0.000000e+00 : f32
    %623 = vector.broadcast %cst_207 : f32 to vector<8x128xf32>
    %624 = arith.maximumf %622, %623 : vector<8x128xf32>
    %c1 = arith.constant 1 : index
    %c0_208 = arith.constant 0 : index
    %c0_209 = arith.constant 0 : index
    %625 = vector.load %arg10[%c1, %c0_208, %c0_209] : memref<7x128x128xf32, #tpu.memory_space<vmem>>, vector<1x128x128xf32>
    %626 = vector.shape_cast %625 : vector<1x128x128xf32> to vector<128x128xf32>
    %cst_210 = arith.constant dense<0.000000e+00> : vector<8x128xf32>
    %627 = tpu.matmul %624, %626, %cst_210 {dimension_numbers = #tpu.dot_dimension_numbers<[1], [0], [0], [1], [0, 0, 1, 1], [], []>} : vector<8x128xf32>, vector<128x128xf32>, vector<8x128xf32> -> vector<8x128xf32>
    %c1_211 = arith.constant 1 : index
    %c0_212 = arith.constant 0 : index
    %c0_213 = arith.constant 0 : index
    %628 = vector.load %arg11[%c1_211, %c0_212, %c0_213] : memref<7x1x128xf32, #tpu.memory_space<vmem>>, vector<1x1x128xf32>
    %629 = vector.shape_cast %628 : vector<1x1x128xf32> to vector<1x128xf32>
    %630 = vector.broadcast %629 : vector<1x128xf32> to vector<8x128xf32>
    %631 = arith.addf %627, %630 : vector<8x128xf32>
    %cst_214 = arith.constant 0.000000e+00 : f32
    %632 = vector.broadcast %cst_214 : f32 to vector<8x128xf32>
    %633 = arith.maximumf %631, %632 : vector<8x128xf32>
    %c2 = arith.constant 2 : index
    %c0_215 = arith.constant 0 : index
    %c0_216 = arith.constant 0 : index
    %634 = vector.load %arg10[%c2, %c0_215, %c0_216] : memref<7x128x128xf32, #tpu.memory_space<vmem>>, vector<1x128x128xf32>
    %635 = vector.shape_cast %634 : vector<1x128x128xf32> to vector<128x128xf32>
    %cst_217 = arith.constant dense<0.000000e+00> : vector<8x128xf32>
    %636 = tpu.matmul %633, %635, %cst_217 {dimension_numbers = #tpu.dot_dimension_numbers<[1], [0], [0], [1], [0, 0, 1, 1], [], []>} : vector<8x128xf32>, vector<128x128xf32>, vector<8x128xf32> -> vector<8x128xf32>
    %c2_218 = arith.constant 2 : index
    %c0_219 = arith.constant 0 : index
    %c0_220 = arith.constant 0 : index
    %637 = vector.load %arg11[%c2_218, %c0_219, %c0_220] : memref<7x1x128xf32, #tpu.memory_space<vmem>>, vector<1x1x128xf32>
    %638 = vector.shape_cast %637 : vector<1x1x128xf32> to vector<1x128xf32>
    %639 = vector.broadcast %638 : vector<1x128xf32> to vector<8x128xf32>
    %640 = arith.addf %636, %639 : vector<8x128xf32>
    %cst_221 = arith.constant 0.000000e+00 : f32
    %641 = vector.broadcast %cst_221 : f32 to vector<8x128xf32>
    %642 = arith.maximumf %640, %641 : vector<8x128xf32>
    %c3 = arith.constant 3 : index
    %c0_222 = arith.constant 0 : index
    %c0_223 = arith.constant 0 : index
    %643 = vector.load %arg10[%c3, %c0_222, %c0_223] : memref<7x128x128xf32, #tpu.memory_space<vmem>>, vector<1x128x128xf32>
    %644 = vector.shape_cast %643 : vector<1x128x128xf32> to vector<128x128xf32>
    %cst_224 = arith.constant dense<0.000000e+00> : vector<8x128xf32>
    %645 = tpu.matmul %642, %644, %cst_224 {dimension_numbers = #tpu.dot_dimension_numbers<[1], [0], [0], [1], [0, 0, 1, 1], [], []>} : vector<8x128xf32>, vector<128x128xf32>, vector<8x128xf32> -> vector<8x128xf32>
    %c3_225 = arith.constant 3 : index
    %c0_226 = arith.constant 0 : index
    %c0_227 = arith.constant 0 : index
    %646 = vector.load %arg11[%c3_225, %c0_226, %c0_227] : memref<7x1x128xf32, #tpu.memory_space<vmem>>, vector<1x1x128xf32>
    %647 = vector.shape_cast %646 : vector<1x1x128xf32> to vector<1x128xf32>
    %648 = vector.broadcast %647 : vector<1x128xf32> to vector<8x128xf32>
    %649 = arith.addf %645, %648 : vector<8x128xf32>
    %cst_228 = arith.constant 0.000000e+00 : f32
    %650 = vector.broadcast %cst_228 : f32 to vector<8x128xf32>
    %651 = arith.maximumf %649, %650 : vector<8x128xf32>
    %c4 = arith.constant 4 : index
    %c0_229 = arith.constant 0 : index
    %c0_230 = arith.constant 0 : index
    %652 = vector.load %arg10[%c4, %c0_229, %c0_230] : memref<7x128x128xf32, #tpu.memory_space<vmem>>, vector<1x128x128xf32>
    %653 = vector.shape_cast %652 : vector<1x128x128xf32> to vector<128x128xf32>
    %cst_231 = arith.constant dense<0.000000e+00> : vector<8x128xf32>
    %654 = tpu.matmul %651, %653, %cst_231 {dimension_numbers = #tpu.dot_dimension_numbers<[1], [0], [0], [1], [0, 0, 1, 1], [], []>} : vector<8x128xf32>, vector<128x128xf32>, vector<8x128xf32> -> vector<8x128xf32>
    %c4_232 = arith.constant 4 : index
    %c0_233 = arith.constant 0 : index
    %c0_234 = arith.constant 0 : index
    %655 = vector.load %arg11[%c4_232, %c0_233, %c0_234] : memref<7x1x128xf32, #tpu.memory_space<vmem>>, vector<1x1x128xf32>
    %656 = vector.shape_cast %655 : vector<1x1x128xf32> to vector<1x128xf32>
    %657 = vector.broadcast %656 : vector<1x128xf32> to vector<8x128xf32>
    %658 = arith.addf %654, %657 : vector<8x128xf32>
    %cst_235 = arith.constant 0.000000e+00 : f32
    %659 = vector.broadcast %cst_235 : f32 to vector<8x128xf32>
    %660 = arith.maximumf %658, %659 : vector<8x128xf32>
    %c5 = arith.constant 5 : index
    %c0_236 = arith.constant 0 : index
    %c0_237 = arith.constant 0 : index
    %661 = vector.load %arg10[%c5, %c0_236, %c0_237] : memref<7x128x128xf32, #tpu.memory_space<vmem>>, vector<1x128x128xf32>
    %662 = vector.shape_cast %661 : vector<1x128x128xf32> to vector<128x128xf32>
    %cst_238 = arith.constant dense<0.000000e+00> : vector<8x128xf32>
    %663 = tpu.matmul %660, %662, %cst_238 {dimension_numbers = #tpu.dot_dimension_numbers<[1], [0], [0], [1], [0, 0, 1, 1], [], []>} : vector<8x128xf32>, vector<128x128xf32>, vector<8x128xf32> -> vector<8x128xf32>
    %c5_239 = arith.constant 5 : index
    %c0_240 = arith.constant 0 : index
    %c0_241 = arith.constant 0 : index
    %664 = vector.load %arg11[%c5_239, %c0_240, %c0_241] : memref<7x1x128xf32, #tpu.memory_space<vmem>>, vector<1x1x128xf32>
    %665 = vector.shape_cast %664 : vector<1x1x128xf32> to vector<1x128xf32>
    %666 = vector.broadcast %665 : vector<1x128xf32> to vector<8x128xf32>
    %667 = arith.addf %663, %666 : vector<8x128xf32>
    %cst_242 = arith.constant 0.000000e+00 : f32
    %668 = vector.broadcast %cst_242 : f32 to vector<8x128xf32>
    %669 = arith.maximumf %667, %668 : vector<8x128xf32>
    %c6 = arith.constant 6 : index
    %c0_243 = arith.constant 0 : index
    %c0_244 = arith.constant 0 : index
    %670 = vector.load %arg10[%c6, %c0_243, %c0_244] : memref<7x128x128xf32, #tpu.memory_space<vmem>>, vector<1x128x128xf32>
    %671 = vector.shape_cast %670 : vector<1x128x128xf32> to vector<128x128xf32>
    %cst_245 = arith.constant dense<0.000000e+00> : vector<8x128xf32>
    %672 = tpu.matmul %669, %671, %cst_245 {dimension_numbers = #tpu.dot_dimension_numbers<[1], [0], [0], [1], [0, 0, 1, 1], [], []>} : vector<8x128xf32>, vector<128x128xf32>, vector<8x128xf32> -> vector<8x128xf32>
    %c6_246 = arith.constant 6 : index
    %c0_247 = arith.constant 0 : index
    %c0_248 = arith.constant 0 : index
    %673 = vector.load %arg11[%c6_246, %c0_247, %c0_248] : memref<7x1x128xf32, #tpu.memory_space<vmem>>, vector<1x1x128xf32>
    %674 = vector.shape_cast %673 : vector<1x1x128xf32> to vector<1x128xf32>
    %675 = vector.broadcast %674 : vector<1x128xf32> to vector<8x128xf32>
    %676 = arith.addf %672, %675 : vector<8x128xf32>
    %cst_249 = arith.constant 0.000000e+00 : f32
    %677 = vector.broadcast %cst_249 : f32 to vector<8x128xf32>
    %678 = arith.maximumf %676, %677 : vector<8x128xf32>
    %c0_250 = arith.constant 0 : index
    %c0_251 = arith.constant 0 : index
    %679 = vector.load %arg12[%c0_250, %c0_251] : memref<128x128xf32, #tpu.memory_space<vmem>>, vector<128x128xf32>
    %cst_252 = arith.constant dense<0.000000e+00> : vector<8x128xf32>
    %680 = tpu.matmul %678, %679, %cst_252 {dimension_numbers = #tpu.dot_dimension_numbers<[1], [0], [0], [1], [0, 0, 1, 1], [], []>} : vector<8x128xf32>, vector<128x128xf32>, vector<8x128xf32> -> vector<8x128xf32>
    %c0_253 = arith.constant 0 : index
    %c0_254 = arith.constant 0 : index
    %681 = vector.load %arg13[%c0_253, %c0_254] : memref<1x128xf32, #tpu.memory_space<vmem>>, vector<1x128xf32>
    %682 = vector.broadcast %681 : vector<1x128xf32> to vector<8x128xf32>
    %683 = arith.addf %680, %682 : vector<8x128xf32>
    %c0_255 = arith.constant 0 : index
    %c0_256 = arith.constant 0 : index
    %684 = vector.load %arg14[%c0_255, %c0_256] : memref<8x128xf32, #tpu.memory_space<vmem>>, vector<8x128xf32>
    tpu.vector_store %arg14[%c0_255, %c0_256], %683 {strides = array<i32>} : memref<8x128xf32, #tpu.memory_space<vmem>>, vector<8x128xf32>,
    return
  }
}

</mosaic_0001>

<bundles_post_ra>
// kernel: tpu_custom_call.1
= control target key start
LH: loop header
LB: loop body
LE: loop exit
PB: predicated region body
PF: predicated region fallthrough
CT: control target
= control target key end

     0   :  { %19 = vsyncpa [#allocation4], 0  ;;  %s12245_s0 = inlined_call_operand.hbm [shape: bf16[64,128], index: 0, kind: input, shape index: {}]   ;;  %s12246_s1 = inlined_call_operand.hbm [shape: bf16[128,512], index: 1, kind: input, shape index: {}]   ;;  %s12247_s2 = inlined_call_operand.hbm [shape: bf16[128,512], index: 2, kind: input, shape index: {}]   ;;  %s12248_s3 = inlined_call_operand.vmem [shape: f32[1,512], index: 3, kind: input, shape index: {}]   ;;  %s12249_s4 = inlined_call_operand.hbm [shape: bf16[128,512], index: 4, kind: input, shape index: {}]   ;;  %s12250_s5 = inlined_call_operand.hbm [shape: bf16[128,512], index: 5, kind: input, shape index: {}]   ;;  %s12251_s6 = inlined_call_operand.vmem [shape: f32[1,512], index: 6, kind: input, shape index: {}]   ;;  %s12252_s7 = inlined_call_operand.hbm [shape: bf16[128,512], index: 7, kind: input, shape index: {}]   ;;  %s12253_s8 = inlined_call_operand.hbm [shape: bf16[128,512], index: 8, kind: input, shape index: {}]   ;;  %s12254_s9 = inlined_call_operand.vmem [shape: f32[1,512], index: 9, kind: input, shape index: {}]   ;;  %s12255_s10 = inlined_call_operand.hbm [shape: f32[7,128,128], index: 10, kind: input, shape index: {}]   ;;  %s12256_s11 = inlined_call_operand.vmem [shape: f32[7,1,128], index: 11, kind: input, shape index: {}]   ;;  %s12257_s12 = inlined_call_operand.hbm [shape: f32[128,128], index: 12, kind: input, shape index: {}]   ;;  %s12258_s13 = inlined_call_operand.vmem [shape: f32[1,128], index: 13, kind: input, shape index: {}]   ;;  %s12259_s14 = inlined_call_operand.hbm [shape: f32[8,128], index: 14, kind: output, shape index: {}]  }
   0x1   :  { %20 = vsyncpa [#allocation7], 0 }
   0x2   :  { %21 = vsyncpa [#allocation10], 0 }
   0x3   :  { %22 = vsyncpa [#allocation13], 0 }
   0x4   :  { %23 = vsyncpa [#allocation16], 0 }
   0x5   :  { %24 = vsyncpa [#allocation5], 0  ;;  %s8750_s29 = smov [#allocation6]   ;;  %s8518_s17 = scalar_lea.hbm %s12246_s1, 4096 }
   0x6   :  { %s42_s30 = sshll.u32 %s8750_s29, 4  ;;  %p8519_p0 = scmp.ne.s32.totalorder %s12246_s1, %s8518_s17  ;;  %s43_s30 = int_to_ptr.vmem [resolvable:$true] %s42_s30 }
   0x7   :  { %p8522_p1 = scmp.lt.u32.totalorder %s8518_s17, %s12246_s1 }
   0x9   :  { %p8524_p2 = pnand %p8522_p1, %p8519_p0 }
   0xb   :  { %8527 = shalt.err (!%p8524_p2)
}
   0xc   :  { %s8528_s22 = scalar_lea.vmem %s43_s30, 4096  ;;  %p8533_p4 = scmp.lt.s32.totalorder %s43_s30, %s43_s30 }
   0xd   :  { %p8529_p3 = scmp.ne.s32.totalorder %s43_s30, %s8528_s22  ;;  %p8534_p5 = scmp.lt.s32.totalorder %s8528_s22, %s8528_s22 }
   0xf   :  { %p8535_p6 = por %p8534_p5, %p8533_p4 }
  0x11   :  { %p8536_p7 = pnand %p8535_p6, %p8529_p3 }
  0x13   :  { %8539 = shalt.err (!%p8536_p7)
}
  0x14   :  { %s8751_s23 = smov 256   ;;  %s8752_s24 = smov 16  }
  0x15   :  { %48 = dma.hbm_to_vmem [thread:$0]  %s12246_s1, 4096, %s43_s30, [#allocation7], %s8751_s23, %s8751_s23, %s8752_s24  }
  0x16   :  { %s8753_s27 = smov [#allocation9]   ;;  %s8754_s29 = smov [#allocation12]  }
  0x17   :  { %s68_s28 = sshll.u32 %s8753_s27, 4  ;;  %s94_s15 = sshll.u32 %s8754_s29, 4  ;;  %s69_s28 = int_to_ptr.vmem [resolvable:$true] %s68_s28  ;;  %s95_s15 = int_to_ptr.vmem [resolvable:$true] %s94_s15 }
  0x18   :  { %s8540_s18 = scalar_lea.hbm %s12249_s4, 4096 }
  0x19   :  { %p8541_p8 = scmp.ne.s32.totalorder %s12249_s4, %s8540_s18  ;;  %p8544_p9 = scmp.lt.u32.totalorder %s8540_s18, %s12249_s4 }
  0x1b   :  { %p8546_p10 = pnand %p8544_p9, %p8541_p8 }
  0x1d   :  { %8549 = shalt.err (!%p8546_p10)
}
  0x1e   :  { %s8550_s1 = scalar_lea.vmem %s69_s28, 4096  ;;  %p8555_p12 = scmp.lt.s32.totalorder %s69_s28, %s69_s28 }
  0x1f   :  { %p8551_p11 = scmp.ne.s32.totalorder %s69_s28, %s8550_s1  ;;  %p8556_p13 = scmp.lt.s32.totalorder %s8550_s1, %s8550_s1 }
  0x21   :  { %p8557_p0 = por %p8556_p13, %p8555_p12 }
  0x23   :  { %p8558_p1 = pnand %p8557_p0, %p8551_p11 }
  0x25   :  { %8561 = shalt.err (!%p8558_p1)
}
  0x26   :  { %74 = dma.hbm_to_vmem [thread:$0]  %s12249_s4, 4096, %s69_s28, [#allocation10], %s8751_s23, %s8751_s23, %s8752_s24  }
  0x27   :  { %s8562_s29 = scalar_lea.hbm %s12252_s7, 4096 }
  0x28   :  { %p8563_p2 = scmp.ne.s32.totalorder %s12252_s7, %s8562_s29  ;;  %p8566_p3 = scmp.lt.u32.totalorder %s8562_s29, %s12252_s7 }
  0x2a   :  { %p8568_p4 = pnand %p8566_p3, %p8563_p2 }
  0x2c   :  { %8571 = shalt.err (!%p8568_p4)
}
  0x2d   :  { %s8572_s20 = scalar_lea.vmem %s95_s15, 4096  ;;  %p8577_p6 = scmp.lt.s32.totalorder %s95_s15, %s95_s15 }
  0x2e   :  { %p8573_p5 = scmp.ne.s32.totalorder %s95_s15, %s8572_s20  ;;  %p8578_p7 = scmp.lt.s32.totalorder %s8572_s20, %s8572_s20 }
  0x30   :  { %p8579_p8 = por %p8578_p7, %p8577_p6 }
  0x32   :  { %p8580_p9 = pnand %p8579_p8, %p8573_p5 }
  0x34   :  { %8583 = shalt.err (!%p8580_p9)
}
  0x35   :  { %100 = dma.hbm_to_vmem [thread:$0]  %s12252_s7, 4096, %s95_s15, [#allocation13], %s8751_s23, %s8751_s23, %s8752_s24  }
  0x36   :  { %s8755_s21 = smov [#allocation15]   ;;  %s8584_s25 = scalar_lea.hbm %s12255_s10, 14336 }
  0x37   :  { %s120_s22 = sshll.u32 %s8755_s21, 4  ;;  %p8585_p10 = scmp.ne.s32.totalorder %s12255_s10, %s8584_s25  ;;  %s121_s22 = int_to_ptr.vmem [resolvable:$true] %s120_s22 }
  0x38   :  { %p8588_p11 = scmp.lt.u32.totalorder %s8584_s25, %s12255_s10 }
  0x3a   :  { %p8590_p12 = pnand %p8588_p11, %p8585_p10 }
  0x3c   :  { %8593 = shalt.err (!%p8590_p12)
}
  0x3d   :  { %s8594_s17 = scalar_lea.vmem %s121_s22, 14336  ;;  %p8599_p0 = scmp.lt.s32.totalorder %s121_s22, %s121_s22 }
  0x3e   :  { %p8595_p13 = scmp.ne.s32.totalorder %s121_s22, %s8594_s17  ;;  %p8600_p1 = scmp.lt.s32.totalorder %s8594_s17, %s8594_s17 }
  0x40   :  { %p8601_p2 = por %p8600_p1, %p8599_p0 }
  0x42   :  { %p8602_p3 = pnand %p8601_p2, %p8595_p13 }
  0x44   :  { %8605 = shalt.err (!%p8602_p3)
}
  0x45   :  { %s8756_s7 = smov 128   ;;  %s8757_s15 = smov 8  }
  0x46   :  { %126 = dma.hbm_to_vmem [thread:$0]  %s12255_s10, 14336, %s121_s22, [#allocation16], %s8756_s7, %s8756_s7, %s8757_s15  }
  0x47   :  { %s8758_s20 = smov [#allocation3]   ;;  %s8606_s1 = scalar_lea.hbm %s12245_s0, 512 }
  0x48   :  { %s30_s4 = sshll.u32 %s8758_s20, 4  ;;  %p8607_p4 = scmp.ne.s32.totalorder %s12245_s0, %s8606_s1  ;;  %s31_s4 = int_to_ptr.vmem [resolvable:$true] %s30_s4 }
  0x49   :  { %p8610_p5 = scmp.lt.u32.totalorder %s8606_s1, %s12245_s0 }
  0x4b   :  { %p8612_p6 = pnand %p8610_p5, %p8607_p4 }
  0x4d   :  { %8615 = shalt.err (!%p8612_p6)
}
  0x4e   :  { %s8616_s29 = scalar_lea.vmem %s31_s4, 512  ;;  %p8621_p8 = scmp.lt.s32.totalorder %s31_s4, %s31_s4 }
  0x4f   :  { %p8617_p7 = scmp.ne.s32.totalorder %s31_s4, %s8616_s29  ;;  %p8622_p9 = scmp.lt.s32.totalorder %s8616_s29, %s8616_s29 }
  0x51   :  { %p8623_p10 = por %p8622_p9, %p8621_p8 }
  0x53   :  { %p8624_p11 = pnand %p8623_p10, %p8617_p7 }
  0x55   :  { %8627 = shalt.err (!%p8624_p11)
}
  0x56   :  { %s8759_s10 = smov 64   ;;  %s8760_s22 = smov 4  }
  0x57   :  { %36 = dma.hbm_to_vmem [thread:$0]  %s12245_s0, 512, %s31_s4, [#allocation4], %s8759_s10, %s8759_s10, %s8760_s22  }
  0x58   :  { %s8761_s18 = smov [#allocation8]   ;;  %s8762_s20 = smov [#allocation11]  }
  0x59   :  { %s54_s19 = sshll.u32 %s8761_s18, 4  ;;  %s80_s28 = sshll.u32 %s8762_s20, 4  ;;  %s55_s19 = int_to_ptr.vmem [resolvable:$true] %s54_s19  ;;  %s81_s28 = int_to_ptr.vmem [resolvable:$true] %s80_s28 }
  0x5a   :  { %s8628_s30 = scalar_lea.hbm %s12247_s2, 4096 }
  0x5b   :  { %p8629_p12 = scmp.ne.s32.totalorder %s12247_s2, %s8628_s30  ;;  %p8632_p13 = scmp.lt.u32.totalorder %s8628_s30, %s12247_s2 }
  0x5d   :  { %p8634_p0 = pnand %p8632_p13, %p8629_p12 }
  0x5f   :  { %8637 = shalt.err (!%p8634_p0)
}
  0x60   :  { %s8638_s0 = scalar_lea.vmem %s55_s19, 4096  ;;  %p8643_p2 = scmp.lt.s32.totalorder %s55_s19, %s55_s19 }
  0x61   :  { %p8639_p1 = scmp.ne.s32.totalorder %s55_s19, %s8638_s0  ;;  %p8644_p3 = scmp.lt.s32.totalorder %s8638_s0, %s8638_s0 }
  0x63   :  { %p8645_p4 = por %p8644_p3, %p8643_p2 }
  0x65   :  { %p8646_p5 = pnand %p8645_p4, %p8639_p1 }
  0x67   :  { %8649 = shalt.err (!%p8646_p5)
}
  0x68   :  { %60 = dma.hbm_to_vmem [thread:$0]  %s12247_s2, 4096, %s55_s19, [#allocation7], %s8751_s23, %s8751_s23, %s8752_s24  }
  0x69   :  { %s8650_s17 = scalar_lea.hbm %s12250_s5, 4096 }
  0x6a   :  { %p8651_p6 = scmp.ne.s32.totalorder %s12250_s5, %s8650_s17  ;;  %p8654_p7 = scmp.lt.u32.totalorder %s8650_s17, %s12250_s5 }
  0x6c   :  { %p8656_p8 = pnand %p8654_p7, %p8651_p6 }
  0x6e   :  { %8659 = shalt.err (!%p8656_p8)
}
  0x6f   :  { %s8660_s30 = scalar_lea.vmem %s81_s28, 4096  ;;  %p8665_p10 = scmp.lt.s32.totalorder %s81_s28, %s81_s28 }
  0x70   :  { %p8661_p9 = scmp.ne.s32.totalorder %s81_s28, %s8660_s30  ;;  %p8666_p11 = scmp.lt.s32.totalorder %s8660_s30, %s8660_s30 }
  0x72   :  { %p8667_p12 = por %p8666_p11, %p8665_p10 }
  0x74   :  { %p8668_p13 = pnand %p8667_p12, %p8661_p9 }
  0x76   :  { %8671 = shalt.err (!%p8668_p13)
}
  0x77   :  { %86 = dma.hbm_to_vmem [thread:$0]  %s12250_s5, 4096, %s81_s28, [#allocation10], %s8751_s23, %s8751_s23, %s8752_s24  }
  0x78   :  { %s8763_s25 = smov [#allocation14]   ;;  %s8764_s27 = smov [#allocation17]  }
  0x79   :  { %s106_s26 = sshll.u32 %s8763_s25, 4  ;;  %s134_s29 = sshll.u32 %s8764_s27, 4  ;;  %s107_s26 = int_to_ptr.vmem [resolvable:$true] %s106_s26  ;;  %s135_s29 = int_to_ptr.vmem [resolvable:$true] %s134_s29 }
  0x7a   :  { %s8672_s10 = scalar_lea.hbm %s12253_s8, 4096 }
  0x7b   :  { %p8673_p0 = scmp.ne.s32.totalorder %s12253_s8, %s8672_s10  ;;  %p8676_p1 = scmp.lt.u32.totalorder %s8672_s10, %s12253_s8 }
  0x7d   :  { %p8678_p2 = pnand %p8676_p1, %p8673_p0 }
  0x7f   :  { %8681 = shalt.err (!%p8678_p2)
}
  0x80   :  { %s8682_s5 = scalar_lea.vmem %s107_s26, 4096  ;;  %p8687_p4 = scmp.lt.s32.totalorder %s107_s26, %s107_s26 }
  0x81   :  { %p8683_p3 = scmp.ne.s32.totalorder %s107_s26, %s8682_s5  ;;  %p8688_p5 = scmp.lt.s32.totalorder %s8682_s5, %s8682_s5 }
  0x83   :  { %p8689_p6 = por %p8688_p5, %p8687_p4 }
  0x85   :  { %p8690_p7 = pnand %p8689_p6, %p8683_p3 }
  0x87   :  { %8693 = shalt.err (!%p8690_p7)
}
  0x88   :  { %112 = dma.hbm_to_vmem [thread:$0]  %s12253_s8, 4096, %s107_s26, [#allocation13], %s8751_s23, %s8751_s23, %s8752_s24  }
  0x89   :  { %s8694_s30 = scalar_lea.hbm %s12257_s12, 2048 }
  0x8a   :  { %p8695_p8 = scmp.ne.s32.totalorder %s12257_s12, %s8694_s30  ;;  %p8698_p9 = scmp.lt.u32.totalorder %s8694_s30, %s12257_s12 }
  0x8c   :  { %p8700_p10 = pnand %p8698_p9, %p8695_p8 }
  0x8e   :  { %8703 = shalt.err (!%p8700_p10)
}
  0x8f   :  { %s8704_s0 = scalar_lea.vmem %s135_s29, 2048  ;;  %p8709_p12 = scmp.lt.s32.totalorder %s135_s29, %s135_s29 }
  0x90   :  { %p8705_p11 = scmp.ne.s32.totalorder %s135_s29, %s8704_s0  ;;  %p8710_p13 = scmp.lt.s32.totalorder %s8704_s0, %s8704_s0 }
  0x92   :  { %p8711_p0 = por %p8710_p13, %p8709_p12 }
  0x94   :  { %p8712_p1 = pnand %p8711_p0, %p8705_p11 }
  0x96   :  { %8715 = shalt.err (!%p8712_p1)
}
  0x97   :  { %140 = dma.hbm_to_vmem [thread:$0]  %s12257_s12, 2048, %s135_s29, [#allocation16], %s8756_s7, %s8756_s7, %s8757_s15  }
  0x98   :  { %8738 = dma.done.wait [#allocation4], 512  }
  0x99   :  { %8739 = vsyncadd [#allocation4], 4294966784 }
  0x9a   :  { %8740 = dma.done.wait [#allocation7], 8192  }
  0x9b   :  { %8741 = vsyncadd [#allocation7], 4294959104 }
  0x9c   :  { %8742 = dma.done.wait [#allocation10], 8192  }
  0x9d   :  { %8743 = vsyncadd [#allocation10], 4294959104 }
  0x9e   :  { %8744 = dma.done.wait [#allocation13], 8192  }
  0x9f   :  { %8745 = vsyncadd [#allocation13], 4294959104 }
  0xa0   :  { %8746 = dma.done.wait [#allocation16], 16384  }
  0xa1   :  { %8747 = vsyncadd [#allocation16], 4294950912  ;;  %v12260_v0 = vmov 0   ;;  %v7330_v1 = vld [vmem:[#allocation6 + $0x4] ss:$16 sps:$4 sm:$0xff]   ;;  %v7391_v44 = vld [vmem:[#allocation3 + $0x8] sm:$0xff]  }
  0xa2   :  { %449 = vmatprep.mubr.bf16.mxu0 %v12260_v0  ;;  %522 = vmatprep.mubr.bf16.mxu1 %v12260_v0  ;;  %v7332_v2 = vld [vmem:[#allocation6 + $0xc] ss:$16 sps:$4 sm:$0xff]   ;;  %v7334_v3 = vld [vmem:[#allocation6] ss:$16 sps:$4 sm:$0xff]   ;;  %v7335_v4 = vld [vmem:[#allocation6 + $0x8] ss:$16 sps:$4 sm:$0xff]  }
  0xa3   :  { %417 = vmatprep.subr.bf16.mxu0 %v7330_v1  ;;  %490 = vmatprep.subr.bf16.mxu1 %v7332_v2  ;;  %v7336_v5 = vld [vmem:[#allocation6 + $0x24] ss:$16 sps:$4 sm:$0xff]   ;;  %v7338_v6 = vld [vmem:[#allocation6 + $0x2c] ss:$16 sps:$4 sm:$0xff]   ;;  %v7340_v7 = vld [vmem:[#allocation6 + $0x20] ss:$16 sps:$4 sm:$0xff]  }
  0xa4   :  { %418 = vmatpush1.bf16.msra.mxu0 %v7334_v3  ;;  %491 = vmatpush1.bf16.msra.mxu1 %v7335_v4  ;;  %v7341_v8 = vld [vmem:[#allocation6 + $0x28] ss:$16 sps:$4 sm:$0xff]   ;;  %v7342_v9 = vld [vmem:[#allocation6 + $0x44] ss:$16 sps:$4 sm:$0xff]   ;;  %v7344_v10 = vld [vmem:[#allocation6 + $0x4c] ss:$16 sps:$4 sm:$0xff]  }
  0xa5   :  { %419 = vmatprep.subr.bf16.mxu0 %v7336_v5  ;;  %492 = vmatprep.subr.bf16.mxu1 %v7338_v6  ;;  %v7346_v11 = vld [vmem:[#allocation6 + $0x40] ss:$16 sps:$4 sm:$0xff]   ;;  %v7347_v12 = vld [vmem:[#allocation6 + $0x48] ss:$16 sps:$4 sm:$0xff]   ;;  %v7348_v13 = vld [vmem:[#allocation6 + $0x64] ss:$16 sps:$4 sm:$0xff]  }
  0xa6   :  { %v7350_v14 = vld [vmem:[#allocation6 + $0x6c] ss:$16 sps:$4 sm:$0xff]   ;;  %v7352_v15 = vld [vmem:[#allocation6 + $0x60] ss:$16 sps:$4 sm:$0xff]   ;;  %v7353_v16 = vld [vmem:[#allocation6 + $0x68] ss:$16 sps:$4 sm:$0xff]  }
  0xa7   :  { %v7354_v17 = vld [vmem:[#allocation6 + $0x84] ss:$16 sps:$4 sm:$0xff]   ;;  %v7356_v18 = vld [vmem:[#allocation6 + $0x8c] ss:$16 sps:$4 sm:$0xff]   ;;  %v7358_v19 = vld [vmem:[#allocation6 + $0x80] ss:$16 sps:$4 sm:$0xff]  }
  0xa8   :  { %420 = vmatpush1.bf16.msra.mxu0 %v7340_v7  ;;  %493 = vmatpush1.bf16.msra.mxu1 %v7341_v8  ;;  %v7359_v20 = vld [vmem:[#allocation6 + $0x88] ss:$16 sps:$4 sm:$0xff]   ;;  %v7360_v21 = vld [vmem:[#allocation6 + $0xa4] ss:$16 sps:$4 sm:$0xff]   ;;  %v7362_v22 = vld [vmem:[#allocation6 + $0xac] ss:$16 sps:$4 sm:$0xff]  }
  0xa9   :  { %421 = vmatprep.subr.bf16.mxu0 %v7342_v9  ;;  %494 = vmatprep.subr.bf16.mxu1 %v7344_v10  ;;  %v7364_v23 = vld [vmem:[#allocation6 + $0xa0] ss:$16 sps:$4 sm:$0xff]   ;;  %v7365_v24 = vld [vmem:[#allocation6 + $0xa8] ss:$16 sps:$4 sm:$0xff]   ;;  %v7366_v25 = vld [vmem:[#allocation6 + $0xc4] ss:$16 sps:$4 sm:$0xff]  }
  0xaa   :  { %v7368_v26 = vld [vmem:[#allocation6 + $0xcc] ss:$16 sps:$4 sm:$0xff]   ;;  %v7370_v27 = vld [vmem:[#allocation6 + $0xc0] ss:$16 sps:$4 sm:$0xff]   ;;  %v7371_v28 = vld [vmem:[#allocation6 + $0xc8] ss:$16 sps:$4 sm:$0xff]  }
  0xab   :  { %v7372_v29 = vld [vmem:[#allocation6 + $0xe4] ss:$16 sps:$4 sm:$0xff]   ;;  %v7374_v30 = vld [vmem:[#allocation6 + $0xec] ss:$16 sps:$4 sm:$0xff]   ;;  %v7376_v31 = vld [vmem:[#allocation6 + $0xe0] ss:$16 sps:$4 sm:$0xff]  }
  0xac   :  { %422 = vmatpush1.bf16.msra.mxu0 %v7346_v11  ;;  %495 = vmatpush1.bf16.msra.mxu1 %v7347_v12  ;;  %v7377_v32 = vld [vmem:[#allocation6 + $0xe8] ss:$16 sps:$4 sm:$0xff]   ;;  %v7379_v33 = vld [vmem:[#allocation8 + $0x4] ss:$16 sps:$4 sm:$0xff]   ;;  %v7381_v34 = vld [vmem:[#allocation8 + $0xc] ss:$16 sps:$4 sm:$0xff]  }
  0xad   :  { %423 = vmatprep.subr.bf16.mxu0 %v7348_v13  ;;  %496 = vmatprep.subr.bf16.mxu1 %v7350_v14  ;;  %v7378_v35 = vld [vmem:[#allocation3] sm:$0xff]   ;;  %v7384_v37 = vld [vmem:[#allocation8 + $0x8] ss:$16 sps:$4 sm:$0xff]   ;;  %v7387_v39 = vld [vmem:[#allocation8 + $0x2c] ss:$16 sps:$4 sm:$0xff]   ;;  %vm8767_vm0 = vmmov 0  }
  0xae   :  { %v7383_v36 = vld [vmem:[#allocation8] ss:$16 sps:$4 sm:$0xff]   ;;  %v7385_v38 = vld [vmem:[#allocation8 + $0x24] ss:$16 sps:$4 sm:$0xff]   ;;  %v7390_v41 = vld [vmem:[#allocation8 + $0x28] ss:$16 sps:$4 sm:$0xff]  }
  0xaf   :  { %v7389_v40 = vld [vmem:[#allocation8 + $0x20] ss:$16 sps:$4 sm:$0xff]   ;;  %v7392_v42 = vld [vmem:[#allocation8 + $0x44] ss:$16 sps:$4 sm:$0xff]   ;;  %v7394_v43 = vld [vmem:[#allocation8 + $0x4c] ss:$16 sps:$4 sm:$0xff]  }
  0xb0   :  { %424 = vmatpush1.bf16.msra.mxu0 %v7352_v15  ;;  %497 = vmatpush1.bf16.msra.mxu1 %v7353_v16  ;;  %v7396_v45 = vld [vmem:[#allocation8 + $0x40] ss:$16 sps:$4 sm:$0xff]   ;;  %v7397_v46 = vld [vmem:[#allocation8 + $0x48] ss:$16 sps:$4 sm:$0xff]   ;;  %v7398_v47 = vld [vmem:[#allocation8 + $0x64] ss:$16 sps:$4 sm:$0xff]  }
  0xb1   :  { %425 = vmatprep.subr.bf16.mxu0 %v7354_v17  ;;  %498 = vmatprep.subr.bf16.mxu1 %v7356_v18  ;;  %v7400_v48 = vld [vmem:[#allocation8 + $0x6c] ss:$16 sps:$4 sm:$0xff]   ;;  %v7402_v49 = vld [vmem:[#allocation8 + $0x60] ss:$16 sps:$4 sm:$0xff]   ;;  %v7403_v50 = vld [vmem:[#allocation8 + $0x68] ss:$16 sps:$4 sm:$0xff]  }
  0xb2   :  { %v7405_v51 = vld [vmem:[#allocation8 + $0x84] ss:$16 sps:$4 sm:$0xff]   ;;  %v7407_v52 = vld [vmem:[#allocation8 + $0x8c] ss:$16 sps:$4 sm:$0xff]   ;;  %v7409_v54 = vld [vmem:[#allocation8 + $0x80] ss:$16 sps:$4 sm:$0xff]  }
  0xb3   :  { %v7404_v53 = vld [vmem:[#allocation3 + $0x10] sm:$0xff]   ;;  %v7410_v55 = vld [vmem:[#allocation8 + $0x88] ss:$16 sps:$4 sm:$0xff]   ;;  %v7413_v57 = vld [vmem:[#allocation8 + $0xac] ss:$16 sps:$4 sm:$0xff]   ;;  %s8769_s19 = smov [#allocation18]  }
  0xb4   :  { %426 = vmatpush1.bf16.msra.mxu0 %v7358_v19  ;;  %499 = vmatpush1.bf16.msra.mxu1 %v7359_v20  ;;  %v7411_v56 = vld [vmem:[#allocation8 + $0xa4] ss:$16 sps:$4 sm:$0xff]   ;;  %v7415_v58 = vld [vmem:[#allocation8 + $0xa0] ss:$16 sps:$4 sm:$0xff]   ;;  %v7416_v59 = vld [vmem:[#allocation8 + $0xa8] ss:$16 sps:$4 sm:$0xff]  }
  0xb5   :  { %427 = vmatprep.subr.bf16.mxu0 %v7360_v21  ;;  %500 = vmatprep.subr.bf16.mxu1 %v7362_v22  ;;  %v7418_v60 = vld [vmem:[#allocation8 + $0xc4] ss:$16 sps:$4 sm:$0xff]   ;;  %v7420_v61 = vld [vmem:[#allocation8 + $0xcc] ss:$16 sps:$4 sm:$0xff]   ;;  %v7422_v63 = vld [vmem:[#allocation8 + $0xc0] ss:$16 sps:$4 sm:$0xff]  }
  0xb6   :  { %v7417_v62 = vld [vmem:[#allocation3 + $0x18] sm:$0xff]   ;;  %v7424_v2 = vld [vmem:[#allocation8 + $0xe4] ss:$16 sps:$4 sm:$0xff]   ;;  %v7428_v4 = vld [vmem:[#allocation8 + $0xe0] ss:$16 sps:$4 sm:$0xff]   ;;  %s6400_s25 = sshll.u32 %s8769_s19, 4  ;;  %s6401_s25 = int_to_ptr.vmem [resolvable:$true] %s6400_s25 }
  0xb7   :  { %v7423_v1 = vld [vmem:[#allocation8 + $0xc8] ss:$16 sps:$4 sm:$0xff]   ;;  %v7426_v3 = vld [vmem:[#allocation8 + $0xec] ss:$16 sps:$4 sm:$0xff]   ;;  %v8991_v6 = vld [vmem:[#allocation11 + $0x4] ss:$16 sps:$4 sm:$0xff]   ;;  %p8721_p3 = scmp.lt.s32.totalorder %s6401_s25, %s6401_s25 }
  0xb8   :  { %428 = vmatpush1.bf16.msra.mxu0 %v7364_v23  ;;  %501 = vmatpush1.bf16.msra.mxu1 %v7365_v24  ;;  %v7429_v5 = vld [vmem:[#allocation8 + $0xe8] ss:$16 sps:$4 sm:$0xff]   ;;  %v8993_v7 = vld [vmem:[#allocation11] ss:$16 sps:$4 sm:$0xff]   ;;  %v8996_v8 = vld [vmem:[#allocation11 + $0xc] ss:$16 sps:$4 sm:$0xff]  }
  0xb9   :  { %429 = vmatprep.subr.bf16.mxu0 %v7366_v25  ;;  %502 = vmatprep.subr.bf16.mxu1 %v7368_v26  ;;  %v8999_v9 = vld [vmem:[#allocation11 + $0x8] ss:$16 sps:$4 sm:$0xff]   ;;  %v9002_v10 = vld [vmem:[#allocation11 + $0x24] ss:$16 sps:$4 sm:$0xff]   ;;  %v9005_v11 = vld [vmem:[#allocation11 + $0x20] ss:$16 sps:$4 sm:$0xff]  }
  0xba   :  { %v9008_v12 = vld [vmem:[#allocation11 + $0x2c] ss:$16 sps:$4 sm:$0xff]   ;;  %v9011_v13 = vld [vmem:[#allocation11 + $0x28] ss:$16 sps:$4 sm:$0xff]   ;;  %v9014_v14 = vld [vmem:[#allocation11 + $0x44] ss:$16 sps:$4 sm:$0xff]  }
  0xbb   :  { %v9017_v15 = vld [vmem:[#allocation11 + $0x40] ss:$16 sps:$4 sm:$0xff]   ;;  %v9020_v16 = vld [vmem:[#allocation11 + $0x4c] ss:$16 sps:$4 sm:$0xff]   ;;  %v9023_v17 = vld [vmem:[#allocation11 + $0x48] ss:$16 sps:$4 sm:$0xff]  }
  0xbc   :  { %430 = vmatpush1.bf16.msra.mxu0 %v7370_v27  ;;  %503 = vmatpush1.bf16.msra.mxu1 %v7371_v28  ;;  %v9026_v18 = vld [vmem:[#allocation11 + $0x64] ss:$16 sps:$4 sm:$0xff]   ;;  %v9029_v19 = vld [vmem:[#allocation11 + $0x60] ss:$16 sps:$4 sm:$0xff]   ;;  %v9032_v20 = vld [vmem:[#allocation11 + $0x6c] ss:$16 sps:$4 sm:$0xff]  }
  0xbd   :  { %431 = vmatprep.subr.bf16.mxu0 %v7372_v29  ;;  %504 = vmatprep.subr.bf16.mxu1 %v7374_v30  ;;  %v9035_v21 = vld [vmem:[#allocation11 + $0x68] ss:$16 sps:$4 sm:$0xff]   ;;  %v9039_v22 = vld [vmem:[#allocation11 + $0x84] ss:$16 sps:$4 sm:$0xff]   ;;  %v9041_v23 = vld [vmem:[#allocation11 + $0x80] ss:$16 sps:$4 sm:$0xff]  }
  0xbe   :  { %v9044_v24 = vld [vmem:[#allocation11 + $0x8c] ss:$16 sps:$4 sm:$0xff]   ;;  %v9047_v25 = vld [vmem:[#allocation11 + $0x88] ss:$16 sps:$4 sm:$0xff]   ;;  %v9050_v26 = vld [vmem:[#allocation11 + $0xa4] ss:$16 sps:$4 sm:$0xff]  }
  0xbf   :  { %v9053_v27 = vld [vmem:[#allocation11 + $0xa0] ss:$16 sps:$4 sm:$0xff]   ;;  %v9056_v28 = vld [vmem:[#allocation11 + $0xac] ss:$16 sps:$4 sm:$0xff]   ;;  %v9059_v29 = vld [vmem:[#allocation11 + $0xa8] ss:$16 sps:$4 sm:$0xff]  }
  0xc0   :  { %432 = vmatpush1.bf16.msra.mxu0 %v7376_v31  ;;  %505 = vmatpush1.bf16.msra.mxu1 %v7377_v32  ;;  %v9062_v30 = vld [vmem:[#allocation11 + $0xc4] ss:$16 sps:$4 sm:$0xff]   ;;  %v9065_v31 = vld [vmem:[#allocation11 + $0xc0] ss:$16 sps:$4 sm:$0xff]   ;;  %v9068_v32 = vld [vmem:[#allocation11 + $0xcc] ss:$16 sps:$4 sm:$0xff]  }
  0xc1   :  { %794 = vmatprep.subr.bf16.mxu0 %v7379_v33  ;;  %835 = vmatprep.subr.bf16.mxu1 %v7381_v34  ;;  %v9071_v33 = vld [vmem:[#allocation11 + $0xc8] ss:$16 sps:$4 sm:$0xff]   ;;  %v9074_v34 = vld [vmem:[#allocation11 + $0xe4] ss:$16 sps:$4 sm:$0xff]   ;;  %s8716_s27 = scalar_lea.vmem %s6401_s25, 128 }
  0xc2   :  { %p8717_p2 = scmp.ne.s32.totalorder %s6401_s25, %s8716_s27  ;;  %p8722_p4 = scmp.lt.s32.totalorder %s8716_s27, %s8716_s27 }
  0xc3   :  { %450 = vmatmul.mubr.bf16.vlgmr.msra.gmra.mrb[0].mxu0 %v7378_v35  ;;  %523 = vmatmul.mubr.bf16.vlgmr.msra.gmra.mrb[0].mxu1 %v7378_v35  ;;  %v9077_v35 = vld [vmem:[#allocation11 + $0xe0] ss:$16 sps:$4 sm:$0xff]  }
  0xc4   :  { %795 = vmatpush1.bf16.msra.mxu0 %v7383_v36  ;;  %836 = vmatpush1.bf16.msra.mxu1 %v7384_v37  ;;  %v9080_v36 = vld [vmem:[#allocation11 + $0xec] ss:$16 sps:$4 sm:$0xff]   ;;  %v9083_v37 = vld [vmem:[#allocation11 + $0xe8] ss:$16 sps:$4 sm:$0xff]   ;;  %p8723_p5 = por %p8722_p4, %p8721_p3 }
  0xc5   :  { %796 = vmatprep.subr.bf16.mxu0 %v7385_v38  ;;  %837 = vmatprep.subr.bf16.mxu1 %v7387_v39  ;;  %v9088_v38 = vld [vmem:[#allocation9 + $0x4] ss:$16 sps:$4 sm:$0xff]   ;;  %v9090_v39 = vld [vmem:[#allocation9 + $0xc] ss:$16 sps:$4 sm:$0xff]  }
  0xc6   :  { %459 = vmatprep.mubr.bf16.mxu0 %v12260_v0  ;;  %532 = vmatprep.mubr.bf16.mxu1 %v12260_v0  ;;  %p8724_p6 = pnand %p8723_p5, %p8717_p2 }
  0xc8   :  { %797 = vmatpush1.bf16.msra.mxu0 %v7389_v40  ;;  %838 = vmatpush1.bf16.msra.mxu1 %v7390_v41  ;;  %v9092_v40 = vld [vmem:[#allocation9] ss:$16 sps:$4 sm:$0xff]   ;;  %v9094_v41 = vld [vmem:[#allocation9 + $0x8] ss:$16 sps:$4 sm:$0xff]  }
  0xc9   :  { %798 = vmatprep.subr.bf16.mxu0 %v7392_v42  ;;  %839 = vmatprep.subr.bf16.mxu1 %v7394_v43  ;;  %v9102_v42 = vld [vmem:[#allocation9 + $0x24] ss:$16 sps:$4 sm:$0xff]   ;;  %v9104_v43 = vld [vmem:[#allocation9 + $0x2c] ss:$16 sps:$4 sm:$0xff]  }
  0xca   :  { %12699 = vst [vmem:[#allocation25_spill] sm:$0xff] %v9104_v43 }
  0xcb   :  { %460 = vmatmul.mubr.bf16.gmra.mrb[4].mxu0 %v7391_v44  ;;  %533 = vmatmul.mubr.bf16.gmra.mrb[4].mxu1 %v7391_v44  ;;  %v9107_v44 = vld [vmem:[#allocation9 + $0x20] ss:$16 sps:$4 sm:$0xff]  }
  0xcc   :  { %799 = vmatpush1.bf16.msra.mxu0 %v7396_v45  ;;  %840 = vmatpush1.bf16.msra.mxu1 %v7397_v46  ;;  %12700 = vst [vmem:[#allocation26_spill] sm:$0xff] %v9107_v44  ;;  %v9109_v45 = vld [vmem:[#allocation9 + $0x28] ss:$16 sps:$4 sm:$0xff]   ;;  %v9115_v46 = vld [vmem:[#allocation9 + $0x44] ss:$16 sps:$4 sm:$0xff]  }
  0xcd   :  { %800 = vmatprep.subr.bf16.mxu0 %v7398_v47  ;;  %841 = vmatprep.subr.bf16.mxu1 %v7400_v48  ;;  %12701 = vst [vmem:[#allocation27_spill] sm:$0xff] %v9109_v45  ;;  %12702 = vst [vmem:[#allocation28_spill] sm:$0xff] %v9115_v46  ;;  %v9117_v47 = vld [vmem:[#allocation9 + $0x4c] ss:$16 sps:$4 sm:$0xff]   ;;  %v9119_v48 = vld [vmem:[#allocation9 + $0x40] ss:$16 sps:$4 sm:$0xff]  }
  0xce   :  { %469 = vmatprep.mubr.bf16.mxu0 %v12260_v0  ;;  %542 = vmatprep.mubr.bf16.mxu1 %v12260_v0  ;;  %12703 = vst [vmem:[#allocation29_spill] sm:$0xff] %v9117_v47  ;;  %12704 = vst [vmem:[#allocation30_spill] sm:$0xff] %v9119_v48 }
  0xd0   :  { %801 = vmatpush1.bf16.msra.mxu0 %v7402_v49  ;;  %842 = vmatpush1.bf16.msra.mxu1 %v7403_v50  ;;  %v9121_v49 = vld [vmem:[#allocation9 + $0x48] ss:$16 sps:$4 sm:$0xff]   ;;  %v9127_v50 = vld [vmem:[#allocation9 + $0x64] ss:$16 sps:$4 sm:$0xff]  }
  0xd1   :  { %802 = vmatprep.subr.bf16.mxu0 %v7405_v51  ;;  %843 = vmatprep.subr.bf16.mxu1 %v7407_v52  ;;  %12705 = vst [vmem:[#allocation31_spill] sm:$0xff] %v9121_v49  ;;  %12706 = vst [vmem:[#allocation32_spill] sm:$0xff] %v9127_v50  ;;  %v9129_v51 = vld [vmem:[#allocation9 + $0x6c] ss:$16 sps:$4 sm:$0xff]   ;;  %v9131_v52 = vld [vmem:[#allocation9 + $0x60] ss:$16 sps:$4 sm:$0xff]  }
  0xd2   :  { %12707 = vst [vmem:[#allocation33_spill] sm:$0xff] %v9129_v51  ;;  %12708 = vst [vmem:[#allocation34_spill] sm:$0xff] %v9131_v52 }
  0xd3   :  { %470 = vmatmul.mubr.bf16.gmra.mrb[8].mxu0 %v7404_v53  ;;  %543 = vmatmul.mubr.bf16.gmra.mrb[8].mxu1 %v7404_v53  ;;  %v9133_v53 = vld [vmem:[#allocation9 + $0x68] ss:$16 sps:$4 sm:$0xff]  }
  0xd4   :  { %803 = vmatpush1.bf16.msra.mxu0 %v7409_v54  ;;  %844 = vmatpush1.bf16.msra.mxu1 %v7410_v55  ;;  %12709 = vst [vmem:[#allocation35_spill] sm:$0xff] %v9133_v53  ;;  %v9139_v54 = vld [vmem:[#allocation9 + $0x84] ss:$16 sps:$4 sm:$0xff]   ;;  %v9141_v55 = vld [vmem:[#allocation9 + $0x8c] ss:$16 sps:$4 sm:$0xff]  }
  0xd5   :  { %804 = vmatprep.subr.bf16.mxu0 %v7411_v56  ;;  %845 = vmatprep.subr.bf16.mxu1 %v7413_v57  ;;  %12710 = vst [vmem:[#allocation36_spill] sm:$0xff] %v9139_v54  ;;  %12711 = vst [vmem:[#allocation37_spill] sm:$0xff] %v9141_v55  ;;  %v9143_v56 = vld [vmem:[#allocation9 + $0x80] ss:$16 sps:$4 sm:$0xff]   ;;  %v9145_v57 = vld [vmem:[#allocation9 + $0x88] ss:$16 sps:$4 sm:$0xff]  }
  0xd6   :  { %479 = vmatprep.mubr.bf16.mxu0 %v12260_v0  ;;  %552 = vmatprep.mubr.bf16.mxu1 %v12260_v0  ;;  %12712 = vst [vmem:[#allocation38_spill] sm:$0xff] %v9143_v56  ;;  %12713 = vst [vmem:[#allocation39_spill] sm:$0xff] %v9145_v57 }
  0xd8   :  { %805 = vmatpush1.bf16.msra.mxu0 %v7415_v58  ;;  %846 = vmatpush1.bf16.msra.mxu1 %v7416_v59  ;;  %v9150_v58 = vld [vmem:[#allocation9 + $0xa4] ss:$16 sps:$4 sm:$0xff]   ;;  %v9152_v59 = vld [vmem:[#allocation9 + $0xac] ss:$16 sps:$4 sm:$0xff]  }
  0xd9   :  { %806 = vmatprep.subr.bf16.mxu0 %v7418_v60  ;;  %847 = vmatprep.subr.bf16.mxu1 %v7420_v61  ;;  %12714 = vst [vmem:[#allocation40_spill] sm:$0xff] %v9150_v58  ;;  %12715 = vst [vmem:[#allocation41_spill] sm:$0xff] %v9152_v59  ;;  %v9154_v60 = vld [vmem:[#allocation9 + $0xa0] ss:$16 sps:$4 sm:$0xff]   ;;  %v9157_v61 = vld [vmem:[#allocation9 + $0xa8] ss:$16 sps:$4 sm:$0xff]  }
  0xda   :  { %12716 = vst [vmem:[#allocation42_spill] sm:$0xff] %v9154_v60  ;;  %12717 = vst [vmem:[#allocation43_spill] sm:$0xff] %v9157_v61 }
  0xdb   :  { %480 = vmatmul.mubr.bf16.gmra.mrb[12].mxu0 %v7417_v62  ;;  %553 = vmatmul.mubr.bf16.gmra.mrb[12].mxu1 %v7417_v62  ;;  %v9159_v62 = vld [vmem:[#allocation9 + $0xc4] ss:$16 sps:$4 sm:$0xff]  }
  0xdc   :  { %807 = vmatpush1.bf16.msra.mxu0 %v7422_v63  ;;  %848 = vmatpush1.bf16.msra.mxu1 %v7423_v1  ;;  %12718 = vst [vmem:[#allocation44_spill] sm:$0xff] %v9159_v62  ;;  %v9163_v63 = vld [vmem:[#allocation9 + $0xcc] ss:$16 sps:$4 sm:$0xff]   ;;  %v9166_v1 = vld [vmem:[#allocation9 + $0xc0] ss:$16 sps:$4 sm:$0xff]  }
  0xdd   :  { %808 = vmatprep.subr.bf16.mxu0 %v7424_v2  ;;  %849 = vmatprep.subr.bf16.mxu1 %v7426_v3  ;;  %12719 = vst [vmem:[#allocation45_spill] sm:$0xff] %v9163_v63  ;;  %12720 = vst [vmem:[#allocation46_spill] sm:$0xff] %v9166_v1  ;;  %v9170_v2 = vld [vmem:[#allocation9 + $0xc8] ss:$16 sps:$4 sm:$0xff]   ;;  %v9172_v3 = vld [vmem:[#allocation9 + $0xe4] ss:$16 sps:$4 sm:$0xff]  }
  0xde   :  { %826 = vmatprep.mubr.bf16.mxu0 %v12260_v0  ;;  %867 = vmatprep.mubr.bf16.mxu1 %v12260_v0  ;;  %12721 = vst [vmem:[#allocation47_spill] sm:$0xff] %v9170_v2  ;;  %12722 = vst [vmem:[#allocation48_spill] sm:$0xff] %v9172_v3 }
  0xe0   :  { %809 = vmatpush1.bf16.msra.mxu0 %v7428_v4  ;;  %850 = vmatpush1.bf16.msra.mxu1 %v7429_v5  ;;  %v9175_v4 = vld [vmem:[#allocation9 + $0xec] ss:$16 sps:$4 sm:$0xff]   ;;  %v9178_v5 = vld [vmem:[#allocation9 + $0xe0] ss:$16 sps:$4 sm:$0xff]  }
  0xe1   :  { %1129 = vmatprep.subr.bf16.mxu0 %v8991_v6  ;;  %1170 = vmatprep.subr.bf16.mxu1 %v8996_v8  ;;  %12723 = vst [vmem:[#allocation49_spill] sm:$0xff] %v9175_v4  ;;  %12724 = vst [vmem:[#allocation50_spill] sm:$0xff] %v9178_v5 }
  0xe3   :  { %827 = vmatmul.mubr.bf16.vlgmr.msra.gmra.mrb[16].mxu0 %v12260_v0  ;;  %868 = vmatmul.mubr.bf16.vlgmr.msra.gmra.mrb[16].mxu1 %v12260_v0 }
  0xe4   :  { %1161 = vmatprep.mubr.bf16.mxu0 %v12260_v0  ;;  %1202 = vmatprep.mubr.bf16.mxu1 %v12260_v0 }
  0xe5   :  { %1130 = vmatpush1.bf16.msra.mxu0 %v8993_v7  ;;  %1171 = vmatpush1.bf16.msra.mxu1 %v8999_v9 }
  0xe6   :  { %1131 = vmatprep.subr.bf16.mxu0 %v9002_v10  ;;  %1172 = vmatprep.subr.bf16.mxu1 %v9008_v12 }
  0xe9   :  { %1132 = vmatpush1.bf16.msra.mxu0 %v9005_v11  ;;  %1173 = vmatpush1.bf16.msra.mxu1 %v9011_v13 }
  0xea   :  { %1133 = vmatprep.subr.bf16.mxu0 %v9014_v14  ;;  %1174 = vmatprep.subr.bf16.mxu1 %v9020_v16 }
  0xed   :  { %1134 = vmatpush1.bf16.msra.mxu0 %v9017_v15  ;;  %1175 = vmatpush1.bf16.msra.mxu1 %v9023_v17 }
  0xee   :  { %1135 = vmatprep.subr.bf16.mxu0 %v9026_v18  ;;  %1176 = vmatprep.subr.bf16.mxu1 %v9032_v20 }
  0xf1   :  { %1136 = vmatpush1.bf16.msra.mxu0 %v9029_v19  ;;  %1177 = vmatpush1.bf16.msra.mxu1 %v9035_v21 }
  0xf2   :  { %1137 = vmatprep.subr.bf16.mxu0 %v9039_v22  ;;  %1178 = vmatprep.subr.bf16.mxu1 %v9044_v24 }
  0xf5   :  { %1138 = vmatpush1.bf16.msra.mxu0 %v9041_v23  ;;  %1179 = vmatpush1.bf16.msra.mxu1 %v9047_v25 }
  0xf6   :  { %1139 = vmatprep.subr.bf16.mxu0 %v9050_v26  ;;  %1180 = vmatprep.subr.bf16.mxu1 %v9056_v28 }
  0xf9   :  { %1140 = vmatpush1.bf16.msra.mxu0 %v9053_v27  ;;  %1181 = vmatpush1.bf16.msra.mxu1 %v9059_v29 }
  0xfa   :  { %1141 = vmatprep.subr.bf16.mxu0 %v9062_v30  ;;  %1182 = vmatprep.subr.bf16.mxu1 %v9068_v32 }
  0xfd   :  { %1142 = vmatpush1.bf16.msra.mxu0 %v9065_v31  ;;  %1183 = vmatpush1.bf16.msra.mxu1 %v9071_v33 }
  0xfe   :  { %1143 = vmatprep.subr.bf16.mxu0 %v9074_v34  ;;  %1184 = vmatprep.subr.bf16.mxu1 %v9080_v36 }
 0x101   :  { %1144 = vmatpush1.bf16.msra.mxu0 %v9077_v35  ;;  %1185 = vmatpush1.bf16.msra.mxu1 %v9083_v37 }
 0x102   :  { %1371 = vmatprep.subr.bf16.mxu0 %v9088_v38  ;;  %1412 = vmatprep.subr.bf16.mxu1 %v9090_v39 }
 0x104   :  { %1162 = vmatmul.mubr.bf16.vlgmr.msra.gmra.mrb[20].mxu0 %v12260_v0  ;;  %1203 = vmatmul.mubr.bf16.vlgmr.msra.gmra.mrb[20].mxu1 %v12260_v0 }
 0x105   :  { %1403 = vmatprep.mubr.bf16.mxu0 %v12260_v0  ;;  %1372 = vmatpush1.bf16.msra.mxu0 %v9092_v40 }
 0x106   :  { %1413 = vmatpush1.bf16.msra.mxu1 %v9094_v41  ;;  %1444 = vmatprep.mubr.bf16.mxu1 %v12260_v0  ;;  %v9182_v0 = vld [vmem:[#allocation9 + $0xe8] ss:$16 sps:$4 sm:$0xff]  }
 0x107   :  { %1373 = vmatprep.subr.bf16.mxu0 %v9102_v42  ;;  %1414 = vmatprep.subr.bf16.mxu1 %v9104_v43  ;;  %12725 = vst [vmem:[#allocation51_spill] sm:$0xff] %v9182_v0 }
 0x109   :  { %1374 = vmatpush1.bf16.msra.mxu0 %v9107_v44 }
 0x10a   :  { %1415 = vmatpush1.bf16.msra.mxu1 %v9109_v45  ;;  %1375 = vmatprep.subr.bf16.mxu0 %v9115_v46  ;;  %v9236_v45 = vld [vmem:[#allocation14 + $0x4] ss:$16 sps:$4 sm:$0xff]  }
 0x10b   :  { %1416 = vmatprep.subr.bf16.mxu1 %v9117_v47  ;;  %12734 = vst [vmem:[#allocation60_spill] sm:$0xff] %v9236_v45 }
 0x10d   :  { %1376 = vmatpush1.bf16.msra.mxu0 %v9119_v48 }
 0x10e   :  { %1417 = vmatpush1.bf16.msra.mxu1 %v9121_v49  ;;  %1377 = vmatprep.subr.bf16.mxu0 %v9127_v50 }
 0x10f   :  { %1418 = vmatprep.subr.bf16.mxu1 %v9129_v51 }
 0x111   :  { %1378 = vmatpush1.bf16.msra.mxu0 %v9131_v52 }
 0x112   :  { %1419 = vmatpush1.bf16.msra.mxu1 %v9133_v53  ;;  %1379 = vmatprep.subr.bf16.mxu0 %v9139_v54 }
 0x113   :  { %1420 = vmatprep.subr.bf16.mxu1 %v9141_v55 }
 0x115   :  { %1380 = vmatpush1.bf16.msra.mxu0 %v9143_v56 }
 0x116   :  { %1421 = vmatpush1.bf16.msra.mxu1 %v9145_v57  ;;  %1381 = vmatprep.subr.bf16.mxu0 %v9150_v58 }
 0x117   :  { %1422 = vmatprep.subr.bf16.mxu1 %v9152_v59 }
 0x119   :  { %1382 = vmatpush1.bf16.msra.mxu0 %v9154_v60 }
 0x11a   :  { %1423 = vmatpush1.bf16.msra.mxu1 %v9157_v61  ;;  %1383 = vmatprep.subr.bf16.mxu0 %v9159_v62  ;;  %v213_v62 = vlaneseq }
 0x11b   :  { %1424 = vmatprep.subr.bf16.mxu1 %v9163_v63 }
 0x11c   :  { %v214_v63 = vshrl.u32 %v213_v62, 7 }
 0x11d   :  { %1384 = vmatpush1.bf16.msra.mxu0 %v9166_v1 }
 0x11e   :  { %1425 = vmatpush1.bf16.msra.mxu1 %v9170_v2  ;;  %1385 = vmatprep.subr.bf16.mxu0 %v9172_v3  ;;  %v9187_v61 = vsub.s32 2, %v214_v63  ;;  %v9189_v60 = vsub.s32 3, %v214_v63  ;;  %v9191_v1 = vsub.s32 0, %v214_v63  ;;  %v211_v3 = vld [vmem:[%s12248_s3] sm:$0xf]  ;;  %v9196_v2 = vsub.s32 1, %v214_v63 }
 0x11f   :  { %1426 = vmatprep.subr.bf16.mxu1 %v9175_v4 }
 0x120   :  { %12726 = vst [vmem:[#allocation52_spill] sm:$0xff] %v9191_v1  ;;  %12727 = vst [vmem:[#allocation53_spill] sm:$0xff] %v9196_v2  ;;  %v9199_v4 = vrot.slane %v211_v3, %v9187_v61  ;;  %v9206_v62 = vrot.slane %v211_v3, %v9189_v60  ;;  %v9209_v59 = vrot.slane %v211_v3, %v9191_v1 }
 0x121   :  { %1386 = vmatpush1.bf16.msra.mxu0 %v9178_v5  ;;  %v9216_v63 = vrot.slane %v211_v3, %v9196_v2 }
 0x122   :  { %1427 = vmatpush1.bf16.msra.mxu1 %v9182_v0  ;;  %1728 = vmatprep.subr.bf16.mxu0 %v9236_v45 }
 0x196   :  { %v9201_v5 = vpop.f32.mrb[0].mxu0  ;;  %v9203_v0 = vpop.f32.mrb[0].mxu1 }
 0x197   :  { %v9211_v58 = vpop.f32.mrb[1].mxu0  ;;  %v9213_v57 = vpop.f32.mrb[1].mxu1 }
 0x198   :  { %v455_v56 = vpop.f32.mrb[2].mxu0  ;;  %v528_v55 = vpop.f32.mrb[2].mxu1 }
 0x199   :  { %v9219_v54 = vadd.f32 %v455_v56, %v9209_v59  ;;  %v457_v53 = vpop.f32.mrb[3].mxu0  ;;  %v9222_v52 = vadd.f32 %v528_v55, %v9199_v4  ;;  %v530_v51 = vpop.f32.mrb[3].mxu1 }
 0x19a   :  { %v9225_v50 = vadd.f32 %v457_v53, %v9216_v63  ;;  %v9228_v49 = vadd.f32 %v530_v51, %v9206_v62 }
 0x19b   :  { %12728 = vst [vmem:[#allocation54_spill] sm:$0xff] %v9219_v54  ;;  %12729 = vst [vmem:[#allocation55_spill] sm:$0xff] %v9222_v52 }
 0x19c   :  { %12730 = vst [vmem:[#allocation56_spill] sm:$0xff] %v9225_v50  ;;  %12731 = vst [vmem:[#allocation57_spill] sm:$0xff] %v9228_v49  ;;  %v9244_v49 = vld [vmem:[#allocation14 + $0xc] ss:$16 sps:$4 sm:$0xff]  }
 0x19d   :  { %12737 = vst [vmem:[#allocation63_spill] sm:$0xff] %v9244_v49  ;;  %1769 = vmatprep.subr.bf16.mxu1 %v9244_v49 }
 0x19e   :  { %v461_v48 = vpop.f32.mrb[4].mxu0  ;;  %v534_v47 = vpop.f32.mrb[4].mxu1 }
 0x19f   :  { %v9231_v3 = vadd.f32 %v461_v48, %v9209_v59  ;;  %v463_v46 = vpop.f32.mrb[5].mxu0  ;;  %v9234_v56 = vadd.f32 %v534_v47, %v9199_v4  ;;  %v536_v54 = vpop.f32.mrb[5].mxu1 }
 0x1a0   :  { %v9239_v55 = vadd.f32 %v463_v46, %v9216_v63  ;;  %v465_v53 = vpop.f32.mrb[6].mxu0  ;;  %v9242_v50 = vadd.f32 %v536_v54, %v9206_v62  ;;  %v538_v51 = vpop.f32.mrb[6].mxu1 }
 0x1a1   :  { %12732 = vst [vmem:[#allocation58_spill] sm:$0xff] %v9231_v3  ;;  %12733 = vst [vmem:[#allocation59_spill] sm:$0xff] %v9234_v56  ;;  %v9247_v48 = vadd.f32 %v465_v53, %v9209_v59  ;;  %v467_v3 = vpop.f32.mrb[7].mxu0  ;;  %v9250_v47 = vadd.f32 %v538_v51, %v9199_v4  ;;  %v540_v56 = vpop.f32.mrb[7].mxu1 }
 0x1a2   :  { %12735 = vst [vmem:[#allocation61_spill] sm:$0xff] %v9239_v55  ;;  %12736 = vst [vmem:[#allocation62_spill] sm:$0xff] %v9242_v50  ;;  %v9254_v46 = vadd.f32 %v467_v3, %v9216_v63  ;;  %v9257_v55 = vadd.f32 %v540_v56, %v9206_v62 }
 0x1a3   :  { %12738 = vst [vmem:[#allocation64_spill] sm:$0xff] %v9247_v48  ;;  %12739 = vst [vmem:[#allocation65_spill] sm:$0xff] %v9250_v47 }
 0x1a4   :  { %12740 = vst [vmem:[#allocation66_spill] sm:$0xff] %v9254_v46  ;;  %12741 = vst [vmem:[#allocation67_spill] sm:$0xff] %v9257_v55 }
 0x1a6   :  { %v471_v54 = vpop.f32.mrb[8].mxu0  ;;  %v544_v50 = vpop.f32.mrb[8].mxu1 }
 0x1a7   :  { %v9261_v53 = vadd.f32 %v471_v54, %v9209_v59  ;;  %v473_v48 = vpop.f32.mrb[9].mxu0  ;;  %v9264_v51 = vadd.f32 %v544_v50, %v9199_v4  ;;  %v546_v47 = vpop.f32.mrb[9].mxu1 }
 0x1a8   :  { %v9267_v52 = vadd.f32 %v473_v48, %v9216_v63  ;;  %v475_v3 = vpop.f32.mrb[10].mxu0  ;;  %v9270_v46 = vadd.f32 %v546_v47, %v9206_v62  ;;  %v548_v56 = vpop.f32.mrb[10].mxu1 }
 0x1a9   :  { %12742 = vst [vmem:[#allocation68_spill] sm:$0xff] %v9261_v53  ;;  %12743 = vst [vmem:[#allocation69_spill] sm:$0xff] %v9264_v51  ;;  %v9273_v55 = vadd.f32 %v475_v3, %v9209_v59  ;;  %v477_v49 = vpop.f32.mrb[11].mxu0  ;;  %v9276_v54 = vadd.f32 %v548_v56, %v9199_v4  ;;  %v550_v53 = vpop.f32.mrb[11].mxu1 }
 0x1aa   :  { %12744 = vst [vmem:[#allocation70_spill] sm:$0xff] %v9267_v52  ;;  %12745 = vst [vmem:[#allocation71_spill] sm:$0xff] %v9270_v46  ;;  %v9279_v50 = vadd.f32 %v477_v49, %v9216_v63  ;;  %v9282_v51 = vadd.f32 %v550_v53, %v9206_v62 }
 0x1ab   :  { %12746 = vst [vmem:[#allocation72_spill] sm:$0xff] %v9273_v55  ;;  %12747 = vst [vmem:[#allocation73_spill] sm:$0xff] %v9276_v54 }
 0x1ac   :  { %12748 = vst [vmem:[#allocation74_spill] sm:$0xff] %v9279_v50  ;;  %12749 = vst [vmem:[#allocation75_spill] sm:$0xff] %v9282_v51 }
 0x1ae   :  { %v481_v48 = vpop.f32.mrb[12].mxu0  ;;  %v554_v52 = vpop.f32.mrb[12].mxu1 }
 0x1af   :  { %v9285_v47 = vadd.f32 %v481_v48, %v9209_v59  ;;  %v483_v46 = vpop.f32.mrb[13].mxu0  ;;  %v9288_v3 = vadd.f32 %v554_v52, %v9199_v4  ;;  %v556_v55 = vpop.f32.mrb[13].mxu1 }
 0x1b0   :  { %v9291_v56 = vadd.f32 %v483_v46, %v9216_v63  ;;  %v485_v54 = vpop.f32.mrb[14].mxu0  ;;  %v9294_v49 = vadd.f32 %v556_v55, %v9206_v62  ;;  %v558_v50 = vpop.f32.mrb[14].mxu1  ;;  %v452_v46 = vadd.f32 %v9201_v5, %v9209_v59  ;;  %v525_v55 = vadd.f32 %v9203_v0, %v9199_v4 }
 0x1b1   :  { %12750 = vst [vmem:[#allocation76_spill] sm:$0xff] %v9285_v47  ;;  %12751 = vst [vmem:[#allocation77_spill] sm:$0xff] %v9288_v3  ;;  %v9297_v53 = vadd.f32 %v485_v54, %v9209_v59  ;;  %v487_v51 = vpop.f32.mrb[15].mxu0  ;;  %v9300_v48 = vadd.f32 %v558_v50, %v9199_v4  ;;  %v560_v47 = vpop.f32.mrb[15].mxu1  ;;  %v454_v54 = vadd.f32 %v9211_v58, %v9216_v63 }
 0x1b2   :  { %12752 = vst [vmem:[#allocation78_spill] sm:$0xff] %v9291_v56  ;;  %12753 = vst [vmem:[#allocation79_spill] sm:$0xff] %v9294_v49  ;;  %v9303_v52 = vadd.f32 %v487_v51, %v9216_v63  ;;  %v9306_v3 = vadd.f32 %v560_v47, %v9206_v62  ;;  %v527_v50 = vadd.f32 %v9213_v57, %v9206_v62 }
 0x1b3   :  { %12754 = vst [vmem:[#allocation80_spill] sm:$0xff] %v9297_v53  ;;  %12755 = vst [vmem:[#allocation81_spill] sm:$0xff] %v9300_v48 }
 0x1b4   :  { %12756 = vst [vmem:[#allocation82_spill] sm:$0xff] %v9303_v52  ;;  %12757 = vst [vmem:[#allocation83_spill] sm:$0xff] %v9306_v3 }
 0x1b6   :  { %v828_v48 = vpop.f32.mrb[16].mxu0  ;;  %v869_v53 = vpop.f32.mrb[16].mxu1 }
 0x1b7   :  { %v876_v49 = vadd.f32 %v828_v48, %v452_v46  ;;  %v878_v51 = vadd.f32 %v869_v53, %v525_v55  ;;  %v830_v52 = vpop.f32.mrb[17].mxu0  ;;  %v871_v56 = vpop.f32.mrb[17].mxu1 }
 0x1b8   :  { %v877_v47 = vadd.f32 %v830_v52, %v454_v54  ;;  %v879_v3 = vadd.f32 %v871_v56, %v527_v50  ;;  %v832_v45 = vpop.f32.mrb[18].mxu0  ;;  %v873_v44 = vpop.f32.mrb[18].mxu1  ;;  %v9319_v54 = vld [vmem:[#allocation14] ss:$16 sps:$4 sm:$0xff]   ;;  %v9321_v50 = vld [vmem:[#allocation14 + $0x8] ss:$16 sps:$4 sm:$0xff]  }
 0x1b9   :  { %v6488_v59 = vmul.f32 -1.442695, %v876_v49  ;;  %v833_v5 = vpop.f32.mrb[19].mxu0  ;;  %v874_v43 = vpop.f32.mrb[19].mxu1  ;;  %v6490_v58 = vmul.f32 -1.442695, %v878_v51 }
 0x1ba   :  { %v6489_v0 = vmul.f32 -1.442695, %v877_v47  ;;  %12759 = vst [vmem:[#allocation85_spill] sm:$0xff] %v9319_v54  ;;  %12760 = vst [vmem:[#allocation86_spill] sm:$0xff] %v9321_v50  ;;  %v9325_v47 = vld [vmem:[#allocation14 + $0x24] ss:$16 sps:$4 sm:$0xff]  }
 0x1bb   :  { %7622 = vpow2.f32 %v6488_v59  ;;  %12761 = vst [vmem:[#allocation87_spill] sm:$0xff] %v9325_v47  ;;  %v9327_v59 = vld [vmem:[#allocation14 + $0x2c] ss:$16 sps:$4 sm:$0xff]   ;;  %v9333_v5 = vld [vmem:[#allocation14 + $0x20] ss:$16 sps:$4 sm:$0xff]  }
 0x1bc   :  { %7624 = vpow2.f32 %v6489_v0  ;;  %12762 = vst [vmem:[#allocation88_spill] sm:$0xff] %v9327_v59  ;;  %12763 = vst [vmem:[#allocation89_spill] sm:$0xff] %v9333_v5  ;;  %v9335_v0 = vld [vmem:[#allocation14 + $0x28] ss:$16 sps:$4 sm:$0xff]  }
 0x1bd   :  { %7626 = vtanh.f32 %v879_v3  ;;  %12764 = vst [vmem:[#allocation90_spill] sm:$0xff] %v9335_v0 }
 0x1be   :  { %7628 = vpow2.f32 %v6490_v58  ;;  %v9339_v58 = vld [vmem:[#allocation14 + $0x44] ss:$16 sps:$4 sm:$0xff]  }
 0x1bf   :  { %12765 = vst [vmem:[#allocation91_spill] sm:$0xff] %v9339_v58 }
 0x1c5   :  { %v7623_v4 = vpop.eup %7622 }
 0x1c6   :  { %v889_v63 = vadd.f32 1.0, %v7623_v4  ;;  %v7625_v57 = vpop.eup %7624  ;;  %v9341_v4 = vld [vmem:[#allocation14 + $0x4c] ss:$16 sps:$4 sm:$0xff]  }
 0x1c7   :  { %v890_v62 = vadd.f32 1.0, %v7625_v57  ;;  %v7627_v53 = vpop.eup %7626  ;;  %12766 = vst [vmem:[#allocation92_spill] sm:$0xff] %v9341_v4  ;;  %v9347_v57 = vld [vmem:[#allocation14 + $0x40] ss:$16 sps:$4 sm:$0xff]  }
 0x1c8   :  { %7630 = vrcp.f32 %v889_v63  ;;  %v7629_v48 = vpop.eup %7628  ;;  %v12767_v63 = vmov 0   ;;  %12768 = vst [vmem:[#allocation93_spill] sm:$0xff] %v9347_v57 }
 0x1c9   :  { %7632 = vrcp.f32 %v890_v62  ;;  %v891_v49 = vadd.f32 1.0, %v7629_v48  ;;  %v9349_v62 = vld [vmem:[#allocation14 + $0x48] ss:$16 sps:$4 sm:$0xff]   ;;  %v9355_v48 = vld [vmem:[#allocation14 + $0x6c] ss:$16 sps:$4 sm:$0xff]  }
 0x1ca   :  { %12769 = vst [vmem:[#allocation94_spill] sm:$0xff] %v9349_v62  ;;  %12771 = vst [vmem:[#allocation96_spill] sm:$0xff] %v9355_v48 }
 0x1cb   :  { %7634 = vrcp.f32 %v891_v49 }
 0x1d2   :  { %v7631_v56 = vpop.eup %7630 }
 0x1d3   :  { %v900_v45 = vmul.f32 %v7631_v56, %v7627_v53  ;;  %v7633_v44 = vpop.eup %7632  ;;  %v9353_v53 = vld [vmem:[#allocation14 + $0x64] ss:$16 sps:$4 sm:$0xff]   ;;  %v9359_v56 = vld [vmem:[#allocation14 + $0x60] ss:$16 sps:$4 sm:$0xff]  }
 0x1d4   :  { %v899_v52 = vmul.f32 0.0, %v7633_v44  ;;  %12770 = vst [vmem:[#allocation95_spill] sm:$0xff] %v9353_v53  ;;  %12772 = vst [vmem:[#allocation97_spill] sm:$0xff] %v9359_v56 }
 0x1d5   :  { %v7635_v46 = vpop.eup %7634 }
 0x1d6   :  { %v9316_v43 = vadd.f32 %v900_v45, %v899_v52  ;;  %v9361_v45 = vld [vmem:[#allocation14 + $0x68] ss:$16 sps:$4 sm:$0xff]  }
 0x1d7   :  { %12773 = vst [vmem:[#allocation98_spill] sm:$0xff] %v9361_v45  ;;  %v9367_v44 = vpop.f32.mrb[20].mxu0 }
 0x1d8   :  { %12758 = vst [vmem:[#allocation84_spill] sm:$0xff] %v9316_v43  ;;  %7636 = vtanh.f32 %v9316_v43  ;;  %v9369_v49 = vpop.f32.mrb[21].mxu0 }
 0x1d9   :  { %v1167_v52 = vpop.f32.mrb[22].mxu0 }
 0x1da   :  { %v9386_v52 = vld [vmem:[#allocation14 + $0xa4] ss:$16 sps:$4 sm:$0xff]  }
 0x1db   :  { %12778 = vst [vmem:[#allocation103_spill] sm:$0xff] %v9386_v52 }
 0x1e2   :  { %v7637_v55 = vpop.eup %7636 }
 0x1e3   :  { %v903_v3 = vmul.f32 %v7637_v55, %v7635_v46  ;;  %v1168_v46 = vpop.f32.mrb[23].mxu0  ;;  %v9371_v55 = vpop.f32.mrb[20].mxu1 }
 0x1e4   :  { %v9395_v46 = vld [vmem:[#allocation14 + $0xa8] ss:$16 sps:$4 sm:$0xff]  }
 0x1e5   :  { %v9323_v51 = vpack.c.bf16 %v903_v3, %v903_v3  ;;  %v9373_v3 = vpop.f32.mrb[21].mxu1  ;;  %12781 = vst [vmem:[#allocation106_spill] sm:$0xff] %v9395_v46 }
 0x1e7   :  { %1404 = vmatmul.mubr.bf16.vlgmr.msra.gmra.mrb[24].mxu0 %v9323_v51  ;;  %1445 = vmatmul.mubr.bf16.vlgmr.msra.gmra.mrb[24].mxu1 %v9323_v51 }
 0x1e8   :  { %1729 = vmatpush1.bf16.msra.mxu0 %v9319_v54  ;;  %1770 = vmatpush1.bf16.msra.mxu1 %v9321_v50 }
 0x1e9   :  { %1730 = vmatprep.subr.bf16.mxu0 %v9325_v47  ;;  %1771 = vmatprep.subr.bf16.mxu1 %v9327_v59 }
 0x1ea   :  { %1760 = vmatprep.mubr.bf16.mxu0 %v12767_v63  ;;  %1801 = vmatprep.mubr.bf16.mxu1 %v12767_v63 }
 0x1ec   :  { %1731 = vmatpush1.bf16.msra.mxu0 %v9333_v5  ;;  %1772 = vmatpush1.bf16.msra.mxu1 %v9335_v0 }
 0x1ed   :  { %1732 = vmatprep.subr.bf16.mxu0 %v9339_v58  ;;  %1773 = vmatprep.subr.bf16.mxu1 %v9341_v4  ;;  %v9375_v4 = vld [vmem:[#allocation14 + $0x84] ss:$16 sps:$4 sm:$0xff]   ;;  %v9497_v58 = vld [vmem:[#allocation12 + $0xcc] ss:$16 sps:$4 sm:$0xff]  }
 0x1ee   :  { %12774 = vst [vmem:[#allocation99_spill] sm:$0xff] %v9375_v4  ;;  %12815 = vst [vmem:[#allocation140_spill] sm:$0xff] %v9497_v58 }
 0x1f0   :  { %1733 = vmatpush1.bf16.msra.mxu0 %v9347_v57  ;;  %1774 = vmatpush1.bf16.msra.mxu1 %v9349_v62  ;;  %v1208_v62 = vpop.f32.mrb[22].mxu1 }
 0x1f1   :  { %1734 = vmatprep.subr.bf16.mxu0 %v9353_v53  ;;  %1775 = vmatprep.subr.bf16.mxu1 %v9355_v48  ;;  %v1209_v57 = vpop.f32.mrb[23].mxu1  ;;  %v9377_v53 = vld [vmem:[#allocation14 + $0x80] ss:$16 sps:$4 sm:$0xff]   ;;  %v9495_v48 = vld [vmem:[#allocation12 + $0xc4] ss:$16 sps:$4 sm:$0xff]  }
 0x1f2   :  { %12775 = vst [vmem:[#allocation100_spill] sm:$0xff] %v9377_v53  ;;  %v9389_v62 = vld [vmem:[#allocation14 + $0xa0] ss:$16 sps:$4 sm:$0xff]   ;;  %v9392_v57 = vld [vmem:[#allocation14 + $0xac] ss:$16 sps:$4 sm:$0xff]   ;;  %12814 = vst [vmem:[#allocation139_spill] sm:$0xff] %v9495_v48 }
 0x1f3   :  { %12779 = vst [vmem:[#allocation104_spill] sm:$0xff] %v9389_v62  ;;  %12780 = vst [vmem:[#allocation105_spill] sm:$0xff] %v9392_v57 }
 0x1f4   :  { %1735 = vmatpush1.bf16.msra.mxu0 %v9359_v56  ;;  %1776 = vmatpush1.bf16.msra.mxu1 %v9361_v45  ;;  %v9380_v56 = vld [vmem:[#allocation14 + $0x8c] ss:$16 sps:$4 sm:$0xff]   ;;  %v9383_v45 = vld [vmem:[#allocation14 + $0x88] ss:$16 sps:$4 sm:$0xff]  }
 0x1f5   :  { %1736 = vmatprep.subr.bf16.mxu0 %v9375_v4  ;;  %12776 = vst [vmem:[#allocation101_spill] sm:$0xff] %v9380_v56  ;;  %12777 = vst [vmem:[#allocation102_spill] sm:$0xff] %v9383_v45  ;;  %1777 = vmatprep.subr.bf16.mxu1 %v9380_v56  ;;  %v9401_v56 = vld [vmem:[#allocation14 + $0xc0] ss:$16 sps:$4 sm:$0xff]   ;;  %v9430_v4 = vld [vmem:[#allocation12 + $0x8] ss:$16 sps:$4 sm:$0xff]  }
 0x1f6   :  { %12783 = vst [vmem:[#allocation108_spill] sm:$0xff] %v9401_v56  ;;  %12793 = vst [vmem:[#allocation118_spill] sm:$0xff] %v9430_v4 }
 0x1f8   :  { %1737 = vmatpush1.bf16.msra.mxu0 %v9377_v53  ;;  %1778 = vmatpush1.bf16.msra.mxu1 %v9383_v45  ;;  %v9398_v53 = vld [vmem:[#allocation14 + $0xc4] ss:$16 sps:$4 sm:$0xff]   ;;  %v9404_v45 = vld [vmem:[#allocation14 + $0xcc] ss:$16 sps:$4 sm:$0xff]  }
 0x1f9   :  { %1738 = vmatprep.subr.bf16.mxu0 %v9386_v52  ;;  %1779 = vmatprep.subr.bf16.mxu1 %v9392_v57  ;;  %12782 = vst [vmem:[#allocation107_spill] sm:$0xff] %v9398_v53  ;;  %12784 = vst [vmem:[#allocation109_spill] sm:$0xff] %v9404_v45  ;;  %v9407_v52 = vld [vmem:[#allocation14 + $0xc8] ss:$16 sps:$4 sm:$0xff]   ;;  %v9413_v57 = vld [vmem:[#allocation14 + $0xe0] ss:$16 sps:$4 sm:$0xff]  }
 0x1fa   :  { %12785 = vst [vmem:[#allocation110_spill] sm:$0xff] %v9407_v52  ;;  %12787 = vst [vmem:[#allocation112_spill] sm:$0xff] %v9413_v57 }
 0x1fc   :  { %1739 = vmatpush1.bf16.msra.mxu0 %v9389_v62  ;;  %1780 = vmatpush1.bf16.msra.mxu1 %v9395_v46  ;;  %v9410_v62 = vld [vmem:[#allocation14 + $0xe4] ss:$16 sps:$4 sm:$0xff]   ;;  %v9416_v46 = vld [vmem:[#allocation14 + $0xec] ss:$16 sps:$4 sm:$0xff]  }
 0x1fd   :  { %1740 = vmatprep.subr.bf16.mxu0 %v9398_v53  ;;  %1781 = vmatprep.subr.bf16.mxu1 %v9404_v45  ;;  %12786 = vst [vmem:[#allocation111_spill] sm:$0xff] %v9410_v62  ;;  %12788 = vst [vmem:[#allocation113_spill] sm:$0xff] %v9416_v46  ;;  %v9419_v53 = vld [vmem:[#allocation14 + $0xe8] ss:$16 sps:$4 sm:$0xff]   ;;  %v9426_v45 = vld [vmem:[#allocation12 + $0xc] ss:$16 sps:$4 sm:$0xff]  }
 0x1fe   :  { %12789 = vst [vmem:[#allocation114_spill] sm:$0xff] %v9419_v53  ;;  %12791 = vst [vmem:[#allocation116_spill] sm:$0xff] %v9426_v45 }
 0x200   :  { %1741 = vmatpush1.bf16.msra.mxu0 %v9401_v56  ;;  %1782 = vmatpush1.bf16.msra.mxu1 %v9407_v52  ;;  %v9424_v56 = vld [vmem:[#allocation12 + $0x4] ss:$16 sps:$4 sm:$0xff]   ;;  %v9428_v52 = vld [vmem:[#allocation12] ss:$16 sps:$4 sm:$0xff]  }
 0x201   :  { %1742 = vmatprep.subr.bf16.mxu0 %v9410_v62  ;;  %1783 = vmatprep.subr.bf16.mxu1 %v9416_v46  ;;  %12790 = vst [vmem:[#allocation115_spill] sm:$0xff] %v9424_v56  ;;  %12792 = vst [vmem:[#allocation117_spill] sm:$0xff] %v9428_v52  ;;  %v9443_v46 = vld [vmem:[#allocation12 + $0x20] ss:$16 sps:$4 sm:$0xff]   ;;  %v9445_v62 = vld [vmem:[#allocation12 + $0x28] ss:$16 sps:$4 sm:$0xff]  }
 0x202   :  { %12796 = vst [vmem:[#allocation121_spill] sm:$0xff] %v9443_v46  ;;  %12797 = vst [vmem:[#allocation122_spill] sm:$0xff] %v9445_v62 }
 0x204   :  { %1743 = vmatpush1.bf16.msra.mxu0 %v9413_v57  ;;  %1784 = vmatpush1.bf16.msra.mxu1 %v9419_v53  ;;  %v9438_v53 = vld [vmem:[#allocation12 + $0x24] ss:$16 sps:$4 sm:$0xff]   ;;  %v9440_v57 = vld [vmem:[#allocation12 + $0x2c] ss:$16 sps:$4 sm:$0xff]  }
 0x205   :  { %1970 = vmatprep.subr.bf16.mxu0 %v9424_v56  ;;  %2011 = vmatprep.subr.bf16.mxu1 %v9426_v45  ;;  %12794 = vst [vmem:[#allocation119_spill] sm:$0xff] %v9438_v53  ;;  %12795 = vst [vmem:[#allocation120_spill] sm:$0xff] %v9440_v57  ;;  %v9455_v45 = vld [vmem:[#allocation12 + $0x40] ss:$16 sps:$4 sm:$0xff]   ;;  %v9457_v56 = vld [vmem:[#allocation12 + $0x48] ss:$16 sps:$4 sm:$0xff]  }
 0x206   :  { %12800 = vst [vmem:[#allocation125_spill] sm:$0xff] %v9455_v45  ;;  %12801 = vst [vmem:[#allocation126_spill] sm:$0xff] %v9457_v56 }
 0x207   :  { %1761 = vmatmul.mubr.bf16.vlgmr.msra.gmra.mrb[28].mxu0 %v12767_v63  ;;  %1802 = vmatmul.mubr.bf16.vlgmr.msra.gmra.mrb[28].mxu1 %v12767_v63 }
 0x208   :  { %2002 = vmatprep.mubr.bf16.mxu0 %v12767_v63  ;;  %1971 = vmatpush1.bf16.msra.mxu0 %v9428_v52  ;;  %v9451_v52 = vld [vmem:[#allocation12 + $0x44] ss:$16 sps:$4 sm:$0xff]  }
 0x209   :  { %2012 = vmatpush1.bf16.msra.mxu1 %v9430_v4  ;;  %2043 = vmatprep.mubr.bf16.mxu1 %v12767_v63  ;;  %12798 = vst [vmem:[#allocation123_spill] sm:$0xff] %v9451_v52  ;;  %v9453_v4 = vld [vmem:[#allocation12 + $0x4c] ss:$16 sps:$4 sm:$0xff]  }
 0x20a   :  { %1972 = vmatprep.subr.bf16.mxu0 %v9438_v53  ;;  %2013 = vmatprep.subr.bf16.mxu1 %v9440_v57  ;;  %12799 = vst [vmem:[#allocation124_spill] sm:$0xff] %v9453_v4  ;;  %v9463_v57 = vld [vmem:[#allocation12 + $0x64] ss:$16 sps:$4 sm:$0xff]   ;;  %v9469_v53 = vld [vmem:[#allocation12 + $0x68] ss:$16 sps:$4 sm:$0xff]  }
 0x20b   :  { %12802 = vst [vmem:[#allocation127_spill] sm:$0xff] %v9463_v57  ;;  %12805 = vst [vmem:[#allocation130_spill] sm:$0xff] %v9469_v53 }
 0x20c   :  { %1973 = vmatpush1.bf16.msra.mxu0 %v9443_v46  ;;  %v9465_v46 = vld [vmem:[#allocation12 + $0x6c] ss:$16 sps:$4 sm:$0xff]  }
 0x20d   :  { %2014 = vmatpush1.bf16.msra.mxu1 %v9445_v62  ;;  %1974 = vmatprep.subr.bf16.mxu0 %v9451_v52  ;;  %12803 = vst [vmem:[#allocation128_spill] sm:$0xff] %v9465_v46  ;;  %v9467_v62 = vld [vmem:[#allocation12 + $0x60] ss:$16 sps:$4 sm:$0xff]   ;;  %v9481_v52 = vld [vmem:[#allocation12 + $0x88] ss:$16 sps:$4 sm:$0xff]  }
 0x20e   :  { %2015 = vmatprep.subr.bf16.mxu1 %v9453_v4  ;;  %12804 = vst [vmem:[#allocation129_spill] sm:$0xff] %v9467_v62  ;;  %v9475_v4 = vld [vmem:[#allocation12 + $0x84] ss:$16 sps:$4 sm:$0xff]   ;;  %12809 = vst [vmem:[#allocation134_spill] sm:$0xff] %v9481_v52 }
 0x20f   :  { %12806 = vst [vmem:[#allocation131_spill] sm:$0xff] %v9475_v4 }
 0x210   :  { %1975 = vmatpush1.bf16.msra.mxu0 %v9455_v45  ;;  %v9477_v45 = vld [vmem:[#allocation12 + $0x8c] ss:$16 sps:$4 sm:$0xff]  }
 0x211   :  { %2016 = vmatpush1.bf16.msra.mxu1 %v9457_v56  ;;  %1976 = vmatprep.subr.bf16.mxu0 %v9463_v57  ;;  %12807 = vst [vmem:[#allocation132_spill] sm:$0xff] %v9477_v45  ;;  %v9479_v56 = vld [vmem:[#allocation12 + $0x80] ss:$16 sps:$4 sm:$0xff]   ;;  %v9493_v57 = vld [vmem:[#allocation12 + $0xa8] ss:$16 sps:$4 sm:$0xff]  }
 0x212   :  { %2017 = vmatprep.subr.bf16.mxu1 %v9465_v46  ;;  %12808 = vst [vmem:[#allocation133_spill] sm:$0xff] %v9479_v56  ;;  %v9487_v46 = vld [vmem:[#allocation12 + $0xa4] ss:$16 sps:$4 sm:$0xff]   ;;  %12813 = vst [vmem:[#allocation138_spill] sm:$0xff] %v9493_v57 }
 0x213   :  { %12810 = vst [vmem:[#allocation135_spill] sm:$0xff] %v9487_v46 }
 0x214   :  { %1977 = vmatpush1.bf16.msra.mxu0 %v9467_v62  ;;  %v9489_v62 = vld [vmem:[#allocation12 + $0xac] ss:$16 sps:$4 sm:$0xff]  }
 0x215   :  { %2018 = vmatpush1.bf16.msra.mxu1 %v9469_v53  ;;  %1978 = vmatprep.subr.bf16.mxu0 %v9475_v4  ;;  %12811 = vst [vmem:[#allocation136_spill] sm:$0xff] %v9489_v62  ;;  %v9491_v53 = vld [vmem:[#allocation12 + $0xa0] ss:$16 sps:$4 sm:$0xff]   ;;  %v9511_v4 = vld [vmem:[#allocation12 + $0xec] ss:$16 sps:$4 sm:$0xff]  }
 0x216   :  { %2019 = vmatprep.subr.bf16.mxu1 %v9477_v45  ;;  %12812 = vst [vmem:[#allocation137_spill] sm:$0xff] %v9491_v53  ;;  %v9508_v45 = vld [vmem:[#allocation12 + $0xe4] ss:$16 sps:$4 sm:$0xff]   ;;  %12819 = vst [vmem:[#allocation144_spill] sm:$0xff] %v9511_v4 }
 0x217   :  { %12818 = vst [vmem:[#allocation143_spill] sm:$0xff] %v9508_v45 }
 0x218   :  { %1979 = vmatpush1.bf16.msra.mxu0 %v9479_v56  ;;  %v9502_v56 = vld [vmem:[#allocation12 + $0xc0] ss:$16 sps:$4 sm:$0xff]  }
 0x219   :  { %2020 = vmatpush1.bf16.msra.mxu1 %v9481_v52  ;;  %1980 = vmatprep.subr.bf16.mxu0 %v9487_v46  ;;  %12816 = vst [vmem:[#allocation141_spill] sm:$0xff] %v9502_v56  ;;  %v9506_v52 = vld [vmem:[#allocation12 + $0xc8] ss:$16 sps:$4 sm:$0xff]   ;;  %v9514_v46 = vld [vmem:[#allocation12 + $0xe0] ss:$16 sps:$4 sm:$0xff]  }
 0x21a   :  { %2021 = vmatprep.subr.bf16.mxu1 %v9489_v62  ;;  %12817 = vst [vmem:[#allocation142_spill] sm:$0xff] %v9506_v52  ;;  %12820 = vst [vmem:[#allocation145_spill] sm:$0xff] %v9514_v46 }
 0x21c   :  { %1981 = vmatpush1.bf16.msra.mxu0 %v9491_v53  ;;  %v9518_v53 = vld [vmem:[#allocation12 + $0xe8] ss:$16 sps:$4 sm:$0xff]  }
 0x21d   :  { %2022 = vmatpush1.bf16.msra.mxu1 %v9493_v57  ;;  %1982 = vmatprep.subr.bf16.mxu0 %v9495_v48  ;;  %12821 = vst [vmem:[#allocation146_spill] sm:$0xff] %v9518_v53  ;;  %v9523_v48 = vld [vmem:[#allocation8 + $0x4] ss:$16 sps:$4 sm:$0xff]  }
 0x21e   :  { %2023 = vmatprep.subr.bf16.mxu1 %v9497_v58  ;;  %12822 = vst [vmem:[#allocation147_spill] sm:$0xff] %v9523_v48  ;;  %v9526_v58 = vld [vmem:[#allocation8 + $0xc] ss:$16 sps:$4 sm:$0xff]  }
 0x21f   :  { %12823 = vst [vmem:[#allocation148_spill] sm:$0xff] %v9526_v58 }
 0x220   :  { %1983 = vmatpush1.bf16.msra.mxu0 %v9502_v56 }
 0x221   :  { %2024 = vmatpush1.bf16.msra.mxu1 %v9506_v52  ;;  %1984 = vmatprep.subr.bf16.mxu0 %v9508_v45  ;;  %v1453_v45 = vld [vmem:[%s12251_s6] sm:$0xf] }
 0x222   :  { %2025 = vmatprep.subr.bf16.mxu1 %v9511_v4  ;;  %v9533_v52 = vrot.slane %v1453_v45, %v9191_v1 }
 0x224   :  { %1985 = vmatpush1.bf16.msra.mxu0 %v9514_v46  ;;  %v9536_v46 = vrot.slane %v1453_v45, %v9196_v2 }
 0x225   :  { %2026 = vmatpush1.bf16.msra.mxu1 %v9518_v53  ;;  %2109 = vmatprep.subr.bf16.mxu0 %v9523_v48 }
 0x226   :  { %2150 = vmatprep.subr.bf16.mxu1 %v9526_v58 }
 0x2ba   :  { %v1405_v4 = vpop.f32.mrb[24].mxu0  ;;  %v1446_v56 = vpop.f32.mrb[24].mxu1 }
 0x2bb   :  { %v1406_v53 = vadd.f32 %v1405_v4, %v9367_v44  ;;  %v1447_v48 = vadd.f32 %v1446_v56, %v9371_v55  ;;  %v1407_v57 = vpop.f32.mrb[25].mxu0  ;;  %v1448_v62 = vpop.f32.mrb[25].mxu1  ;;  %v9545_v4 = vrot.slane %v1453_v45, %v9187_v61  ;;  %v9548_v56 = vrot.slane %v1453_v45, %v9189_v60 }
 0x2bc   :  { %v1408_v58 = vadd.f32 %v1407_v57, %v9369_v49  ;;  %v1449_v0 = vadd.f32 %v1448_v62, %v9373_v3  ;;  %v1409_v5 = vpop.f32.mrb[26].mxu0  ;;  %v1450_v59 = vpop.f32.mrb[26].mxu1 }
 0x2bd   :  { %v1475_v47 = vadd.f32 %v9533_v52, %v1406_v53  ;;  %v1410_v50 = vpop.f32.mrb[27].mxu0  ;;  %v1451_v54 = vpop.f32.mrb[27].mxu1  ;;  %v1477_v44 = vadd.f32 %v9545_v4, %v1447_v48 }
 0x2be   :  { %v1476_v43 = vadd.f32 %v9536_v46, %v1408_v58  ;;  %v1478_v59 = vadd.f32 %v9548_v56, %v1449_v0 }
 0x2bf   :  { %v6555_v2 = vmul.f32 -1.442695, %v1475_v47  ;;  %v6557_v5 = vmul.f32 -1.442695, %v1477_v44  ;;  %v9559_v44 = vld [vmem:[#allocation8] ss:$16 sps:$4 sm:$0xff]  }
 0x2c0   :  { %v6556_v1 = vmul.f32 -1.442695, %v1476_v43 }
 0x2c1   :  { %7638 = vpow2.f32 %v6555_v2 }
 0x2c2   :  { %7640 = vpow2.f32 %v6556_v1 }
 0x2c3   :  { %7642 = vtanh.f32 %v1478_v59  ;;  %v9562_v59 = vld [vmem:[#allocation8 + $0x8] ss:$16 sps:$4 sm:$0xff]  }
 0x2c4   :  { %7644 = vpow2.f32 %v6557_v5  ;;  %v9565_v5 = vld [vmem:[#allocation8 + $0x24] ss:$16 sps:$4 sm:$0xff]  }
 0x2cb   :  { %v7639_v53 = vpop.eup %7638 }
 0x2cc   :  { %v1488_v50 = vadd.f32 1.0, %v7639_v53  ;;  %v7641_v54 = vpop.eup %7640  ;;  %v9568_v53 = vld [vmem:[#allocation8 + $0x2c] ss:$16 sps:$4 sm:$0xff]  }
 0x2cd   :  { %v1489_v43 = vadd.f32 1.0, %v7641_v54  ;;  %v7643_v2 = vpop.eup %7642  ;;  %v9576_v54 = vld [vmem:[#allocation8 + $0x28] ss:$16 sps:$4 sm:$0xff]  }
 0x2ce   :  { %7646 = vrcp.f32 %v1488_v50  ;;  %v7645_v47 = vpop.eup %7644  ;;  %v9573_v50 = vld [vmem:[#allocation8 + $0x20] ss:$16 sps:$4 sm:$0xff]  }
 0x2cf   :  { %7648 = vrcp.f32 %v1489_v43  ;;  %v1490_v45 = vadd.f32 1.0, %v7645_v47  ;;  %v9579_v43 = vld [vmem:[#allocation8 + $0x44] ss:$16 sps:$4 sm:$0xff]   ;;  %v9585_v47 = vld [vmem:[#allocation8 + $0x40] ss:$16 sps:$4 sm:$0xff]  }
 0x2d1   :  { %7650 = vrcp.f32 %v1490_v45  ;;  %v9597_v45 = vld [vmem:[#allocation8 + $0x60] ss:$16 sps:$4 sm:$0xff]  }
 0x2d2   :  { %12825 = vst [vmem:[#allocation150_spill] sm:$0xff] %v9597_v45 }
 0x2d8   :  { %v7647_v58 = vpop.eup %7646 }
 0x2d9   :  { %v1499_v1 = vmul.f32 %v7647_v58, %v7643_v2  ;;  %v7649_v49 = vpop.eup %7648  ;;  %v9582_v2 = vld [vmem:[#allocation8 + $0x4c] ss:$16 sps:$4 sm:$0xff]   ;;  %v9588_v58 = vld [vmem:[#allocation8 + $0x48] ss:$16 sps:$4 sm:$0xff]  }
 0x2da   :  { %v1498_v55 = vmul.f32 0.0, %v7649_v49  ;;  %v9594_v49 = vld [vmem:[#allocation8 + $0x6c] ss:$16 sps:$4 sm:$0xff]  }
 0x2db   :  { %v7651_v0 = vpop.eup %7650  ;;  %12824 = vst [vmem:[#allocation149_spill] sm:$0xff] %v9594_v49 }
 0x2dc   :  { %v9552_v3 = vadd.f32 %v1499_v1, %v1498_v55  ;;  %v9591_v1 = vld [vmem:[#allocation8 + $0x64] ss:$16 sps:$4 sm:$0xff]   ;;  %v9600_v55 = vld [vmem:[#allocation8 + $0x68] ss:$16 sps:$4 sm:$0xff]  }
 0x2dd   :  { %12826 = vst [vmem:[#allocation151_spill] sm:$0xff] %v9600_v55 }
 0x2de   :  { %7652 = vtanh.f32 %v9552_v3 }
 0x2e8   :  { %v7653_v48 = vpop.eup %7652 }
 0x2e9   :  { %v1502_v62 = vmul.f32 %v7653_v48, %v7651_v0  ;;  %v9603_v0 = vld [vmem:[#allocation8 + $0x84] ss:$16 sps:$4 sm:$0xff]   ;;  %v9606_v48 = vld [vmem:[#allocation8 + $0x8c] ss:$16 sps:$4 sm:$0xff]  }
 0x2ea   :  { %12827 = vst [vmem:[#allocation152_spill] sm:$0xff] %v9603_v0  ;;  %12828 = vst [vmem:[#allocation153_spill] sm:$0xff] %v9606_v48 }
 0x2eb   :  { %v9555_v57 = vpack.c.bf16 %v1502_v62, %v1502_v62  ;;  %v9609_v62 = vld [vmem:[#allocation8 + $0x80] ss:$16 sps:$4 sm:$0xff]  }
 0x2ec   :  { %12829 = vst [vmem:[#allocation154_spill] sm:$0xff] %v9609_v62 }
 0x2ed   :  { %2003 = vmatmul.mubr.bf16.vlgmr.msra.gmra.mrb[32].mxu0 %v9555_v57  ;;  %2044 = vmatmul.mubr.bf16.vlgmr.msra.gmra.mrb[32].mxu1 %v9555_v57 }
 0x2ee   :  { %2110 = vmatpush1.bf16.msra.mxu0 %v9559_v44  ;;  %2151 = vmatpush1.bf16.msra.mxu1 %v9562_v59 }
 0x2ef   :  { %2111 = vmatprep.subr.bf16.mxu0 %v9565_v5  ;;  %2152 = vmatprep.subr.bf16.mxu1 %v9568_v53 }
 0x2f0   :  { %2141 = vmatprep.mubr.bf16.mxu0 %v12767_v63  ;;  %2182 = vmatprep.mubr.bf16.mxu1 %v12767_v63 }
 0x2f2   :  { %2112 = vmatpush1.bf16.msra.mxu0 %v9573_v50  ;;  %2153 = vmatpush1.bf16.msra.mxu1 %v9576_v54 }
 0x2f3   :  { %2113 = vmatprep.subr.bf16.mxu0 %v9579_v43  ;;  %2154 = vmatprep.subr.bf16.mxu1 %v9582_v2 }
 0x2f6   :  { %2114 = vmatpush1.bf16.msra.mxu0 %v9585_v47  ;;  %2155 = vmatpush1.bf16.msra.mxu1 %v9588_v58 }
 0x2f7   :  { %2115 = vmatprep.subr.bf16.mxu0 %v9591_v1  ;;  %2156 = vmatprep.subr.bf16.mxu1 %v9594_v49  ;;  %v9612_v49 = vld [vmem:[#allocation8 + $0x88] ss:$16 sps:$4 sm:$0xff]  }
 0x2f8   :  { %12830 = vst [vmem:[#allocation155_spill] sm:$0xff] %v9612_v49 }
 0x2fa   :  { %2116 = vmatpush1.bf16.msra.mxu0 %v9597_v45  ;;  %2157 = vmatpush1.bf16.msra.mxu1 %v9600_v55  ;;  %v9615_v45 = vld [vmem:[#allocation8 + $0xa4] ss:$16 sps:$4 sm:$0xff]   ;;  %v9618_v55 = vld [vmem:[#allocation8 + $0xac] ss:$16 sps:$4 sm:$0xff]  }
 0x2fb   :  { %2117 = vmatprep.subr.bf16.mxu0 %v9603_v0  ;;  %2158 = vmatprep.subr.bf16.mxu1 %v9606_v48  ;;  %12831 = vst [vmem:[#allocation156_spill] sm:$0xff] %v9615_v45  ;;  %12832 = vst [vmem:[#allocation157_spill] sm:$0xff] %v9618_v55  ;;  %v9621_v0 = vld [vmem:[#allocation8 + $0xa0] ss:$16 sps:$4 sm:$0xff]   ;;  %v9624_v48 = vld [vmem:[#allocation8 + $0xa8] ss:$16 sps:$4 sm:$0xff]  }
 0x2fc   :  { %12833 = vst [vmem:[#allocation158_spill] sm:$0xff] %v9621_v0  ;;  %12834 = vst [vmem:[#allocation159_spill] sm:$0xff] %v9624_v48 }
 0x2fe   :  { %2118 = vmatpush1.bf16.msra.mxu0 %v9609_v62  ;;  %2159 = vmatpush1.bf16.msra.mxu1 %v9612_v49  ;;  %v9627_v62 = vld [vmem:[#allocation8 + $0xc4] ss:$16 sps:$4 sm:$0xff]   ;;  %v9630_v49 = vld [vmem:[#allocation8 + $0xcc] ss:$16 sps:$4 sm:$0xff]  }
 0x2ff   :  { %2119 = vmatprep.subr.bf16.mxu0 %v9615_v45  ;;  %2160 = vmatprep.subr.bf16.mxu1 %v9618_v55  ;;  %12835 = vst [vmem:[#allocation160_spill] sm:$0xff] %v9627_v62  ;;  %12836 = vst [vmem:[#allocation161_spill] sm:$0xff] %v9630_v49  ;;  %v9633_v45 = vld [vmem:[#allocation8 + $0xc0] ss:$16 sps:$4 sm:$0xff]   ;;  %v9636_v55 = vld [vmem:[#allocation8 + $0xc8] ss:$16 sps:$4 sm:$0xff]  }
 0x302   :  { %2120 = vmatpush1.bf16.msra.mxu0 %v9621_v0  ;;  %2161 = vmatpush1.bf16.msra.mxu1 %v9624_v48  ;;  %v9639_v0 = vld [vmem:[#allocation8 + $0xe4] ss:$16 sps:$4 sm:$0xff]   ;;  %v9642_v48 = vld [vmem:[#allocation8 + $0xec] ss:$16 sps:$4 sm:$0xff]  }
 0x303   :  { %2121 = vmatprep.subr.bf16.mxu0 %v9627_v62  ;;  %2162 = vmatprep.subr.bf16.mxu1 %v9630_v49  ;;  %v9645_v62 = vld [vmem:[#allocation8 + $0xe0] ss:$16 sps:$4 sm:$0xff]   ;;  %v9648_v49 = vld [vmem:[#allocation8 + $0xe8] ss:$16 sps:$4 sm:$0xff]  }
 0x306   :  { %2122 = vmatpush1.bf16.msra.mxu0 %v9633_v45  ;;  %2163 = vmatpush1.bf16.msra.mxu1 %v9636_v55 }
 0x307   :  { %2123 = vmatprep.subr.bf16.mxu0 %v9639_v0  ;;  %2164 = vmatprep.subr.bf16.mxu1 %v9642_v48 }
 0x30a   :  { %2124 = vmatpush1.bf16.msra.mxu0 %v9645_v62  ;;  %2165 = vmatpush1.bf16.msra.mxu1 %v9648_v49 }
 0x30b   :  { %2220 = vmatprep.subr.bf16.mxu0 %v8991_v6  ;;  %2261 = vmatprep.subr.bf16.mxu1 %v8996_v8  ;;  %v9673_v6 = vpop.f32.mrb[28].mxu0 }
 0x30d   :  { %2142 = vmatmul.mubr.bf16.vlgmr.msra.gmra.mrb[36].mxu0 %v9323_v51  ;;  %2183 = vmatmul.mubr.bf16.vlgmr.msra.gmra.mrb[36].mxu1 %v9323_v51  ;;  %v9732_v51 = vld [vmem:[%s12254_s9] sm:$0xf] }
 0x30e   :  { %2221 = vmatpush1.bf16.msra.mxu0 %v8993_v7  ;;  %2262 = vmatpush1.bf16.msra.mxu1 %v8999_v9  ;;  %v9677_v7 = vpop.f32.mrb[29].mxu0 }
 0x30f   :  { %2222 = vmatprep.subr.bf16.mxu0 %v9002_v10  ;;  %2263 = vmatprep.subr.bf16.mxu1 %v9008_v12  ;;  %v1766_v8 = vpop.f32.mrb[30].mxu0  ;;  %v1803_v10 = vpop.f32.mrb[28].mxu1 }
 0x310   :  { %2252 = vmatprep.mubr.bf16.mxu0 %v12767_v63  ;;  %2293 = vmatprep.mubr.bf16.mxu1 %v12767_v63  ;;  %v1767_v9 = vpop.f32.mrb[31].mxu0 }
 0x312   :  { %2223 = vmatpush1.bf16.msra.mxu0 %v9005_v11  ;;  %2264 = vmatpush1.bf16.msra.mxu1 %v9011_v13  ;;  %v1805_v11 = vpop.f32.mrb[29].mxu1 }
 0x313   :  { %2224 = vmatprep.subr.bf16.mxu0 %v9014_v14  ;;  %2265 = vmatprep.subr.bf16.mxu1 %v9020_v16  ;;  %v1807_v12 = vpop.f32.mrb[30].mxu1  ;;  %v12837_v14 = vld [vmem:[#allocation25_spill] sm:$0xff]  ;;  %v12839_v16 = vld [vmem:[#allocation27_spill] sm:$0xff] }
 0x314   :  { %v1808_v13 = vpop.f32.mrb[31].mxu1 }
 0x315   :  { %v12868_v13 = vld [vmem:[#allocation53_spill] sm:$0xff] }
 0x316   :  { %2225 = vmatpush1.bf16.msra.mxu0 %v9017_v15  ;;  %2266 = vmatpush1.bf16.msra.mxu1 %v9023_v17  ;;  %v12838_v15 = vld [vmem:[#allocation26_spill] sm:$0xff]  ;;  %v12840_v17 = vld [vmem:[#allocation28_spill] sm:$0xff] }
 0x317   :  { %2226 = vmatprep.subr.bf16.mxu0 %v9026_v18  ;;  %2267 = vmatprep.subr.bf16.mxu1 %v9032_v20  ;;  %v12841_v18 = vld [vmem:[#allocation29_spill] sm:$0xff]  ;;  %v12843_v20 = vld [vmem:[#allocation31_spill] sm:$0xff] }
 0x31a   :  { %2227 = vmatpush1.bf16.msra.mxu0 %v9029_v19  ;;  %2268 = vmatpush1.bf16.msra.mxu1 %v9035_v21  ;;  %v12842_v19 = vld [vmem:[#allocation30_spill] sm:$0xff]  ;;  %v12844_v21 = vld [vmem:[#allocation32_spill] sm:$0xff] }
 0x31b   :  { %2228 = vmatprep.subr.bf16.mxu0 %v9039_v22  ;;  %2269 = vmatprep.subr.bf16.mxu1 %v9044_v24  ;;  %v12845_v22 = vld [vmem:[#allocation33_spill] sm:$0xff]  ;;  %v12847_v24 = vld [vmem:[#allocation35_spill] sm:$0xff] }
 0x31e   :  { %2229 = vmatpush1.bf16.msra.mxu0 %v9041_v23  ;;  %2270 = vmatpush1.bf16.msra.mxu1 %v9047_v25  ;;  %v12846_v23 = vld [vmem:[#allocation34_spill] sm:$0xff]  ;;  %v12848_v25 = vld [vmem:[#allocation36_spill] sm:$0xff] }
 0x31f   :  { %2230 = vmatprep.subr.bf16.mxu0 %v9050_v26  ;;  %2271 = vmatprep.subr.bf16.mxu1 %v9056_v28  ;;  %v12849_v26 = vld [vmem:[#allocation37_spill] sm:$0xff]  ;;  %v12851_v28 = vld [vmem:[#allocation39_spill] sm:$0xff] }
 0x322   :  { %2231 = vmatpush1.bf16.msra.mxu0 %v9053_v27  ;;  %2272 = vmatpush1.bf16.msra.mxu1 %v9059_v29  ;;  %v12850_v27 = vld [vmem:[#allocation38_spill] sm:$0xff]  ;;  %v12852_v29 = vld [vmem:[#allocation40_spill] sm:$0xff] }
 0x323   :  { %2232 = vmatprep.subr.bf16.mxu0 %v9062_v30  ;;  %2273 = vmatprep.subr.bf16.mxu1 %v9068_v32  ;;  %v12853_v30 = vld [vmem:[#allocation41_spill] sm:$0xff]  ;;  %v12855_v32 = vld [vmem:[#allocation43_spill] sm:$0xff] }
 0x326   :  { %2233 = vmatpush1.bf16.msra.mxu0 %v9065_v31  ;;  %2274 = vmatpush1.bf16.msra.mxu1 %v9071_v33  ;;  %v12854_v31 = vld [vmem:[#allocation42_spill] sm:$0xff]  ;;  %v12856_v33 = vld [vmem:[#allocation44_spill] sm:$0xff] }
 0x327   :  { %2234 = vmatprep.subr.bf16.mxu0 %v9074_v34  ;;  %2275 = vmatprep.subr.bf16.mxu1 %v9080_v36  ;;  %v12857_v34 = vld [vmem:[#allocation45_spill] sm:$0xff]  ;;  %v12859_v36 = vld [vmem:[#allocation47_spill] sm:$0xff] }
 0x32a   :  { %2235 = vmatpush1.bf16.msra.mxu0 %v9077_v35  ;;  %2276 = vmatpush1.bf16.msra.mxu1 %v9083_v37  ;;  %v12858_v35 = vld [vmem:[#allocation46_spill] sm:$0xff]  ;;  %v12860_v37 = vld [vmem:[#allocation48_spill] sm:$0xff] }
 0x32b   :  { %2302 = vmatprep.subr.bf16.mxu0 %v9088_v38  ;;  %2343 = vmatprep.subr.bf16.mxu1 %v9090_v39  ;;  %v12861_v38 = vld [vmem:[#allocation49_spill] sm:$0xff]  ;;  %v12862_v39 = vld [vmem:[#allocation50_spill] sm:$0xff] }
 0x32d   :  { %2253 = vmatmul.mubr.bf16.vlgmr.msra.gmra.mrb[40].mxu0 %v9555_v57  ;;  %2294 = vmatmul.mubr.bf16.vlgmr.msra.gmra.mrb[40].mxu1 %v9555_v57  ;;  %v12866_v57 = vld [vmem:[#allocation52_spill] sm:$0xff] }
 0x32e   :  { %2303 = vmatpush1.bf16.msra.mxu0 %v9092_v40  ;;  %2344 = vmatpush1.bf16.msra.mxu1 %v9094_v41  ;;  %v12863_v40 = vld [vmem:[#allocation51_spill] sm:$0xff]  ;;  %v12864_v41 = vld [vmem:[#allocation60_spill] sm:$0xff]  ;;  %v9736_v8 = vrot.slane %v9732_v51, %v12866_v57 }
 0x32f   :  { %2304 = vmatprep.subr.bf16.mxu0 %v9102_v42  ;;  %2345 = vmatprep.subr.bf16.mxu1 %v12837_v14  ;;  %v12865_v42 = vld [vmem:[#allocation63_spill] sm:$0xff]  ;;  %v9740_v14 = vrot.slane %v9732_v51, %v12868_v13  ;;  %v12873_v57 = vld [vmem:[#allocation56_spill] sm:$0xff] }
 0x330   :  { %2334 = vmatprep.mubr.bf16.mxu0 %v12767_v63  ;;  %2375 = vmatprep.mubr.bf16.mxu1 %v12767_v63  ;;  %12867 = vst [vmem:[#allocation25_spill] sm:$0xff] %v9736_v8 }
 0x331   :  { %12869 = vst [vmem:[#allocation26_spill] sm:$0xff] %v9740_v14 }
 0x332   :  { %2305 = vmatpush1.bf16.msra.mxu0 %v12838_v15  ;;  %2346 = vmatpush1.bf16.msra.mxu1 %v12839_v16 }
 0x333   :  { %2306 = vmatprep.subr.bf16.mxu0 %v12840_v17  ;;  %2347 = vmatprep.subr.bf16.mxu1 %v12841_v18 }
 0x336   :  { %2307 = vmatpush1.bf16.msra.mxu0 %v12842_v19  ;;  %2348 = vmatpush1.bf16.msra.mxu1 %v12843_v20 }
 0x337   :  { %2308 = vmatprep.subr.bf16.mxu0 %v12844_v21  ;;  %2349 = vmatprep.subr.bf16.mxu1 %v12845_v22 }
 0x33a   :  { %2309 = vmatpush1.bf16.msra.mxu0 %v12846_v23  ;;  %2350 = vmatpush1.bf16.msra.mxu1 %v12847_v24 }
 0x33b   :  { %2310 = vmatprep.subr.bf16.mxu0 %v12848_v25  ;;  %2351 = vmatprep.subr.bf16.mxu1 %v12849_v26 }
 0x33e   :  { %2311 = vmatpush1.bf16.msra.mxu0 %v12850_v27  ;;  %2352 = vmatpush1.bf16.msra.mxu1 %v12851_v28 }
 0x33f   :  { %2312 = vmatprep.subr.bf16.mxu0 %v12852_v29  ;;  %2353 = vmatprep.subr.bf16.mxu1 %v12853_v30 }
 0x342   :  { %2313 = vmatpush1.bf16.msra.mxu0 %v12854_v31  ;;  %2354 = vmatpush1.bf16.msra.mxu1 %v12855_v32 }
 0x343   :  { %2314 = vmatprep.subr.bf16.mxu0 %v12856_v33  ;;  %2355 = vmatprep.subr.bf16.mxu1 %v12857_v34 }
 0x346   :  { %2315 = vmatpush1.bf16.msra.mxu0 %v12858_v35  ;;  %2356 = vmatpush1.bf16.msra.mxu1 %v12859_v36 }
 0x347   :  { %2316 = vmatprep.subr.bf16.mxu0 %v12860_v37  ;;  %2357 = vmatprep.subr.bf16.mxu1 %v12861_v38  ;;  %v12871_v38 = vld [vmem:[#allocation54_spill] sm:$0xff] }
 0x34a   :  { %2317 = vmatpush1.bf16.msra.mxu0 %v12862_v39  ;;  %2358 = vmatpush1.bf16.msra.mxu1 %v12863_v40 }
 0x34b   :  { %2414 = vmatprep.subr.bf16.mxu0 %v12864_v41  ;;  %2455 = vmatprep.subr.bf16.mxu1 %v12865_v42 }
 0x3c0   :  { %v2004_v9 = vpop.f32.mrb[32].mxu0  ;;  %v2045_v12 = vpop.f32.mrb[32].mxu1 }
 0x3c1   :  { %v2005_v15 = vadd.f32 %v2004_v9, %v9673_v6  ;;  %v9743_v16 = vadd.f32 %v2045_v12, %v1803_v10  ;;  %v2006_v17 = vpop.f32.mrb[33].mxu0  ;;  %v2047_v18 = vpop.f32.mrb[33].mxu1  ;;  %v9750_v6 = vrot.slane %v9732_v51, %v9189_v60  ;;  %v12872_v60 = vld [vmem:[#allocation55_spill] sm:$0xff]  ;;  %v12874_v12 = vld [vmem:[#allocation57_spill] sm:$0xff] }
 0x3c2   :  { %v2007_v19 = vadd.f32 %v2006_v17, %v9677_v7  ;;  %v2048_v20 = vadd.f32 %v2047_v18, %v1805_v11  ;;  %v2008_v21 = vpop.f32.mrb[34].mxu0  ;;  %v2049_v22 = vpop.f32.mrb[34].mxu1 }
 0x3c3   :  { %v2074_v23 = vadd.f32 %v9736_v8, %v2005_v15  ;;  %v2009_v24 = vpop.f32.mrb[35].mxu0  ;;  %v2050_v25 = vpop.f32.mrb[35].mxu1  ;;  %12870 = vst [vmem:[#allocation27_spill] sm:$0xff] %v9750_v6 }
 0x3c4   :  { %v2075_v26 = vadd.f32 %v9740_v14, %v2007_v19  ;;  %v2077_v10 = vadd.f32 %v9750_v6, %v2048_v20 }
 0x3c5   :  { %v6622_v27 = vmul.f32 -1.442695, %v2074_v23 }
 0x3c6   :  { %v6623_v28 = vmul.f32 -1.442695, %v2075_v26 }
 0x3c7   :  { %7654 = vpow2.f32 %v6622_v27 }
 0x3c8   :  { %7656 = vpow2.f32 %v6623_v28 }
 0x3c9   :  { %7658 = vtanh.f32 %v2077_v10 }
 0x3d1   :  { %v7655_v7 = vpop.eup %7654 }
 0x3d2   :  { %v2087_v11 = vadd.f32 1.0, %v7655_v7  ;;  %v7657_v29 = vpop.eup %7656 }
 0x3d3   :  { %v2088_v30 = vadd.f32 1.0, %v7657_v29  ;;  %v7659_v31 = vpop.eup %7658 }
 0x3d4   :  { %7660 = vrcp.f32 %v2087_v11 }
 0x3d5   :  { %7662 = vrcp.f32 %v2088_v30 }
 0x3de   :  { %v7661_v32 = vpop.eup %7660 }
 0x3df   :  { %v2098_v33 = vmul.f32 %v7661_v32, %v7659_v31  ;;  %v7663_v34 = vpop.eup %7662  ;;  %v12875_v31 = vld [vmem:[#allocation84_spill] sm:$0xff] }
 0x3e0   :  { %v2143_v35 = vpop.f32.mrb[36].mxu0  ;;  %v2184_v36 = vpop.f32.mrb[36].mxu1  ;;  %v2097_v37 = vmul.f32 0.0, %v7663_v34 }
 0x3e1   :  { %v2191_v39 = vadd.f32 %v2143_v35, %v12871_v38  ;;  %v2193_v40 = vadd.f32 %v2184_v36, %v12872_v60  ;;  %v2145_v41 = vpop.f32.mrb[37].mxu0  ;;  %v2186_v42 = vpop.f32.mrb[37].mxu1 }
 0x3e2   :  { %v2192_v9 = vadd.f32 %v2145_v41, %v12873_v57  ;;  %v2194_v13 = vadd.f32 %v2186_v42, %v12874_v12  ;;  %v2147_v15 = vpop.f32.mrb[38].mxu0  ;;  %v2188_v17 = vpop.f32.mrb[38].mxu1  ;;  %v9757_v18 = vadd.f32 %v2098_v33, %v2097_v37  ;;  %v9773_v41 = vrot.slane %v9732_v51, %v9187_v61  ;;  %v12878_v61 = vld [vmem:[#allocation87_spill] sm:$0xff]  ;;  %v12879_v51 = vld [vmem:[#allocation88_spill] sm:$0xff] }
 0x3e3   :  { %v6625_v19 = vmul.f32 -1.442695, %v2191_v39  ;;  %v2148_v20 = vpop.f32.mrb[39].mxu0  ;;  %v2189_v21 = vpop.f32.mrb[39].mxu1  ;;  %v6627_v23 = vmul.f32 -1.442695, %v2193_v40 }
 0x3e4   :  { %v6626_v22 = vmul.f32 -1.442695, %v2192_v9  ;;  %v2076_v42 = vadd.f32 %v9773_v41, %v9743_v16  ;;  %v12876_v17 = vld [vmem:[#allocation85_spill] sm:$0xff]  ;;  %v12881_v20 = vld [vmem:[#allocation90_spill] sm:$0xff]  ;;  %v12882_v21 = vld [vmem:[#allocation91_spill] sm:$0xff] }
 0x3e5   :  { %7664 = vpow2.f32 %v6625_v19  ;;  %v12877_v19 = vld [vmem:[#allocation86_spill] sm:$0xff]  ;;  %v12880_v16 = vld [vmem:[#allocation89_spill] sm:$0xff] }
 0x3e6   :  { %7666 = vpow2.f32 %v6626_v22  ;;  %v6624_v9 = vmul.f32 -1.442695, %v2076_v42  ;;  %v12883_v22 = vld [vmem:[#allocation92_spill] sm:$0xff]  ;;  %v12899_v42 = vld [vmem:[#allocation109_spill] sm:$0xff] }
 0x3e7   :  { %7668 = vtanh.f32 %v2194_v13 }
 0x3e8   :  { %7670 = vpow2.f32 %v6627_v23 }
 0x3ef   :  { %v7665_v24 = vpop.eup %7664 }
 0x3f0   :  { %v2204_v25 = vadd.f32 1.0, %v7665_v24  ;;  %v7667_v26 = vpop.eup %7666  ;;  %v12884_v24 = vld [vmem:[#allocation93_spill] sm:$0xff] }
 0x3f1   :  { %v2205_v27 = vadd.f32 1.0, %v7667_v26  ;;  %v7669_v28 = vpop.eup %7668  ;;  %v12886_v26 = vld [vmem:[#allocation95_spill] sm:$0xff] }
 0x3f2   :  { %7672 = vrcp.f32 %v2204_v25  ;;  %v7671_v10 = vpop.eup %7670  ;;  %v12885_v25 = vld [vmem:[#allocation94_spill] sm:$0xff] }
 0x3f3   :  { %7674 = vrcp.f32 %v2205_v27  ;;  %v2206_v30 = vadd.f32 1.0, %v7671_v10  ;;  %v12887_v27 = vld [vmem:[#allocation96_spill] sm:$0xff]  ;;  %v12888_v10 = vld [vmem:[#allocation97_spill] sm:$0xff] }
 0x3f5   :  { %7676 = vrcp.f32 %v2206_v30  ;;  %v12892_v30 = vld [vmem:[#allocation100_spill] sm:$0xff] }
 0x3fc   :  { %v7673_v7 = vpop.eup %7672 }
 0x3fd   :  { %v2215_v11 = vmul.f32 %v7673_v7, %v7669_v28  ;;  %v7675_v29 = vpop.eup %7674  ;;  %v12889_v7 = vld [vmem:[#allocation98_spill] sm:$0xff] }
 0x3fe   :  { %v2214_v32 = vmul.f32 %v7675_v29, %v12875_v31  ;;  %v12891_v29 = vld [vmem:[#allocation101_spill] sm:$0xff]  ;;  %v12893_v31 = vld [vmem:[#allocation102_spill] sm:$0xff] }
 0x3ff   :  { %v7677_v57 = vpop.eup %7676 }
 0x400   :  { %v9760_v33 = vpop.f32.mrb[40].mxu0  ;;  %v9762_v34 = vpop.f32.mrb[40].mxu1  ;;  %v9768_v37 = vadd.f32 %v2215_v11, %v2214_v32  ;;  %v12890_v11 = vld [vmem:[#allocation99_spill] sm:$0xff] }
 0x401   :  { %v9764_v35 = vpop.f32.mrb[41].mxu0  ;;  %v9766_v36 = vpop.f32.mrb[41].mxu1  ;;  %v12894_v32 = vld [vmem:[#allocation103_spill] sm:$0xff] }
 0x402   :  { %v2258_v38 = vpop.f32.mrb[42].mxu0  ;;  %v2299_v39 = vpop.f32.mrb[42].mxu1  ;;  %7678 = vtanh.f32 %v9768_v37 }
 0x403   :  { %v2259_v60 = vpop.f32.mrb[43].mxu0  ;;  %v2300_v40 = vpop.f32.mrb[43].mxu1  ;;  %7680 = vpow2.f32 %v6624_v9  ;;  %v12895_v38 = vld [vmem:[#allocation105_spill] sm:$0xff]  ;;  %v12896_v39 = vld [vmem:[#allocation104_spill] sm:$0xff] }
 0x404   :  { %7682 = vtanh.f32 %v9757_v18  ;;  %v12897_v60 = vld [vmem:[#allocation106_spill] sm:$0xff]  ;;  %v12898_v40 = vld [vmem:[#allocation107_spill] sm:$0xff] }
 0x40c   :  { %v7679_v12 = vpop.eup %7678 }
 0x40d   :  { %v2218_v13 = vmul.f32 %v7679_v12, %v7677_v57  ;;  %v7681_v23 = vpop.eup %7680  ;;  %v12900_v12 = vld [vmem:[#allocation108_spill] sm:$0xff] }
 0x40e   :  { %v2089_v28 = vadd.f32 1.0, %v7681_v23  ;;  %v7683_v57 = vpop.eup %7682  ;;  %v12908_v23 = vld [vmem:[#allocation117_spill] sm:$0xff] }
 0x40f   :  { %v9777_v15 = vpack.c.bf16 %v2218_v13, %v2218_v13  ;;  %v12901_v13 = vld [vmem:[#allocation110_spill] sm:$0xff] }
 0x410   :  { %7684 = vrcp.f32 %v2089_v28  ;;  %v12913_v28 = vld [vmem:[#allocation122_spill] sm:$0xff] }
 0x411   :  { %2335 = vmatmul.mubr.bf16.vlgmr.msra.gmra.mrb[44].mxu0 %v9777_v15  ;;  %2376 = vmatmul.mubr.bf16.vlgmr.msra.gmra.mrb[44].mxu1 %v9777_v15 }
 0x412   :  { %2415 = vmatpush1.bf16.msra.mxu0 %v12876_v17  ;;  %2456 = vmatpush1.bf16.msra.mxu1 %v12877_v19  ;;  %v12902_v17 = vld [vmem:[#allocation111_spill] sm:$0xff]  ;;  %v12903_v19 = vld [vmem:[#allocation113_spill] sm:$0xff] }
 0x413   :  { %2416 = vmatprep.subr.bf16.mxu0 %v12878_v61  ;;  %2457 = vmatprep.subr.bf16.mxu1 %v12879_v51  ;;  %v12904_v51 = vld [vmem:[#allocation112_spill] sm:$0xff] }
 0x414   :  { %2446 = vmatprep.mubr.bf16.mxu0 %v12767_v63  ;;  %2487 = vmatprep.mubr.bf16.mxu1 %v12767_v63 }
 0x416   :  { %2417 = vmatpush1.bf16.msra.mxu0 %v12880_v16  ;;  %2458 = vmatpush1.bf16.msra.mxu1 %v12881_v20  ;;  %v12905_v16 = vld [vmem:[#allocation114_spill] sm:$0xff] }
 0x417   :  { %2418 = vmatprep.subr.bf16.mxu0 %v12882_v21  ;;  %2459 = vmatprep.subr.bf16.mxu1 %v12883_v22  ;;  %v12906_v21 = vld [vmem:[#allocation115_spill] sm:$0xff]  ;;  %v12907_v22 = vld [vmem:[#allocation116_spill] sm:$0xff] }
 0x41a   :  { %2419 = vmatpush1.bf16.msra.mxu0 %v12884_v24  ;;  %2460 = vmatpush1.bf16.msra.mxu1 %v12885_v25  ;;  %v7685_v9 = vpop.eup %7684  ;;  %v12909_v24 = vld [vmem:[#allocation118_spill] sm:$0xff]  ;;  %v12910_v25 = vld [vmem:[#allocation119_spill] sm:$0xff] }
 0x41b   :  { %2420 = vmatprep.subr.bf16.mxu0 %v12886_v26  ;;  %2461 = vmatprep.subr.bf16.mxu1 %v12887_v27  ;;  %v2101_v61 = vmul.f32 %v7685_v9, %v7683_v57  ;;  %v12911_v26 = vld [vmem:[#allocation120_spill] sm:$0xff]  ;;  %v12912_v27 = vld [vmem:[#allocation121_spill] sm:$0xff]  ;;  %v12926_v57 = vld [vmem:[#allocation135_spill] sm:$0xff] }
 0x41c   :  { %v12927_v9 = vld [vmem:[#allocation136_spill] sm:$0xff] }
 0x41d   :  { %v2413_v20 = vpack.c.bf16 %v2101_v61, %v2101_v61  ;;  %v12932_v61 = vld [vmem:[#allocation141_spill] sm:$0xff] }
 0x41e   :  { %2421 = vmatpush1.bf16.msra.mxu0 %v12888_v10  ;;  %2462 = vmatpush1.bf16.msra.mxu1 %v12889_v7  ;;  %v12914_v10 = vld [vmem:[#allocation123_spill] sm:$0xff]  ;;  %v12915_v7 = vld [vmem:[#allocation124_spill] sm:$0xff] }
 0x41f   :  { %2422 = vmatprep.subr.bf16.mxu0 %v12890_v11  ;;  %2463 = vmatprep.subr.bf16.mxu1 %v12891_v29  ;;  %v12916_v11 = vld [vmem:[#allocation125_spill] sm:$0xff]  ;;  %v12917_v29 = vld [vmem:[#allocation126_spill] sm:$0xff] }
 0x422   :  { %2423 = vmatpush1.bf16.msra.mxu0 %v12892_v30  ;;  %2464 = vmatpush1.bf16.msra.mxu1 %v12893_v31  ;;  %v12918_v30 = vld [vmem:[#allocation127_spill] sm:$0xff]  ;;  %v12919_v31 = vld [vmem:[#allocation128_spill] sm:$0xff] }
 0x423   :  { %2424 = vmatprep.subr.bf16.mxu0 %v12894_v32  ;;  %2465 = vmatprep.subr.bf16.mxu1 %v12895_v38  ;;  %v12920_v32 = vld [vmem:[#allocation129_spill] sm:$0xff]  ;;  %v12921_v38 = vld [vmem:[#allocation130_spill] sm:$0xff] }
 0x426   :  { %2425 = vmatpush1.bf16.msra.mxu0 %v12896_v39  ;;  %2466 = vmatpush1.bf16.msra.mxu1 %v12897_v60  ;;  %v12922_v39 = vld [vmem:[#allocation131_spill] sm:$0xff]  ;;  %v12923_v60 = vld [vmem:[#allocation132_spill] sm:$0xff] }
 0x427   :  { %2426 = vmatprep.subr.bf16.mxu0 %v12898_v40  ;;  %2467 = vmatprep.subr.bf16.mxu1 %v12899_v42  ;;  %v12924_v40 = vld [vmem:[#allocation133_spill] sm:$0xff]  ;;  %v12925_v42 = vld [vmem:[#allocation134_spill] sm:$0xff] }
 0x42a   :  { %2427 = vmatpush1.bf16.msra.mxu0 %v12900_v12  ;;  %2468 = vmatpush1.bf16.msra.mxu1 %v12901_v13  ;;  %v12928_v12 = vld [vmem:[#allocation137_spill] sm:$0xff]  ;;  %v12929_v13 = vld [vmem:[#allocation138_spill] sm:$0xff] }
 0x42b   :  { %2428 = vmatprep.subr.bf16.mxu0 %v12902_v17  ;;  %2469 = vmatprep.subr.bf16.mxu1 %v12903_v19  ;;  %v12930_v17 = vld [vmem:[#allocation139_spill] sm:$0xff]  ;;  %v12931_v19 = vld [vmem:[#allocation140_spill] sm:$0xff] }
 0x42e   :  { %2429 = vmatpush1.bf16.msra.mxu0 %v12904_v51  ;;  %2470 = vmatpush1.bf16.msra.mxu1 %v12905_v16  ;;  %v12933_v51 = vld [vmem:[#allocation142_spill] sm:$0xff]  ;;  %v12934_v16 = vld [vmem:[#allocation143_spill] sm:$0xff] }
 0x42f   :  { %2496 = vmatprep.subr.bf16.mxu0 %v12906_v21  ;;  %2537 = vmatprep.subr.bf16.mxu1 %v12907_v22  ;;  %v12936_v21 = vld [vmem:[#allocation145_spill] sm:$0xff]  ;;  %v12937_v22 = vld [vmem:[#allocation146_spill] sm:$0xff] }
 0x431   :  { %2447 = vmatmul.mubr.bf16.vlgmr.msra.gmra.mrb[48].mxu0 %v2413_v20  ;;  %2488 = vmatmul.mubr.bf16.vlgmr.msra.gmra.mrb[48].mxu1 %v2413_v20  ;;  %v12935_v20 = vld [vmem:[#allocation144_spill] sm:$0xff] }
 0x432   :  { %2497 = vmatpush1.bf16.msra.mxu0 %v12908_v23  ;;  %2538 = vmatpush1.bf16.msra.mxu1 %v12909_v24  ;;  %v12938_v23 = vld [vmem:[#allocation147_spill] sm:$0xff]  ;;  %v12939_v24 = vld [vmem:[#allocation148_spill] sm:$0xff] }
 0x433   :  { %2498 = vmatprep.subr.bf16.mxu0 %v12910_v25  ;;  %2539 = vmatprep.subr.bf16.mxu1 %v12911_v26 }
 0x434   :  { %2528 = vmatprep.mubr.bf16.mxu0 %v12767_v63  ;;  %2569 = vmatprep.mubr.bf16.mxu1 %v12767_v63 }
 0x436   :  { %2499 = vmatpush1.bf16.msra.mxu0 %v12912_v27  ;;  %2540 = vmatpush1.bf16.msra.mxu1 %v12913_v28 }
 0x437   :  { %2500 = vmatprep.subr.bf16.mxu0 %v12914_v10  ;;  %2541 = vmatprep.subr.bf16.mxu1 %v12915_v7 }
 0x43a   :  { %2501 = vmatpush1.bf16.msra.mxu0 %v12916_v11  ;;  %2542 = vmatpush1.bf16.msra.mxu1 %v12917_v29 }
 0x43b   :  { %2502 = vmatprep.subr.bf16.mxu0 %v12918_v30  ;;  %2543 = vmatprep.subr.bf16.mxu1 %v12919_v31 }
 0x43e   :  { %2503 = vmatpush1.bf16.msra.mxu0 %v12920_v32  ;;  %2544 = vmatpush1.bf16.msra.mxu1 %v12921_v38 }
 0x43f   :  { %2504 = vmatprep.subr.bf16.mxu0 %v12922_v39  ;;  %2545 = vmatprep.subr.bf16.mxu1 %v12923_v60 }
 0x442   :  { %2505 = vmatpush1.bf16.msra.mxu0 %v12924_v40  ;;  %2546 = vmatpush1.bf16.msra.mxu1 %v12925_v42 }
 0x443   :  { %2506 = vmatprep.subr.bf16.mxu0 %v12926_v57  ;;  %2547 = vmatprep.subr.bf16.mxu1 %v12927_v9 }
 0x446   :  { %2507 = vmatpush1.bf16.msra.mxu0 %v12928_v12  ;;  %2548 = vmatpush1.bf16.msra.mxu1 %v12929_v13 }
 0x447   :  { %2508 = vmatprep.subr.bf16.mxu0 %v12930_v17  ;;  %2549 = vmatprep.subr.bf16.mxu1 %v12931_v19 }
 0x44a   :  { %2509 = vmatpush1.bf16.msra.mxu0 %v12932_v61  ;;  %2550 = vmatpush1.bf16.msra.mxu1 %v12933_v51 }
 0x44b   :  { %2510 = vmatprep.subr.bf16.mxu0 %v12934_v16  ;;  %2551 = vmatprep.subr.bf16.mxu1 %v12935_v20 }
 0x44e   :  { %2511 = vmatpush1.bf16.msra.mxu0 %v12936_v21  ;;  %2552 = vmatpush1.bf16.msra.mxu1 %v12937_v22 }
 0x44f   :  { %2613 = vmatprep.subr.bf16.mxu0 %v12938_v23  ;;  %2654 = vmatprep.subr.bf16.mxu1 %v12939_v24 }
 0x4e4   :  { %v2336_v25 = vpop.f32.mrb[44].mxu0  ;;  %v2377_v26 = vpop.f32.mrb[44].mxu1 }
 0x4e5   :  { %v2337_v27 = vadd.f32 %v2336_v25, %v9760_v33  ;;  %v2378_v28 = vadd.f32 %v2377_v26, %v9762_v34  ;;  %v2338_v10 = vpop.f32.mrb[45].mxu0  ;;  %v2379_v7 = vpop.f32.mrb[45].mxu1 }
 0x4e6   :  { %v2339_v11 = vadd.f32 %v2338_v10, %v9764_v35  ;;  %v2380_v29 = vadd.f32 %v2379_v7, %v9766_v36  ;;  %v2340_v30 = vpop.f32.mrb[46].mxu0  ;;  %v2381_v31 = vpop.f32.mrb[46].mxu1 }
 0x4e7   :  { %v2384_v32 = vadd.f32 %v2337_v27, %v9533_v52  ;;  %v2341_v38 = vpop.f32.mrb[47].mxu0  ;;  %v2382_v39 = vpop.f32.mrb[47].mxu1  ;;  %v2386_v33 = vadd.f32 %v2378_v28, %v9545_v4  ;;  %v12952_v31 = vld [vmem:[#allocation161_spill] sm:$0xff] }
 0x4e8   :  { %v2385_v60 = vadd.f32 %v2339_v11, %v9536_v46  ;;  %v2387_v34 = vadd.f32 %v2380_v29, %v9548_v56  ;;  %v9909_v38 = vld [vmem:[#allocation11 + $0xc] ss:$16 sps:$4 sm:$0xff]  }
 0x4e9   :  { %v6628_v40 = vmul.f32 -1.442695, %v2384_v32  ;;  %v6630_v57 = vmul.f32 -1.442695, %v2386_v33  ;;  %v9906_v32 = vld [vmem:[#allocation11 + $0x4] ss:$16 sps:$4 sm:$0xff]  }
 0x4ea   :  { %v6629_v42 = vmul.f32 -1.442695, %v2385_v60  ;;  %v9937_v39 = vld [vmem:[#allocation11 + $0x4c] ss:$16 sps:$4 sm:$0xff]   ;;  %v9940_v60 = vld [vmem:[#allocation11 + $0x40] ss:$16 sps:$4 sm:$0xff]  }
 0x4eb   :  { %7686 = vpow2.f32 %v6628_v40  ;;  %v9943_v40 = vld [vmem:[#allocation11 + $0x48] ss:$16 sps:$4 sm:$0xff]   ;;  %v9949_v33 = vld [vmem:[#allocation11 + $0x6c] ss:$16 sps:$4 sm:$0xff]  }
 0x4ec   :  { %7688 = vpow2.f32 %v6629_v42  ;;  %v9946_v42 = vld [vmem:[#allocation11 + $0x64] ss:$16 sps:$4 sm:$0xff]  }
 0x4ed   :  { %7690 = vtanh.f32 %v2387_v34  ;;  %v9952_v34 = vld [vmem:[#allocation11 + $0x60] ss:$16 sps:$4 sm:$0xff]  }
 0x4ee   :  { %7692 = vpow2.f32 %v6630_v57  ;;  %v9955_v57 = vld [vmem:[#allocation11 + $0x68] ss:$16 sps:$4 sm:$0xff]  }
 0x4f5   :  { %v7687_v35 = vpop.eup %7686 }
 0x4f6   :  { %v2397_v9 = vadd.f32 1.0, %v7687_v35  ;;  %v7689_v36 = vpop.eup %7688  ;;  %v9958_v35 = vld [vmem:[#allocation11 + $0x84] ss:$16 sps:$4 sm:$0xff]  }
 0x4f7   :  { %v2398_v12 = vadd.f32 1.0, %v7689_v36  ;;  %v7691_v13 = vpop.eup %7690  ;;  %v9964_v36 = vld [vmem:[#allocation11 + $0x80] ss:$16 sps:$4 sm:$0xff]  }
 0x4f8   :  { %7694 = vrcp.f32 %v2397_v9  ;;  %v7693_v17 = vpop.eup %7692  ;;  %v9961_v9 = vld [vmem:[#allocation11 + $0x8c] ss:$16 sps:$4 sm:$0xff]  }
 0x4f9   :  { %7696 = vrcp.f32 %v2398_v12  ;;  %v2399_v16 = vadd.f32 1.0, %v7693_v17  ;;  %v9967_v12 = vld [vmem:[#allocation11 + $0x88] ss:$16 sps:$4 sm:$0xff]   ;;  %v9973_v17 = vld [vmem:[#allocation11 + $0xac] ss:$16 sps:$4 sm:$0xff]  }
 0x4fb   :  { %7698 = vrcp.f32 %v2399_v16  ;;  %v9985_v16 = vld [vmem:[#allocation11 + $0xcc] ss:$16 sps:$4 sm:$0xff]  }
 0x502   :  { %v7695_v19 = vpop.eup %7694 }
 0x503   :  { %v2408_v61 = vmul.f32 %v7695_v19, %v7691_v13  ;;  %v7697_v51 = vpop.eup %7696  ;;  %v9970_v13 = vld [vmem:[#allocation11 + $0xa4] ss:$16 sps:$4 sm:$0xff]   ;;  %v9976_v19 = vld [vmem:[#allocation11 + $0xa0] ss:$16 sps:$4 sm:$0xff]  }
 0x504   :  { %v9858_v20 = vpop.f32.mrb[48].mxu0  ;;  %v9860_v21 = vpop.f32.mrb[48].mxu1  ;;  %v2407_v22 = vmul.f32 %v7697_v51, %v9552_v3  ;;  %v12940_v3 = vld [vmem:[#allocation149_spill] sm:$0xff]  ;;  %v9982_v51 = vld [vmem:[#allocation11 + $0xc4] ss:$16 sps:$4 sm:$0xff]  }
 0x505   :  { %v9863_v23 = vpop.f32.mrb[49].mxu0  ;;  %v9865_v24 = vpop.f32.mrb[49].mxu1 }
 0x506   :  { %v2452_v25 = vpop.f32.mrb[50].mxu0  ;;  %v2493_v26 = vpop.f32.mrb[50].mxu1  ;;  %v9867_v27 = vadd.f32 %v2408_v61, %v2407_v22  ;;  %v9979_v61 = vld [vmem:[#allocation11 + $0xa8] ss:$16 sps:$4 sm:$0xff]   ;;  %v9988_v22 = vld [vmem:[#allocation11 + $0xc0] ss:$16 sps:$4 sm:$0xff]  }
 0x507   :  { %v2453_v28 = vpop.f32.mrb[51].mxu0  ;;  %v2494_v10 = vpop.f32.mrb[51].mxu1  ;;  %v9991_v25 = vld [vmem:[#allocation11 + $0xc8] ss:$16 sps:$4 sm:$0xff]   ;;  %v9994_v26 = vld [vmem:[#allocation11 + $0xe4] ss:$16 sps:$4 sm:$0xff]  }
 0x508   :  { %7700 = vtanh.f32 %v9867_v27  ;;  %v7699_v7 = vpop.eup %7698  ;;  %v9997_v28 = vld [vmem:[#allocation11 + $0xec] ss:$16 sps:$4 sm:$0xff]   ;;  %v10000_v10 = vld [vmem:[#allocation11 + $0xe0] ss:$16 sps:$4 sm:$0xff]  }
 0x512   :  { %v7701_v11 = vpop.eup %7700 }
 0x513   :  { %v2411_v29 = vmul.f32 %v7701_v11, %v7699_v7  ;;  %v10003_v7 = vld [vmem:[#allocation11 + $0xe8] ss:$16 sps:$4 sm:$0xff]   ;;  %v10006_v11 = vld [vmem:[#allocation9 + $0x4] ss:$16 sps:$4 sm:$0xff]  }
 0x514   :  { %12953 = vst [vmem:[#allocation28_spill] sm:$0xff] %v10006_v11 }
 0x515   :  { %v9870_v30 = vpack.c.bf16 %v2411_v29, %v2411_v29  ;;  %v10009_v29 = vld [vmem:[#allocation9 + $0xc] ss:$16 sps:$4 sm:$0xff]  }
 0x516   :  { %12954 = vst [vmem:[#allocation29_spill] sm:$0xff] %v10009_v29 }
 0x517   :  { %2529 = vmatmul.mubr.bf16.vlgmr.msra.gmra.mrb[52].mxu0 %v9870_v30  ;;  %2570 = vmatmul.mubr.bf16.vlgmr.msra.gmra.mrb[52].mxu1 %v9870_v30 }
 0x518   :  { %2614 = vmatpush1.bf16.msra.mxu0 %v9559_v44  ;;  %2655 = vmatpush1.bf16.msra.mxu1 %v9562_v59  ;;  %v12941_v44 = vld [vmem:[#allocation150_spill] sm:$0xff]  ;;  %v12942_v59 = vld [vmem:[#allocation151_spill] sm:$0xff] }
 0x519   :  { %2615 = vmatprep.subr.bf16.mxu0 %v9565_v5  ;;  %2656 = vmatprep.subr.bf16.mxu1 %v9568_v53  ;;  %v12943_v5 = vld [vmem:[#allocation152_spill] sm:$0xff]  ;;  %v12944_v53 = vld [vmem:[#allocation153_spill] sm:$0xff] }
 0x51a   :  { %2645 = vmatprep.mubr.bf16.mxu0 %v12767_v63  ;;  %2686 = vmatprep.mubr.bf16.mxu1 %v12767_v63 }
 0x51c   :  { %2616 = vmatpush1.bf16.msra.mxu0 %v9573_v50  ;;  %2657 = vmatpush1.bf16.msra.mxu1 %v9576_v54  ;;  %v12945_v50 = vld [vmem:[#allocation154_spill] sm:$0xff]  ;;  %v12946_v54 = vld [vmem:[#allocation155_spill] sm:$0xff] }
 0x51d   :  { %2617 = vmatprep.subr.bf16.mxu0 %v9579_v43  ;;  %2658 = vmatprep.subr.bf16.mxu1 %v9582_v2  ;;  %v12947_v43 = vld [vmem:[#allocation156_spill] sm:$0xff]  ;;  %v12948_v2 = vld [vmem:[#allocation157_spill] sm:$0xff] }
 0x520   :  { %2618 = vmatpush1.bf16.msra.mxu0 %v9585_v47  ;;  %2659 = vmatpush1.bf16.msra.mxu1 %v9588_v58  ;;  %v12949_v47 = vld [vmem:[#allocation158_spill] sm:$0xff]  ;;  %v12950_v58 = vld [vmem:[#allocation159_spill] sm:$0xff] }
 0x521   :  { %2619 = vmatprep.subr.bf16.mxu0 %v9591_v1  ;;  %2660 = vmatprep.subr.bf16.mxu1 %v12940_v3  ;;  %v12951_v1 = vld [vmem:[#allocation160_spill] sm:$0xff] }
 0x522   :  { %v10014_v3 = vld [vmem:[#allocation9] ss:$16 sps:$4 sm:$0xff]  }
 0x523   :  { %12955 = vst [vmem:[#allocation30_spill] sm:$0xff] %v10014_v3 }
 0x524   :  { %2620 = vmatpush1.bf16.msra.mxu0 %v12941_v44  ;;  %2661 = vmatpush1.bf16.msra.mxu1 %v12942_v59  ;;  %v10017_v44 = vld [vmem:[#allocation9 + $0x8] ss:$16 sps:$4 sm:$0xff]   ;;  %v10020_v59 = vld [vmem:[#allocation9 + $0x24] ss:$16 sps:$4 sm:$0xff]  }
 0x525   :  { %2621 = vmatprep.subr.bf16.mxu0 %v12943_v5  ;;  %2662 = vmatprep.subr.bf16.mxu1 %v12944_v53  ;;  %12956 = vst [vmem:[#allocation31_spill] sm:$0xff] %v10017_v44  ;;  %12957 = vst [vmem:[#allocation32_spill] sm:$0xff] %v10020_v59  ;;  %v10023_v5 = vld [vmem:[#allocation9 + $0x2c] ss:$16 sps:$4 sm:$0xff]   ;;  %v10031_v53 = vld [vmem:[#allocation9 + $0x28] ss:$16 sps:$4 sm:$0xff]  }
 0x526   :  { %12958 = vst [vmem:[#allocation33_spill] sm:$0xff] %v10023_v5  ;;  %12960 = vst [vmem:[#allocation35_spill] sm:$0xff] %v10031_v53 }
 0x528   :  { %2622 = vmatpush1.bf16.msra.mxu0 %v12945_v50  ;;  %2663 = vmatpush1.bf16.msra.mxu1 %v12946_v54  ;;  %v10034_v50 = vld [vmem:[#allocation9 + $0x44] ss:$16 sps:$4 sm:$0xff]   ;;  %v10037_v54 = vld [vmem:[#allocation9 + $0x4c] ss:$16 sps:$4 sm:$0xff]  }
 0x529   :  { %2623 = vmatprep.subr.bf16.mxu0 %v12947_v43  ;;  %2664 = vmatprep.subr.bf16.mxu1 %v12948_v2  ;;  %12961 = vst [vmem:[#allocation36_spill] sm:$0xff] %v10034_v50  ;;  %12962 = vst [vmem:[#allocation37_spill] sm:$0xff] %v10037_v54  ;;  %v10040_v43 = vld [vmem:[#allocation9 + $0x40] ss:$16 sps:$4 sm:$0xff]   ;;  %v10043_v2 = vld [vmem:[#allocation9 + $0x48] ss:$16 sps:$4 sm:$0xff]  }
 0x52a   :  { %12963 = vst [vmem:[#allocation38_spill] sm:$0xff] %v10040_v43  ;;  %12964 = vst [vmem:[#allocation39_spill] sm:$0xff] %v10043_v2 }
 0x52c   :  { %2624 = vmatpush1.bf16.msra.mxu0 %v12949_v47  ;;  %2665 = vmatpush1.bf16.msra.mxu1 %v12950_v58  ;;  %v10046_v47 = vld [vmem:[#allocation9 + $0x64] ss:$16 sps:$4 sm:$0xff]   ;;  %v10049_v58 = vld [vmem:[#allocation9 + $0x6c] ss:$16 sps:$4 sm:$0xff]  }
 0x52d   :  { %2625 = vmatprep.subr.bf16.mxu0 %v12951_v1  ;;  %2666 = vmatprep.subr.bf16.mxu1 %v12952_v31  ;;  %12965 = vst [vmem:[#allocation40_spill] sm:$0xff] %v10046_v47  ;;  %12966 = vst [vmem:[#allocation41_spill] sm:$0xff] %v10049_v58  ;;  %v10052_v1 = vld [vmem:[#allocation9 + $0x60] ss:$16 sps:$4 sm:$0xff]   ;;  %v10055_v31 = vld [vmem:[#allocation9 + $0x68] ss:$16 sps:$4 sm:$0xff]  }
 0x52e   :  { %12967 = vst [vmem:[#allocation42_spill] sm:$0xff] %v10052_v1  ;;  %12968 = vst [vmem:[#allocation43_spill] sm:$0xff] %v10055_v31 }
 0x530   :  { %2626 = vmatpush1.bf16.msra.mxu0 %v9633_v45  ;;  %2667 = vmatpush1.bf16.msra.mxu1 %v9636_v55  ;;  %v9914_v45 = vld [vmem:[#allocation11] ss:$16 sps:$4 sm:$0xff]   ;;  %v9917_v55 = vld [vmem:[#allocation11 + $0x8] ss:$16 sps:$4 sm:$0xff]  }
 0x531   :  { %2627 = vmatprep.subr.bf16.mxu0 %v9639_v0  ;;  %2668 = vmatprep.subr.bf16.mxu1 %v9642_v48  ;;  %v9923_v0 = vld [vmem:[#allocation11 + $0x2c] ss:$16 sps:$4 sm:$0xff]   ;;  %v9928_v48 = vld [vmem:[#allocation11 + $0x20] ss:$16 sps:$4 sm:$0xff]  }
 0x534   :  { %2628 = vmatpush1.bf16.msra.mxu0 %v9645_v62  ;;  %2669 = vmatpush1.bf16.msra.mxu1 %v9648_v49  ;;  %v9920_v49 = vld [vmem:[#allocation11 + $0x24] ss:$16 sps:$4 sm:$0xff]   ;;  %v9931_v62 = vld [vmem:[#allocation11 + $0x28] ss:$16 sps:$4 sm:$0xff]  }
 0x535   :  { %2724 = vmatprep.subr.bf16.mxu0 %v9906_v32  ;;  %2765 = vmatprep.subr.bf16.mxu1 %v9909_v38 }
 0x537   :  { %2646 = vmatmul.mubr.bf16.vlgmr.msra.gmra.mrb[56].mxu0 %v9777_v15  ;;  %2687 = vmatmul.mubr.bf16.vlgmr.msra.gmra.mrb[56].mxu1 %v9777_v15  ;;  %v9934_v15 = vld [vmem:[#allocation11 + $0x44] ss:$16 sps:$4 sm:$0xff]  }
 0x538   :  { %2725 = vmatpush1.bf16.msra.mxu0 %v9914_v45  ;;  %2766 = vmatpush1.bf16.msra.mxu1 %v9917_v55 }
 0x539   :  { %2726 = vmatprep.subr.bf16.mxu0 %v9920_v49  ;;  %2767 = vmatprep.subr.bf16.mxu1 %v9923_v0 }
 0x53a   :  { %2756 = vmatprep.mubr.bf16.mxu0 %v12767_v63  ;;  %2797 = vmatprep.mubr.bf16.mxu1 %v12767_v63 }
 0x53c   :  { %2727 = vmatpush1.bf16.msra.mxu0 %v9928_v48  ;;  %2768 = vmatpush1.bf16.msra.mxu1 %v9931_v62 }
 0x53d   :  { %2728 = vmatprep.subr.bf16.mxu0 %v9934_v15  ;;  %2769 = vmatprep.subr.bf16.mxu1 %v9937_v39 }
 0x540   :  { %2729 = vmatpush1.bf16.msra.mxu0 %v9940_v60  ;;  %2770 = vmatpush1.bf16.msra.mxu1 %v9943_v40 }
 0x541   :  { %2730 = vmatprep.subr.bf16.mxu0 %v9946_v42  ;;  %2771 = vmatprep.subr.bf16.mxu1 %v9949_v33 }
 0x544   :  { %2731 = vmatpush1.bf16.msra.mxu0 %v9952_v34  ;;  %2772 = vmatpush1.bf16.msra.mxu1 %v9955_v57 }
 0x545   :  { %2732 = vmatprep.subr.bf16.mxu0 %v9958_v35  ;;  %2773 = vmatprep.subr.bf16.mxu1 %v9961_v9 }
 0x548   :  { %2733 = vmatpush1.bf16.msra.mxu0 %v9964_v36  ;;  %2774 = vmatpush1.bf16.msra.mxu1 %v9967_v12 }
 0x549   :  { %2734 = vmatprep.subr.bf16.mxu0 %v9970_v13  ;;  %2775 = vmatprep.subr.bf16.mxu1 %v9973_v17 }
 0x54c   :  { %2735 = vmatpush1.bf16.msra.mxu0 %v9976_v19  ;;  %2776 = vmatpush1.bf16.msra.mxu1 %v9979_v61 }
 0x54d   :  { %2736 = vmatprep.subr.bf16.mxu0 %v9982_v51  ;;  %2777 = vmatprep.subr.bf16.mxu1 %v9985_v16 }
 0x550   :  { %2737 = vmatpush1.bf16.msra.mxu0 %v9988_v22  ;;  %2778 = vmatpush1.bf16.msra.mxu1 %v9991_v25 }
 0x551   :  { %2738 = vmatprep.subr.bf16.mxu0 %v9994_v26  ;;  %2779 = vmatprep.subr.bf16.mxu1 %v9997_v28 }
 0x554   :  { %2739 = vmatpush1.bf16.msra.mxu0 %v10000_v10  ;;  %2780 = vmatpush1.bf16.msra.mxu1 %v10003_v7 }
 0x555   :  { %2806 = vmatprep.subr.bf16.mxu0 %v10006_v11  ;;  %2847 = vmatprep.subr.bf16.mxu1 %v10009_v29 }
 0x557   :  { %2757 = vmatmul.mubr.bf16.vlgmr.msra.gmra.mrb[60].mxu0 %v9870_v30  ;;  %2798 = vmatmul.mubr.bf16.vlgmr.msra.gmra.mrb[60].mxu1 %v9870_v30  ;;  %v10028_v30 = vld [vmem:[#allocation9 + $0x20] ss:$16 sps:$4 sm:$0xff]  }
 0x558   :  { %2807 = vmatpush1.bf16.msra.mxu0 %v10014_v3  ;;  %2848 = vmatpush1.bf16.msra.mxu1 %v10017_v44  ;;  %12959 = vst [vmem:[#allocation34_spill] sm:$0xff] %v10028_v30 }
 0x559   :  { %2808 = vmatprep.subr.bf16.mxu0 %v10020_v59  ;;  %2849 = vmatprep.subr.bf16.mxu1 %v10023_v5 }
 0x55a   :  { %2838 = vmatprep.mubr.bf16.mxu0 %v12767_v63  ;;  %2879 = vmatprep.mubr.bf16.mxu1 %v12767_v63 }
 0x55c   :  { %2809 = vmatpush1.bf16.msra.mxu0 %v10028_v30  ;;  %2850 = vmatpush1.bf16.msra.mxu1 %v10031_v53 }
 0x55d   :  { %2810 = vmatprep.subr.bf16.mxu0 %v10034_v50  ;;  %2851 = vmatprep.subr.bf16.mxu1 %v10037_v54 }
 0x560   :  { %2811 = vmatpush1.bf16.msra.mxu0 %v10040_v43  ;;  %2852 = vmatpush1.bf16.msra.mxu1 %v10043_v2  ;;  %v10058_v43 = vld [vmem:[#allocation9 + $0x84] ss:$16 sps:$4 sm:$0xff]   ;;  %v10061_v2 = vld [vmem:[#allocation9 + $0x8c] ss:$16 sps:$4 sm:$0xff]  }
 0x561   :  { %2812 = vmatprep.subr.bf16.mxu0 %v10046_v47  ;;  %2853 = vmatprep.subr.bf16.mxu1 %v10049_v58  ;;  %12969 = vst [vmem:[#allocation44_spill] sm:$0xff] %v10058_v43  ;;  %12970 = vst [vmem:[#allocation45_spill] sm:$0xff] %v10061_v2  ;;  %v10064_v47 = vld [vmem:[#allocation9 + $0x80] ss:$16 sps:$4 sm:$0xff]   ;;  %v10067_v58 = vld [vmem:[#allocation9 + $0x88] ss:$16 sps:$4 sm:$0xff]  }
 0x562   :  { %12971 = vst [vmem:[#allocation46_spill] sm:$0xff] %v10064_v47  ;;  %12972 = vst [vmem:[#allocation47_spill] sm:$0xff] %v10067_v58 }
 0x564   :  { %2813 = vmatpush1.bf16.msra.mxu0 %v10052_v1  ;;  %2854 = vmatpush1.bf16.msra.mxu1 %v10055_v31  ;;  %v10070_v1 = vld [vmem:[#allocation9 + $0xa4] ss:$16 sps:$4 sm:$0xff]   ;;  %v10073_v31 = vld [vmem:[#allocation9 + $0xac] ss:$16 sps:$4 sm:$0xff]  }
 0x565   :  { %2814 = vmatprep.subr.bf16.mxu0 %v10058_v43  ;;  %2855 = vmatprep.subr.bf16.mxu1 %v10061_v2  ;;  %12973 = vst [vmem:[#allocation48_spill] sm:$0xff] %v10070_v1  ;;  %12974 = vst [vmem:[#allocation49_spill] sm:$0xff] %v10073_v31  ;;  %v10076_v43 = vld [vmem:[#allocation9 + $0xa0] ss:$16 sps:$4 sm:$0xff]   ;;  %v10079_v2 = vld [vmem:[#allocation9 + $0xa8] ss:$16 sps:$4 sm:$0xff]  }
 0x566   :  { %12975 = vst [vmem:[#allocation50_spill] sm:$0xff] %v10076_v43  ;;  %12976 = vst [vmem:[#allocation51_spill] sm:$0xff] %v10079_v2 }
 0x568   :  { %2815 = vmatpush1.bf16.msra.mxu0 %v10064_v47  ;;  %2856 = vmatpush1.bf16.msra.mxu1 %v10067_v58  ;;  %v10082_v47 = vld [vmem:[#allocation9 + $0xc4] ss:$16 sps:$4 sm:$0xff]   ;;  %v10085_v58 = vld [vmem:[#allocation9 + $0xcc] ss:$16 sps:$4 sm:$0xff]  }
 0x569   :  { %2816 = vmatprep.subr.bf16.mxu0 %v10070_v1  ;;  %2857 = vmatprep.subr.bf16.mxu1 %v10073_v31  ;;  %12977 = vst [vmem:[#allocation60_spill] sm:$0xff] %v10082_v47  ;;  %12978 = vst [vmem:[#allocation63_spill] sm:$0xff] %v10085_v58  ;;  %v10088_v1 = vld [vmem:[#allocation9 + $0xc0] ss:$16 sps:$4 sm:$0xff]   ;;  %v10091_v31 = vld [vmem:[#allocation9 + $0xc8] ss:$16 sps:$4 sm:$0xff]  }
 0x56a   :  { %12979 = vst [vmem:[#allocation52_spill] sm:$0xff] %v10088_v1  ;;  %12980 = vst [vmem:[#allocation53_spill] sm:$0xff] %v10091_v31 }
 0x56c   :  { %2817 = vmatpush1.bf16.msra.mxu0 %v10076_v43  ;;  %2858 = vmatpush1.bf16.msra.mxu1 %v10079_v2  ;;  %v10094_v43 = vld [vmem:[#allocation9 + $0xe4] ss:$16 sps:$4 sm:$0xff]   ;;  %v10097_v2 = vld [vmem:[#allocation9 + $0xec] ss:$16 sps:$4 sm:$0xff]  }
 0x56d   :  { %2818 = vmatprep.subr.bf16.mxu0 %v10082_v47  ;;  %2859 = vmatprep.subr.bf16.mxu1 %v10085_v58  ;;  %12981 = vst [vmem:[#allocation54_spill] sm:$0xff] %v10094_v43  ;;  %12982 = vst [vmem:[#allocation55_spill] sm:$0xff] %v10097_v2  ;;  %v10100_v47 = vld [vmem:[#allocation9 + $0xe0] ss:$16 sps:$4 sm:$0xff]   ;;  %v10103_v58 = vld [vmem:[#allocation9 + $0xe8] ss:$16 sps:$4 sm:$0xff]  }
 0x56e   :  { %12983 = vst [vmem:[#allocation56_spill] sm:$0xff] %v10100_v47  ;;  %12984 = vst [vmem:[#allocation57_spill] sm:$0xff] %v10103_v58 }
 0x570   :  { %2819 = vmatpush1.bf16.msra.mxu0 %v10088_v1  ;;  %2860 = vmatpush1.bf16.msra.mxu1 %v10091_v31  ;;  %v10106_v1 = vld [vmem:[#allocation14 + $0x4] ss:$16 sps:$4 sm:$0xff]   ;;  %v10109_v31 = vld [vmem:[#allocation14 + $0xc] ss:$16 sps:$4 sm:$0xff]  }
 0x571   :  { %2820 = vmatprep.subr.bf16.mxu0 %v10094_v43  ;;  %2861 = vmatprep.subr.bf16.mxu1 %v10097_v2  ;;  %12985 = vst [vmem:[#allocation84_spill] sm:$0xff] %v10106_v1  ;;  %12986 = vst [vmem:[#allocation85_spill] sm:$0xff] %v10109_v31 }
 0x574   :  { %2821 = vmatpush1.bf16.msra.mxu0 %v10100_v47  ;;  %2862 = vmatpush1.bf16.msra.mxu1 %v10103_v58 }
 0x575   :  { %2918 = vmatprep.subr.bf16.mxu0 %v10106_v1  ;;  %2959 = vmatprep.subr.bf16.mxu1 %v10109_v31 }
 0x5ea   :  { %v2530_v43 = vpop.f32.mrb[52].mxu0  ;;  %v2571_v54 = vpop.f32.mrb[52].mxu1 }
 0x5eb   :  { %v2531_v2 = vadd.f32 %v2530_v43, %v9858_v20  ;;  %v10114_v50 = vadd.f32 %v2571_v54, %v9860_v21  ;;  %v2532_v47 = vpop.f32.mrb[53].mxu0  ;;  %v2573_v53 = vpop.f32.mrb[53].mxu1 }
 0x5ec   :  { %v2533_v30 = vadd.f32 %v2532_v47, %v9863_v23  ;;  %v2574_v58 = vadd.f32 %v2573_v53, %v9865_v24  ;;  %v2534_v5 = vpop.f32.mrb[54].mxu0  ;;  %v2575_v59 = vpop.f32.mrb[54].mxu1 }
 0x5ed   :  { %v2578_v1 = vadd.f32 %v2531_v2, %v9736_v8  ;;  %v2535_v44 = vpop.f32.mrb[55].mxu0  ;;  %v2576_v3 = vpop.f32.mrb[55].mxu1  ;;  %v12987_v2 = vld [vmem:[#allocation58_spill] sm:$0xff] }
 0x5ee   :  { %v2579_v31 = vadd.f32 %v2533_v30, %v9740_v14  ;;  %v2581_v20 = vadd.f32 %v2574_v58, %v9750_v6 }
 0x5ef   :  { %v6631_v29 = vmul.f32 -1.442695, %v2578_v1 }
 0x5f0   :  { %v6632_v11 = vmul.f32 -1.442695, %v2579_v31  ;;  %v12989_v31 = vld [vmem:[#allocation61_spill] sm:$0xff] }
 0x5f1   :  { %7702 = vpow2.f32 %v6631_v29 }
 0x5f2   :  { %7704 = vpow2.f32 %v6632_v11  ;;  %v12988_v11 = vld [vmem:[#allocation59_spill] sm:$0xff] }
 0x5f3   :  { %7706 = vtanh.f32 %v2581_v20  ;;  %v12990_v20 = vld [vmem:[#allocation62_spill] sm:$0xff] }
 0x5fb   :  { %v7703_v21 = vpop.eup %7702 }
 0x5fc   :  { %v2591_v54 = vadd.f32 1.0, %v7703_v21  ;;  %v7705_v43 = vpop.eup %7704 }
 0x5fd   :  { %v2592_v23 = vadd.f32 1.0, %v7705_v43  ;;  %v7707_v24 = vpop.eup %7706 }
 0x5fe   :  { %7708 = vrcp.f32 %v2591_v54 }
 0x5ff   :  { %7710 = vrcp.f32 %v2592_v23 }
 0x608   :  { %v7709_v59 = vpop.eup %7708 }
 0x609   :  { %v2602_v5 = vmul.f32 %v7709_v59, %v7707_v24  ;;  %v7711_v44 = vpop.eup %7710 }
 0x60a   :  { %v2647_v3 = vpop.f32.mrb[56].mxu0  ;;  %v2688_v53 = vpop.f32.mrb[56].mxu1  ;;  %v2601_v30 = vmul.f32 %v7711_v44, %v9757_v18 }
 0x60b   :  { %v2695_v29 = vadd.f32 %v2647_v3, %v12987_v2  ;;  %v2697_v47 = vadd.f32 %v2688_v53, %v12988_v11  ;;  %v2649_v58 = vpop.f32.mrb[57].mxu0  ;;  %v2690_v1 = vpop.f32.mrb[57].mxu1 }
 0x60c   :  { %v2696_v21 = vadd.f32 %v2649_v58, %v12989_v31  ;;  %v2698_v54 = vadd.f32 %v2690_v1, %v12990_v20  ;;  %v2651_v43 = vpop.f32.mrb[58].mxu0  ;;  %v2692_v23 = vpop.f32.mrb[58].mxu1  ;;  %v10126_v6 = vadd.f32 %v2602_v5, %v2601_v30 }
 0x60d   :  { %v6634_v24 = vmul.f32 -1.442695, %v2695_v29  ;;  %v2652_v59 = vpop.f32.mrb[59].mxu0  ;;  %v2693_v14 = vpop.f32.mrb[59].mxu1  ;;  %v6636_v18 = vmul.f32 -1.442695, %v2697_v47 }
 0x60e   :  { %v6635_v8 = vmul.f32 -1.442695, %v2696_v21 }
 0x60f   :  { %7712 = vpow2.f32 %v6634_v24 }
 0x610   :  { %7714 = vpow2.f32 %v6635_v8 }
 0x611   :  { %7716 = vtanh.f32 %v2698_v54 }
 0x612   :  { %7718 = vpow2.f32 %v6636_v18 }
 0x619   :  { %v7713_v44 = vpop.eup %7712 }
 0x61a   :  { %v2708_v3 = vadd.f32 1.0, %v7713_v44  ;;  %v7715_v53 = vpop.eup %7714 }
 0x61b   :  { %v2709_v2 = vadd.f32 1.0, %v7715_v53  ;;  %v7717_v11 = vpop.eup %7716 }
 0x61c   :  { %7720 = vrcp.f32 %v2708_v3  ;;  %v7719_v58 = vpop.eup %7718 }
 0x61d   :  { %7722 = vrcp.f32 %v2709_v2  ;;  %v2710_v29 = vadd.f32 1.0, %v7719_v58  ;;  %v10146_v2 = vld [vmem:[#allocation14] ss:$16 sps:$4 sm:$0xff]   ;;  %v10155_v58 = vld [vmem:[#allocation14 + $0x2c] ss:$16 sps:$4 sm:$0xff]  }
 0x61e   :  { %12992 = vst [vmem:[#allocation87_spill] sm:$0xff] %v10155_v58 }
 0x61f   :  { %7724 = vrcp.f32 %v2710_v29  ;;  %v10169_v29 = vld [vmem:[#allocation14 + $0x4c] ss:$16 sps:$4 sm:$0xff]  }
 0x620   :  { %12996 = vst [vmem:[#allocation91_spill] sm:$0xff] %v10169_v29 }
 0x626   :  { %v7721_v1 = vpop.eup %7720 }
 0x627   :  { %v2719_v5 = vmul.f32 %v7721_v1, %v7717_v11  ;;  %v7723_v30 = vpop.eup %7722  ;;  %v10149_v11 = vld [vmem:[#allocation14 + $0x8] ss:$16 sps:$4 sm:$0xff]   ;;  %v10160_v1 = vld [vmem:[#allocation14 + $0x20] ss:$16 sps:$4 sm:$0xff]  }
 0x628   :  { %v2718_v14 = vmul.f32 %v7723_v30, %v9768_v37  ;;  %v2580_v37 = vadd.f32 %v10114_v50, %v9773_v41  ;;  %v10152_v50 = vld [vmem:[#allocation14 + $0x24] ss:$16 sps:$4 sm:$0xff]   ;;  %12993 = vst [vmem:[#allocation88_spill] sm:$0xff] %v10160_v1 }
 0x629   :  { %v7725_v59 = vpop.eup %7724  ;;  %12991 = vst [vmem:[#allocation86_spill] sm:$0xff] %v10152_v50  ;;  %v10166_v30 = vld [vmem:[#allocation14 + $0x44] ss:$16 sps:$4 sm:$0xff]  }
 0x62a   :  { %v10129_v31 = vpop.f32.mrb[60].mxu0  ;;  %v10131_v8 = vpop.f32.mrb[60].mxu1  ;;  %v10137_v20 = vadd.f32 %v2719_v5, %v2718_v14  ;;  %v6633_v18 = vmul.f32 -1.442695, %v2580_v37  ;;  %v10163_v5 = vld [vmem:[#allocation14 + $0x28] ss:$16 sps:$4 sm:$0xff]  }
 0x62b   :  { %v10133_v47 = vpop.f32.mrb[61].mxu0  ;;  %v10135_v21 = vpop.f32.mrb[61].mxu1  ;;  %12994 = vst [vmem:[#allocation89_spill] sm:$0xff] %v10163_v5  ;;  %12995 = vst [vmem:[#allocation90_spill] sm:$0xff] %v10166_v30 }
 0x62c   :  { %v2762_v54 = vpop.f32.mrb[62].mxu0  ;;  %v2803_v43 = vpop.f32.mrb[62].mxu1  ;;  %7726 = vtanh.f32 %v10137_v20 }
 0x62d   :  { %v2763_v23 = vpop.f32.mrb[63].mxu0  ;;  %v2804_v24 = vpop.f32.mrb[63].mxu1  ;;  %7728 = vpow2.f32 %v6633_v18  ;;  %v10172_v54 = vld [vmem:[#allocation14 + $0x40] ss:$16 sps:$4 sm:$0xff]   ;;  %v10175_v43 = vld [vmem:[#allocation14 + $0x48] ss:$16 sps:$4 sm:$0xff]  }
 0x62e   :  { %12997 = vst [vmem:[#allocation92_spill] sm:$0xff] %v10172_v54  ;;  %12998 = vst [vmem:[#allocation93_spill] sm:$0xff] %v10175_v43  ;;  %v10178_v23 = vld [vmem:[#allocation14 + $0x64] ss:$16 sps:$4 sm:$0xff]   ;;  %v10181_v24 = vld [vmem:[#allocation14 + $0x6c] ss:$16 sps:$4 sm:$0xff]   ;;  %7730 = vtanh.f32 %v10126_v6 }
 0x62f   :  { %12999 = vst [vmem:[#allocation94_spill] sm:$0xff] %v10178_v23  ;;  %13000 = vst [vmem:[#allocation95_spill] sm:$0xff] %v10181_v24  ;;  %v10188_v18 = vld [vmem:[#allocation14 + $0x68] ss:$16 sps:$4 sm:$0xff]  }
 0x630   :  { %13002 = vst [vmem:[#allocation97_spill] sm:$0xff] %v10188_v18 }
 0x636   :  { %v7727_v44 = vpop.eup %7726 }
 0x637   :  { %v2722_v3 = vmul.f32 %v7727_v44, %v7725_v59  ;;  %v7729_v14 = vpop.eup %7728  ;;  %v10185_v59 = vld [vmem:[#allocation14 + $0x60] ss:$16 sps:$4 sm:$0xff]   ;;  %v10191_v44 = vld [vmem:[#allocation14 + $0x84] ss:$16 sps:$4 sm:$0xff]  }
 0x638   :  { %v2593_v37 = vadd.f32 1.0, %v7729_v14  ;;  %13001 = vst [vmem:[#allocation96_spill] sm:$0xff] %v10185_v59  ;;  %13003 = vst [vmem:[#allocation98_spill] sm:$0xff] %v10191_v44  ;;  %v10197_v14 = vld [vmem:[#allocation14 + $0x80] ss:$16 sps:$4 sm:$0xff]  }
 0x639   :  { %v10142_v53 = vpack.c.bf16 %v2722_v3, %v2722_v3  ;;  %v10194_v3 = vld [vmem:[#allocation14 + $0x8c] ss:$16 sps:$4 sm:$0xff]   ;;  %13005 = vst [vmem:[#allocation101_spill] sm:$0xff] %v10197_v14 }
 0x63a   :  { %13004 = vst [vmem:[#allocation99_spill] sm:$0xff] %v10194_v3  ;;  %7732 = vrcp.f32 %v2593_v37  ;;  %v10212_v37 = vld [vmem:[#allocation14 + $0xa8] ss:$16 sps:$4 sm:$0xff]  }
 0x63b   :  { %2839 = vmatmul.mubr.bf16.vlgmr.msra.gmra.mrb[64].mxu0 %v10142_v53  ;;  %2880 = vmatmul.mubr.bf16.vlgmr.msra.gmra.mrb[64].mxu1 %v10142_v53  ;;  %13010 = vst [vmem:[#allocation104_spill] sm:$0xff] %v10212_v37 }
 0x63c   :  { %2919 = vmatpush1.bf16.msra.mxu0 %v10146_v2  ;;  %2960 = vmatpush1.bf16.msra.mxu1 %v10149_v11 }
 0x63d   :  { %2920 = vmatprep.subr.bf16.mxu0 %v10152_v50  ;;  %2961 = vmatprep.subr.bf16.mxu1 %v10155_v58 }
 0x63e   :  { %2950 = vmatprep.mubr.bf16.mxu0 %v12767_v63  ;;  %2991 = vmatprep.mubr.bf16.mxu1 %v12767_v63 }
 0x640   :  { %2921 = vmatpush1.bf16.msra.mxu0 %v10160_v1  ;;  %2962 = vmatpush1.bf16.msra.mxu1 %v10163_v5 }
 0x641   :  { %2922 = vmatprep.subr.bf16.mxu0 %v10166_v30  ;;  %2963 = vmatprep.subr.bf16.mxu1 %v10169_v29 }
 0x644   :  { %2923 = vmatpush1.bf16.msra.mxu0 %v10172_v54  ;;  %2964 = vmatpush1.bf16.msra.mxu1 %v10175_v43  ;;  %v10236_v43 = vld [vmem:[#allocation14 + $0xe8] ss:$16 sps:$4 sm:$0xff]   ;;  %v10239_v54 = vld [vmem:[#allocation12 + $0x4] ss:$16 sps:$4 sm:$0xff]  }
 0x645   :  { %2924 = vmatprep.subr.bf16.mxu0 %v10178_v23  ;;  %2965 = vmatprep.subr.bf16.mxu1 %v10181_v24  ;;  %v10200_v24 = vld [vmem:[#allocation14 + $0x88] ss:$16 sps:$4 sm:$0xff]   ;;  %v10221_v23 = vld [vmem:[#allocation14 + $0xc0] ss:$16 sps:$4 sm:$0xff]   ;;  %13018 = vst [vmem:[#allocation112_spill] sm:$0xff] %v10236_v43  ;;  %13019 = vst [vmem:[#allocation114_spill] sm:$0xff] %v10239_v54 }
 0x646   :  { %13006 = vst [vmem:[#allocation100_spill] sm:$0xff] %v10200_v24  ;;  %13013 = vst [vmem:[#allocation109_spill] sm:$0xff] %v10221_v23 }
 0x648   :  { %2925 = vmatpush1.bf16.msra.mxu0 %v10185_v59  ;;  %2966 = vmatpush1.bf16.msra.mxu1 %v10188_v18  ;;  %v10203_v59 = vld [vmem:[#allocation14 + $0xa4] ss:$16 sps:$4 sm:$0xff]   ;;  %v10206_v18 = vld [vmem:[#allocation14 + $0xac] ss:$16 sps:$4 sm:$0xff]  }
 0x649   :  { %2926 = vmatprep.subr.bf16.mxu0 %v10191_v44  ;;  %2967 = vmatprep.subr.bf16.mxu1 %v10194_v3  ;;  %13007 = vst [vmem:[#allocation102_spill] sm:$0xff] %v10203_v59  ;;  %13008 = vst [vmem:[#allocation103_spill] sm:$0xff] %v10206_v18  ;;  %v10209_v44 = vld [vmem:[#allocation14 + $0xa0] ss:$16 sps:$4 sm:$0xff]  }
 0x64a   :  { %13009 = vst [vmem:[#allocation105_spill] sm:$0xff] %v10209_v44 }
 0x64c   :  { %2927 = vmatpush1.bf16.msra.mxu0 %v10197_v14  ;;  %2968 = vmatpush1.bf16.msra.mxu1 %v10200_v24  ;;  %v10215_v14 = vld [vmem:[#allocation14 + $0xc4] ss:$16 sps:$4 sm:$0xff]   ;;  %v10218_v24 = vld [vmem:[#allocation14 + $0xcc] ss:$16 sps:$4 sm:$0xff]  }
 0x64d   :  { %2928 = vmatprep.subr.bf16.mxu0 %v10203_v59  ;;  %2969 = vmatprep.subr.bf16.mxu1 %v10206_v18  ;;  %13011 = vst [vmem:[#allocation106_spill] sm:$0xff] %v10215_v14  ;;  %13012 = vst [vmem:[#allocation107_spill] sm:$0xff] %v10218_v24  ;;  %v7731_v59 = vpop.eup %7730  ;;  %v10224_v18 = vld [vmem:[#allocation14 + $0xc8] ss:$16 sps:$4 sm:$0xff]  }
 0x64e   :  { %v7733_v3 = vpop.eup %7732  ;;  %13014 = vst [vmem:[#allocation108_spill] sm:$0xff] %v10224_v18 }
 0x650   :  { %2929 = vmatpush1.bf16.msra.mxu0 %v10209_v44  ;;  %2970 = vmatpush1.bf16.msra.mxu1 %v10212_v37  ;;  %v10227_v44 = vld [vmem:[#allocation14 + $0xe4] ss:$16 sps:$4 sm:$0xff]   ;;  %v10230_v37 = vld [vmem:[#allocation14 + $0xec] ss:$16 sps:$4 sm:$0xff]  }
 0x651   :  { %2930 = vmatprep.subr.bf16.mxu0 %v10215_v14  ;;  %2971 = vmatprep.subr.bf16.mxu1 %v10218_v24  ;;  %13015 = vst [vmem:[#allocation110_spill] sm:$0xff] %v10227_v44  ;;  %13016 = vst [vmem:[#allocation111_spill] sm:$0xff] %v10230_v37  ;;  %v2605_v14 = vmul.f32 %v7733_v3, %v7731_v59  ;;  %v10233_v24 = vld [vmem:[#allocation14 + $0xe0] ss:$16 sps:$4 sm:$0xff]   ;;  %v10248_v3 = vld [vmem:[#allocation12 + $0x8] ss:$16 sps:$4 sm:$0xff]  }
 0x652   :  { %13017 = vst [vmem:[#allocation113_spill] sm:$0xff] %v10233_v24  ;;  %v10245_v59 = vld [vmem:[#allocation12] ss:$16 sps:$4 sm:$0xff]   ;;  %13022 = vst [vmem:[#allocation117_spill] sm:$0xff] %v10248_v3 }
 0x653   :  { %13021 = vst [vmem:[#allocation116_spill] sm:$0xff] %v10245_v59 }
 0x654   :  { %2931 = vmatpush1.bf16.msra.mxu0 %v10221_v23  ;;  %2972 = vmatpush1.bf16.msra.mxu1 %v10224_v18  ;;  %v2917_v23 = vpack.c.bf16 %v2605_v14, %v2605_v14  ;;  %v10242_v18 = vld [vmem:[#allocation12 + $0xc] ss:$16 sps:$4 sm:$0xff]  }
 0x655   :  { %2932 = vmatprep.subr.bf16.mxu0 %v10227_v44  ;;  %2973 = vmatprep.subr.bf16.mxu1 %v10230_v37  ;;  %13020 = vst [vmem:[#allocation115_spill] sm:$0xff] %v10242_v18  ;;  %v10254_v14 = vld [vmem:[#allocation12 + $0x2c] ss:$16 sps:$4 sm:$0xff]  }
 0x656   :  { %13024 = vst [vmem:[#allocation119_spill] sm:$0xff] %v10254_v14 }
 0x658   :  { %2933 = vmatpush1.bf16.msra.mxu0 %v10233_v24  ;;  %2974 = vmatpush1.bf16.msra.mxu1 %v10236_v43  ;;  %v10251_v43 = vld [vmem:[#allocation12 + $0x24] ss:$16 sps:$4 sm:$0xff]  }
 0x659   :  { %3000 = vmatprep.subr.bf16.mxu0 %v10239_v54  ;;  %3041 = vmatprep.subr.bf16.mxu1 %v10242_v18  ;;  %13023 = vst [vmem:[#allocation118_spill] sm:$0xff] %v10251_v43  ;;  %v10274_v18 = vld [vmem:[#allocation12 + $0x48] ss:$16 sps:$4 sm:$0xff]  }
 0x65a   :  { %13030 = vst [vmem:[#allocation125_spill] sm:$0xff] %v10274_v18 }
 0x65b   :  { %2951 = vmatmul.mubr.bf16.vlgmr.msra.gmra.mrb[68].mxu0 %v2917_v23  ;;  %2992 = vmatmul.mubr.bf16.vlgmr.msra.gmra.mrb[68].mxu1 %v2917_v23  ;;  %v10259_v23 = vld [vmem:[#allocation12 + $0x20] ss:$16 sps:$4 sm:$0xff]  }
 0x65c   :  { %3001 = vmatpush1.bf16.msra.mxu0 %v10245_v59  ;;  %3042 = vmatpush1.bf16.msra.mxu1 %v10248_v3  ;;  %13025 = vst [vmem:[#allocation120_spill] sm:$0xff] %v10259_v23  ;;  %v10262_v59 = vld [vmem:[#allocation12 + $0x28] ss:$16 sps:$4 sm:$0xff]   ;;  %v10265_v3 = vld [vmem:[#allocation12 + $0x44] ss:$16 sps:$4 sm:$0xff]  }
 0x65d   :  { %3002 = vmatprep.subr.bf16.mxu0 %v10251_v43  ;;  %3043 = vmatprep.subr.bf16.mxu1 %v10254_v14  ;;  %13026 = vst [vmem:[#allocation121_spill] sm:$0xff] %v10262_v59  ;;  %13027 = vst [vmem:[#allocation122_spill] sm:$0xff] %v10265_v3  ;;  %v10268_v43 = vld [vmem:[#allocation12 + $0x4c] ss:$16 sps:$4 sm:$0xff]   ;;  %v10271_v14 = vld [vmem:[#allocation12 + $0x40] ss:$16 sps:$4 sm:$0xff]  }
 0x65e   :  { %3032 = vmatprep.mubr.bf16.mxu0 %v12767_v63  ;;  %3073 = vmatprep.mubr.bf16.mxu1 %v12767_v63  ;;  %13028 = vst [vmem:[#allocation123_spill] sm:$0xff] %v10268_v43  ;;  %13029 = vst [vmem:[#allocation124_spill] sm:$0xff] %v10271_v14 }
 0x660   :  { %3003 = vmatpush1.bf16.msra.mxu0 %v10259_v23  ;;  %3044 = vmatpush1.bf16.msra.mxu1 %v10262_v59  ;;  %v10277_v23 = vld [vmem:[#allocation12 + $0x64] ss:$16 sps:$4 sm:$0xff]   ;;  %v10280_v59 = vld [vmem:[#allocation12 + $0x6c] ss:$16 sps:$4 sm:$0xff]  }
 0x661   :  { %3004 = vmatprep.subr.bf16.mxu0 %v10265_v3  ;;  %3045 = vmatprep.subr.bf16.mxu1 %v10268_v43  ;;  %13031 = vst [vmem:[#allocation126_spill] sm:$0xff] %v10277_v23  ;;  %13032 = vst [vmem:[#allocation127_spill] sm:$0xff] %v10280_v59  ;;  %v10283_v3 = vld [vmem:[#allocation12 + $0x60] ss:$16 sps:$4 sm:$0xff]   ;;  %v10286_v43 = vld [vmem:[#allocation12 + $0x68] ss:$16 sps:$4 sm:$0xff]  }
 0x662   :  { %13033 = vst [vmem:[#allocation128_spill] sm:$0xff] %v10283_v3  ;;  %13034 = vst [vmem:[#allocation129_spill] sm:$0xff] %v10286_v43 }
 0x664   :  { %3005 = vmatpush1.bf16.msra.mxu0 %v10271_v14  ;;  %3046 = vmatpush1.bf16.msra.mxu1 %v10274_v18  ;;  %v10289_v14 = vld [vmem:[#allocation12 + $0x84] ss:$16 sps:$4 sm:$0xff]   ;;  %v10292_v18 = vld [vmem:[#allocation12 + $0x8c] ss:$16 sps:$4 sm:$0xff]  }
 0x665   :  { %3006 = vmatprep.subr.bf16.mxu0 %v10277_v23  ;;  %3047 = vmatprep.subr.bf16.mxu1 %v10280_v59  ;;  %13035 = vst [vmem:[#allocation130_spill] sm:$0xff] %v10289_v14  ;;  %13036 = vst [vmem:[#allocation131_spill] sm:$0xff] %v10292_v18  ;;  %v10295_v23 = vld [vmem:[#allocation12 + $0x80] ss:$16 sps:$4 sm:$0xff]   ;;  %v10298_v59 = vld [vmem:[#allocation12 + $0x88] ss:$16 sps:$4 sm:$0xff]  }
 0x666   :  { %13037 = vst [vmem:[#allocation132_spill] sm:$0xff] %v10295_v23  ;;  %13038 = vst [vmem:[#allocation133_spill] sm:$0xff] %v10298_v59 }
 0x668   :  { %3007 = vmatpush1.bf16.msra.mxu0 %v10283_v3  ;;  %3048 = vmatpush1.bf16.msra.mxu1 %v10286_v43  ;;  %v10301_v3 = vld [vmem:[#allocation12 + $0xa4] ss:$16 sps:$4 sm:$0xff]   ;;  %v10304_v43 = vld [vmem:[#allocation12 + $0xac] ss:$16 sps:$4 sm:$0xff]  }
 0x669   :  { %3008 = vmatprep.subr.bf16.mxu0 %v10289_v14  ;;  %3049 = vmatprep.subr.bf16.mxu1 %v10292_v18  ;;  %13039 = vst [vmem:[#allocation134_spill] sm:$0xff] %v10301_v3  ;;  %13040 = vst [vmem:[#allocation135_spill] sm:$0xff] %v10304_v43  ;;  %v10307_v14 = vld [vmem:[#allocation12 + $0xa0] ss:$16 sps:$4 sm:$0xff]   ;;  %v10310_v18 = vld [vmem:[#allocation12 + $0xa8] ss:$16 sps:$4 sm:$0xff]  }
 0x66a   :  { %13041 = vst [vmem:[#allocation136_spill] sm:$0xff] %v10307_v14  ;;  %13042 = vst [vmem:[#allocation137_spill] sm:$0xff] %v10310_v18 }
 0x66c   :  { %3009 = vmatpush1.bf16.msra.mxu0 %v10295_v23  ;;  %3050 = vmatpush1.bf16.msra.mxu1 %v10298_v59  ;;  %v10313_v23 = vld [vmem:[#allocation12 + $0xc4] ss:$16 sps:$4 sm:$0xff]   ;;  %v10316_v59 = vld [vmem:[#allocation12 + $0xcc] ss:$16 sps:$4 sm:$0xff]  }
 0x66d   :  { %3010 = vmatprep.subr.bf16.mxu0 %v10301_v3  ;;  %3051 = vmatprep.subr.bf16.mxu1 %v10304_v43  ;;  %13043 = vst [vmem:[#allocation138_spill] sm:$0xff] %v10313_v23  ;;  %13044 = vst [vmem:[#allocation139_spill] sm:$0xff] %v10316_v59  ;;  %v10319_v3 = vld [vmem:[#allocation12 + $0xc0] ss:$16 sps:$4 sm:$0xff]   ;;  %v10322_v43 = vld [vmem:[#allocation12 + $0xc8] ss:$16 sps:$4 sm:$0xff]  }
 0x66e   :  { %13045 = vst [vmem:[#allocation140_spill] sm:$0xff] %v10319_v3  ;;  %13046 = vst [vmem:[#allocation141_spill] sm:$0xff] %v10322_v43 }
 0x670   :  { %3011 = vmatpush1.bf16.msra.mxu0 %v10307_v14  ;;  %3052 = vmatpush1.bf16.msra.mxu1 %v10310_v18  ;;  %v10325_v14 = vld [vmem:[#allocation12 + $0xe4] ss:$16 sps:$4 sm:$0xff]   ;;  %v10328_v18 = vld [vmem:[#allocation12 + $0xec] ss:$16 sps:$4 sm:$0xff]  }
 0x671   :  { %3012 = vmatprep.subr.bf16.mxu0 %v10313_v23  ;;  %3053 = vmatprep.subr.bf16.mxu1 %v10316_v59  ;;  %13047 = vst [vmem:[#allocation142_spill] sm:$0xff] %v10325_v14  ;;  %13048 = vst [vmem:[#allocation143_spill] sm:$0xff] %v10328_v18  ;;  %v10331_v23 = vld [vmem:[#allocation12 + $0xe0] ss:$16 sps:$4 sm:$0xff]   ;;  %v10334_v59 = vld [vmem:[#allocation12 + $0xe8] ss:$16 sps:$4 sm:$0xff]  }
 0x672   :  { %13049 = vst [vmem:[#allocation144_spill] sm:$0xff] %v10331_v23  ;;  %13050 = vst [vmem:[#allocation145_spill] sm:$0xff] %v10334_v59 }
 0x674   :  { %3013 = vmatpush1.bf16.msra.mxu0 %v10319_v3  ;;  %3054 = vmatpush1.bf16.msra.mxu1 %v10322_v43  ;;  %v10337_v3 = vld [vmem:[#allocation8 + $0x4] ss:$16 sps:$4 sm:$0xff]   ;;  %v10340_v43 = vld [vmem:[#allocation8 + $0xc] ss:$16 sps:$4 sm:$0xff]  }
 0x675   :  { %3014 = vmatprep.subr.bf16.mxu0 %v10325_v14  ;;  %3055 = vmatprep.subr.bf16.mxu1 %v10328_v18  ;;  %13051 = vst [vmem:[#allocation146_spill] sm:$0xff] %v10337_v3  ;;  %13052 = vst [vmem:[#allocation147_spill] sm:$0xff] %v10340_v43 }
 0x678   :  { %3015 = vmatpush1.bf16.msra.mxu0 %v10331_v23  ;;  %3056 = vmatpush1.bf16.msra.mxu1 %v10334_v59 }
 0x679   :  { %3117 = vmatprep.subr.bf16.mxu0 %v10337_v3  ;;  %3158 = vmatprep.subr.bf16.mxu1 %v10340_v43 }
 0x70e   :  { %v2840_v14 = vpop.f32.mrb[64].mxu0  ;;  %v2881_v54 = vpop.f32.mrb[64].mxu1 }
 0x70f   :  { %v2841_v18 = vadd.f32 %v2840_v14, %v10129_v31  ;;  %v2882_v24 = vadd.f32 %v2881_v54, %v10131_v8  ;;  %v2842_v37 = vpop.f32.mrb[65].mxu0  ;;  %v2883_v23 = vpop.f32.mrb[65].mxu1 }
 0x710   :  { %v2843_v44 = vadd.f32 %v2842_v37, %v10133_v47  ;;  %v2884_v59 = vadd.f32 %v2883_v23, %v10135_v21  ;;  %v2844_v29 = vpop.f32.mrb[66].mxu0  ;;  %v2885_v30 = vpop.f32.mrb[66].mxu1 }
 0x711   :  { %v2888_v3 = vadd.f32 %v2841_v18, %v9533_v52  ;;  %v2845_v5 = vpop.f32.mrb[67].mxu0  ;;  %v2886_v1 = vpop.f32.mrb[67].mxu1  ;;  %v2890_v31 = vadd.f32 %v2882_v24, %v9545_v4 }
 0x712   :  { %v2889_v43 = vadd.f32 %v2843_v44, %v9536_v46  ;;  %v2891_v8 = vadd.f32 %v2884_v59, %v9548_v56 }
 0x713   :  { %v6637_v58 = vmul.f32 -1.442695, %v2888_v3  ;;  %v6639_v54 = vmul.f32 -1.442695, %v2890_v31 }
 0x714   :  { %v6638_v50 = vmul.f32 -1.442695, %v2889_v43 }
 0x715   :  { %7734 = vpow2.f32 %v6637_v58 }
 0x716   :  { %7736 = vpow2.f32 %v6638_v50 }
 0x717   :  { %7738 = vtanh.f32 %v2891_v8 }
 0x718   :  { %7740 = vpow2.f32 %v6639_v54 }
 0x71f   :  { %v7735_v47 = vpop.eup %7734 }
 0x720   :  { %v2901_v37 = vadd.f32 1.0, %v7735_v47  ;;  %v7737_v21 = vpop.eup %7736 }
 0x721   :  { %v2902_v30 = vadd.f32 1.0, %v7737_v21  ;;  %v7739_v1 = vpop.eup %7738 }
 0x722   :  { %7742 = vrcp.f32 %v2901_v37  ;;  %v7741_v5 = vpop.eup %7740 }
 0x723   :  { %7744 = vrcp.f32 %v2902_v30  ;;  %v2903_v58 = vadd.f32 1.0, %v7741_v5  ;;  %v10373_v5 = vld [vmem:[#allocation8 + $0x24] ss:$16 sps:$4 sm:$0xff]  }
 0x725   :  { %7746 = vrcp.f32 %v2903_v58  ;;  %v10387_v58 = vld [vmem:[#allocation8 + $0x44] ss:$16 sps:$4 sm:$0xff]  }
 0x72c   :  { %v7743_v29 = vpop.eup %7742 }
 0x72d   :  { %v2912_v18 = vmul.f32 %v7743_v29, %v7739_v1  ;;  %v7745_v43 = vpop.eup %7744  ;;  %v10370_v1 = vld [vmem:[#allocation8 + $0x8] ss:$16 sps:$4 sm:$0xff]   ;;  %v10376_v29 = vld [vmem:[#allocation8 + $0x2c] ss:$16 sps:$4 sm:$0xff]  }
 0x72e   :  { %v10351_v50 = vpop.f32.mrb[68].mxu0  ;;  %v10353_v24 = vpop.f32.mrb[68].mxu1  ;;  %v2911_v44 = vmul.f32 %v7745_v43, %v9867_v27  ;;  %v10367_v27 = vld [vmem:[#allocation8] ss:$16 sps:$4 sm:$0xff]   ;;  %v10384_v43 = vld [vmem:[#allocation8 + $0x28] ss:$16 sps:$4 sm:$0xff]  }
 0x72f   :  { %v10356_v59 = vpop.f32.mrb[69].mxu0  ;;  %v10358_v3 = vpop.f32.mrb[69].mxu1 }
 0x730   :  { %v2956_v14 = vpop.f32.mrb[70].mxu0  ;;  %v2997_v23 = vpop.f32.mrb[70].mxu1  ;;  %v10360_v31 = vadd.f32 %v2912_v18, %v2911_v44  ;;  %v10381_v18 = vld [vmem:[#allocation8 + $0x20] ss:$16 sps:$4 sm:$0xff]   ;;  %v10390_v44 = vld [vmem:[#allocation8 + $0x4c] ss:$16 sps:$4 sm:$0xff]  }
 0x731   :  { %v2957_v8 = vpop.f32.mrb[71].mxu0  ;;  %v2998_v54 = vpop.f32.mrb[71].mxu1  ;;  %v10393_v14 = vld [vmem:[#allocation8 + $0x40] ss:$16 sps:$4 sm:$0xff]   ;;  %v10396_v23 = vld [vmem:[#allocation8 + $0x48] ss:$16 sps:$4 sm:$0xff]  }
 0x732   :  { %7748 = vtanh.f32 %v10360_v31  ;;  %v7747_v47 = vpop.eup %7746  ;;  %13053 = vst [vmem:[#allocation148_spill] sm:$0xff] %v10396_v23  ;;  %v10399_v8 = vld [vmem:[#allocation8 + $0x64] ss:$16 sps:$4 sm:$0xff]   ;;  %v10402_v54 = vld [vmem:[#allocation8 + $0x6c] ss:$16 sps:$4 sm:$0xff]  }
 0x733   :  { %13054 = vst [vmem:[#allocation149_spill] sm:$0xff] %v10399_v8  ;;  %13055 = vst [vmem:[#allocation150_spill] sm:$0xff] %v10402_v54 }
 0x73c   :  { %v7749_v37 = vpop.eup %7748 }
 0x73d   :  { %v2915_v21 = vmul.f32 %v7749_v37, %v7747_v47  ;;  %v10405_v47 = vld [vmem:[#allocation8 + $0x60] ss:$16 sps:$4 sm:$0xff]   ;;  %v10408_v37 = vld [vmem:[#allocation8 + $0x68] ss:$16 sps:$4 sm:$0xff]  }
 0x73e   :  { %13056 = vst [vmem:[#allocation151_spill] sm:$0xff] %v10405_v47  ;;  %13057 = vst [vmem:[#allocation152_spill] sm:$0xff] %v10408_v37 }
 0x73f   :  { %v10363_v30 = vpack.c.bf16 %v2915_v21, %v2915_v21  ;;  %v10411_v21 = vld [vmem:[#allocation8 + $0x84] ss:$16 sps:$4 sm:$0xff]  }
 0x740   :  { %13058 = vst [vmem:[#allocation153_spill] sm:$0xff] %v10411_v21 }
 0x741   :  { %3033 = vmatmul.mubr.bf16.vlgmr.msra.gmra.mrb[72].mxu0 %v10363_v30  ;;  %3074 = vmatmul.mubr.bf16.vlgmr.msra.gmra.mrb[72].mxu1 %v10363_v30 }
 0x742   :  { %3118 = vmatpush1.bf16.msra.mxu0 %v10367_v27  ;;  %3159 = vmatpush1.bf16.msra.mxu1 %v10370_v1 }
 0x743   :  { %3119 = vmatprep.subr.bf16.mxu0 %v10373_v5  ;;  %3160 = vmatprep.subr.bf16.mxu1 %v10376_v29 }
 0x744   :  { %3149 = vmatprep.mubr.bf16.mxu0 %v12767_v63  ;;  %3190 = vmatprep.mubr.bf16.mxu1 %v12767_v63 }
 0x746   :  { %3120 = vmatpush1.bf16.msra.mxu0 %v10381_v18  ;;  %3161 = vmatpush1.bf16.msra.mxu1 %v10384_v43 }
 0x747   :  { %3121 = vmatprep.subr.bf16.mxu0 %v10387_v58  ;;  %3162 = vmatprep.subr.bf16.mxu1 %v10390_v44 }
 0x74a   :  { %3122 = vmatpush1.bf16.msra.mxu0 %v10393_v14  ;;  %3163 = vmatpush1.bf16.msra.mxu1 %v10396_v23  ;;  %v10414_v23 = vld [vmem:[#allocation8 + $0x8c] ss:$16 sps:$4 sm:$0xff]  }
 0x74b   :  { %3123 = vmatprep.subr.bf16.mxu0 %v10399_v8  ;;  %3164 = vmatprep.subr.bf16.mxu1 %v10402_v54  ;;  %13059 = vst [vmem:[#allocation154_spill] sm:$0xff] %v10414_v23  ;;  %v10417_v8 = vld [vmem:[#allocation8 + $0x80] ss:$16 sps:$4 sm:$0xff]   ;;  %v10420_v54 = vld [vmem:[#allocation8 + $0x88] ss:$16 sps:$4 sm:$0xff]  }
 0x74c   :  { %13060 = vst [vmem:[#allocation155_spill] sm:$0xff] %v10417_v8  ;;  %13061 = vst [vmem:[#allocation156_spill] sm:$0xff] %v10420_v54 }
 0x74e   :  { %3124 = vmatpush1.bf16.msra.mxu0 %v10405_v47  ;;  %3165 = vmatpush1.bf16.msra.mxu1 %v10408_v37  ;;  %v10423_v47 = vld [vmem:[#allocation8 + $0xa4] ss:$16 sps:$4 sm:$0xff]   ;;  %v10426_v37 = vld [vmem:[#allocation8 + $0xac] ss:$16 sps:$4 sm:$0xff]  }
 0x74f   :  { %3125 = vmatprep.subr.bf16.mxu0 %v10411_v21  ;;  %3166 = vmatprep.subr.bf16.mxu1 %v10414_v23  ;;  %13062 = vst [vmem:[#allocation157_spill] sm:$0xff] %v10423_v47  ;;  %13063 = vst [vmem:[#allocation158_spill] sm:$0xff] %v10426_v37  ;;  %v10429_v21 = vld [vmem:[#allocation8 + $0xa0] ss:$16 sps:$4 sm:$0xff]   ;;  %v10432_v23 = vld [vmem:[#allocation8 + $0xa8] ss:$16 sps:$4 sm:$0xff]  }
 0x750   :  { %13064 = vst [vmem:[#allocation159_spill] sm:$0xff] %v10429_v21  ;;  %13065 = vst [vmem:[#allocation160_spill] sm:$0xff] %v10432_v23 }
 0x752   :  { %3126 = vmatpush1.bf16.msra.mxu0 %v10417_v8  ;;  %3167 = vmatpush1.bf16.msra.mxu1 %v10420_v54  ;;  %v10435_v8 = vld [vmem:[#allocation8 + $0xc4] ss:$16 sps:$4 sm:$0xff]   ;;  %v10438_v54 = vld [vmem:[#allocation8 + $0xcc] ss:$16 sps:$4 sm:$0xff]  }
 0x753   :  { %3127 = vmatprep.subr.bf16.mxu0 %v10423_v47  ;;  %3168 = vmatprep.subr.bf16.mxu1 %v10426_v37  ;;  %13066 = vst [vmem:[#allocation161_spill] sm:$0xff] %v10435_v8  ;;  %13067 = vst [vmem:[#allocation58_spill] sm:$0xff] %v10438_v54  ;;  %v10441_v47 = vld [vmem:[#allocation8 + $0xc0] ss:$16 sps:$4 sm:$0xff]   ;;  %v10444_v37 = vld [vmem:[#allocation8 + $0xc8] ss:$16 sps:$4 sm:$0xff]  }
 0x756   :  { %3128 = vmatpush1.bf16.msra.mxu0 %v10429_v21  ;;  %3169 = vmatpush1.bf16.msra.mxu1 %v10432_v23  ;;  %v10447_v21 = vld [vmem:[#allocation8 + $0xe4] ss:$16 sps:$4 sm:$0xff]   ;;  %v10450_v23 = vld [vmem:[#allocation8 + $0xec] ss:$16 sps:$4 sm:$0xff]  }
 0x757   :  { %3129 = vmatprep.subr.bf16.mxu0 %v10435_v8  ;;  %3170 = vmatprep.subr.bf16.mxu1 %v10438_v54  ;;  %v10453_v8 = vld [vmem:[#allocation8 + $0xe0] ss:$16 sps:$4 sm:$0xff]   ;;  %v10456_v54 = vld [vmem:[#allocation8 + $0xe8] ss:$16 sps:$4 sm:$0xff]  }
 0x75a   :  { %3130 = vmatpush1.bf16.msra.mxu0 %v10441_v47  ;;  %3171 = vmatpush1.bf16.msra.mxu1 %v10444_v37 }
 0x75b   :  { %3131 = vmatprep.subr.bf16.mxu0 %v10447_v21  ;;  %3172 = vmatprep.subr.bf16.mxu1 %v10450_v23 }
 0x75e   :  { %3132 = vmatpush1.bf16.msra.mxu0 %v10453_v8  ;;  %3173 = vmatpush1.bf16.msra.mxu1 %v10456_v54 }
 0x75f   :  { %3228 = vmatprep.subr.bf16.mxu0 %v9906_v32  ;;  %3269 = vmatprep.subr.bf16.mxu1 %v9909_v38  ;;  %v13068_v32 = vld [vmem:[#allocation28_spill] sm:$0xff]  ;;  %v13069_v38 = vld [vmem:[#allocation29_spill] sm:$0xff] }
 0x761   :  { %3150 = vmatmul.mubr.bf16.vlgmr.msra.gmra.mrb[76].mxu0 %v10142_v53  ;;  %3191 = vmatmul.mubr.bf16.vlgmr.msra.gmra.mrb[76].mxu1 %v10142_v53  ;;  %v13100_v53 = vld [vmem:[#allocation84_spill] sm:$0xff] }
 0x762   :  { %3229 = vmatpush1.bf16.msra.mxu0 %v9914_v45  ;;  %3270 = vmatpush1.bf16.msra.mxu1 %v9917_v55  ;;  %v13070_v45 = vld [vmem:[#allocation30_spill] sm:$0xff]  ;;  %v13071_v55 = vld [vmem:[#allocation31_spill] sm:$0xff] }
 0x763   :  { %3230 = vmatprep.subr.bf16.mxu0 %v9920_v49  ;;  %3271 = vmatprep.subr.bf16.mxu1 %v9923_v0  ;;  %v13072_v49 = vld [vmem:[#allocation32_spill] sm:$0xff]  ;;  %v13073_v0 = vld [vmem:[#allocation33_spill] sm:$0xff] }
 0x764   :  { %3260 = vmatprep.mubr.bf16.mxu0 %v12767_v63  ;;  %3301 = vmatprep.mubr.bf16.mxu1 %v12767_v63 }
 0x766   :  { %3231 = vmatpush1.bf16.msra.mxu0 %v9928_v48  ;;  %3272 = vmatpush1.bf16.msra.mxu1 %v9931_v62  ;;  %v13074_v48 = vld [vmem:[#allocation34_spill] sm:$0xff]  ;;  %v13075_v62 = vld [vmem:[#allocation35_spill] sm:$0xff] }
 0x767   :  { %3232 = vmatprep.subr.bf16.mxu0 %v9934_v15  ;;  %3273 = vmatprep.subr.bf16.mxu1 %v9937_v39  ;;  %v13076_v15 = vld [vmem:[#allocation36_spill] sm:$0xff]  ;;  %v13077_v39 = vld [vmem:[#allocation37_spill] sm:$0xff] }
 0x76a   :  { %3233 = vmatpush1.bf16.msra.mxu0 %v9940_v60  ;;  %3274 = vmatpush1.bf16.msra.mxu1 %v9943_v40  ;;  %v13078_v60 = vld [vmem:[#allocation38_spill] sm:$0xff]  ;;  %v13079_v40 = vld [vmem:[#allocation39_spill] sm:$0xff] }
 0x76b   :  { %3234 = vmatprep.subr.bf16.mxu0 %v9946_v42  ;;  %3275 = vmatprep.subr.bf16.mxu1 %v9949_v33  ;;  %v13080_v42 = vld [vmem:[#allocation40_spill] sm:$0xff]  ;;  %v13081_v33 = vld [vmem:[#allocation41_spill] sm:$0xff] }
 0x76e   :  { %3235 = vmatpush1.bf16.msra.mxu0 %v9952_v34  ;;  %3276 = vmatpush1.bf16.msra.mxu1 %v9955_v57  ;;  %v13082_v34 = vld [vmem:[#allocation42_spill] sm:$0xff]  ;;  %v13083_v57 = vld [vmem:[#allocation43_spill] sm:$0xff] }
 0x76f   :  { %3236 = vmatprep.subr.bf16.mxu0 %v9958_v35  ;;  %3277 = vmatprep.subr.bf16.mxu1 %v9961_v9  ;;  %v13084_v35 = vld [vmem:[#allocation44_spill] sm:$0xff]  ;;  %v13085_v9 = vld [vmem:[#allocation45_spill] sm:$0xff] }
 0x772   :  { %3237 = vmatpush1.bf16.msra.mxu0 %v9964_v36  ;;  %3278 = vmatpush1.bf16.msra.mxu1 %v9967_v12  ;;  %v13086_v36 = vld [vmem:[#allocation46_spill] sm:$0xff]  ;;  %v13087_v12 = vld [vmem:[#allocation47_spill] sm:$0xff] }
 0x773   :  { %3238 = vmatprep.subr.bf16.mxu0 %v9970_v13  ;;  %3279 = vmatprep.subr.bf16.mxu1 %v9973_v17  ;;  %v13088_v13 = vld [vmem:[#allocation48_spill] sm:$0xff]  ;;  %v13089_v17 = vld [vmem:[#allocation49_spill] sm:$0xff] }
 0x776   :  { %3239 = vmatpush1.bf16.msra.mxu0 %v9976_v19  ;;  %3280 = vmatpush1.bf16.msra.mxu1 %v9979_v61  ;;  %v13090_v19 = vld [vmem:[#allocation50_spill] sm:$0xff]  ;;  %v13091_v61 = vld [vmem:[#allocation51_spill] sm:$0xff] }
 0x777   :  { %3240 = vmatprep.subr.bf16.mxu0 %v9982_v51  ;;  %3281 = vmatprep.subr.bf16.mxu1 %v9985_v16  ;;  %v13092_v51 = vld [vmem:[#allocation60_spill] sm:$0xff]  ;;  %v13093_v16 = vld [vmem:[#allocation63_spill] sm:$0xff] }
 0x77a   :  { %3241 = vmatpush1.bf16.msra.mxu0 %v9988_v22  ;;  %3282 = vmatpush1.bf16.msra.mxu1 %v9991_v25  ;;  %v13094_v22 = vld [vmem:[#allocation52_spill] sm:$0xff]  ;;  %v13095_v25 = vld [vmem:[#allocation53_spill] sm:$0xff] }
 0x77b   :  { %3242 = vmatprep.subr.bf16.mxu0 %v9994_v26  ;;  %3283 = vmatprep.subr.bf16.mxu1 %v9997_v28  ;;  %v13096_v26 = vld [vmem:[#allocation54_spill] sm:$0xff]  ;;  %v13097_v28 = vld [vmem:[#allocation55_spill] sm:$0xff] }
 0x77e   :  { %3243 = vmatpush1.bf16.msra.mxu0 %v10000_v10  ;;  %3284 = vmatpush1.bf16.msra.mxu1 %v10003_v7  ;;  %v13098_v10 = vld [vmem:[#allocation56_spill] sm:$0xff]  ;;  %v13099_v7 = vld [vmem:[#allocation57_spill] sm:$0xff] }
 0x77f   :  { %3310 = vmatprep.subr.bf16.mxu0 %v13068_v32  ;;  %3351 = vmatprep.subr.bf16.mxu1 %v13069_v38 }
 0x781   :  { %3261 = vmatmul.mubr.bf16.vlgmr.msra.gmra.mrb[80].mxu0 %v10363_v30  ;;  %3302 = vmatmul.mubr.bf16.vlgmr.msra.gmra.mrb[80].mxu1 %v10363_v30  ;;  %v13101_v30 = vld [vmem:[#allocation85_spill] sm:$0xff] }
 0x782   :  { %3311 = vmatpush1.bf16.msra.mxu0 %v13070_v45  ;;  %3352 = vmatpush1.bf16.msra.mxu1 %v13071_v55 }
 0x783   :  { %3312 = vmatprep.subr.bf16.mxu0 %v13072_v49  ;;  %3353 = vmatprep.subr.bf16.mxu1 %v13073_v0 }
 0x784   :  { %3342 = vmatprep.mubr.bf16.mxu0 %v12767_v63  ;;  %3383 = vmatprep.mubr.bf16.mxu1 %v12767_v63 }
 0x786   :  { %3313 = vmatpush1.bf16.msra.mxu0 %v13074_v48  ;;  %3354 = vmatpush1.bf16.msra.mxu1 %v13075_v62 }
 0x787   :  { %3314 = vmatprep.subr.bf16.mxu0 %v13076_v15  ;;  %3355 = vmatprep.subr.bf16.mxu1 %v13077_v39 }
 0x78a   :  { %3315 = vmatpush1.bf16.msra.mxu0 %v13078_v60  ;;  %3356 = vmatpush1.bf16.msra.mxu1 %v13079_v40  ;;  %v13102_v60 = vld [vmem:[#allocation25_spill] sm:$0xff] }
 0x78b   :  { %3316 = vmatprep.subr.bf16.mxu0 %v13080_v42  ;;  %3357 = vmatprep.subr.bf16.mxu1 %v13081_v33 }
 0x78e   :  { %3317 = vmatpush1.bf16.msra.mxu0 %v13082_v34  ;;  %3358 = vmatpush1.bf16.msra.mxu1 %v13083_v57  ;;  %v13103_v34 = vld [vmem:[#allocation26_spill] sm:$0xff] }
 0x78f   :  { %3318 = vmatprep.subr.bf16.mxu0 %v13084_v35  ;;  %3359 = vmatprep.subr.bf16.mxu1 %v13085_v9 }
 0x792   :  { %3319 = vmatpush1.bf16.msra.mxu0 %v13086_v36  ;;  %3360 = vmatpush1.bf16.msra.mxu1 %v13087_v12 }
 0x793   :  { %3320 = vmatprep.subr.bf16.mxu0 %v13088_v13  ;;  %3361 = vmatprep.subr.bf16.mxu1 %v13089_v17 }
 0x796   :  { %3321 = vmatpush1.bf16.msra.mxu0 %v13090_v19  ;;  %3362 = vmatpush1.bf16.msra.mxu1 %v13091_v61 }
 0x797   :  { %3322 = vmatprep.subr.bf16.mxu0 %v13092_v51  ;;  %3363 = vmatprep.subr.bf16.mxu1 %v13093_v16 }
 0x79a   :  { %3323 = vmatpush1.bf16.msra.mxu0 %v13094_v22  ;;  %3364 = vmatpush1.bf16.msra.mxu1 %v13095_v25  ;;  %v13105_v25 = vld [vmem:[#allocation64_spill] sm:$0xff] }
 0x79b   :  { %3324 = vmatprep.subr.bf16.mxu0 %v13096_v26  ;;  %3365 = vmatprep.subr.bf16.mxu1 %v13097_v28  ;;  %v13106_v28 = vld [vmem:[#allocation65_spill] sm:$0xff] }
 0x79e   :  { %3325 = vmatpush1.bf16.msra.mxu0 %v13098_v10  ;;  %3366 = vmatpush1.bf16.msra.mxu1 %v13099_v7 }
 0x79f   :  { %3422 = vmatprep.subr.bf16.mxu0 %v13100_v53  ;;  %3463 = vmatprep.subr.bf16.mxu1 %v13101_v30  ;;  %v13107_v30 = vld [vmem:[#allocation66_spill] sm:$0xff] }
 0x814   :  { %v3034_v32 = vpop.f32.mrb[72].mxu0  ;;  %v3075_v38 = vpop.f32.mrb[72].mxu1 }
 0x815   :  { %v3035_v45 = vadd.f32 %v3034_v32, %v10351_v50  ;;  %v10535_v55 = vadd.f32 %v3075_v38, %v10353_v24  ;;  %v3036_v49 = vpop.f32.mrb[73].mxu0  ;;  %v3077_v0 = vpop.f32.mrb[73].mxu1  ;;  %v13104_v50 = vld [vmem:[#allocation27_spill] sm:$0xff] }
 0x816   :  { %v3037_v48 = vadd.f32 %v3036_v49, %v10356_v59  ;;  %v3078_v62 = vadd.f32 %v3077_v0, %v10358_v3  ;;  %v3038_v15 = vpop.f32.mrb[74].mxu0  ;;  %v3079_v39 = vpop.f32.mrb[74].mxu1  ;;  %v13108_v38 = vld [vmem:[#allocation67_spill] sm:$0xff] }
 0x817   :  { %v3082_v40 = vadd.f32 %v3035_v45, %v13102_v60  ;;  %v3039_v42 = vpop.f32.mrb[75].mxu0  ;;  %v3080_v33 = vpop.f32.mrb[75].mxu1 }
 0x818   :  { %v3083_v57 = vadd.f32 %v3037_v48, %v13103_v34  ;;  %v3085_v24 = vadd.f32 %v3078_v62, %v13104_v50 }
 0x819   :  { %v6640_v35 = vmul.f32 -1.442695, %v3082_v40 }
 0x81a   :  { %v6641_v9 = vmul.f32 -1.442695, %v3083_v57 }
 0x81b   :  { %7750 = vpow2.f32 %v6640_v35 }
 0x81c   :  { %7752 = vpow2.f32 %v6641_v9 }
 0x81d   :  { %7754 = vtanh.f32 %v3085_v24 }
 0x825   :  { %v7751_v36 = vpop.eup %7750 }
 0x826   :  { %v3095_v12 = vadd.f32 1.0, %v7751_v36  ;;  %v7753_v13 = vpop.eup %7752 }
 0x827   :  { %v3096_v59 = vadd.f32 1.0, %v7753_v13  ;;  %v7755_v3 = vpop.eup %7754 }
 0x828   :  { %7756 = vrcp.f32 %v3095_v12 }
 0x829   :  { %7758 = vrcp.f32 %v3096_v59 }
 0x832   :  { %v7757_v17 = vpop.eup %7756 }
 0x833   :  { %v3106_v19 = vmul.f32 %v7757_v17, %v7755_v3  ;;  %v7759_v61 = vpop.eup %7758 }
 0x834   :  { %v3151_v51 = vpop.f32.mrb[76].mxu0  ;;  %v3192_v16 = vpop.f32.mrb[76].mxu1  ;;  %v3105_v22 = vmul.f32 %v7759_v61, %v10126_v6 }
 0x835   :  { %v3199_v26 = vadd.f32 %v3151_v51, %v13105_v25  ;;  %v3201_v10 = vadd.f32 %v3192_v16, %v13106_v28  ;;  %v3153_v7 = vpop.f32.mrb[77].mxu0  ;;  %v3194_v53 = vpop.f32.mrb[77].mxu1 }
 0x836   :  { %v3200_v32 = vadd.f32 %v3153_v7, %v13107_v30  ;;  %v3202_v45 = vadd.f32 %v3194_v53, %v13108_v38  ;;  %v3155_v49 = vpop.f32.mrb[78].mxu0  ;;  %v3196_v0 = vpop.f32.mrb[78].mxu1  ;;  %v10547_v48 = vadd.f32 %v3106_v19, %v3105_v22  ;;  %v13109_v38 = vld [vmem:[#allocation86_spill] sm:$0xff] }
 0x837   :  { %v6643_v62 = vmul.f32 -1.442695, %v3199_v26  ;;  %v3156_v15 = vpop.f32.mrb[79].mxu0  ;;  %v3197_v39 = vpop.f32.mrb[79].mxu1  ;;  %v6645_v6 = vmul.f32 -1.442695, %v3201_v10 }
 0x838   :  { %v6644_v40 = vmul.f32 -1.442695, %v3200_v32  ;;  %v13112_v49 = vld [vmem:[#allocation89_spill] sm:$0xff]  ;;  %v13113_v0 = vld [vmem:[#allocation90_spill] sm:$0xff] }
 0x839   :  { %7760 = vpow2.f32 %v6643_v62  ;;  %v13114_v62 = vld [vmem:[#allocation91_spill] sm:$0xff]  ;;  %v13117_v39 = vld [vmem:[#allocation94_spill] sm:$0xff] }
 0x83a   :  { %7762 = vpow2.f32 %v6644_v40  ;;  %v13118_v40 = vld [vmem:[#allocation95_spill] sm:$0xff] }
 0x83b   :  { %7764 = vtanh.f32 %v3202_v45  ;;  %v13110_v45 = vld [vmem:[#allocation87_spill] sm:$0xff] }
 0x83c   :  { %7766 = vpow2.f32 %v6645_v6 }
 0x843   :  { %v7761_v42 = vpop.eup %7760 }
 0x844   :  { %v3212_v33 = vadd.f32 1.0, %v7761_v42  ;;  %v7763_v57 = vpop.eup %7762  ;;  %v13119_v42 = vld [vmem:[#allocation96_spill] sm:$0xff] }
 0x845   :  { %v3213_v35 = vadd.f32 1.0, %v7763_v57  ;;  %v7765_v9 = vpop.eup %7764  ;;  %v13121_v57 = vld [vmem:[#allocation98_spill] sm:$0xff] }
 0x846   :  { %7768 = vrcp.f32 %v3212_v33  ;;  %v7767_v24 = vpop.eup %7766  ;;  %v13120_v33 = vld [vmem:[#allocation97_spill] sm:$0xff] }
 0x847   :  { %7770 = vrcp.f32 %v3213_v35  ;;  %v3214_v59 = vadd.f32 1.0, %v7767_v24  ;;  %v13122_v35 = vld [vmem:[#allocation99_spill] sm:$0xff]  ;;  %v13124_v24 = vld [vmem:[#allocation100_spill] sm:$0xff] }
 0x849   :  { %7772 = vrcp.f32 %v3214_v59  ;;  %v13128_v59 = vld [vmem:[#allocation104_spill] sm:$0xff] }
 0x850   :  { %v7769_v36 = vpop.eup %7768 }
 0x851   :  { %v3223_v12 = vmul.f32 %v7769_v36, %v7765_v9  ;;  %v7771_v13 = vpop.eup %7770  ;;  %v13123_v9 = vld [vmem:[#allocation101_spill] sm:$0xff]  ;;  %v13125_v36 = vld [vmem:[#allocation102_spill] sm:$0xff] }
 0x852   :  { %v3222_v3 = vmul.f32 %v7771_v13, %v10137_v20  ;;  %v3084_v20 = vadd.f32 %v10535_v55, %v9773_v41  ;;  %v13111_v55 = vld [vmem:[#allocation88_spill] sm:$0xff]  ;;  %v13127_v13 = vld [vmem:[#allocation105_spill] sm:$0xff] }
 0x853   :  { %v7773_v10 = vpop.eup %7772 }
 0x854   :  { %v10550_v17 = vpop.f32.mrb[80].mxu0  ;;  %v10552_v19 = vpop.f32.mrb[80].mxu1  ;;  %v10558_v16 = vadd.f32 %v3223_v12, %v3222_v3  ;;  %v6642_v7 = vmul.f32 -1.442695, %v3084_v20  ;;  %v13126_v12 = vld [vmem:[#allocation103_spill] sm:$0xff]  ;;  %v13129_v3 = vld [vmem:[#allocation106_spill] sm:$0xff] }
 0x855   :  { %v10554_v61 = vpop.f32.mrb[81].mxu0  ;;  %v10556_v51 = vpop.f32.mrb[81].mxu1  ;;  %v13132_v20 = vld [vmem:[#allocation108_spill] sm:$0xff] }
 0x856   :  { %v3266_v22 = vpop.f32.mrb[82].mxu0  ;;  %v3307_v25 = vpop.f32.mrb[82].mxu1  ;;  %7774 = vtanh.f32 %v10558_v16 }
 0x857   :  { %v3267_v26 = vpop.f32.mrb[83].mxu0  ;;  %v3308_v28 = vpop.f32.mrb[83].mxu1  ;;  %7776 = vpow2.f32 %v6642_v7  ;;  %v13130_v22 = vld [vmem:[#allocation107_spill] sm:$0xff] }
 0x858   :  { %7778 = vtanh.f32 %v10547_v48  ;;  %v13131_v28 = vld [vmem:[#allocation109_spill] sm:$0xff]  ;;  %v13134_v7 = vld [vmem:[#allocation111_spill] sm:$0xff] }
 0x860   :  { %v7775_v53 = vpop.eup %7774 }
 0x861   :  { %v3226_v30 = vmul.f32 %v7775_v53, %v7773_v10  ;;  %v7777_v15 = vpop.eup %7776  ;;  %v13133_v10 = vld [vmem:[#allocation110_spill] sm:$0xff] }
 0x862   :  { %v3097_v6 = vadd.f32 1.0, %v7777_v15  ;;  %v7779_v25 = vpop.eup %7778  ;;  %v13141_v15 = vld [vmem:[#allocation118_spill] sm:$0xff] }
 0x863   :  { %v10563_v32 = vpack.c.bf16 %v3226_v30, %v3226_v30  ;;  %v13135_v30 = vld [vmem:[#allocation113_spill] sm:$0xff] }
 0x864   :  { %7780 = vrcp.f32 %v3097_v6  ;;  %v13146_v6 = vld [vmem:[#allocation123_spill] sm:$0xff] }
 0x865   :  { %3343 = vmatmul.mubr.bf16.vlgmr.msra.gmra.mrb[84].mxu0 %v10563_v32  ;;  %3384 = vmatmul.mubr.bf16.vlgmr.msra.gmra.mrb[84].mxu1 %v10563_v32 }
 0x866   :  { %3423 = vmatpush1.bf16.msra.mxu0 %v10146_v2  ;;  %3464 = vmatpush1.bf16.msra.mxu1 %v10149_v11  ;;  %v13115_v2 = vld [vmem:[#allocation92_spill] sm:$0xff]  ;;  %v13116_v11 = vld [vmem:[#allocation93_spill] sm:$0xff] }
 0x867   :  { %3424 = vmatprep.subr.bf16.mxu0 %v13109_v38  ;;  %3465 = vmatprep.subr.bf16.mxu1 %v13110_v45  ;;  %v13136_v38 = vld [vmem:[#allocation112_spill] sm:$0xff] }
 0x868   :  { %3454 = vmatprep.mubr.bf16.mxu0 %v12767_v63  ;;  %3495 = vmatprep.mubr.bf16.mxu1 %v12767_v63 }
 0x86a   :  { %3425 = vmatpush1.bf16.msra.mxu0 %v13111_v55  ;;  %3466 = vmatpush1.bf16.msra.mxu1 %v13112_v49  ;;  %v13137_v55 = vld [vmem:[#allocation114_spill] sm:$0xff]  ;;  %v13138_v49 = vld [vmem:[#allocation115_spill] sm:$0xff] }
 0x86b   :  { %3426 = vmatprep.subr.bf16.mxu0 %v13113_v0  ;;  %3467 = vmatprep.subr.bf16.mxu1 %v13114_v62  ;;  %v13139_v0 = vld [vmem:[#allocation116_spill] sm:$0xff]  ;;  %v13140_v62 = vld [vmem:[#allocation117_spill] sm:$0xff] }
 0x86e   :  { %3427 = vmatpush1.bf16.msra.mxu0 %v13115_v2  ;;  %3468 = vmatpush1.bf16.msra.mxu1 %v13116_v11  ;;  %v7781_v26 = vpop.eup %7780  ;;  %v13142_v2 = vld [vmem:[#allocation119_spill] sm:$0xff]  ;;  %v13143_v11 = vld [vmem:[#allocation120_spill] sm:$0xff] }
 0x86f   :  { %3428 = vmatprep.subr.bf16.mxu0 %v13117_v39  ;;  %3469 = vmatprep.subr.bf16.mxu1 %v13118_v40  ;;  %v3109_v53 = vmul.f32 %v7781_v26, %v7779_v25  ;;  %v13144_v39 = vld [vmem:[#allocation121_spill] sm:$0xff]  ;;  %v13145_v40 = vld [vmem:[#allocation122_spill] sm:$0xff]  ;;  %v13159_v25 = vld [vmem:[#allocation136_spill] sm:$0xff] }
 0x870   :  { %v13160_v26 = vld [vmem:[#allocation137_spill] sm:$0xff] }
 0x871   :  { %v3421_v45 = vpack.c.bf16 %v3109_v53, %v3109_v53  ;;  %v13165_v53 = vld [vmem:[#allocation142_spill] sm:$0xff] }
 0x872   :  { %3429 = vmatpush1.bf16.msra.mxu0 %v13119_v42  ;;  %3470 = vmatpush1.bf16.msra.mxu1 %v13120_v33  ;;  %v13147_v42 = vld [vmem:[#allocation124_spill] sm:$0xff]  ;;  %v13148_v33 = vld [vmem:[#allocation125_spill] sm:$0xff] }
 0x873   :  { %3430 = vmatprep.subr.bf16.mxu0 %v13121_v57  ;;  %3471 = vmatprep.subr.bf16.mxu1 %v13122_v35  ;;  %v13149_v57 = vld [vmem:[#allocation126_spill] sm:$0xff]  ;;  %v13150_v35 = vld [vmem:[#allocation127_spill] sm:$0xff] }
 0x876   :  { %3431 = vmatpush1.bf16.msra.mxu0 %v13123_v9  ;;  %3472 = vmatpush1.bf16.msra.mxu1 %v13124_v24  ;;  %v13151_v9 = vld [vmem:[#allocation128_spill] sm:$0xff]  ;;  %v13152_v24 = vld [vmem:[#allocation129_spill] sm:$0xff] }
 0x877   :  { %3432 = vmatprep.subr.bf16.mxu0 %v13125_v36  ;;  %3473 = vmatprep.subr.bf16.mxu1 %v13126_v12  ;;  %v13153_v36 = vld [vmem:[#allocation130_spill] sm:$0xff]  ;;  %v13154_v12 = vld [vmem:[#allocation131_spill] sm:$0xff] }
 0x87a   :  { %3433 = vmatpush1.bf16.msra.mxu0 %v13127_v13  ;;  %3474 = vmatpush1.bf16.msra.mxu1 %v13128_v59  ;;  %v13155_v13 = vld [vmem:[#allocation132_spill] sm:$0xff]  ;;  %v13156_v59 = vld [vmem:[#allocation133_spill] sm:$0xff] }
 0x87b   :  { %3434 = vmatprep.subr.bf16.mxu0 %v13129_v3  ;;  %3475 = vmatprep.subr.bf16.mxu1 %v13130_v22  ;;  %v13157_v3 = vld [vmem:[#allocation134_spill] sm:$0xff]  ;;  %v13158_v22 = vld [vmem:[#allocation135_spill] sm:$0xff] }
 0x87e   :  { %3435 = vmatpush1.bf16.msra.mxu0 %v13131_v28  ;;  %3476 = vmatpush1.bf16.msra.mxu1 %v13132_v20  ;;  %v13161_v28 = vld [vmem:[#allocation138_spill] sm:$0xff]  ;;  %v13162_v20 = vld [vmem:[#allocation139_spill] sm:$0xff] }
 0x87f   :  { %3436 = vmatprep.subr.bf16.mxu0 %v13133_v10  ;;  %3477 = vmatprep.subr.bf16.mxu1 %v13134_v7  ;;  %v13163_v10 = vld [vmem:[#allocation140_spill] sm:$0xff]  ;;  %v13164_v7 = vld [vmem:[#allocation141_spill] sm:$0xff] }
 0x882   :  { %3437 = vmatpush1.bf16.msra.mxu0 %v13135_v30  ;;  %3478 = vmatpush1.bf16.msra.mxu1 %v13136_v38  ;;  %v13166_v30 = vld [vmem:[#allocation143_spill] sm:$0xff]  ;;  %v13167_v38 = vld [vmem:[#allocation144_spill] sm:$0xff] }
 0x883   :  { %3504 = vmatprep.subr.bf16.mxu0 %v13137_v55  ;;  %3545 = vmatprep.subr.bf16.mxu1 %v13138_v49  ;;  %v13169_v55 = vld [vmem:[#allocation146_spill] sm:$0xff]  ;;  %v13170_v49 = vld [vmem:[#allocation147_spill] sm:$0xff] }
 0x885   :  { %3455 = vmatmul.mubr.bf16.vlgmr.msra.gmra.mrb[88].mxu0 %v3421_v45  ;;  %3496 = vmatmul.mubr.bf16.vlgmr.msra.gmra.mrb[88].mxu1 %v3421_v45  ;;  %v13168_v45 = vld [vmem:[#allocation145_spill] sm:$0xff] }
 0x886   :  { %3505 = vmatpush1.bf16.msra.mxu0 %v13139_v0  ;;  %3546 = vmatpush1.bf16.msra.mxu1 %v13140_v62 }
 0x887   :  { %3506 = vmatprep.subr.bf16.mxu0 %v13141_v15  ;;  %3547 = vmatprep.subr.bf16.mxu1 %v13142_v2 }
 0x888   :  { %3536 = vmatprep.mubr.bf16.mxu0 %v12767_v63  ;;  %3577 = vmatprep.mubr.bf16.mxu1 %v12767_v63 }
 0x88a   :  { %3507 = vmatpush1.bf16.msra.mxu0 %v13143_v11  ;;  %3548 = vmatpush1.bf16.msra.mxu1 %v13144_v39 }
 0x88b   :  { %3508 = vmatprep.subr.bf16.mxu0 %v13145_v40  ;;  %3549 = vmatprep.subr.bf16.mxu1 %v13146_v6 }
 0x88e   :  { %3509 = vmatpush1.bf16.msra.mxu0 %v13147_v42  ;;  %3550 = vmatpush1.bf16.msra.mxu1 %v13148_v33 }
 0x88f   :  { %3510 = vmatprep.subr.bf16.mxu0 %v13149_v57  ;;  %3551 = vmatprep.subr.bf16.mxu1 %v13150_v35 }
 0x892   :  { %3511 = vmatpush1.bf16.msra.mxu0 %v13151_v9  ;;  %3552 = vmatpush1.bf16.msra.mxu1 %v13152_v24 }
 0x893   :  { %3512 = vmatprep.subr.bf16.mxu0 %v13153_v36  ;;  %3553 = vmatprep.subr.bf16.mxu1 %v13154_v12 }
 0x896   :  { %3513 = vmatpush1.bf16.msra.mxu0 %v13155_v13  ;;  %3554 = vmatpush1.bf16.msra.mxu1 %v13156_v59 }
 0x897   :  { %3514 = vmatprep.subr.bf16.mxu0 %v13157_v3  ;;  %3555 = vmatprep.subr.bf16.mxu1 %v13158_v22 }
 0x89a   :  { %3515 = vmatpush1.bf16.msra.mxu0 %v13159_v25  ;;  %3556 = vmatpush1.bf16.msra.mxu1 %v13160_v26 }
 0x89b   :  { %3516 = vmatprep.subr.bf16.mxu0 %v13161_v28  ;;  %3557 = vmatprep.subr.bf16.mxu1 %v13162_v20 }
 0x89e   :  { %3517 = vmatpush1.bf16.msra.mxu0 %v13163_v10  ;;  %3558 = vmatpush1.bf16.msra.mxu1 %v13164_v7 }
 0x89f   :  { %3518 = vmatprep.subr.bf16.mxu0 %v13165_v53  ;;  %3559 = vmatprep.subr.bf16.mxu1 %v13166_v30 }
 0x8a2   :  { %3519 = vmatpush1.bf16.msra.mxu0 %v13167_v38  ;;  %3560 = vmatpush1.bf16.msra.mxu1 %v13168_v45 }
 0x8a3   :  { %3621 = vmatprep.subr.bf16.mxu0 %v13169_v55  ;;  %3662 = vmatprep.subr.bf16.mxu1 %v13170_v49 }
 0x938   :  { %v3344_v0 = vpop.f32.mrb[84].mxu0  ;;  %v3385_v62 = vpop.f32.mrb[84].mxu1 }
 0x939   :  { %v3345_v15 = vadd.f32 %v3344_v0, %v10550_v17  ;;  %v3386_v2 = vadd.f32 %v3385_v62, %v10552_v19  ;;  %v3346_v11 = vpop.f32.mrb[85].mxu0  ;;  %v3387_v39 = vpop.f32.mrb[85].mxu1 }
 0x93a   :  { %v3347_v40 = vadd.f32 %v3346_v11, %v10554_v61  ;;  %v3388_v6 = vadd.f32 %v3387_v39, %v10556_v51  ;;  %v3348_v42 = vpop.f32.mrb[86].mxu0  ;;  %v3389_v33 = vpop.f32.mrb[86].mxu1 }
 0x93b   :  { %v3392_v57 = vadd.f32 %v3345_v15, %v9533_v52  ;;  %v3349_v35 = vpop.f32.mrb[87].mxu0  ;;  %v3390_v9 = vpop.f32.mrb[87].mxu1  ;;  %v3394_v17 = vadd.f32 %v3386_v2, %v9545_v4  ;;  %v13182_v42 = vld [vmem:[#allocation159_spill] sm:$0xff]  ;;  %v13183_v33 = vld [vmem:[#allocation160_spill] sm:$0xff] }
 0x93c   :  { %v3393_v24 = vadd.f32 %v3347_v40, %v9536_v46  ;;  %v3395_v19 = vadd.f32 %v3388_v6, %v9548_v56  ;;  %v13176_v6 = vld [vmem:[#allocation153_spill] sm:$0xff]  ;;  %v13185_v35 = vld [vmem:[#allocation58_spill] sm:$0xff] }
 0x93d   :  { %v6646_v36 = vmul.f32 -1.442695, %v3392_v57  ;;  %v6648_v13 = vmul.f32 -1.442695, %v3394_v17  ;;  %v13184_v57 = vld [vmem:[#allocation161_spill] sm:$0xff] }
 0x93e   :  { %v6647_v12 = vmul.f32 -1.442695, %v3393_v24  ;;  %v10692_v9 = vld [vmem:[#allocation11 + $0x4] ss:$16 sps:$4 sm:$0xff]   ;;  %v10695_v24 = vld [vmem:[#allocation11 + $0xc] ss:$16 sps:$4 sm:$0xff]  }
 0x93f   :  { %7782 = vpow2.f32 %v6646_v36  ;;  %v10723_v36 = vld [vmem:[#allocation11 + $0x4c] ss:$16 sps:$4 sm:$0xff]   ;;  %v10729_v17 = vld [vmem:[#allocation11 + $0x48] ss:$16 sps:$4 sm:$0xff]  }
 0x940   :  { %7784 = vpow2.f32 %v6647_v12  ;;  %v10726_v12 = vld [vmem:[#allocation11 + $0x40] ss:$16 sps:$4 sm:$0xff]  }
 0x941   :  { %7786 = vtanh.f32 %v3395_v19  ;;  %v10732_v19 = vld [vmem:[#allocation11 + $0x64] ss:$16 sps:$4 sm:$0xff]  }
 0x942   :  { %7788 = vpow2.f32 %v6648_v13  ;;  %v10735_v13 = vld [vmem:[#allocation11 + $0x6c] ss:$16 sps:$4 sm:$0xff]  }
 0x949   :  { %v7783_v61 = vpop.eup %7782 }
 0x94a   :  { %v3405_v59 = vadd.f32 1.0, %v7783_v61  ;;  %v7785_v51 = vpop.eup %7784  ;;  %v10738_v61 = vld [vmem:[#allocation11 + $0x60] ss:$16 sps:$4 sm:$0xff]  }
 0x94b   :  { %v3406_v3 = vadd.f32 1.0, %v7785_v51  ;;  %v7787_v22 = vpop.eup %7786  ;;  %v10744_v51 = vld [vmem:[#allocation11 + $0x84] ss:$16 sps:$4 sm:$0xff]  }
 0x94c   :  { %7790 = vrcp.f32 %v3405_v59  ;;  %v7789_v25 = vpop.eup %7788  ;;  %v10741_v59 = vld [vmem:[#allocation11 + $0x68] ss:$16 sps:$4 sm:$0xff]  }
 0x94d   :  { %7792 = vrcp.f32 %v3406_v3  ;;  %v3407_v10 = vadd.f32 1.0, %v7789_v25  ;;  %v10747_v3 = vld [vmem:[#allocation11 + $0x8c] ss:$16 sps:$4 sm:$0xff]   ;;  %v10753_v25 = vld [vmem:[#allocation11 + $0x88] ss:$16 sps:$4 sm:$0xff]  }
 0x94f   :  { %7794 = vrcp.f32 %v3407_v10  ;;  %v10765_v10 = vld [vmem:[#allocation11 + $0xa8] ss:$16 sps:$4 sm:$0xff]  }
 0x956   :  { %v7791_v26 = vpop.eup %7790 }
 0x957   :  { %v3416_v28 = vmul.f32 %v7791_v26, %v7787_v22  ;;  %v7793_v20 = vpop.eup %7792  ;;  %v10750_v22 = vld [vmem:[#allocation11 + $0x80] ss:$16 sps:$4 sm:$0xff]   ;;  %v10756_v26 = vld [vmem:[#allocation11 + $0xa4] ss:$16 sps:$4 sm:$0xff]  }
 0x958   :  { %v10644_v7 = vpop.f32.mrb[88].mxu0  ;;  %v10646_v53 = vpop.f32.mrb[88].mxu1  ;;  %v3415_v30 = vmul.f32 %v7793_v20, %v10360_v31  ;;  %v13171_v31 = vld [vmem:[#allocation148_spill] sm:$0xff] }
 0x959   :  { %v10649_v38 = vpop.f32.mrb[89].mxu0  ;;  %v10651_v45 = vpop.f32.mrb[89].mxu1  ;;  %v10762_v20 = vld [vmem:[#allocation11 + $0xa0] ss:$16 sps:$4 sm:$0xff]  }
 0x95a   :  { %v3460_v55 = vpop.f32.mrb[90].mxu0  ;;  %v3501_v49 = vpop.f32.mrb[90].mxu1  ;;  %v10653_v0 = vadd.f32 %v3416_v28, %v3415_v30  ;;  %v10759_v28 = vld [vmem:[#allocation11 + $0xac] ss:$16 sps:$4 sm:$0xff]   ;;  %v10768_v30 = vld [vmem:[#allocation11 + $0xc4] ss:$16 sps:$4 sm:$0xff]  }
 0x95b   :  { %v3461_v62 = vpop.f32.mrb[91].mxu0  ;;  %v3502_v15 = vpop.f32.mrb[91].mxu1  ;;  %v10771_v55 = vld [vmem:[#allocation11 + $0xcc] ss:$16 sps:$4 sm:$0xff]   ;;  %v10774_v49 = vld [vmem:[#allocation11 + $0xc0] ss:$16 sps:$4 sm:$0xff]  }
 0x95c   :  { %7796 = vtanh.f32 %v10653_v0  ;;  %v7795_v2 = vpop.eup %7794  ;;  %v10777_v62 = vld [vmem:[#allocation11 + $0xc8] ss:$16 sps:$4 sm:$0xff]   ;;  %v10780_v15 = vld [vmem:[#allocation11 + $0xe4] ss:$16 sps:$4 sm:$0xff]  }
 0x966   :  { %v7797_v11 = vpop.eup %7796 }
 0x967   :  { %v3419_v39 = vmul.f32 %v7797_v11, %v7795_v2  ;;  %v10783_v2 = vld [vmem:[#allocation11 + $0xec] ss:$16 sps:$4 sm:$0xff]   ;;  %v10786_v11 = vld [vmem:[#allocation11 + $0xe0] ss:$16 sps:$4 sm:$0xff]  }
 0x969   :  { %v10656_v40 = vpack.c.bf16 %v3419_v39, %v3419_v39  ;;  %v10789_v39 = vld [vmem:[#allocation11 + $0xe8] ss:$16 sps:$4 sm:$0xff]  }
 0x96b   :  { %3537 = vmatmul.mubr.bf16.vlgmr.msra.gmra.mrb[92].mxu0 %v10656_v40  ;;  %3578 = vmatmul.mubr.bf16.vlgmr.msra.gmra.mrb[92].mxu1 %v10656_v40 }
 0x96c   :  { %3622 = vmatpush1.bf16.msra.mxu0 %v10367_v27  ;;  %3663 = vmatpush1.bf16.msra.mxu1 %v10370_v1  ;;  %v13172_v27 = vld [vmem:[#allocation149_spill] sm:$0xff]  ;;  %v13173_v1 = vld [vmem:[#allocation150_spill] sm:$0xff] }
 0x96d   :  { %3623 = vmatprep.subr.bf16.mxu0 %v10373_v5  ;;  %3664 = vmatprep.subr.bf16.mxu1 %v10376_v29  ;;  %v13174_v5 = vld [vmem:[#allocation151_spill] sm:$0xff]  ;;  %v13175_v29 = vld [vmem:[#allocation152_spill] sm:$0xff] }
 0x96e   :  { %3653 = vmatprep.mubr.bf16.mxu0 %v12767_v63  ;;  %3694 = vmatprep.mubr.bf16.mxu1 %v12767_v63 }
 0x970   :  { %3624 = vmatpush1.bf16.msra.mxu0 %v10381_v18  ;;  %3665 = vmatpush1.bf16.msra.mxu1 %v10384_v43  ;;  %v13177_v18 = vld [vmem:[#allocation154_spill] sm:$0xff]  ;;  %v13178_v43 = vld [vmem:[#allocation155_spill] sm:$0xff] }
 0x971   :  { %3625 = vmatprep.subr.bf16.mxu0 %v10387_v58  ;;  %3666 = vmatprep.subr.bf16.mxu1 %v10390_v44  ;;  %v13179_v58 = vld [vmem:[#allocation156_spill] sm:$0xff]  ;;  %v13180_v44 = vld [vmem:[#allocation157_spill] sm:$0xff] }
 0x974   :  { %3626 = vmatpush1.bf16.msra.mxu0 %v10393_v14  ;;  %3667 = vmatpush1.bf16.msra.mxu1 %v13171_v31  ;;  %v13181_v14 = vld [vmem:[#allocation158_spill] sm:$0xff] }
 0x975   :  { %3627 = vmatprep.subr.bf16.mxu0 %v13172_v27  ;;  %3668 = vmatprep.subr.bf16.mxu1 %v13173_v1  ;;  %v10792_v31 = vld [vmem:[#allocation9 + $0x4] ss:$16 sps:$4 sm:$0xff]   ;;  %v10795_v27 = vld [vmem:[#allocation9 + $0xc] ss:$16 sps:$4 sm:$0xff]   ;;  %v10800_v1 = vld [vmem:[#allocation9] ss:$16 sps:$4 sm:$0xff]  }
 0x976   :  { %13186 = vst [vmem:[#allocation59_spill] sm:$0xff] %v10792_v31  ;;  %13187 = vst [vmem:[#allocation61_spill] sm:$0xff] %v10795_v27 }
 0x977   :  { %13188 = vst [vmem:[#allocation62_spill] sm:$0xff] %v10800_v1 }
 0x978   :  { %3628 = vmatpush1.bf16.msra.mxu0 %v13174_v5  ;;  %3669 = vmatpush1.bf16.msra.mxu1 %v13175_v29  ;;  %v10803_v5 = vld [vmem:[#allocation9 + $0x8] ss:$16 sps:$4 sm:$0xff]   ;;  %v10806_v29 = vld [vmem:[#allocation9 + $0x24] ss:$16 sps:$4 sm:$0xff]  }
 0x979   :  { %3629 = vmatprep.subr.bf16.mxu0 %v13176_v6  ;;  %3670 = vmatprep.subr.bf16.mxu1 %v13177_v18  ;;  %13189 = vst [vmem:[#allocation28_spill] sm:$0xff] %v10803_v5  ;;  %13190 = vst [vmem:[#allocation29_spill] sm:$0xff] %v10806_v29  ;;  %v10809_v6 = vld [vmem:[#allocation9 + $0x2c] ss:$16 sps:$4 sm:$0xff]   ;;  %v10817_v18 = vld [vmem:[#allocation9 + $0x28] ss:$16 sps:$4 sm:$0xff]  }
 0x97a   :  { %13191 = vst [vmem:[#allocation30_spill] sm:$0xff] %v10809_v6  ;;  %13193 = vst [vmem:[#allocation32_spill] sm:$0xff] %v10817_v18 }
 0x97c   :  { %3630 = vmatpush1.bf16.msra.mxu0 %v13178_v43  ;;  %3671 = vmatpush1.bf16.msra.mxu1 %v13179_v58  ;;  %v10820_v43 = vld [vmem:[#allocation9 + $0x44] ss:$16 sps:$4 sm:$0xff]   ;;  %v10823_v58 = vld [vmem:[#allocation9 + $0x4c] ss:$16 sps:$4 sm:$0xff]  }
 0x97d   :  { %3631 = vmatprep.subr.bf16.mxu0 %v13180_v44  ;;  %3672 = vmatprep.subr.bf16.mxu1 %v13181_v14  ;;  %13194 = vst [vmem:[#allocation33_spill] sm:$0xff] %v10820_v43  ;;  %13195 = vst [vmem:[#allocation34_spill] sm:$0xff] %v10823_v58  ;;  %v10826_v44 = vld [vmem:[#allocation9 + $0x40] ss:$16 sps:$4 sm:$0xff]   ;;  %v10829_v14 = vld [vmem:[#allocation9 + $0x48] ss:$16 sps:$4 sm:$0xff]  }
 0x97e   :  { %13196 = vst [vmem:[#allocation35_spill] sm:$0xff] %v10826_v44  ;;  %13197 = vst [vmem:[#allocation36_spill] sm:$0xff] %v10829_v14 }
 0x980   :  { %3632 = vmatpush1.bf16.msra.mxu0 %v13182_v42  ;;  %3673 = vmatpush1.bf16.msra.mxu1 %v13183_v33  ;;  %v10832_v42 = vld [vmem:[#allocation9 + $0x64] ss:$16 sps:$4 sm:$0xff]   ;;  %v10835_v33 = vld [vmem:[#allocation9 + $0x6c] ss:$16 sps:$4 sm:$0xff]  }
 0x981   :  { %3633 = vmatprep.subr.bf16.mxu0 %v13184_v57  ;;  %3674 = vmatprep.subr.bf16.mxu1 %v13185_v35  ;;  %13198 = vst [vmem:[#allocation37_spill] sm:$0xff] %v10832_v42  ;;  %13199 = vst [vmem:[#allocation38_spill] sm:$0xff] %v10835_v33  ;;  %v10838_v57 = vld [vmem:[#allocation9 + $0x60] ss:$16 sps:$4 sm:$0xff]   ;;  %v10841_v35 = vld [vmem:[#allocation9 + $0x68] ss:$16 sps:$4 sm:$0xff]  }
 0x982   :  { %13200 = vst [vmem:[#allocation39_spill] sm:$0xff] %v10838_v57  ;;  %13201 = vst [vmem:[#allocation40_spill] sm:$0xff] %v10841_v35 }
 0x984   :  { %3634 = vmatpush1.bf16.msra.mxu0 %v10441_v47  ;;  %3675 = vmatpush1.bf16.msra.mxu1 %v10444_v37  ;;  %v10700_v47 = vld [vmem:[#allocation11] ss:$16 sps:$4 sm:$0xff]  }
 0x985   :  { %3635 = vmatprep.subr.bf16.mxu0 %v10447_v21  ;;  %3676 = vmatprep.subr.bf16.mxu1 %v10450_v23  ;;  %v10703_v23 = vld [vmem:[#allocation11 + $0x8] ss:$16 sps:$4 sm:$0xff]   ;;  %v10714_v37 = vld [vmem:[#allocation11 + $0x20] ss:$16 sps:$4 sm:$0xff]  }
 0x986   :  { %v10717_v21 = vld [vmem:[#allocation11 + $0x28] ss:$16 sps:$4 sm:$0xff]  }
 0x988   :  { %3636 = vmatpush1.bf16.msra.mxu0 %v10453_v8  ;;  %3677 = vmatpush1.bf16.msra.mxu1 %v10456_v54  ;;  %v10706_v8 = vld [vmem:[#allocation11 + $0x24] ss:$16 sps:$4 sm:$0xff]   ;;  %v10709_v54 = vld [vmem:[#allocation11 + $0x2c] ss:$16 sps:$4 sm:$0xff]  }
 0x989   :  { %3732 = vmatprep.subr.bf16.mxu0 %v10692_v9  ;;  %3773 = vmatprep.subr.bf16.mxu1 %v10695_v24 }
 0x98b   :  { %3654 = vmatmul.mubr.bf16.vlgmr.msra.gmra.mrb[96].mxu0 %v10563_v32  ;;  %3695 = vmatmul.mubr.bf16.vlgmr.msra.gmra.mrb[96].mxu1 %v10563_v32  ;;  %v10720_v32 = vld [vmem:[#allocation11 + $0x44] ss:$16 sps:$4 sm:$0xff]  }
 0x98c   :  { %3733 = vmatpush1.bf16.msra.mxu0 %v10700_v47  ;;  %3774 = vmatpush1.bf16.msra.mxu1 %v10703_v23 }
 0x98d   :  { %3734 = vmatprep.subr.bf16.mxu0 %v10706_v8  ;;  %3775 = vmatprep.subr.bf16.mxu1 %v10709_v54 }
 0x98e   :  { %3764 = vmatprep.mubr.bf16.mxu0 %v12767_v63  ;;  %3805 = vmatprep.mubr.bf16.mxu1 %v12767_v63 }
 0x990   :  { %3735 = vmatpush1.bf16.msra.mxu0 %v10714_v37  ;;  %3776 = vmatpush1.bf16.msra.mxu1 %v10717_v21 }
 0x991   :  { %3736 = vmatprep.subr.bf16.mxu0 %v10720_v32  ;;  %3777 = vmatprep.subr.bf16.mxu1 %v10723_v36 }
 0x994   :  { %3737 = vmatpush1.bf16.msra.mxu0 %v10726_v12  ;;  %3778 = vmatpush1.bf16.msra.mxu1 %v10729_v17 }
 0x995   :  { %3738 = vmatprep.subr.bf16.mxu0 %v10732_v19  ;;  %3779 = vmatprep.subr.bf16.mxu1 %v10735_v13 }
 0x998   :  { %3739 = vmatpush1.bf16.msra.mxu0 %v10738_v61  ;;  %3780 = vmatpush1.bf16.msra.mxu1 %v10741_v59 }
 0x999   :  { %3740 = vmatprep.subr.bf16.mxu0 %v10744_v51  ;;  %3781 = vmatprep.subr.bf16.mxu1 %v10747_v3 }
 0x99c   :  { %3741 = vmatpush1.bf16.msra.mxu0 %v10750_v22  ;;  %3782 = vmatpush1.bf16.msra.mxu1 %v10753_v25 }
 0x99d   :  { %3742 = vmatprep.subr.bf16.mxu0 %v10756_v26  ;;  %3783 = vmatprep.subr.bf16.mxu1 %v10759_v28 }
 0x9a0   :  { %3743 = vmatpush1.bf16.msra.mxu0 %v10762_v20  ;;  %3784 = vmatpush1.bf16.msra.mxu1 %v10765_v10 }
 0x9a1   :  { %3744 = vmatprep.subr.bf16.mxu0 %v10768_v30  ;;  %3785 = vmatprep.subr.bf16.mxu1 %v10771_v55 }
 0x9a4   :  { %3745 = vmatpush1.bf16.msra.mxu0 %v10774_v49  ;;  %3786 = vmatpush1.bf16.msra.mxu1 %v10777_v62 }
 0x9a5   :  { %3746 = vmatprep.subr.bf16.mxu0 %v10780_v15  ;;  %3787 = vmatprep.subr.bf16.mxu1 %v10783_v2 }
 0x9a8   :  { %3747 = vmatpush1.bf16.msra.mxu0 %v10786_v11  ;;  %3788 = vmatpush1.bf16.msra.mxu1 %v10789_v39 }
 0x9a9   :  { %3814 = vmatprep.subr.bf16.mxu0 %v10792_v31  ;;  %3855 = vmatprep.subr.bf16.mxu1 %v10795_v27 }
 0x9ab   :  { %3765 = vmatmul.mubr.bf16.vlgmr.msra.gmra.mrb[100].mxu0 %v10656_v40  ;;  %3806 = vmatmul.mubr.bf16.vlgmr.msra.gmra.mrb[100].mxu1 %v10656_v40  ;;  %v10814_v40 = vld [vmem:[#allocation9 + $0x20] ss:$16 sps:$4 sm:$0xff]  }
 0x9ac   :  { %3815 = vmatpush1.bf16.msra.mxu0 %v10800_v1  ;;  %3856 = vmatpush1.bf16.msra.mxu1 %v10803_v5  ;;  %13192 = vst [vmem:[#allocation31_spill] sm:$0xff] %v10814_v40 }
 0x9ad   :  { %3816 = vmatprep.subr.bf16.mxu0 %v10806_v29  ;;  %3857 = vmatprep.subr.bf16.mxu1 %v10809_v6 }
 0x9ae   :  { %3846 = vmatprep.mubr.bf16.mxu0 %v12767_v63  ;;  %3887 = vmatprep.mubr.bf16.mxu1 %v12767_v63 }
 0x9b0   :  { %3817 = vmatpush1.bf16.msra.mxu0 %v10814_v40  ;;  %3858 = vmatpush1.bf16.msra.mxu1 %v10817_v18 }
 0x9b1   :  { %3818 = vmatprep.subr.bf16.mxu0 %v10820_v43  ;;  %3859 = vmatprep.subr.bf16.mxu1 %v10823_v58 }
 0x9b4   :  { %3819 = vmatpush1.bf16.msra.mxu0 %v10826_v44  ;;  %3860 = vmatpush1.bf16.msra.mxu1 %v10829_v14  ;;  %v10844_v44 = vld [vmem:[#allocation9 + $0x84] ss:$16 sps:$4 sm:$0xff]   ;;  %v10847_v14 = vld [vmem:[#allocation9 + $0x8c] ss:$16 sps:$4 sm:$0xff]  }
 0x9b5   :  { %3820 = vmatprep.subr.bf16.mxu0 %v10832_v42  ;;  %3861 = vmatprep.subr.bf16.mxu1 %v10835_v33  ;;  %13202 = vst [vmem:[#allocation41_spill] sm:$0xff] %v10844_v44  ;;  %13203 = vst [vmem:[#allocation42_spill] sm:$0xff] %v10847_v14  ;;  %v10850_v42 = vld [vmem:[#allocation9 + $0x80] ss:$16 sps:$4 sm:$0xff]   ;;  %v10853_v33 = vld [vmem:[#allocation9 + $0x88] ss:$16 sps:$4 sm:$0xff]  }
 0x9b6   :  { %13204 = vst [vmem:[#allocation43_spill] sm:$0xff] %v10850_v42  ;;  %13205 = vst [vmem:[#allocation44_spill] sm:$0xff] %v10853_v33 }
 0x9b8   :  { %3821 = vmatpush1.bf16.msra.mxu0 %v10838_v57  ;;  %3862 = vmatpush1.bf16.msra.mxu1 %v10841_v35  ;;  %v10856_v57 = vld [vmem:[#allocation9 + $0xa4] ss:$16 sps:$4 sm:$0xff]   ;;  %v10859_v35 = vld [vmem:[#allocation9 + $0xac] ss:$16 sps:$4 sm:$0xff]  }
 0x9b9   :  { %3822 = vmatprep.subr.bf16.mxu0 %v10844_v44  ;;  %3863 = vmatprep.subr.bf16.mxu1 %v10847_v14  ;;  %13206 = vst [vmem:[#allocation45_spill] sm:$0xff] %v10856_v57  ;;  %13207 = vst [vmem:[#allocation46_spill] sm:$0xff] %v10859_v35  ;;  %v10862_v44 = vld [vmem:[#allocation9 + $0xa0] ss:$16 sps:$4 sm:$0xff]   ;;  %v10865_v14 = vld [vmem:[#allocation9 + $0xa8] ss:$16 sps:$4 sm:$0xff]  }
 0x9ba   :  { %13208 = vst [vmem:[#allocation47_spill] sm:$0xff] %v10862_v44  ;;  %13209 = vst [vmem:[#allocation48_spill] sm:$0xff] %v10865_v14 }
 0x9bc   :  { %3823 = vmatpush1.bf16.msra.mxu0 %v10850_v42  ;;  %3864 = vmatpush1.bf16.msra.mxu1 %v10853_v33  ;;  %v10868_v42 = vld [vmem:[#allocation9 + $0xc4] ss:$16 sps:$4 sm:$0xff]   ;;  %v10871_v33 = vld [vmem:[#allocation9 + $0xcc] ss:$16 sps:$4 sm:$0xff]  }
 0x9bd   :  { %3824 = vmatprep.subr.bf16.mxu0 %v10856_v57  ;;  %3865 = vmatprep.subr.bf16.mxu1 %v10859_v35  ;;  %13210 = vst [vmem:[#allocation49_spill] sm:$0xff] %v10868_v42  ;;  %13211 = vst [vmem:[#allocation50_spill] sm:$0xff] %v10871_v33  ;;  %v10874_v57 = vld [vmem:[#allocation9 + $0xc0] ss:$16 sps:$4 sm:$0xff]   ;;  %v10877_v35 = vld [vmem:[#allocation9 + $0xc8] ss:$16 sps:$4 sm:$0xff]  }
 0x9be   :  { %13212 = vst [vmem:[#allocation51_spill] sm:$0xff] %v10874_v57  ;;  %13213 = vst [vmem:[#allocation60_spill] sm:$0xff] %v10877_v35 }
 0x9c0   :  { %3825 = vmatpush1.bf16.msra.mxu0 %v10862_v44  ;;  %3866 = vmatpush1.bf16.msra.mxu1 %v10865_v14  ;;  %v10880_v44 = vld [vmem:[#allocation9 + $0xe4] ss:$16 sps:$4 sm:$0xff]   ;;  %v10883_v14 = vld [vmem:[#allocation9 + $0xec] ss:$16 sps:$4 sm:$0xff]  }
 0x9c1   :  { %3826 = vmatprep.subr.bf16.mxu0 %v10868_v42  ;;  %3867 = vmatprep.subr.bf16.mxu1 %v10871_v33  ;;  %13214 = vst [vmem:[#allocation63_spill] sm:$0xff] %v10880_v44  ;;  %13215 = vst [vmem:[#allocation52_spill] sm:$0xff] %v10883_v14  ;;  %v10886_v42 = vld [vmem:[#allocation9 + $0xe0] ss:$16 sps:$4 sm:$0xff]   ;;  %v10889_v33 = vld [vmem:[#allocation9 + $0xe8] ss:$16 sps:$4 sm:$0xff]  }
 0x9c2   :  { %13216 = vst [vmem:[#allocation53_spill] sm:$0xff] %v10886_v42  ;;  %13217 = vst [vmem:[#allocation54_spill] sm:$0xff] %v10889_v33 }
 0x9c4   :  { %3827 = vmatpush1.bf16.msra.mxu0 %v10874_v57  ;;  %3868 = vmatpush1.bf16.msra.mxu1 %v10877_v35  ;;  %v10892_v57 = vld [vmem:[#allocation14 + $0x4] ss:$16 sps:$4 sm:$0xff]   ;;  %v10895_v35 = vld [vmem:[#allocation14 + $0xc] ss:$16 sps:$4 sm:$0xff]  }
 0x9c5   :  { %3828 = vmatprep.subr.bf16.mxu0 %v10880_v44  ;;  %3869 = vmatprep.subr.bf16.mxu1 %v10883_v14  ;;  %13218 = vst [vmem:[#allocation55_spill] sm:$0xff] %v10892_v57  ;;  %13219 = vst [vmem:[#allocation56_spill] sm:$0xff] %v10895_v35 }
 0x9c8   :  { %3829 = vmatpush1.bf16.msra.mxu0 %v10886_v42  ;;  %3870 = vmatpush1.bf16.msra.mxu1 %v10889_v33 }
 0x9c9   :  { %3926 = vmatprep.subr.bf16.mxu0 %v10892_v57  ;;  %3967 = vmatprep.subr.bf16.mxu1 %v10895_v35 }
 0xa3e   :  { %v3538_v44 = vpop.f32.mrb[92].mxu0  ;;  %v3579_v58 = vpop.f32.mrb[92].mxu1 }
 0xa3f   :  { %v3539_v14 = vadd.f32 %v3538_v44, %v10644_v7  ;;  %v10900_v43 = vadd.f32 %v3579_v58, %v10646_v53  ;;  %v3540_v42 = vpop.f32.mrb[93].mxu0  ;;  %v3581_v18 = vpop.f32.mrb[93].mxu1 }
 0xa40   :  { %v3541_v40 = vadd.f32 %v3540_v42, %v10649_v38  ;;  %v3582_v33 = vadd.f32 %v3581_v18, %v10651_v45  ;;  %v3542_v6 = vpop.f32.mrb[94].mxu0  ;;  %v3583_v29 = vpop.f32.mrb[94].mxu1 }
 0xa41   :  { %v3586_v57 = vadd.f32 %v3539_v14, %v13102_v60  ;;  %v3543_v5 = vpop.f32.mrb[95].mxu0  ;;  %v3584_v1 = vpop.f32.mrb[95].mxu1  ;;  %v13220_v14 = vld [vmem:[#allocation68_spill] sm:$0xff] }
 0xa42   :  { %v3587_v35 = vadd.f32 %v3541_v40, %v13103_v34  ;;  %v3589_v7 = vadd.f32 %v3582_v33, %v13104_v50 }
 0xa43   :  { %v6649_v27 = vmul.f32 -1.442695, %v3586_v57 }
 0xa44   :  { %v6650_v31 = vmul.f32 -1.442695, %v3587_v35  ;;  %v13222_v35 = vld [vmem:[#allocation70_spill] sm:$0xff] }
 0xa45   :  { %7798 = vpow2.f32 %v6649_v27 }
 0xa46   :  { %7800 = vpow2.f32 %v6650_v31  ;;  %v13221_v31 = vld [vmem:[#allocation69_spill] sm:$0xff] }
 0xa47   :  { %7802 = vtanh.f32 %v3589_v7  ;;  %v13223_v7 = vld [vmem:[#allocation71_spill] sm:$0xff] }
 0xa4f   :  { %v7799_v53 = vpop.eup %7798 }
 0xa50   :  { %v3599_v58 = vadd.f32 1.0, %v7799_v53  ;;  %v7801_v44 = vpop.eup %7800 }
 0xa51   :  { %v3600_v38 = vadd.f32 1.0, %v7801_v44  ;;  %v7803_v45 = vpop.eup %7802 }
 0xa52   :  { %7804 = vrcp.f32 %v3599_v58 }
 0xa53   :  { %7806 = vrcp.f32 %v3600_v38 }
 0xa5c   :  { %v7805_v29 = vpop.eup %7804 }
 0xa5d   :  { %v3610_v6 = vmul.f32 %v7805_v29, %v7803_v45  ;;  %v7807_v5 = vpop.eup %7806 }
 0xa5e   :  { %v3655_v1 = vpop.f32.mrb[96].mxu0  ;;  %v3696_v18 = vpop.f32.mrb[96].mxu1  ;;  %v3609_v40 = vmul.f32 %v7807_v5, %v10547_v48 }
 0xa5f   :  { %v3703_v27 = vadd.f32 %v3655_v1, %v13220_v14  ;;  %v3705_v42 = vadd.f32 %v3696_v18, %v13221_v31  ;;  %v3657_v33 = vpop.f32.mrb[97].mxu0  ;;  %v3698_v57 = vpop.f32.mrb[97].mxu1 }
 0xa60   :  { %v3704_v53 = vadd.f32 %v3657_v33, %v13222_v35  ;;  %v3706_v58 = vadd.f32 %v3698_v57, %v13223_v7  ;;  %v3659_v44 = vpop.f32.mrb[98].mxu0  ;;  %v3700_v38 = vpop.f32.mrb[98].mxu1  ;;  %v10912_v50 = vadd.f32 %v3610_v6, %v3609_v40 }
 0xa61   :  { %v6652_v45 = vmul.f32 -1.442695, %v3703_v27  ;;  %v3660_v29 = vpop.f32.mrb[99].mxu0  ;;  %v3701_v34 = vpop.f32.mrb[99].mxu1  ;;  %v6654_v48 = vmul.f32 -1.442695, %v3705_v42 }
 0xa62   :  { %v6653_v60 = vmul.f32 -1.442695, %v3704_v53 }
 0xa63   :  { %7808 = vpow2.f32 %v6652_v45 }
 0xa64   :  { %7810 = vpow2.f32 %v6653_v60 }
 0xa65   :  { %7812 = vtanh.f32 %v3706_v58 }
 0xa66   :  { %7814 = vpow2.f32 %v6654_v48 }
 0xa6d   :  { %v7809_v5 = vpop.eup %7808 }
 0xa6e   :  { %v3716_v1 = vadd.f32 1.0, %v7809_v5  ;;  %v7811_v18 = vpop.eup %7810 }
 0xa6f   :  { %v3717_v14 = vadd.f32 1.0, %v7811_v18  ;;  %v7813_v31 = vpop.eup %7812 }
 0xa70   :  { %7816 = vrcp.f32 %v3716_v1  ;;  %v7815_v33 = vpop.eup %7814 }
 0xa71   :  { %7818 = vrcp.f32 %v3717_v14  ;;  %v3718_v27 = vadd.f32 1.0, %v7815_v33  ;;  %v10932_v14 = vld [vmem:[#allocation14] ss:$16 sps:$4 sm:$0xff]   ;;  %v10941_v33 = vld [vmem:[#allocation14 + $0x2c] ss:$16 sps:$4 sm:$0xff]  }
 0xa72   :  { %13225 = vst [vmem:[#allocation84_spill] sm:$0xff] %v10941_v33 }
 0xa73   :  { %7820 = vrcp.f32 %v3718_v27  ;;  %v10955_v27 = vld [vmem:[#allocation14 + $0x4c] ss:$16 sps:$4 sm:$0xff]  }
 0xa74   :  { %13229 = vst [vmem:[#allocation66_spill] sm:$0xff] %v10955_v27 }
 0xa7a   :  { %v7817_v57 = vpop.eup %7816 }
 0xa7b   :  { %v3727_v6 = vmul.f32 %v7817_v57, %v7813_v31  ;;  %v7819_v40 = vpop.eup %7818  ;;  %v10935_v31 = vld [vmem:[#allocation14 + $0x8] ss:$16 sps:$4 sm:$0xff]   ;;  %v10946_v57 = vld [vmem:[#allocation14 + $0x20] ss:$16 sps:$4 sm:$0xff]  }
 0xa7c   :  { %v3726_v34 = vmul.f32 %v7819_v40, %v10558_v16  ;;  %v3588_v16 = vadd.f32 %v10900_v43, %v9773_v41  ;;  %v10938_v43 = vld [vmem:[#allocation14 + $0x24] ss:$16 sps:$4 sm:$0xff]   ;;  %13226 = vst [vmem:[#allocation85_spill] sm:$0xff] %v10946_v57 }
 0xa7d   :  { %v7821_v29 = vpop.eup %7820  ;;  %13224 = vst [vmem:[#allocation57_spill] sm:$0xff] %v10938_v43  ;;  %v10952_v40 = vld [vmem:[#allocation14 + $0x44] ss:$16 sps:$4 sm:$0xff]  }
 0xa7e   :  { %v10915_v35 = vpop.f32.mrb[100].mxu0  ;;  %v10917_v60 = vpop.f32.mrb[100].mxu1  ;;  %v10923_v7 = vadd.f32 %v3727_v6, %v3726_v34  ;;  %v6651_v48 = vmul.f32 -1.442695, %v3588_v16  ;;  %v10949_v6 = vld [vmem:[#allocation14 + $0x28] ss:$16 sps:$4 sm:$0xff]  }
 0xa7f   :  { %v10919_v42 = vpop.f32.mrb[101].mxu0  ;;  %v10921_v53 = vpop.f32.mrb[101].mxu1  ;;  %13227 = vst [vmem:[#allocation64_spill] sm:$0xff] %v10949_v6  ;;  %13228 = vst [vmem:[#allocation65_spill] sm:$0xff] %v10952_v40 }
 0xa80   :  { %v3770_v58 = vpop.f32.mrb[102].mxu0  ;;  %v3811_v44 = vpop.f32.mrb[102].mxu1  ;;  %7822 = vtanh.f32 %v10923_v7 }
 0xa81   :  { %v3771_v38 = vpop.f32.mrb[103].mxu0  ;;  %v3812_v45 = vpop.f32.mrb[103].mxu1  ;;  %7824 = vpow2.f32 %v6651_v48  ;;  %v10958_v58 = vld [vmem:[#allocation14 + $0x40] ss:$16 sps:$4 sm:$0xff]   ;;  %v10961_v44 = vld [vmem:[#allocation14 + $0x48] ss:$16 sps:$4 sm:$0xff]  }
 0xa82   :  { %13230 = vst [vmem:[#allocation67_spill] sm:$0xff] %v10958_v58  ;;  %13231 = vst [vmem:[#allocation86_spill] sm:$0xff] %v10961_v44  ;;  %v10964_v38 = vld [vmem:[#allocation14 + $0x64] ss:$16 sps:$4 sm:$0xff]   ;;  %v10967_v45 = vld [vmem:[#allocation14 + $0x6c] ss:$16 sps:$4 sm:$0xff]   ;;  %7826 = vtanh.f32 %v10912_v50 }
 0xa83   :  { %13232 = vst [vmem:[#allocation87_spill] sm:$0xff] %v10964_v38  ;;  %13233 = vst [vmem:[#allocation88_spill] sm:$0xff] %v10967_v45  ;;  %v10974_v48 = vld [vmem:[#allocation14 + $0x68] ss:$16 sps:$4 sm:$0xff]  }
 0xa84   :  { %13235 = vst [vmem:[#allocation90_spill] sm:$0xff] %v10974_v48 }
 0xa8a   :  { %v7823_v5 = vpop.eup %7822 }
 0xa8b   :  { %v3730_v1 = vmul.f32 %v7823_v5, %v7821_v29  ;;  %v7825_v34 = vpop.eup %7824  ;;  %v10971_v29 = vld [vmem:[#allocation14 + $0x60] ss:$16 sps:$4 sm:$0xff]   ;;  %v10977_v5 = vld [vmem:[#allocation14 + $0x84] ss:$16 sps:$4 sm:$0xff]  }
 0xa8c   :  { %v3601_v16 = vadd.f32 1.0, %v7825_v34  ;;  %13234 = vst [vmem:[#allocation89_spill] sm:$0xff] %v10971_v29  ;;  %13236 = vst [vmem:[#allocation91_spill] sm:$0xff] %v10977_v5  ;;  %v10983_v34 = vld [vmem:[#allocation14 + $0x80] ss:$16 sps:$4 sm:$0xff]  }
 0xa8d   :  { %v10928_v18 = vpack.c.bf16 %v3730_v1, %v3730_v1  ;;  %v10980_v1 = vld [vmem:[#allocation14 + $0x8c] ss:$16 sps:$4 sm:$0xff]   ;;  %13238 = vst [vmem:[#allocation93_spill] sm:$0xff] %v10983_v34 }
 0xa8e   :  { %13237 = vst [vmem:[#allocation92_spill] sm:$0xff] %v10980_v1  ;;  %7828 = vrcp.f32 %v3601_v16  ;;  %v10998_v16 = vld [vmem:[#allocation14 + $0xa8] ss:$16 sps:$4 sm:$0xff]  }
 0xa8f   :  { %3847 = vmatmul.mubr.bf16.vlgmr.msra.gmra.mrb[104].mxu0 %v10928_v18  ;;  %3888 = vmatmul.mubr.bf16.vlgmr.msra.gmra.mrb[104].mxu1 %v10928_v18  ;;  %13243 = vst [vmem:[#allocation98_spill] sm:$0xff] %v10998_v16 }
 0xa90   :  { %3927 = vmatpush1.bf16.msra.mxu0 %v10932_v14  ;;  %3968 = vmatpush1.bf16.msra.mxu1 %v10935_v31 }
 0xa91   :  { %3928 = vmatprep.subr.bf16.mxu0 %v10938_v43  ;;  %3969 = vmatprep.subr.bf16.mxu1 %v10941_v33 }
 0xa92   :  { %3958 = vmatprep.mubr.bf16.mxu0 %v12767_v63  ;;  %3999 = vmatprep.mubr.bf16.mxu1 %v12767_v63 }
 0xa94   :  { %3929 = vmatpush1.bf16.msra.mxu0 %v10946_v57  ;;  %3970 = vmatpush1.bf16.msra.mxu1 %v10949_v6 }
 0xa95   :  { %3930 = vmatprep.subr.bf16.mxu0 %v10952_v40  ;;  %3971 = vmatprep.subr.bf16.mxu1 %v10955_v27 }
 0xa98   :  { %3931 = vmatpush1.bf16.msra.mxu0 %v10958_v58  ;;  %3972 = vmatpush1.bf16.msra.mxu1 %v10961_v44  ;;  %v11022_v44 = vld [vmem:[#allocation14 + $0xe8] ss:$16 sps:$4 sm:$0xff]   ;;  %v11025_v58 = vld [vmem:[#allocation12 + $0x4] ss:$16 sps:$4 sm:$0xff]  }
 0xa99   :  { %3932 = vmatprep.subr.bf16.mxu0 %v10964_v38  ;;  %3973 = vmatprep.subr.bf16.mxu1 %v10967_v45  ;;  %v10986_v45 = vld [vmem:[#allocation14 + $0x88] ss:$16 sps:$4 sm:$0xff]   ;;  %v11007_v38 = vld [vmem:[#allocation14 + $0xc0] ss:$16 sps:$4 sm:$0xff]   ;;  %13251 = vst [vmem:[#allocation106_spill] sm:$0xff] %v11022_v44  ;;  %13252 = vst [vmem:[#allocation107_spill] sm:$0xff] %v11025_v58 }
 0xa9a   :  { %13239 = vst [vmem:[#allocation94_spill] sm:$0xff] %v10986_v45  ;;  %13246 = vst [vmem:[#allocation100_spill] sm:$0xff] %v11007_v38 }
 0xa9c   :  { %3933 = vmatpush1.bf16.msra.mxu0 %v10971_v29  ;;  %3974 = vmatpush1.bf16.msra.mxu1 %v10974_v48  ;;  %v10989_v29 = vld [vmem:[#allocation14 + $0xa4] ss:$16 sps:$4 sm:$0xff]   ;;  %v10992_v48 = vld [vmem:[#allocation14 + $0xac] ss:$16 sps:$4 sm:$0xff]  }
 0xa9d   :  { %3934 = vmatprep.subr.bf16.mxu0 %v10977_v5  ;;  %3975 = vmatprep.subr.bf16.mxu1 %v10980_v1  ;;  %13240 = vst [vmem:[#allocation95_spill] sm:$0xff] %v10989_v29  ;;  %13241 = vst [vmem:[#allocation96_spill] sm:$0xff] %v10992_v48  ;;  %v10995_v5 = vld [vmem:[#allocation14 + $0xa0] ss:$16 sps:$4 sm:$0xff]  }
 0xa9e   :  { %13242 = vst [vmem:[#allocation97_spill] sm:$0xff] %v10995_v5 }
 0xaa0   :  { %3935 = vmatpush1.bf16.msra.mxu0 %v10983_v34  ;;  %3976 = vmatpush1.bf16.msra.mxu1 %v10986_v45  ;;  %v11001_v34 = vld [vmem:[#allocation14 + $0xc4] ss:$16 sps:$4 sm:$0xff]   ;;  %v11004_v45 = vld [vmem:[#allocation14 + $0xcc] ss:$16 sps:$4 sm:$0xff]  }
 0xaa1   :  { %3936 = vmatprep.subr.bf16.mxu0 %v10989_v29  ;;  %3977 = vmatprep.subr.bf16.mxu1 %v10992_v48  ;;  %13244 = vst [vmem:[#allocation99_spill] sm:$0xff] %v11001_v34  ;;  %13245 = vst [vmem:[#allocation101_spill] sm:$0xff] %v11004_v45  ;;  %v7827_v29 = vpop.eup %7826  ;;  %v11010_v48 = vld [vmem:[#allocation14 + $0xc8] ss:$16 sps:$4 sm:$0xff]  }
 0xaa2   :  { %v7829_v1 = vpop.eup %7828  ;;  %13247 = vst [vmem:[#allocation102_spill] sm:$0xff] %v11010_v48 }
 0xaa4   :  { %3937 = vmatpush1.bf16.msra.mxu0 %v10995_v5  ;;  %3978 = vmatpush1.bf16.msra.mxu1 %v10998_v16  ;;  %v11013_v5 = vld [vmem:[#allocation14 + $0xe4] ss:$16 sps:$4 sm:$0xff]   ;;  %v11016_v16 = vld [vmem:[#allocation14 + $0xec] ss:$16 sps:$4 sm:$0xff]  }
 0xaa5   :  { %3938 = vmatprep.subr.bf16.mxu0 %v11001_v34  ;;  %3979 = vmatprep.subr.bf16.mxu1 %v11004_v45  ;;  %13248 = vst [vmem:[#allocation103_spill] sm:$0xff] %v11013_v5  ;;  %13249 = vst [vmem:[#allocation105_spill] sm:$0xff] %v11016_v16  ;;  %v3613_v34 = vmul.f32 %v7829_v1, %v7827_v29  ;;  %v11019_v45 = vld [vmem:[#allocation14 + $0xe0] ss:$16 sps:$4 sm:$0xff]   ;;  %v11034_v1 = vld [vmem:[#allocation12 + $0x8] ss:$16 sps:$4 sm:$0xff]  }
 0xaa6   :  { %13250 = vst [vmem:[#allocation104_spill] sm:$0xff] %v11019_v45  ;;  %v11031_v29 = vld [vmem:[#allocation12] ss:$16 sps:$4 sm:$0xff]   ;;  %13255 = vst [vmem:[#allocation110_spill] sm:$0xff] %v11034_v1 }
 0xaa7   :  { %13254 = vst [vmem:[#allocation108_spill] sm:$0xff] %v11031_v29 }
 0xaa8   :  { %3939 = vmatpush1.bf16.msra.mxu0 %v11007_v38  ;;  %3980 = vmatpush1.bf16.msra.mxu1 %v11010_v48  ;;  %v3925_v38 = vpack.c.bf16 %v3613_v34, %v3613_v34  ;;  %v11028_v48 = vld [vmem:[#allocation12 + $0xc] ss:$16 sps:$4 sm:$0xff]  }
 0xaa9   :  { %3940 = vmatprep.subr.bf16.mxu0 %v11013_v5  ;;  %3981 = vmatprep.subr.bf16.mxu1 %v11016_v16  ;;  %13253 = vst [vmem:[#allocation109_spill] sm:$0xff] %v11028_v48  ;;  %v11040_v34 = vld [vmem:[#allocation12 + $0x2c] ss:$16 sps:$4 sm:$0xff]  }
 0xaaa   :  { %13257 = vst [vmem:[#allocation113_spill] sm:$0xff] %v11040_v34 }
 0xaac   :  { %3941 = vmatpush1.bf16.msra.mxu0 %v11019_v45  ;;  %3982 = vmatpush1.bf16.msra.mxu1 %v11022_v44  ;;  %v11037_v44 = vld [vmem:[#allocation12 + $0x24] ss:$16 sps:$4 sm:$0xff]  }
 0xaad   :  { %4008 = vmatprep.subr.bf16.mxu0 %v11025_v58  ;;  %4049 = vmatprep.subr.bf16.mxu1 %v11028_v48  ;;  %13256 = vst [vmem:[#allocation111_spill] sm:$0xff] %v11037_v44  ;;  %v11060_v48 = vld [vmem:[#allocation12 + $0x48] ss:$16 sps:$4 sm:$0xff]  }
 0xaae   :  { %13263 = vst [vmem:[#allocation118_spill] sm:$0xff] %v11060_v48 }
 0xaaf   :  { %3959 = vmatmul.mubr.bf16.vlgmr.msra.gmra.mrb[108].mxu0 %v3925_v38  ;;  %4000 = vmatmul.mubr.bf16.vlgmr.msra.gmra.mrb[108].mxu1 %v3925_v38  ;;  %v11045_v38 = vld [vmem:[#allocation12 + $0x20] ss:$16 sps:$4 sm:$0xff]  }
 0xab0   :  { %4009 = vmatpush1.bf16.msra.mxu0 %v11031_v29  ;;  %4050 = vmatpush1.bf16.msra.mxu1 %v11034_v1  ;;  %13258 = vst [vmem:[#allocation112_spill] sm:$0xff] %v11045_v38  ;;  %v11048_v29 = vld [vmem:[#allocation12 + $0x28] ss:$16 sps:$4 sm:$0xff]   ;;  %v11051_v1 = vld [vmem:[#allocation12 + $0x44] ss:$16 sps:$4 sm:$0xff]  }
 0xab1   :  { %4010 = vmatprep.subr.bf16.mxu0 %v11037_v44  ;;  %4051 = vmatprep.subr.bf16.mxu1 %v11040_v34  ;;  %13259 = vst [vmem:[#allocation114_spill] sm:$0xff] %v11048_v29  ;;  %13260 = vst [vmem:[#allocation115_spill] sm:$0xff] %v11051_v1  ;;  %v11054_v44 = vld [vmem:[#allocation12 + $0x4c] ss:$16 sps:$4 sm:$0xff]   ;;  %v11057_v34 = vld [vmem:[#allocation12 + $0x40] ss:$16 sps:$4 sm:$0xff]  }
 0xab2   :  { %4040 = vmatprep.mubr.bf16.mxu0 %v12767_v63  ;;  %4081 = vmatprep.mubr.bf16.mxu1 %v12767_v63  ;;  %13261 = vst [vmem:[#allocation116_spill] sm:$0xff] %v11054_v44  ;;  %13262 = vst [vmem:[#allocation117_spill] sm:$0xff] %v11057_v34 }
 0xab4   :  { %4011 = vmatpush1.bf16.msra.mxu0 %v11045_v38  ;;  %4052 = vmatpush1.bf16.msra.mxu1 %v11048_v29  ;;  %v11063_v38 = vld [vmem:[#allocation12 + $0x64] ss:$16 sps:$4 sm:$0xff]   ;;  %v11066_v29 = vld [vmem:[#allocation12 + $0x6c] ss:$16 sps:$4 sm:$0xff]  }
 0xab5   :  { %4012 = vmatprep.subr.bf16.mxu0 %v11051_v1  ;;  %4053 = vmatprep.subr.bf16.mxu1 %v11054_v44  ;;  %13264 = vst [vmem:[#allocation119_spill] sm:$0xff] %v11063_v38  ;;  %13265 = vst [vmem:[#allocation120_spill] sm:$0xff] %v11066_v29  ;;  %v11069_v1 = vld [vmem:[#allocation12 + $0x60] ss:$16 sps:$4 sm:$0xff]   ;;  %v11072_v44 = vld [vmem:[#allocation12 + $0x68] ss:$16 sps:$4 sm:$0xff]  }
 0xab6   :  { %13266 = vst [vmem:[#allocation121_spill] sm:$0xff] %v11069_v1  ;;  %13267 = vst [vmem:[#allocation122_spill] sm:$0xff] %v11072_v44 }
 0xab8   :  { %4013 = vmatpush1.bf16.msra.mxu0 %v11057_v34  ;;  %4054 = vmatpush1.bf16.msra.mxu1 %v11060_v48  ;;  %v11075_v34 = vld [vmem:[#allocation12 + $0x84] ss:$16 sps:$4 sm:$0xff]   ;;  %v11078_v48 = vld [vmem:[#allocation12 + $0x8c] ss:$16 sps:$4 sm:$0xff]  }
 0xab9   :  { %4014 = vmatprep.subr.bf16.mxu0 %v11063_v38  ;;  %4055 = vmatprep.subr.bf16.mxu1 %v11066_v29  ;;  %13268 = vst [vmem:[#allocation123_spill] sm:$0xff] %v11075_v34  ;;  %13269 = vst [vmem:[#allocation124_spill] sm:$0xff] %v11078_v48  ;;  %v11081_v38 = vld [vmem:[#allocation12 + $0x80] ss:$16 sps:$4 sm:$0xff]   ;;  %v11084_v29 = vld [vmem:[#allocation12 + $0x88] ss:$16 sps:$4 sm:$0xff]  }
 0xaba   :  { %13270 = vst [vmem:[#allocation125_spill] sm:$0xff] %v11081_v38  ;;  %13271 = vst [vmem:[#allocation126_spill] sm:$0xff] %v11084_v29 }
 0xabc   :  { %4015 = vmatpush1.bf16.msra.mxu0 %v11069_v1  ;;  %4056 = vmatpush1.bf16.msra.mxu1 %v11072_v44  ;;  %v11087_v1 = vld [vmem:[#allocation12 + $0xa4] ss:$16 sps:$4 sm:$0xff]   ;;  %v11090_v44 = vld [vmem:[#allocation12 + $0xac] ss:$16 sps:$4 sm:$0xff]  }
 0xabd   :  { %4016 = vmatprep.subr.bf16.mxu0 %v11075_v34  ;;  %4057 = vmatprep.subr.bf16.mxu1 %v11078_v48  ;;  %13272 = vst [vmem:[#allocation127_spill] sm:$0xff] %v11087_v1  ;;  %13273 = vst [vmem:[#allocation128_spill] sm:$0xff] %v11090_v44  ;;  %v11093_v34 = vld [vmem:[#allocation12 + $0xa0] ss:$16 sps:$4 sm:$0xff]   ;;  %v11096_v48 = vld [vmem:[#allocation12 + $0xa8] ss:$16 sps:$4 sm:$0xff]  }
 0xabe   :  { %13274 = vst [vmem:[#allocation129_spill] sm:$0xff] %v11093_v34  ;;  %13275 = vst [vmem:[#allocation130_spill] sm:$0xff] %v11096_v48 }
 0xac0   :  { %4017 = vmatpush1.bf16.msra.mxu0 %v11081_v38  ;;  %4058 = vmatpush1.bf16.msra.mxu1 %v11084_v29  ;;  %v11099_v38 = vld [vmem:[#allocation12 + $0xc4] ss:$16 sps:$4 sm:$0xff]   ;;  %v11102_v29 = vld [vmem:[#allocation12 + $0xcc] ss:$16 sps:$4 sm:$0xff]  }
 0xac1   :  { %4018 = vmatprep.subr.bf16.mxu0 %v11087_v1  ;;  %4059 = vmatprep.subr.bf16.mxu1 %v11090_v44  ;;  %13276 = vst [vmem:[#allocation131_spill] sm:$0xff] %v11099_v38  ;;  %13277 = vst [vmem:[#allocation132_spill] sm:$0xff] %v11102_v29  ;;  %v11105_v1 = vld [vmem:[#allocation12 + $0xc0] ss:$16 sps:$4 sm:$0xff]   ;;  %v11108_v44 = vld [vmem:[#allocation12 + $0xc8] ss:$16 sps:$4 sm:$0xff]  }
 0xac2   :  { %13278 = vst [vmem:[#allocation133_spill] sm:$0xff] %v11105_v1  ;;  %13279 = vst [vmem:[#allocation134_spill] sm:$0xff] %v11108_v44 }
 0xac4   :  { %4019 = vmatpush1.bf16.msra.mxu0 %v11093_v34  ;;  %4060 = vmatpush1.bf16.msra.mxu1 %v11096_v48  ;;  %v11111_v34 = vld [vmem:[#allocation12 + $0xe4] ss:$16 sps:$4 sm:$0xff]   ;;  %v11114_v48 = vld [vmem:[#allocation12 + $0xec] ss:$16 sps:$4 sm:$0xff]  }
 0xac5   :  { %4020 = vmatprep.subr.bf16.mxu0 %v11099_v38  ;;  %4061 = vmatprep.subr.bf16.mxu1 %v11102_v29  ;;  %13280 = vst [vmem:[#allocation135_spill] sm:$0xff] %v11111_v34  ;;  %13281 = vst [vmem:[#allocation136_spill] sm:$0xff] %v11114_v48  ;;  %v11117_v38 = vld [vmem:[#allocation12 + $0xe0] ss:$16 sps:$4 sm:$0xff]   ;;  %v11120_v29 = vld [vmem:[#allocation12 + $0xe8] ss:$16 sps:$4 sm:$0xff]  }
 0xac6   :  { %13282 = vst [vmem:[#allocation137_spill] sm:$0xff] %v11117_v38  ;;  %13283 = vst [vmem:[#allocation138_spill] sm:$0xff] %v11120_v29 }
 0xac8   :  { %4021 = vmatpush1.bf16.msra.mxu0 %v11105_v1  ;;  %4062 = vmatpush1.bf16.msra.mxu1 %v11108_v44  ;;  %v11123_v1 = vld [vmem:[#allocation8 + $0x4] ss:$16 sps:$4 sm:$0xff]   ;;  %v11126_v44 = vld [vmem:[#allocation8 + $0xc] ss:$16 sps:$4 sm:$0xff]  }
 0xac9   :  { %4022 = vmatprep.subr.bf16.mxu0 %v11111_v34  ;;  %4063 = vmatprep.subr.bf16.mxu1 %v11114_v48  ;;  %13284 = vst [vmem:[#allocation139_spill] sm:$0xff] %v11123_v1  ;;  %13285 = vst [vmem:[#allocation140_spill] sm:$0xff] %v11126_v44 }
 0xacc   :  { %4023 = vmatpush1.bf16.msra.mxu0 %v11117_v38  ;;  %4064 = vmatpush1.bf16.msra.mxu1 %v11120_v29 }
 0xacd   :  { %4125 = vmatprep.subr.bf16.mxu0 %v11123_v1  ;;  %4166 = vmatprep.subr.bf16.mxu1 %v11126_v44 }
 0xb62   :  { %v3848_v34 = vpop.f32.mrb[104].mxu0  ;;  %v3889_v58 = vpop.f32.mrb[104].mxu1 }
 0xb63   :  { %v3849_v48 = vadd.f32 %v3848_v34, %v10915_v35  ;;  %v3890_v45 = vadd.f32 %v3889_v58, %v10917_v60  ;;  %v3850_v16 = vpop.f32.mrb[105].mxu0  ;;  %v3891_v38 = vpop.f32.mrb[105].mxu1 }
 0xb64   :  { %v3851_v5 = vadd.f32 %v3850_v16, %v10919_v42  ;;  %v3892_v29 = vadd.f32 %v3891_v38, %v10921_v53  ;;  %v3852_v27 = vpop.f32.mrb[106].mxu0  ;;  %v3893_v40 = vpop.f32.mrb[106].mxu1 }
 0xb65   :  { %v3896_v1 = vadd.f32 %v3849_v48, %v9533_v52  ;;  %v3853_v6 = vpop.f32.mrb[107].mxu0  ;;  %v3894_v57 = vpop.f32.mrb[107].mxu1  ;;  %v3898_v35 = vadd.f32 %v3890_v45, %v9545_v4 }
 0xb66   :  { %v3897_v44 = vadd.f32 %v3851_v5, %v9536_v46  ;;  %v3899_v60 = vadd.f32 %v3892_v29, %v9548_v56 }
 0xb67   :  { %v6655_v33 = vmul.f32 -1.442695, %v3896_v1  ;;  %v6657_v58 = vmul.f32 -1.442695, %v3898_v35 }
 0xb68   :  { %v6656_v43 = vmul.f32 -1.442695, %v3897_v44 }
 0xb69   :  { %7830 = vpow2.f32 %v6655_v33 }
 0xb6a   :  { %7832 = vpow2.f32 %v6656_v43 }
 0xb6b   :  { %7834 = vtanh.f32 %v3899_v60 }
 0xb6c   :  { %7836 = vpow2.f32 %v6657_v58 }
 0xb73   :  { %v7831_v42 = vpop.eup %7830 }
 0xb74   :  { %v3909_v16 = vadd.f32 1.0, %v7831_v42  ;;  %v7833_v53 = vpop.eup %7832 }
 0xb75   :  { %v3910_v40 = vadd.f32 1.0, %v7833_v53  ;;  %v7835_v57 = vpop.eup %7834 }
 0xb76   :  { %7838 = vrcp.f32 %v3909_v16  ;;  %v7837_v6 = vpop.eup %7836 }
 0xb77   :  { %7840 = vrcp.f32 %v3910_v40  ;;  %v3911_v33 = vadd.f32 1.0, %v7837_v6  ;;  %v11159_v6 = vld [vmem:[#allocation8 + $0x24] ss:$16 sps:$4 sm:$0xff]  }
 0xb79   :  { %7842 = vrcp.f32 %v3911_v33  ;;  %v11173_v33 = vld [vmem:[#allocation8 + $0x44] ss:$16 sps:$4 sm:$0xff]  }
 0xb80   :  { %v7839_v27 = vpop.eup %7838 }
 0xb81   :  { %v3920_v48 = vmul.f32 %v7839_v27, %v7835_v57  ;;  %v7841_v44 = vpop.eup %7840  ;;  %v11156_v57 = vld [vmem:[#allocation8 + $0x8] ss:$16 sps:$4 sm:$0xff]   ;;  %v11162_v27 = vld [vmem:[#allocation8 + $0x2c] ss:$16 sps:$4 sm:$0xff]  }
 0xb82   :  { %v11137_v43 = vpop.f32.mrb[108].mxu0  ;;  %v11139_v45 = vpop.f32.mrb[108].mxu1  ;;  %v3919_v5 = vmul.f32 %v7841_v44, %v10653_v0  ;;  %v11153_v0 = vld [vmem:[#allocation8] ss:$16 sps:$4 sm:$0xff]   ;;  %v11170_v44 = vld [vmem:[#allocation8 + $0x28] ss:$16 sps:$4 sm:$0xff]  }
 0xb83   :  { %v11142_v29 = vpop.f32.mrb[109].mxu0  ;;  %v11144_v1 = vpop.f32.mrb[109].mxu1 }
 0xb84   :  { %v3964_v34 = vpop.f32.mrb[110].mxu0  ;;  %v4005_v38 = vpop.f32.mrb[110].mxu1  ;;  %v11146_v35 = vadd.f32 %v3920_v48, %v3919_v5  ;;  %v11167_v48 = vld [vmem:[#allocation8 + $0x20] ss:$16 sps:$4 sm:$0xff]   ;;  %v11176_v5 = vld [vmem:[#allocation8 + $0x4c] ss:$16 sps:$4 sm:$0xff]  }
 0xb85   :  { %v3965_v60 = vpop.f32.mrb[111].mxu0  ;;  %v4006_v58 = vpop.f32.mrb[111].mxu1  ;;  %v11179_v34 = vld [vmem:[#allocation8 + $0x40] ss:$16 sps:$4 sm:$0xff]   ;;  %v11182_v38 = vld [vmem:[#allocation8 + $0x48] ss:$16 sps:$4 sm:$0xff]  }
 0xb86   :  { %7844 = vtanh.f32 %v11146_v35  ;;  %v7843_v42 = vpop.eup %7842  ;;  %13286 = vst [vmem:[#allocation141_spill] sm:$0xff] %v11182_v38  ;;  %v11185_v60 = vld [vmem:[#allocation8 + $0x64] ss:$16 sps:$4 sm:$0xff]   ;;  %v11188_v58 = vld [vmem:[#allocation8 + $0x6c] ss:$16 sps:$4 sm:$0xff]  }
 0xb87   :  { %13287 = vst [vmem:[#allocation142_spill] sm:$0xff] %v11185_v60  ;;  %13288 = vst [vmem:[#allocation143_spill] sm:$0xff] %v11188_v58 }
 0xb90   :  { %v7845_v16 = vpop.eup %7844 }
 0xb91   :  { %v3923_v53 = vmul.f32 %v7845_v16, %v7843_v42  ;;  %v11191_v42 = vld [vmem:[#allocation8 + $0x60] ss:$16 sps:$4 sm:$0xff]   ;;  %v11194_v16 = vld [vmem:[#allocation8 + $0x68] ss:$16 sps:$4 sm:$0xff]  }
 0xb92   :  { %13289 = vst [vmem:[#allocation144_spill] sm:$0xff] %v11191_v42  ;;  %13290 = vst [vmem:[#allocation145_spill] sm:$0xff] %v11194_v16 }
 0xb93   :  { %v11149_v40 = vpack.c.bf16 %v3923_v53, %v3923_v53  ;;  %v11197_v53 = vld [vmem:[#allocation8 + $0x84] ss:$16 sps:$4 sm:$0xff]  }
 0xb94   :  { %13291 = vst [vmem:[#allocation146_spill] sm:$0xff] %v11197_v53 }
 0xb95   :  { %4041 = vmatmul.mubr.bf16.vlgmr.msra.gmra.mrb[112].mxu0 %v11149_v40  ;;  %4082 = vmatmul.mubr.bf16.vlgmr.msra.gmra.mrb[112].mxu1 %v11149_v40 }
 0xb96   :  { %4126 = vmatpush1.bf16.msra.mxu0 %v11153_v0  ;;  %4167 = vmatpush1.bf16.msra.mxu1 %v11156_v57 }
 0xb97   :  { %4127 = vmatprep.subr.bf16.mxu0 %v11159_v6  ;;  %4168 = vmatprep.subr.bf16.mxu1 %v11162_v27 }
 0xb98   :  { %4157 = vmatprep.mubr.bf16.mxu0 %v12767_v63  ;;  %4198 = vmatprep.mubr.bf16.mxu1 %v12767_v63 }
 0xb9a   :  { %4128 = vmatpush1.bf16.msra.mxu0 %v11167_v48  ;;  %4169 = vmatpush1.bf16.msra.mxu1 %v11170_v44 }
 0xb9b   :  { %4129 = vmatprep.subr.bf16.mxu0 %v11173_v33  ;;  %4170 = vmatprep.subr.bf16.mxu1 %v11176_v5 }
 0xb9e   :  { %4130 = vmatpush1.bf16.msra.mxu0 %v11179_v34  ;;  %4171 = vmatpush1.bf16.msra.mxu1 %v11182_v38  ;;  %v11200_v38 = vld [vmem:[#allocation8 + $0x8c] ss:$16 sps:$4 sm:$0xff]  }
 0xb9f   :  { %4131 = vmatprep.subr.bf16.mxu0 %v11185_v60  ;;  %4172 = vmatprep.subr.bf16.mxu1 %v11188_v58  ;;  %13292 = vst [vmem:[#allocation147_spill] sm:$0xff] %v11200_v38  ;;  %v11203_v60 = vld [vmem:[#allocation8 + $0x80] ss:$16 sps:$4 sm:$0xff]   ;;  %v11206_v58 = vld [vmem:[#allocation8 + $0x88] ss:$16 sps:$4 sm:$0xff]  }
 0xba0   :  { %13293 = vst [vmem:[#allocation148_spill] sm:$0xff] %v11203_v60  ;;  %13294 = vst [vmem:[#allocation149_spill] sm:$0xff] %v11206_v58 }
 0xba2   :  { %4132 = vmatpush1.bf16.msra.mxu0 %v11191_v42  ;;  %4173 = vmatpush1.bf16.msra.mxu1 %v11194_v16  ;;  %v11209_v42 = vld [vmem:[#allocation8 + $0xa4] ss:$16 sps:$4 sm:$0xff]   ;;  %v11212_v16 = vld [vmem:[#allocation8 + $0xac] ss:$16 sps:$4 sm:$0xff]  }
 0xba3   :  { %4133 = vmatprep.subr.bf16.mxu0 %v11197_v53  ;;  %4174 = vmatprep.subr.bf16.mxu1 %v11200_v38  ;;  %13295 = vst [vmem:[#allocation150_spill] sm:$0xff] %v11209_v42  ;;  %13296 = vst [vmem:[#allocation151_spill] sm:$0xff] %v11212_v16  ;;  %v11215_v53 = vld [vmem:[#allocation8 + $0xa0] ss:$16 sps:$4 sm:$0xff]   ;;  %v11218_v38 = vld [vmem:[#allocation8 + $0xa8] ss:$16 sps:$4 sm:$0xff]  }
 0xba4   :  { %13297 = vst [vmem:[#allocation152_spill] sm:$0xff] %v11215_v53  ;;  %13298 = vst [vmem:[#allocation153_spill] sm:$0xff] %v11218_v38 }
 0xba6   :  { %4134 = vmatpush1.bf16.msra.mxu0 %v11203_v60  ;;  %4175 = vmatpush1.bf16.msra.mxu1 %v11206_v58  ;;  %v11221_v60 = vld [vmem:[#allocation8 + $0xc4] ss:$16 sps:$4 sm:$0xff]   ;;  %v11224_v58 = vld [vmem:[#allocation8 + $0xcc] ss:$16 sps:$4 sm:$0xff]  }
 0xba7   :  { %4135 = vmatprep.subr.bf16.mxu0 %v11209_v42  ;;  %4176 = vmatprep.subr.bf16.mxu1 %v11212_v16  ;;  %13299 = vst [vmem:[#allocation154_spill] sm:$0xff] %v11221_v60  ;;  %13300 = vst [vmem:[#allocation155_spill] sm:$0xff] %v11224_v58  ;;  %v11227_v42 = vld [vmem:[#allocation8 + $0xc0] ss:$16 sps:$4 sm:$0xff]   ;;  %v11230_v16 = vld [vmem:[#allocation8 + $0xc8] ss:$16 sps:$4 sm:$0xff]  }
 0xbaa   :  { %4136 = vmatpush1.bf16.msra.mxu0 %v11215_v53  ;;  %4177 = vmatpush1.bf16.msra.mxu1 %v11218_v38  ;;  %v11233_v53 = vld [vmem:[#allocation8 + $0xe4] ss:$16 sps:$4 sm:$0xff]   ;;  %v11236_v38 = vld [vmem:[#allocation8 + $0xec] ss:$16 sps:$4 sm:$0xff]  }
 0xbab   :  { %4137 = vmatprep.subr.bf16.mxu0 %v11221_v60  ;;  %4178 = vmatprep.subr.bf16.mxu1 %v11224_v58  ;;  %v11239_v60 = vld [vmem:[#allocation8 + $0xe0] ss:$16 sps:$4 sm:$0xff]   ;;  %v11242_v58 = vld [vmem:[#allocation8 + $0xe8] ss:$16 sps:$4 sm:$0xff]  }
 0xbae   :  { %4138 = vmatpush1.bf16.msra.mxu0 %v11227_v42  ;;  %4179 = vmatpush1.bf16.msra.mxu1 %v11230_v16 }
 0xbaf   :  { %4139 = vmatprep.subr.bf16.mxu0 %v11233_v53  ;;  %4180 = vmatprep.subr.bf16.mxu1 %v11236_v38 }
 0xbb2   :  { %4140 = vmatpush1.bf16.msra.mxu0 %v11239_v60  ;;  %4181 = vmatpush1.bf16.msra.mxu1 %v11242_v58 }
 0xbb3   :  { %4236 = vmatprep.subr.bf16.mxu0 %v10692_v9  ;;  %4277 = vmatprep.subr.bf16.mxu1 %v10695_v24  ;;  %v13301_v9 = vld [vmem:[#allocation59_spill] sm:$0xff]  ;;  %v13302_v24 = vld [vmem:[#allocation61_spill] sm:$0xff] }
 0xbb5   :  { %4158 = vmatmul.mubr.bf16.vlgmr.msra.gmra.mrb[116].mxu0 %v10928_v18  ;;  %4199 = vmatmul.mubr.bf16.vlgmr.msra.gmra.mrb[116].mxu1 %v10928_v18  ;;  %v13333_v18 = vld [vmem:[#allocation55_spill] sm:$0xff] }
 0xbb6   :  { %4237 = vmatpush1.bf16.msra.mxu0 %v10700_v47  ;;  %4278 = vmatpush1.bf16.msra.mxu1 %v10703_v23  ;;  %v13303_v47 = vld [vmem:[#allocation62_spill] sm:$0xff]  ;;  %v13304_v23 = vld [vmem:[#allocation28_spill] sm:$0xff] }
 0xbb7   :  { %4238 = vmatprep.subr.bf16.mxu0 %v10706_v8  ;;  %4279 = vmatprep.subr.bf16.mxu1 %v10709_v54  ;;  %v13305_v8 = vld [vmem:[#allocation29_spill] sm:$0xff]  ;;  %v13306_v54 = vld [vmem:[#allocation30_spill] sm:$0xff] }
 0xbb8   :  { %4268 = vmatprep.mubr.bf16.mxu0 %v12767_v63  ;;  %4309 = vmatprep.mubr.bf16.mxu1 %v12767_v63 }
 0xbba   :  { %4239 = vmatpush1.bf16.msra.mxu0 %v10714_v37  ;;  %4280 = vmatpush1.bf16.msra.mxu1 %v10717_v21  ;;  %v13307_v37 = vld [vmem:[#allocation31_spill] sm:$0xff]  ;;  %v13308_v21 = vld [vmem:[#allocation32_spill] sm:$0xff] }
 0xbbb   :  { %4240 = vmatprep.subr.bf16.mxu0 %v10720_v32  ;;  %4281 = vmatprep.subr.bf16.mxu1 %v10723_v36  ;;  %v13309_v32 = vld [vmem:[#allocation33_spill] sm:$0xff]  ;;  %v13310_v36 = vld [vmem:[#allocation34_spill] sm:$0xff] }
 0xbbe   :  { %4241 = vmatpush1.bf16.msra.mxu0 %v10726_v12  ;;  %4282 = vmatpush1.bf16.msra.mxu1 %v10729_v17  ;;  %v13311_v12 = vld [vmem:[#allocation35_spill] sm:$0xff]  ;;  %v13312_v17 = vld [vmem:[#allocation36_spill] sm:$0xff] }
 0xbbf   :  { %4242 = vmatprep.subr.bf16.mxu0 %v10732_v19  ;;  %4283 = vmatprep.subr.bf16.mxu1 %v10735_v13  ;;  %v13313_v19 = vld [vmem:[#allocation37_spill] sm:$0xff]  ;;  %v13314_v13 = vld [vmem:[#allocation38_spill] sm:$0xff] }
 0xbc2   :  { %4243 = vmatpush1.bf16.msra.mxu0 %v10738_v61  ;;  %4284 = vmatpush1.bf16.msra.mxu1 %v10741_v59  ;;  %v13315_v61 = vld [vmem:[#allocation39_spill] sm:$0xff]  ;;  %v13316_v59 = vld [vmem:[#allocation40_spill] sm:$0xff] }
 0xbc3   :  { %4244 = vmatprep.subr.bf16.mxu0 %v10744_v51  ;;  %4285 = vmatprep.subr.bf16.mxu1 %v10747_v3  ;;  %v13317_v51 = vld [vmem:[#allocation41_spill] sm:$0xff]  ;;  %v13318_v3 = vld [vmem:[#allocation42_spill] sm:$0xff] }
 0xbc6   :  { %4245 = vmatpush1.bf16.msra.mxu0 %v10750_v22  ;;  %4286 = vmatpush1.bf16.msra.mxu1 %v10753_v25  ;;  %v13319_v22 = vld [vmem:[#allocation43_spill] sm:$0xff]  ;;  %v13320_v25 = vld [vmem:[#allocation44_spill] sm:$0xff] }
 0xbc7   :  { %4246 = vmatprep.subr.bf16.mxu0 %v10756_v26  ;;  %4287 = vmatprep.subr.bf16.mxu1 %v10759_v28  ;;  %v13321_v26 = vld [vmem:[#allocation45_spill] sm:$0xff]  ;;  %v13322_v28 = vld [vmem:[#allocation46_spill] sm:$0xff] }
 0xbca   :  { %4247 = vmatpush1.bf16.msra.mxu0 %v10762_v20  ;;  %4288 = vmatpush1.bf16.msra.mxu1 %v10765_v10  ;;  %v13323_v20 = vld [vmem:[#allocation47_spill] sm:$0xff]  ;;  %v13324_v10 = vld [vmem:[#allocation48_spill] sm:$0xff] }
 0xbcb   :  { %4248 = vmatprep.subr.bf16.mxu0 %v10768_v30  ;;  %4289 = vmatprep.subr.bf16.mxu1 %v10771_v55  ;;  %v13325_v30 = vld [vmem:[#allocation49_spill] sm:$0xff]  ;;  %v13326_v55 = vld [vmem:[#allocation50_spill] sm:$0xff] }
 0xbce   :  { %4249 = vmatpush1.bf16.msra.mxu0 %v10774_v49  ;;  %4290 = vmatpush1.bf16.msra.mxu1 %v10777_v62  ;;  %v13327_v49 = vld [vmem:[#allocation51_spill] sm:$0xff]  ;;  %v13328_v62 = vld [vmem:[#allocation60_spill] sm:$0xff] }
 0xbcf   :  { %4250 = vmatprep.subr.bf16.mxu0 %v10780_v15  ;;  %4291 = vmatprep.subr.bf16.mxu1 %v10783_v2  ;;  %v13329_v15 = vld [vmem:[#allocation63_spill] sm:$0xff]  ;;  %v13330_v2 = vld [vmem:[#allocation52_spill] sm:$0xff] }
 0xbd2   :  { %4251 = vmatpush1.bf16.msra.mxu0 %v10786_v11  ;;  %4292 = vmatpush1.bf16.msra.mxu1 %v10789_v39  ;;  %v13331_v11 = vld [vmem:[#allocation53_spill] sm:$0xff]  ;;  %v13332_v39 = vld [vmem:[#allocation54_spill] sm:$0xff] }
 0xbd3   :  { %4318 = vmatprep.subr.bf16.mxu0 %v13301_v9  ;;  %4359 = vmatprep.subr.bf16.mxu1 %v13302_v24 }
 0xbd5   :  { %4269 = vmatmul.mubr.bf16.vlgmr.msra.gmra.mrb[120].mxu0 %v11149_v40  ;;  %4310 = vmatmul.mubr.bf16.vlgmr.msra.gmra.mrb[120].mxu1 %v11149_v40  ;;  %v13334_v40 = vld [vmem:[#allocation56_spill] sm:$0xff] }
 0xbd6   :  { %4319 = vmatpush1.bf16.msra.mxu0 %v13303_v47  ;;  %4360 = vmatpush1.bf16.msra.mxu1 %v13304_v23 }
 0xbd7   :  { %4320 = vmatprep.subr.bf16.mxu0 %v13305_v8  ;;  %4361 = vmatprep.subr.bf16.mxu1 %v13306_v54 }
 0xbd8   :  { %4350 = vmatprep.mubr.bf16.mxu0 %v12767_v63  ;;  %4391 = vmatprep.mubr.bf16.mxu1 %v12767_v63 }
 0xbda   :  { %4321 = vmatpush1.bf16.msra.mxu0 %v13307_v37  ;;  %4362 = vmatpush1.bf16.msra.mxu1 %v13308_v21 }
 0xbdb   :  { %4322 = vmatprep.subr.bf16.mxu0 %v13309_v32  ;;  %4363 = vmatprep.subr.bf16.mxu1 %v13310_v36 }
 0xbde   :  { %4323 = vmatpush1.bf16.msra.mxu0 %v13311_v12  ;;  %4364 = vmatpush1.bf16.msra.mxu1 %v13312_v17  ;;  %v13335_v12 = vld [vmem:[#allocation25_spill] sm:$0xff] }
 0xbdf   :  { %4324 = vmatprep.subr.bf16.mxu0 %v13313_v19  ;;  %4365 = vmatprep.subr.bf16.mxu1 %v13314_v13 }
 0xbe2   :  { %4325 = vmatpush1.bf16.msra.mxu0 %v13315_v61  ;;  %4366 = vmatpush1.bf16.msra.mxu1 %v13316_v59  ;;  %v13336_v61 = vld [vmem:[#allocation26_spill] sm:$0xff] }
 0xbe3   :  { %4326 = vmatprep.subr.bf16.mxu0 %v13317_v51  ;;  %4367 = vmatprep.subr.bf16.mxu1 %v13318_v3 }
 0xbe6   :  { %4327 = vmatpush1.bf16.msra.mxu0 %v13319_v22  ;;  %4368 = vmatpush1.bf16.msra.mxu1 %v13320_v25 }
 0xbe7   :  { %4328 = vmatprep.subr.bf16.mxu0 %v13321_v26  ;;  %4369 = vmatprep.subr.bf16.mxu1 %v13322_v28 }
 0xbea   :  { %4329 = vmatpush1.bf16.msra.mxu0 %v13323_v20  ;;  %4370 = vmatpush1.bf16.msra.mxu1 %v13324_v10 }
 0xbeb   :  { %4330 = vmatprep.subr.bf16.mxu0 %v13325_v30  ;;  %4371 = vmatprep.subr.bf16.mxu1 %v13326_v55 }
 0xbee   :  { %4331 = vmatpush1.bf16.msra.mxu0 %v13327_v49  ;;  %4372 = vmatpush1.bf16.msra.mxu1 %v13328_v62  ;;  %v13338_v62 = vld [vmem:[#allocation72_spill] sm:$0xff] }
 0xbef   :  { %4332 = vmatprep.subr.bf16.mxu0 %v13329_v15  ;;  %4373 = vmatprep.subr.bf16.mxu1 %v13330_v2  ;;  %v13339_v2 = vld [vmem:[#allocation73_spill] sm:$0xff] }
 0xbf2   :  { %4333 = vmatpush1.bf16.msra.mxu0 %v13331_v11  ;;  %4374 = vmatpush1.bf16.msra.mxu1 %v13332_v39 }
 0xbf3   :  { %4430 = vmatprep.subr.bf16.mxu0 %v13333_v18  ;;  %4471 = vmatprep.subr.bf16.mxu1 %v13334_v40  ;;  %v13340_v40 = vld [vmem:[#allocation74_spill] sm:$0xff] }
 0xc68   :  { %v4042_v9 = vpop.f32.mrb[112].mxu0  ;;  %v4083_v24 = vpop.f32.mrb[112].mxu1 }
 0xc69   :  { %v4043_v47 = vadd.f32 %v4042_v9, %v11137_v43  ;;  %v11321_v23 = vadd.f32 %v4083_v24, %v11139_v45  ;;  %v4044_v8 = vpop.f32.mrb[113].mxu0  ;;  %v4085_v54 = vpop.f32.mrb[113].mxu1  ;;  %v13337_v43 = vld [vmem:[#allocation27_spill] sm:$0xff] }
 0xc6a   :  { %v4045_v37 = vadd.f32 %v4044_v8, %v11142_v29  ;;  %v4086_v21 = vadd.f32 %v4085_v54, %v11144_v1  ;;  %v4046_v32 = vpop.f32.mrb[114].mxu0  ;;  %v4087_v36 = vpop.f32.mrb[114].mxu1  ;;  %v13341_v24 = vld [vmem:[#allocation75_spill] sm:$0xff] }
 0xc6b   :  { %v4090_v17 = vadd.f32 %v4043_v47, %v13335_v12  ;;  %v4047_v19 = vpop.f32.mrb[115].mxu0  ;;  %v4088_v13 = vpop.f32.mrb[115].mxu1 }
 0xc6c   :  { %v4091_v59 = vadd.f32 %v4045_v37, %v13336_v61  ;;  %v4093_v45 = vadd.f32 %v4086_v21, %v13337_v43 }
 0xc6d   :  { %v6658_v51 = vmul.f32 -1.442695, %v4090_v17 }
 0xc6e   :  { %v6659_v3 = vmul.f32 -1.442695, %v4091_v59 }
 0xc6f   :  { %7846 = vpow2.f32 %v6658_v51 }
 0xc70   :  { %7848 = vpow2.f32 %v6659_v3 }
 0xc71   :  { %7850 = vtanh.f32 %v4093_v45 }
 0xc79   :  { %v7847_v22 = vpop.eup %7846 }
 0xc7a   :  { %v4103_v25 = vadd.f32 1.0, %v7847_v22  ;;  %v7849_v26 = vpop.eup %7848 }
 0xc7b   :  { %v4104_v29 = vadd.f32 1.0, %v7849_v26  ;;  %v7851_v1 = vpop.eup %7850 }
 0xc7c   :  { %7852 = vrcp.f32 %v4103_v25 }
 0xc7d   :  { %7854 = vrcp.f32 %v4104_v29 }
 0xc86   :  { %v7853_v28 = vpop.eup %7852 }
 0xc87   :  { %v4114_v20 = vmul.f32 %v7853_v28, %v7851_v1  ;;  %v7855_v10 = vpop.eup %7854 }
 0xc88   :  { %v4159_v30 = vpop.f32.mrb[116].mxu0  ;;  %v4200_v55 = vpop.f32.mrb[116].mxu1  ;;  %v4113_v49 = vmul.f32 %v7855_v10, %v10912_v50 }
 0xc89   :  { %v4207_v15 = vadd.f32 %v4159_v30, %v13338_v62  ;;  %v4209_v11 = vadd.f32 %v4200_v55, %v13339_v2  ;;  %v4161_v39 = vpop.f32.mrb[117].mxu0  ;;  %v4202_v18 = vpop.f32.mrb[117].mxu1 }
 0xc8a   :  { %v4208_v9 = vadd.f32 %v4161_v39, %v13340_v40  ;;  %v4210_v47 = vadd.f32 %v4202_v18, %v13341_v24  ;;  %v4163_v8 = vpop.f32.mrb[118].mxu0  ;;  %v4204_v54 = vpop.f32.mrb[118].mxu1  ;;  %v11333_v37 = vadd.f32 %v4114_v20, %v4113_v49  ;;  %v13342_v24 = vld [vmem:[#allocation57_spill] sm:$0xff] }
 0xc8b   :  { %v6661_v21 = vmul.f32 -1.442695, %v4207_v15  ;;  %v4164_v32 = vpop.f32.mrb[119].mxu0  ;;  %v4205_v36 = vpop.f32.mrb[119].mxu1  ;;  %v6663_v50 = vmul.f32 -1.442695, %v4209_v11 }
 0xc8c   :  { %v6662_v17 = vmul.f32 -1.442695, %v4208_v9  ;;  %v13345_v8 = vld [vmem:[#allocation64_spill] sm:$0xff]  ;;  %v13346_v54 = vld [vmem:[#allocation65_spill] sm:$0xff]  ;;  %v13350_v36 = vld [vmem:[#allocation87_spill] sm:$0xff] }
 0xc8d   :  { %7856 = vpow2.f32 %v6661_v21  ;;  %v13347_v21 = vld [vmem:[#allocation66_spill] sm:$0xff] }
 0xc8e   :  { %7858 = vpow2.f32 %v6662_v17  ;;  %v13351_v17 = vld [vmem:[#allocation88_spill] sm:$0xff] }
 0xc8f   :  { %7860 = vtanh.f32 %v4210_v47  ;;  %v13343_v47 = vld [vmem:[#allocation84_spill] sm:$0xff] }
 0xc90   :  { %7862 = vpow2.f32 %v6663_v50 }
 0xc97   :  { %v7857_v19 = vpop.eup %7856 }
 0xc98   :  { %v4220_v13 = vadd.f32 1.0, %v7857_v19  ;;  %v7859_v59 = vpop.eup %7858  ;;  %v13352_v19 = vld [vmem:[#allocation89_spill] sm:$0xff] }
 0xc99   :  { %v4221_v51 = vadd.f32 1.0, %v7859_v59  ;;  %v7861_v3 = vpop.eup %7860  ;;  %v13354_v59 = vld [vmem:[#allocation91_spill] sm:$0xff] }
 0xc9a   :  { %7864 = vrcp.f32 %v4220_v13  ;;  %v7863_v45 = vpop.eup %7862  ;;  %v13353_v13 = vld [vmem:[#allocation90_spill] sm:$0xff] }
 0xc9b   :  { %7866 = vrcp.f32 %v4221_v51  ;;  %v4222_v29 = vadd.f32 1.0, %v7863_v45  ;;  %v13355_v51 = vld [vmem:[#allocation92_spill] sm:$0xff]  ;;  %v13357_v45 = vld [vmem:[#allocation94_spill] sm:$0xff] }
 0xc9d   :  { %7868 = vrcp.f32 %v4222_v29  ;;  %v13361_v29 = vld [vmem:[#allocation98_spill] sm:$0xff] }
 0xca4   :  { %v7865_v22 = vpop.eup %7864 }
 0xca5   :  { %v4231_v25 = vmul.f32 %v7865_v22, %v7861_v3  ;;  %v7867_v26 = vpop.eup %7866  ;;  %v13356_v3 = vld [vmem:[#allocation93_spill] sm:$0xff]  ;;  %v13358_v22 = vld [vmem:[#allocation95_spill] sm:$0xff] }
 0xca6   :  { %v4230_v1 = vmul.f32 %v7867_v26, %v10923_v7  ;;  %v4092_v7 = vadd.f32 %v11321_v23, %v9773_v41  ;;  %v13344_v23 = vld [vmem:[#allocation85_spill] sm:$0xff] }
 0xca7   :  { %v7869_v11 = vpop.eup %7868  ;;  %v13360_v26 = vld [vmem:[#allocation97_spill] sm:$0xff] }
 0xca8   :  { %v11336_v28 = vpop.f32.mrb[120].mxu0  ;;  %v11338_v20 = vpop.f32.mrb[120].mxu1  ;;  %v11344_v55 = vadd.f32 %v4231_v25, %v4230_v1  ;;  %v6660_v39 = vmul.f32 -1.442695, %v4092_v7  ;;  %v13359_v25 = vld [vmem:[#allocation96_spill] sm:$0xff]  ;;  %v13362_v1 = vld [vmem:[#allocation99_spill] sm:$0xff] }
 0xca9   :  { %v11340_v10 = vpop.f32.mrb[121].mxu0  ;;  %v11342_v30 = vpop.f32.mrb[121].mxu1  ;;  %v13365_v7 = vld [vmem:[#allocation102_spill] sm:$0xff] }
 0xcaa   :  { %v4274_v49 = vpop.f32.mrb[122].mxu0  ;;  %v4315_v62 = vpop.f32.mrb[122].mxu1  ;;  %7870 = vtanh.f32 %v11344_v55 }
 0xcab   :  { %v4275_v15 = vpop.f32.mrb[123].mxu0  ;;  %v4316_v2 = vpop.f32.mrb[123].mxu1  ;;  %7872 = vpow2.f32 %v6660_v39  ;;  %v13363_v49 = vld [vmem:[#allocation101_spill] sm:$0xff] }
 0xcac   :  { %7874 = vtanh.f32 %v11333_v37  ;;  %v13364_v2 = vld [vmem:[#allocation100_spill] sm:$0xff]  ;;  %v13367_v39 = vld [vmem:[#allocation105_spill] sm:$0xff] }
 0xcb4   :  { %v7871_v18 = vpop.eup %7870 }
 0xcb5   :  { %v4234_v40 = vmul.f32 %v7871_v18, %v7869_v11  ;;  %v7873_v32 = vpop.eup %7872  ;;  %v13366_v11 = vld [vmem:[#allocation103_spill] sm:$0xff] }
 0xcb6   :  { %v4105_v50 = vadd.f32 1.0, %v7873_v32  ;;  %v7875_v62 = vpop.eup %7874  ;;  %v13374_v32 = vld [vmem:[#allocation111_spill] sm:$0xff] }
 0xcb7   :  { %v11349_v9 = vpack.c.bf16 %v4234_v40, %v4234_v40  ;;  %v13368_v40 = vld [vmem:[#allocation104_spill] sm:$0xff] }
 0xcb8   :  { %7876 = vrcp.f32 %v4105_v50  ;;  %v13379_v50 = vld [vmem:[#allocation116_spill] sm:$0xff] }
 0xcb9   :  { %4351 = vmatmul.mubr.bf16.vlgmr.msra.gmra.mrb[124].mxu0 %v11349_v9  ;;  %4392 = vmatmul.mubr.bf16.vlgmr.msra.gmra.mrb[124].mxu1 %v11349_v9 }
 0xcba   :  { %4431 = vmatpush1.bf16.msra.mxu0 %v10932_v14  ;;  %4472 = vmatpush1.bf16.msra.mxu1 %v10935_v31  ;;  %v13348_v14 = vld [vmem:[#allocation67_spill] sm:$0xff]  ;;  %v13349_v31 = vld [vmem:[#allocation86_spill] sm:$0xff] }
 0xcbb   :  { %4432 = vmatprep.subr.bf16.mxu0 %v13342_v24  ;;  %4473 = vmatprep.subr.bf16.mxu1 %v13343_v47  ;;  %v13369_v24 = vld [vmem:[#allocation106_spill] sm:$0xff] }
 0xcbc   :  { %4462 = vmatprep.mubr.bf16.mxu0 %v12767_v63  ;;  %4503 = vmatprep.mubr.bf16.mxu1 %v12767_v63 }
 0xcbe   :  { %4433 = vmatpush1.bf16.msra.mxu0 %v13344_v23  ;;  %4474 = vmatpush1.bf16.msra.mxu1 %v13345_v8  ;;  %v13370_v23 = vld [vmem:[#allocation107_spill] sm:$0xff]  ;;  %v13371_v8 = vld [vmem:[#allocation109_spill] sm:$0xff] }
 0xcbf   :  { %4434 = vmatprep.subr.bf16.mxu0 %v13346_v54  ;;  %4475 = vmatprep.subr.bf16.mxu1 %v13347_v21  ;;  %v13372_v54 = vld [vmem:[#allocation108_spill] sm:$0xff]  ;;  %v13373_v21 = vld [vmem:[#allocation110_spill] sm:$0xff] }
 0xcc2   :  { %4435 = vmatpush1.bf16.msra.mxu0 %v13348_v14  ;;  %4476 = vmatpush1.bf16.msra.mxu1 %v13349_v31  ;;  %v7877_v15 = vpop.eup %7876  ;;  %v13375_v14 = vld [vmem:[#allocation113_spill] sm:$0xff]  ;;  %v13376_v31 = vld [vmem:[#allocation112_spill] sm:$0xff] }
 0xcc3   :  { %4436 = vmatprep.subr.bf16.mxu0 %v13350_v36  ;;  %4477 = vmatprep.subr.bf16.mxu1 %v13351_v17  ;;  %v4117_v18 = vmul.f32 %v7877_v15, %v7875_v62  ;;  %v13377_v36 = vld [vmem:[#allocation114_spill] sm:$0xff]  ;;  %v13378_v17 = vld [vmem:[#allocation115_spill] sm:$0xff]  ;;  %v13392_v62 = vld [vmem:[#allocation129_spill] sm:$0xff] }
 0xcc4   :  { %v13393_v15 = vld [vmem:[#allocation130_spill] sm:$0xff] }
 0xcc5   :  { %v4429_v47 = vpack.c.bf16 %v4117_v18, %v4117_v18  ;;  %v13398_v18 = vld [vmem:[#allocation135_spill] sm:$0xff] }
 0xcc6   :  { %4437 = vmatpush1.bf16.msra.mxu0 %v13352_v19  ;;  %4478 = vmatpush1.bf16.msra.mxu1 %v13353_v13  ;;  %v13380_v19 = vld [vmem:[#allocation117_spill] sm:$0xff]  ;;  %v13381_v13 = vld [vmem:[#allocation118_spill] sm:$0xff] }
 0xcc7   :  { %4438 = vmatprep.subr.bf16.mxu0 %v13354_v59  ;;  %4479 = vmatprep.subr.bf16.mxu1 %v13355_v51  ;;  %v13382_v59 = vld [vmem:[#allocation119_spill] sm:$0xff]  ;;  %v13383_v51 = vld [vmem:[#allocation120_spill] sm:$0xff] }
 0xcca   :  { %4439 = vmatpush1.bf16.msra.mxu0 %v13356_v3  ;;  %4480 = vmatpush1.bf16.msra.mxu1 %v13357_v45  ;;  %v13384_v3 = vld [vmem:[#allocation121_spill] sm:$0xff]  ;;  %v13385_v45 = vld [vmem:[#allocation122_spill] sm:$0xff] }
 0xccb   :  { %4440 = vmatprep.subr.bf16.mxu0 %v13358_v22  ;;  %4481 = vmatprep.subr.bf16.mxu1 %v13359_v25  ;;  %v13386_v22 = vld [vmem:[#allocation123_spill] sm:$0xff]  ;;  %v13387_v25 = vld [vmem:[#allocation124_spill] sm:$0xff] }
 0xcce   :  { %4441 = vmatpush1.bf16.msra.mxu0 %v13360_v26  ;;  %4482 = vmatpush1.bf16.msra.mxu1 %v13361_v29  ;;  %v13388_v26 = vld [vmem:[#allocation125_spill] sm:$0xff]  ;;  %v13389_v29 = vld [vmem:[#allocation126_spill] sm:$0xff] }
 0xccf   :  { %4442 = vmatprep.subr.bf16.mxu0 %v13362_v1  ;;  %4483 = vmatprep.subr.bf16.mxu1 %v13363_v49  ;;  %v13390_v1 = vld [vmem:[#allocation127_spill] sm:$0xff]  ;;  %v13391_v49 = vld [vmem:[#allocation128_spill] sm:$0xff] }
 0xcd2   :  { %4443 = vmatpush1.bf16.msra.mxu0 %v13364_v2  ;;  %4484 = vmatpush1.bf16.msra.mxu1 %v13365_v7  ;;  %v13394_v2 = vld [vmem:[#allocation131_spill] sm:$0xff]  ;;  %v13395_v7 = vld [vmem:[#allocation132_spill] sm:$0xff] }
 0xcd3   :  { %4444 = vmatprep.subr.bf16.mxu0 %v13366_v11  ;;  %4485 = vmatprep.subr.bf16.mxu1 %v13367_v39  ;;  %v13396_v11 = vld [vmem:[#allocation133_spill] sm:$0xff]  ;;  %v13397_v39 = vld [vmem:[#allocation134_spill] sm:$0xff] }
 0xcd6   :  { %4445 = vmatpush1.bf16.msra.mxu0 %v13368_v40  ;;  %4486 = vmatpush1.bf16.msra.mxu1 %v13369_v24  ;;  %v13399_v40 = vld [vmem:[#allocation136_spill] sm:$0xff]  ;;  %v13400_v24 = vld [vmem:[#allocation137_spill] sm:$0xff] }
 0xcd7   :  { %4512 = vmatprep.subr.bf16.mxu0 %v13370_v23  ;;  %4553 = vmatprep.subr.bf16.mxu1 %v13371_v8  ;;  %v13402_v23 = vld [vmem:[#allocation139_spill] sm:$0xff]  ;;  %v13403_v8 = vld [vmem:[#allocation140_spill] sm:$0xff] }
 0xcd9   :  { %4463 = vmatmul.mubr.bf16.vlgmr.msra.gmra.mrb[128].mxu0 %v4429_v47  ;;  %4504 = vmatmul.mubr.bf16.vlgmr.msra.gmra.mrb[128].mxu1 %v4429_v47  ;;  %v13401_v47 = vld [vmem:[#allocation138_spill] sm:$0xff] }
 0xcda   :  { %4513 = vmatpush1.bf16.msra.mxu0 %v13372_v54  ;;  %4554 = vmatpush1.bf16.msra.mxu1 %v13373_v21 }
 0xcdb   :  { %4514 = vmatprep.subr.bf16.mxu0 %v13374_v32  ;;  %4555 = vmatprep.subr.bf16.mxu1 %v13375_v14 }
 0xcdc   :  { %4544 = vmatprep.mubr.bf16.mxu0 %v12767_v63  ;;  %4585 = vmatprep.mubr.bf16.mxu1 %v12767_v63 }
 0xcde   :  { %4515 = vmatpush1.bf16.msra.mxu0 %v13376_v31  ;;  %4556 = vmatpush1.bf16.msra.mxu1 %v13377_v36 }
 0xcdf   :  { %4516 = vmatprep.subr.bf16.mxu0 %v13378_v17  ;;  %4557 = vmatprep.subr.bf16.mxu1 %v13379_v50 }
 0xce2   :  { %4517 = vmatpush1.bf16.msra.mxu0 %v13380_v19  ;;  %4558 = vmatpush1.bf16.msra.mxu1 %v13381_v13 }
 0xce3   :  { %4518 = vmatprep.subr.bf16.mxu0 %v13382_v59  ;;  %4559 = vmatprep.subr.bf16.mxu1 %v13383_v51 }
 0xce6   :  { %4519 = vmatpush1.bf16.msra.mxu0 %v13384_v3  ;;  %4560 = vmatpush1.bf16.msra.mxu1 %v13385_v45 }
 0xce7   :  { %4520 = vmatprep.subr.bf16.mxu0 %v13386_v22  ;;  %4561 = vmatprep.subr.bf16.mxu1 %v13387_v25 }
 0xcea   :  { %4521 = vmatpush1.bf16.msra.mxu0 %v13388_v26  ;;  %4562 = vmatpush1.bf16.msra.mxu1 %v13389_v29 }
 0xceb   :  { %4522 = vmatprep.subr.bf16.mxu0 %v13390_v1  ;;  %4563 = vmatprep.subr.bf16.mxu1 %v13391_v49 }
 0xcee   :  { %4523 = vmatpush1.bf16.msra.mxu0 %v13392_v62  ;;  %4564 = vmatpush1.bf16.msra.mxu1 %v13393_v15 }
 0xcef   :  { %4524 = vmatprep.subr.bf16.mxu0 %v13394_v2  ;;  %4565 = vmatprep.subr.bf16.mxu1 %v13395_v7 }
 0xcf2   :  { %4525 = vmatpush1.bf16.msra.mxu0 %v13396_v11  ;;  %4566 = vmatpush1.bf16.msra.mxu1 %v13397_v39 }
 0xcf3   :  { %4526 = vmatprep.subr.bf16.mxu0 %v13398_v18  ;;  %4567 = vmatprep.subr.bf16.mxu1 %v13399_v40 }
 0xcf6   :  { %4527 = vmatpush1.bf16.msra.mxu0 %v13400_v24  ;;  %4568 = vmatpush1.bf16.msra.mxu1 %v13401_v47 }
 0xcf7   :  { %4629 = vmatprep.subr.bf16.mxu0 %v13402_v23  ;;  %4670 = vmatprep.subr.bf16.mxu1 %v13403_v8 }
 0xd8c   :  { %v4352_v54 = vpop.f32.mrb[124].mxu0  ;;  %v4393_v21 = vpop.f32.mrb[124].mxu1 }
 0xd8d   :  { %v4353_v32 = vadd.f32 %v4352_v54, %v11336_v28  ;;  %v4394_v14 = vadd.f32 %v4393_v21, %v11338_v20  ;;  %v4354_v31 = vpop.f32.mrb[125].mxu0  ;;  %v4395_v36 = vpop.f32.mrb[125].mxu1 }
 0xd8e   :  { %v4355_v17 = vadd.f32 %v4354_v31, %v11340_v10  ;;  %v4396_v50 = vadd.f32 %v4395_v36, %v11342_v30  ;;  %v4356_v19 = vpop.f32.mrb[126].mxu0  ;;  %v4397_v13 = vpop.f32.mrb[126].mxu1 }
 0xd8f   :  { %v4400_v59 = vadd.f32 %v4353_v32, %v9533_v52  ;;  %v4357_v51 = vpop.f32.mrb[127].mxu0  ;;  %v4398_v3 = vpop.f32.mrb[127].mxu1  ;;  %v4402_v28 = vadd.f32 %v4394_v14, %v9545_v4  ;;  %v13415_v19 = vld [vmem:[#allocation152_spill] sm:$0xff]  ;;  %v13416_v13 = vld [vmem:[#allocation153_spill] sm:$0xff] }
 0xd90   :  { %v4401_v45 = vadd.f32 %v4355_v17, %v9536_v46  ;;  %v4403_v20 = vadd.f32 %v4396_v50, %v9548_v56  ;;  %v13409_v50 = vld [vmem:[#allocation146_spill] sm:$0xff]  ;;  %v13418_v51 = vld [vmem:[#allocation155_spill] sm:$0xff] }
 0xd91   :  { %v6664_v22 = vmul.f32 -1.442695, %v4400_v59  ;;  %v6666_v26 = vmul.f32 -1.442695, %v4402_v28  ;;  %v13417_v59 = vld [vmem:[#allocation154_spill] sm:$0xff] }
 0xd92   :  { %v6665_v25 = vmul.f32 -1.442695, %v4401_v45  ;;  %v11478_v3 = vld [vmem:[#allocation11 + $0x4] ss:$16 sps:$4 sm:$0xff]   ;;  %v11481_v45 = vld [vmem:[#allocation11 + $0xc] ss:$16 sps:$4 sm:$0xff]  }
 0xd93   :  { %7878 = vpow2.f32 %v6664_v22  ;;  %v11509_v22 = vld [vmem:[#allocation11 + $0x4c] ss:$16 sps:$4 sm:$0xff]   ;;  %v11515_v28 = vld [vmem:[#allocation11 + $0x48] ss:$16 sps:$4 sm:$0xff]  }
 0xd94   :  { %7880 = vpow2.f32 %v6665_v25  ;;  %v11512_v25 = vld [vmem:[#allocation11 + $0x40] ss:$16 sps:$4 sm:$0xff]  }
 0xd95   :  { %7882 = vtanh.f32 %v4403_v20  ;;  %v11518_v20 = vld [vmem:[#allocation11 + $0x64] ss:$16 sps:$4 sm:$0xff]  }
 0xd96   :  { %7884 = vpow2.f32 %v6666_v26  ;;  %v11521_v26 = vld [vmem:[#allocation11 + $0x6c] ss:$16 sps:$4 sm:$0xff]  }
 0xd9d   :  { %v7879_v10 = vpop.eup %7878 }
 0xd9e   :  { %v4413_v29 = vadd.f32 1.0, %v7879_v10  ;;  %v7881_v30 = vpop.eup %7880  ;;  %v11524_v10 = vld [vmem:[#allocation11 + $0x60] ss:$16 sps:$4 sm:$0xff]  }
 0xd9f   :  { %v4414_v1 = vadd.f32 1.0, %v7881_v30  ;;  %v7883_v49 = vpop.eup %7882  ;;  %v11530_v30 = vld [vmem:[#allocation11 + $0x84] ss:$16 sps:$4 sm:$0xff]  }
 0xda0   :  { %7886 = vrcp.f32 %v4413_v29  ;;  %v7885_v62 = vpop.eup %7884  ;;  %v11527_v29 = vld [vmem:[#allocation11 + $0x68] ss:$16 sps:$4 sm:$0xff]  }
 0xda1   :  { %7888 = vrcp.f32 %v4414_v1  ;;  %v4415_v11 = vadd.f32 1.0, %v7885_v62  ;;  %v11533_v1 = vld [vmem:[#allocation11 + $0x8c] ss:$16 sps:$4 sm:$0xff]   ;;  %v11539_v62 = vld [vmem:[#allocation11 + $0x88] ss:$16 sps:$4 sm:$0xff]  }
 0xda3   :  { %7890 = vrcp.f32 %v4415_v11  ;;  %v11551_v11 = vld [vmem:[#allocation11 + $0xa8] ss:$16 sps:$4 sm:$0xff]  }
 0xdaa   :  { %v7887_v15 = vpop.eup %7886 }
 0xdab   :  { %v4424_v2 = vmul.f32 %v7887_v15, %v7883_v49  ;;  %v7889_v7 = vpop.eup %7888  ;;  %v11536_v49 = vld [vmem:[#allocation11 + $0x80] ss:$16 sps:$4 sm:$0xff]   ;;  %v11542_v15 = vld [vmem:[#allocation11 + $0xa4] ss:$16 sps:$4 sm:$0xff]  }
 0xdac   :  { %v11430_v39 = vpop.f32.mrb[128].mxu0  ;;  %v11432_v18 = vpop.f32.mrb[128].mxu1  ;;  %v4423_v40 = vmul.f32 %v7889_v7, %v11146_v35  ;;  %v13404_v35 = vld [vmem:[#allocation141_spill] sm:$0xff]  ;;  %v11548_v7 = vld [vmem:[#allocation11 + $0xa0] ss:$16 sps:$4 sm:$0xff]  }
 0xdad   :  { %v11435_v24 = vpop.f32.mrb[129].mxu0  ;;  %v11437_v47 = vpop.f32.mrb[129].mxu1 }
 0xdae   :  { %v4468_v23 = vpop.f32.mrb[130].mxu0  ;;  %v4509_v8 = vpop.f32.mrb[130].mxu1  ;;  %v11439_v54 = vadd.f32 %v4424_v2, %v4423_v40  ;;  %v11545_v2 = vld [vmem:[#allocation11 + $0xac] ss:$16 sps:$4 sm:$0xff]   ;;  %v11554_v40 = vld [vmem:[#allocation11 + $0xc4] ss:$16 sps:$4 sm:$0xff]  }
 0xdaf   :  { %v4469_v21 = vpop.f32.mrb[131].mxu0  ;;  %v4510_v32 = vpop.f32.mrb[131].mxu1  ;;  %v11557_v23 = vld [vmem:[#allocation11 + $0xcc] ss:$16 sps:$4 sm:$0xff]   ;;  %v11560_v8 = vld [vmem:[#allocation11 + $0xc0] ss:$16 sps:$4 sm:$0xff]  }
 0xdb0   :  { %7892 = vtanh.f32 %v11439_v54  ;;  %v7891_v14 = vpop.eup %7890  ;;  %v11563_v21 = vld [vmem:[#allocation11 + $0xc8] ss:$16 sps:$4 sm:$0xff]   ;;  %v11566_v32 = vld [vmem:[#allocation11 + $0xe4] ss:$16 sps:$4 sm:$0xff]  }
 0xdba   :  { %v7893_v31 = vpop.eup %7892 }
 0xdbb   :  { %v4427_v36 = vmul.f32 %v7893_v31, %v7891_v14  ;;  %v11569_v14 = vld [vmem:[#allocation11 + $0xec] ss:$16 sps:$4 sm:$0xff]   ;;  %v11572_v31 = vld [vmem:[#allocation11 + $0xe0] ss:$16 sps:$4 sm:$0xff]  }
 0xdbd   :  { %v11442_v17 = vpack.c.bf16 %v4427_v36, %v4427_v36  ;;  %v11575_v36 = vld [vmem:[#allocation11 + $0xe8] ss:$16 sps:$4 sm:$0xff]  }
 0xdbf   :  { %4545 = vmatmul.mubr.bf16.vlgmr.msra.gmra.mrb[132].mxu0 %v11442_v17  ;;  %4586 = vmatmul.mubr.bf16.vlgmr.msra.gmra.mrb[132].mxu1 %v11442_v17 }
 0xdc0   :  { %4630 = vmatpush1.bf16.msra.mxu0 %v11153_v0  ;;  %4671 = vmatpush1.bf16.msra.mxu1 %v11156_v57  ;;  %v13405_v0 = vld [vmem:[#allocation142_spill] sm:$0xff]  ;;  %v13406_v57 = vld [vmem:[#allocation143_spill] sm:$0xff] }
 0xdc1   :  { %4631 = vmatprep.subr.bf16.mxu0 %v11159_v6  ;;  %4672 = vmatprep.subr.bf16.mxu1 %v11162_v27  ;;  %v13407_v6 = vld [vmem:[#allocation144_spill] sm:$0xff]  ;;  %v13408_v27 = vld [vmem:[#allocation145_spill] sm:$0xff] }
 0xdc2   :  { %4661 = vmatprep.mubr.bf16.mxu0 %v12767_v63  ;;  %4702 = vmatprep.mubr.bf16.mxu1 %v12767_v63 }
 0xdc4   :  { %4632 = vmatpush1.bf16.msra.mxu0 %v11167_v48  ;;  %4673 = vmatpush1.bf16.msra.mxu1 %v11170_v44  ;;  %v13410_v48 = vld [vmem:[#allocation147_spill] sm:$0xff]  ;;  %v13411_v44 = vld [vmem:[#allocation148_spill] sm:$0xff] }
 0xdc5   :  { %4633 = vmatprep.subr.bf16.mxu0 %v11173_v33  ;;  %4674 = vmatprep.subr.bf16.mxu1 %v11176_v5  ;;  %v13412_v33 = vld [vmem:[#allocation149_spill] sm:$0xff]  ;;  %v13413_v5 = vld [vmem:[#allocation150_spill] sm:$0xff] }
 0xdc8   :  { %4634 = vmatpush1.bf16.msra.mxu0 %v11179_v34  ;;  %4675 = vmatpush1.bf16.msra.mxu1 %v13404_v35  ;;  %v13414_v34 = vld [vmem:[#allocation151_spill] sm:$0xff]  ;;  %v11578_v35 = vld [vmem:[#allocation9 + $0x4] ss:$16 sps:$4 sm:$0xff]  }
 0xdc9   :  { %4635 = vmatprep.subr.bf16.mxu0 %v13405_v0  ;;  %4676 = vmatprep.subr.bf16.mxu1 %v13406_v57  ;;  %13419 = vst [vmem:[#allocation156_spill] sm:$0xff] %v11578_v35  ;;  %v11581_v0 = vld [vmem:[#allocation9 + $0xc] ss:$16 sps:$4 sm:$0xff]   ;;  %v11586_v57 = vld [vmem:[#allocation9] ss:$16 sps:$4 sm:$0xff]  }
 0xdca   :  { %13420 = vst [vmem:[#allocation157_spill] sm:$0xff] %v11581_v0  ;;  %13421 = vst [vmem:[#allocation158_spill] sm:$0xff] %v11586_v57 }
 0xdcc   :  { %4636 = vmatpush1.bf16.msra.mxu0 %v13407_v6  ;;  %4677 = vmatpush1.bf16.msra.mxu1 %v13408_v27  ;;  %v11589_v6 = vld [vmem:[#allocation9 + $0x8] ss:$16 sps:$4 sm:$0xff]   ;;  %v11592_v27 = vld [vmem:[#allocation9 + $0x24] ss:$16 sps:$4 sm:$0xff]  }
 0xdcd   :  { %4637 = vmatprep.subr.bf16.mxu0 %v13409_v50  ;;  %4678 = vmatprep.subr.bf16.mxu1 %v13410_v48  ;;  %13422 = vst [vmem:[#allocation159_spill] sm:$0xff] %v11589_v6  ;;  %13423 = vst [vmem:[#allocation160_spill] sm:$0xff] %v11592_v27  ;;  %v11595_v50 = vld [vmem:[#allocation9 + $0x2c] ss:$16 sps:$4 sm:$0xff]   ;;  %v11603_v48 = vld [vmem:[#allocation9 + $0x28] ss:$16 sps:$4 sm:$0xff]  }
 0xdce   :  { %13424 = vst [vmem:[#allocation161_spill] sm:$0xff] %v11595_v50  ;;  %13426 = vst [vmem:[#allocation68_spill] sm:$0xff] %v11603_v48 }
 0xdd0   :  { %4638 = vmatpush1.bf16.msra.mxu0 %v13411_v44  ;;  %4679 = vmatpush1.bf16.msra.mxu1 %v13412_v33  ;;  %v11606_v44 = vld [vmem:[#allocation9 + $0x44] ss:$16 sps:$4 sm:$0xff]   ;;  %v11609_v33 = vld [vmem:[#allocation9 + $0x4c] ss:$16 sps:$4 sm:$0xff]  }
 0xdd1   :  { %4639 = vmatprep.subr.bf16.mxu0 %v13413_v5  ;;  %4680 = vmatprep.subr.bf16.mxu1 %v13414_v34  ;;  %13427 = vst [vmem:[#allocation69_spill] sm:$0xff] %v11606_v44  ;;  %13428 = vst [vmem:[#allocation70_spill] sm:$0xff] %v11609_v33  ;;  %v11612_v5 = vld [vmem:[#allocation9 + $0x40] ss:$16 sps:$4 sm:$0xff]   ;;  %v11615_v34 = vld [vmem:[#allocation9 + $0x48] ss:$16 sps:$4 sm:$0xff]  }
 0xdd2   :  { %13429 = vst [vmem:[#allocation71_spill] sm:$0xff] %v11612_v5  ;;  %13430 = vst [vmem:[#allocation59_spill] sm:$0xff] %v11615_v34 }
 0xdd4   :  { %4640 = vmatpush1.bf16.msra.mxu0 %v13415_v19  ;;  %4681 = vmatpush1.bf16.msra.mxu1 %v13416_v13  ;;  %v11618_v19 = vld [vmem:[#allocation9 + $0x64] ss:$16 sps:$4 sm:$0xff]   ;;  %v11621_v13 = vld [vmem:[#allocation9 + $0x6c] ss:$16 sps:$4 sm:$0xff]  }
 0xdd5   :  { %4641 = vmatprep.subr.bf16.mxu0 %v13417_v59  ;;  %4682 = vmatprep.subr.bf16.mxu1 %v13418_v51  ;;  %13431 = vst [vmem:[#allocation61_spill] sm:$0xff] %v11618_v19  ;;  %13432 = vst [vmem:[#allocation62_spill] sm:$0xff] %v11621_v13  ;;  %v11624_v59 = vld [vmem:[#allocation9 + $0x60] ss:$16 sps:$4 sm:$0xff]   ;;  %v11627_v51 = vld [vmem:[#allocation9 + $0x68] ss:$16 sps:$4 sm:$0xff]  }
 0xdd6   :  { %13433 = vst [vmem:[#allocation28_spill] sm:$0xff] %v11624_v59  ;;  %13434 = vst [vmem:[#allocation29_spill] sm:$0xff] %v11627_v51 }
 0xdd8   :  { %4642 = vmatpush1.bf16.msra.mxu0 %v11227_v42  ;;  %4683 = vmatpush1.bf16.msra.mxu1 %v11230_v16  ;;  %v11486_v42 = vld [vmem:[#allocation11] ss:$16 sps:$4 sm:$0xff]  }
 0xdd9   :  { %4643 = vmatprep.subr.bf16.mxu0 %v11233_v53  ;;  %4684 = vmatprep.subr.bf16.mxu1 %v11236_v38  ;;  %v11489_v38 = vld [vmem:[#allocation11 + $0x8] ss:$16 sps:$4 sm:$0xff]   ;;  %v11500_v16 = vld [vmem:[#allocation11 + $0x20] ss:$16 sps:$4 sm:$0xff]  }
 0xdda   :  { %v11503_v53 = vld [vmem:[#allocation11 + $0x28] ss:$16 sps:$4 sm:$0xff]  }
 0xddc   :  { %4644 = vmatpush1.bf16.msra.mxu0 %v11239_v60  ;;  %4685 = vmatpush1.bf16.msra.mxu1 %v11242_v58  ;;  %v11492_v60 = vld [vmem:[#allocation11 + $0x24] ss:$16 sps:$4 sm:$0xff]   ;;  %v11495_v58 = vld [vmem:[#allocation11 + $0x2c] ss:$16 sps:$4 sm:$0xff]  }
 0xddd   :  { %4740 = vmatprep.subr.bf16.mxu0 %v11478_v3  ;;  %4781 = vmatprep.subr.bf16.mxu1 %v11481_v45 }
 0xddf   :  { %4662 = vmatmul.mubr.bf16.vlgmr.msra.gmra.mrb[136].mxu0 %v11349_v9  ;;  %4703 = vmatmul.mubr.bf16.vlgmr.msra.gmra.mrb[136].mxu1 %v11349_v9  ;;  %v11506_v9 = vld [vmem:[#allocation11 + $0x44] ss:$16 sps:$4 sm:$0xff]  }
 0xde0   :  { %4741 = vmatpush1.bf16.msra.mxu0 %v11486_v42  ;;  %4782 = vmatpush1.bf16.msra.mxu1 %v11489_v38 }
 0xde1   :  { %4742 = vmatprep.subr.bf16.mxu0 %v11492_v60  ;;  %4783 = vmatprep.subr.bf16.mxu1 %v11495_v58 }
 0xde2   :  { %4772 = vmatprep.mubr.bf16.mxu0 %v12767_v63  ;;  %4813 = vmatprep.mubr.bf16.mxu1 %v12767_v63 }
 0xde4   :  { %4743 = vmatpush1.bf16.msra.mxu0 %v11500_v16  ;;  %4784 = vmatpush1.bf16.msra.mxu1 %v11503_v53 }
 0xde5   :  { %4744 = vmatprep.subr.bf16.mxu0 %v11506_v9  ;;  %4785 = vmatprep.subr.bf16.mxu1 %v11509_v22 }
 0xde8   :  { %4745 = vmatpush1.bf16.msra.mxu0 %v11512_v25  ;;  %4786 = vmatpush1.bf16.msra.mxu1 %v11515_v28 }
 0xde9   :  { %4746 = vmatprep.subr.bf16.mxu0 %v11518_v20  ;;  %4787 = vmatprep.subr.bf16.mxu1 %v11521_v26 }
 0xdec   :  { %4747 = vmatpush1.bf16.msra.mxu0 %v11524_v10  ;;  %4788 = vmatpush1.bf16.msra.mxu1 %v11527_v29 }
 0xded   :  { %4748 = vmatprep.subr.bf16.mxu0 %v11530_v30  ;;  %4789 = vmatprep.subr.bf16.mxu1 %v11533_v1 }
 0xdf0   :  { %4749 = vmatpush1.bf16.msra.mxu0 %v11536_v49  ;;  %4790 = vmatpush1.bf16.msra.mxu1 %v11539_v62 }
 0xdf1   :  { %4750 = vmatprep.subr.bf16.mxu0 %v11542_v15  ;;  %4791 = vmatprep.subr.bf16.mxu1 %v11545_v2 }
 0xdf4   :  { %4751 = vmatpush1.bf16.msra.mxu0 %v11548_v7  ;;  %4792 = vmatpush1.bf16.msra.mxu1 %v11551_v11 }
 0xdf5   :  { %4752 = vmatprep.subr.bf16.mxu0 %v11554_v40  ;;  %4793 = vmatprep.subr.bf16.mxu1 %v11557_v23 }
 0xdf8   :  { %4753 = vmatpush1.bf16.msra.mxu0 %v11560_v8  ;;  %4794 = vmatpush1.bf16.msra.mxu1 %v11563_v21 }
 0xdf9   :  { %4754 = vmatprep.subr.bf16.mxu0 %v11566_v32  ;;  %4795 = vmatprep.subr.bf16.mxu1 %v11569_v14 }
 0xdfc   :  { %4755 = vmatpush1.bf16.msra.mxu0 %v11572_v31  ;;  %4796 = vmatpush1.bf16.msra.mxu1 %v11575_v36 }
 0xdfd   :  { %4822 = vmatprep.subr.bf16.mxu0 %v11578_v35  ;;  %4863 = vmatprep.subr.bf16.mxu1 %v11581_v0 }
 0xdff   :  { %4773 = vmatmul.mubr.bf16.vlgmr.msra.gmra.mrb[140].mxu0 %v11442_v17  ;;  %4814 = vmatmul.mubr.bf16.vlgmr.msra.gmra.mrb[140].mxu1 %v11442_v17  ;;  %v11600_v17 = vld [vmem:[#allocation9 + $0x20] ss:$16 sps:$4 sm:$0xff]  }
 0xe00   :  { %4823 = vmatpush1.bf16.msra.mxu0 %v11586_v57  ;;  %4864 = vmatpush1.bf16.msra.mxu1 %v11589_v6  ;;  %13425 = vst [vmem:[#allocation58_spill] sm:$0xff] %v11600_v17 }
 0xe01   :  { %4824 = vmatprep.subr.bf16.mxu0 %v11592_v27  ;;  %4865 = vmatprep.subr.bf16.mxu1 %v11595_v50 }
 0xe02   :  { %4854 = vmatprep.mubr.bf16.mxu0 %v12767_v63  ;;  %4895 = vmatprep.mubr.bf16.mxu1 %v12767_v63 }
 0xe04   :  { %4825 = vmatpush1.bf16.msra.mxu0 %v11600_v17  ;;  %4866 = vmatpush1.bf16.msra.mxu1 %v11603_v48 }
 0xe05   :  { %4826 = vmatprep.subr.bf16.mxu0 %v11606_v44  ;;  %4867 = vmatprep.subr.bf16.mxu1 %v11609_v33 }
 0xe08   :  { %4827 = vmatpush1.bf16.msra.mxu0 %v11612_v5  ;;  %4868 = vmatpush1.bf16.msra.mxu1 %v11615_v34  ;;  %v11630_v5 = vld [vmem:[#allocation9 + $0x84] ss:$16 sps:$4 sm:$0xff]   ;;  %v11633_v34 = vld [vmem:[#allocation9 + $0x8c] ss:$16 sps:$4 sm:$0xff]  }
 0xe09   :  { %4828 = vmatprep.subr.bf16.mxu0 %v11618_v19  ;;  %4869 = vmatprep.subr.bf16.mxu1 %v11621_v13  ;;  %13435 = vst [vmem:[#allocation30_spill] sm:$0xff] %v11630_v5  ;;  %13436 = vst [vmem:[#allocation31_spill] sm:$0xff] %v11633_v34  ;;  %v11636_v19 = vld [vmem:[#allocation9 + $0x80] ss:$16 sps:$4 sm:$0xff]   ;;  %v11639_v13 = vld [vmem:[#allocation9 + $0x88] ss:$16 sps:$4 sm:$0xff]  }
 0xe0a   :  { %13437 = vst [vmem:[#allocation32_spill] sm:$0xff] %v11636_v19  ;;  %13438 = vst [vmem:[#allocation33_spill] sm:$0xff] %v11639_v13 }
 0xe0c   :  { %4829 = vmatpush1.bf16.msra.mxu0 %v11624_v59  ;;  %4870 = vmatpush1.bf16.msra.mxu1 %v11627_v51  ;;  %v11642_v59 = vld [vmem:[#allocation9 + $0xa4] ss:$16 sps:$4 sm:$0xff]   ;;  %v11645_v51 = vld [vmem:[#allocation9 + $0xac] ss:$16 sps:$4 sm:$0xff]  }
 0xe0d   :  { %4830 = vmatprep.subr.bf16.mxu0 %v11630_v5  ;;  %4871 = vmatprep.subr.bf16.mxu1 %v11633_v34  ;;  %13439 = vst [vmem:[#allocation34_spill] sm:$0xff] %v11642_v59  ;;  %13440 = vst [vmem:[#allocation35_spill] sm:$0xff] %v11645_v51  ;;  %v11648_v5 = vld [vmem:[#allocation9 + $0xa0] ss:$16 sps:$4 sm:$0xff]   ;;  %v11651_v34 = vld [vmem:[#allocation9 + $0xa8] ss:$16 sps:$4 sm:$0xff]  }
 0xe0e   :  { %13441 = vst [vmem:[#allocation36_spill] sm:$0xff] %v11648_v5  ;;  %13442 = vst [vmem:[#allocation37_spill] sm:$0xff] %v11651_v34 }
 0xe10   :  { %4831 = vmatpush1.bf16.msra.mxu0 %v11636_v19  ;;  %4872 = vmatpush1.bf16.msra.mxu1 %v11639_v13  ;;  %v11654_v19 = vld [vmem:[#allocation9 + $0xc4] ss:$16 sps:$4 sm:$0xff]   ;;  %v11657_v13 = vld [vmem:[#allocation9 + $0xcc] ss:$16 sps:$4 sm:$0xff]  }
 0xe11   :  { %4832 = vmatprep.subr.bf16.mxu0 %v11642_v59  ;;  %4873 = vmatprep.subr.bf16.mxu1 %v11645_v51  ;;  %13443 = vst [vmem:[#allocation38_spill] sm:$0xff] %v11654_v19  ;;  %13444 = vst [vmem:[#allocation39_spill] sm:$0xff] %v11657_v13  ;;  %v11660_v59 = vld [vmem:[#allocation9 + $0xc0] ss:$16 sps:$4 sm:$0xff]   ;;  %v11663_v51 = vld [vmem:[#allocation9 + $0xc8] ss:$16 sps:$4 sm:$0xff]  }
 0xe12   :  { %13445 = vst [vmem:[#allocation40_spill] sm:$0xff] %v11660_v59  ;;  %13446 = vst [vmem:[#allocation41_spill] sm:$0xff] %v11663_v51 }
 0xe14   :  { %4833 = vmatpush1.bf16.msra.mxu0 %v11648_v5  ;;  %4874 = vmatpush1.bf16.msra.mxu1 %v11651_v34  ;;  %v11666_v5 = vld [vmem:[#allocation9 + $0xe4] ss:$16 sps:$4 sm:$0xff]   ;;  %v11669_v34 = vld [vmem:[#allocation9 + $0xec] ss:$16 sps:$4 sm:$0xff]  }
 0xe15   :  { %4834 = vmatprep.subr.bf16.mxu0 %v11654_v19  ;;  %4875 = vmatprep.subr.bf16.mxu1 %v11657_v13  ;;  %13447 = vst [vmem:[#allocation42_spill] sm:$0xff] %v11666_v5  ;;  %13448 = vst [vmem:[#allocation43_spill] sm:$0xff] %v11669_v34  ;;  %v11672_v19 = vld [vmem:[#allocation9 + $0xe0] ss:$16 sps:$4 sm:$0xff]   ;;  %v11675_v13 = vld [vmem:[#allocation9 + $0xe8] ss:$16 sps:$4 sm:$0xff]  }
 0xe16   :  { %13449 = vst [vmem:[#allocation44_spill] sm:$0xff] %v11672_v19  ;;  %13450 = vst [vmem:[#allocation45_spill] sm:$0xff] %v11675_v13 }
 0xe18   :  { %4835 = vmatpush1.bf16.msra.mxu0 %v11660_v59  ;;  %4876 = vmatpush1.bf16.msra.mxu1 %v11663_v51  ;;  %v11678_v59 = vld [vmem:[#allocation14 + $0x4] ss:$16 sps:$4 sm:$0xff]   ;;  %v11681_v51 = vld [vmem:[#allocation14 + $0xc] ss:$16 sps:$4 sm:$0xff]  }
 0xe19   :  { %4836 = vmatprep.subr.bf16.mxu0 %v11666_v5  ;;  %4877 = vmatprep.subr.bf16.mxu1 %v11669_v34  ;;  %13451 = vst [vmem:[#allocation46_spill] sm:$0xff] %v11678_v59  ;;  %13452 = vst [vmem:[#allocation47_spill] sm:$0xff] %v11681_v51 }
 0xe1c   :  { %4837 = vmatpush1.bf16.msra.mxu0 %v11672_v19  ;;  %4878 = vmatpush1.bf16.msra.mxu1 %v11675_v13 }
 0xe1d   :  { %4934 = vmatprep.subr.bf16.mxu0 %v11678_v59  ;;  %4975 = vmatprep.subr.bf16.mxu1 %v11681_v51 }
 0xe92   :  { %v4546_v5 = vpop.f32.mrb[132].mxu0  ;;  %v4587_v33 = vpop.f32.mrb[132].mxu1 }
 0xe93   :  { %v4547_v34 = vadd.f32 %v4546_v5, %v11430_v39  ;;  %v11686_v44 = vadd.f32 %v4587_v33, %v11432_v18  ;;  %v4548_v19 = vpop.f32.mrb[133].mxu0  ;;  %v4589_v48 = vpop.f32.mrb[133].mxu1 }
 0xe94   :  { %v4549_v17 = vadd.f32 %v4548_v19, %v11435_v24  ;;  %v4590_v13 = vadd.f32 %v4589_v48, %v11437_v47  ;;  %v4550_v50 = vpop.f32.mrb[134].mxu0  ;;  %v4591_v27 = vpop.f32.mrb[134].mxu1 }
 0xe95   :  { %v4594_v59 = vadd.f32 %v4547_v34, %v13335_v12  ;;  %v4551_v6 = vpop.f32.mrb[135].mxu0  ;;  %v4592_v57 = vpop.f32.mrb[135].mxu1  ;;  %v13453_v34 = vld [vmem:[#allocation76_spill] sm:$0xff] }
 0xe96   :  { %v4595_v51 = vadd.f32 %v4549_v17, %v13336_v61  ;;  %v4597_v39 = vadd.f32 %v4590_v13, %v13337_v43 }
 0xe97   :  { %v6667_v0 = vmul.f32 -1.442695, %v4594_v59 }
 0xe98   :  { %v6668_v35 = vmul.f32 -1.442695, %v4595_v51  ;;  %v13455_v51 = vld [vmem:[#allocation78_spill] sm:$0xff] }
 0xe99   :  { %7894 = vpow2.f32 %v6667_v0 }
 0xe9a   :  { %7896 = vpow2.f32 %v6668_v35  ;;  %v13454_v35 = vld [vmem:[#allocation77_spill] sm:$0xff] }
 0xe9b   :  { %7898 = vtanh.f32 %v4597_v39  ;;  %v13456_v39 = vld [vmem:[#allocation79_spill] sm:$0xff] }
 0xea3   :  { %v7895_v18 = vpop.eup %7894 }
 0xea4   :  { %v4607_v33 = vadd.f32 1.0, %v7895_v18  ;;  %v7897_v5 = vpop.eup %7896 }
 0xea5   :  { %v4608_v24 = vadd.f32 1.0, %v7897_v5  ;;  %v7899_v47 = vpop.eup %7898 }
 0xea6   :  { %7900 = vrcp.f32 %v4607_v33 }
 0xea7   :  { %7902 = vrcp.f32 %v4608_v24 }
 0xeb0   :  { %v7901_v27 = vpop.eup %7900 }
 0xeb1   :  { %v4618_v50 = vmul.f32 %v7901_v27, %v7899_v47  ;;  %v7903_v6 = vpop.eup %7902 }
 0xeb2   :  { %v4663_v57 = vpop.f32.mrb[136].mxu0  ;;  %v4704_v48 = vpop.f32.mrb[136].mxu1  ;;  %v4617_v17 = vmul.f32 %v7903_v6, %v11333_v37 }
 0xeb3   :  { %v4711_v0 = vadd.f32 %v4663_v57, %v13453_v34  ;;  %v4713_v19 = vadd.f32 %v4704_v48, %v13454_v35  ;;  %v4665_v13 = vpop.f32.mrb[137].mxu0  ;;  %v4706_v59 = vpop.f32.mrb[137].mxu1 }
 0xeb4   :  { %v4712_v18 = vadd.f32 %v4665_v13, %v13455_v51  ;;  %v4714_v33 = vadd.f32 %v4706_v59, %v13456_v39  ;;  %v4667_v5 = vpop.f32.mrb[138].mxu0  ;;  %v4708_v24 = vpop.f32.mrb[138].mxu1  ;;  %v11698_v43 = vadd.f32 %v4618_v50, %v4617_v17 }
 0xeb5   :  { %v6670_v47 = vmul.f32 -1.442695, %v4711_v0  ;;  %v4668_v27 = vpop.f32.mrb[139].mxu0  ;;  %v4709_v61 = vpop.f32.mrb[139].mxu1  ;;  %v6672_v37 = vmul.f32 -1.442695, %v4713_v19 }
 0xeb6   :  { %v6671_v12 = vmul.f32 -1.442695, %v4712_v18 }
 0xeb7   :  { %7904 = vpow2.f32 %v6670_v47 }
 0xeb8   :  { %7906 = vpow2.f32 %v6671_v12 }
 0xeb9   :  { %7908 = vtanh.f32 %v4714_v33 }
 0xeba   :  { %7910 = vpow2.f32 %v6672_v37 }
 0xec1   :  { %v7905_v6 = vpop.eup %7904 }
 0xec2   :  { %v4724_v57 = vadd.f32 1.0, %v7905_v6  ;;  %v7907_v48 = vpop.eup %7906 }
 0xec3   :  { %v4725_v34 = vadd.f32 1.0, %v7907_v48  ;;  %v7909_v35 = vpop.eup %7908 }
 0xec4   :  { %7912 = vrcp.f32 %v4724_v57  ;;  %v7911_v13 = vpop.eup %7910 }
 0xec5   :  { %7914 = vrcp.f32 %v4725_v34  ;;  %v4726_v0 = vadd.f32 1.0, %v7911_v13  ;;  %v11718_v34 = vld [vmem:[#allocation14] ss:$16 sps:$4 sm:$0xff]   ;;  %v11727_v13 = vld [vmem:[#allocation14 + $0x2c] ss:$16 sps:$4 sm:$0xff]  }
 0xec6   :  { %13458 = vst [vmem:[#allocation49_spill] sm:$0xff] %v11727_v13 }
 0xec7   :  { %7916 = vrcp.f32 %v4726_v0  ;;  %v11741_v0 = vld [vmem:[#allocation14 + $0x4c] ss:$16 sps:$4 sm:$0xff]  }
 0xec8   :  { %13462 = vst [vmem:[#allocation63_spill] sm:$0xff] %v11741_v0 }
 0xece   :  { %v7913_v59 = vpop.eup %7912 }
 0xecf   :  { %v4735_v50 = vmul.f32 %v7913_v59, %v7909_v35  ;;  %v7915_v17 = vpop.eup %7914  ;;  %v11721_v35 = vld [vmem:[#allocation14 + $0x8] ss:$16 sps:$4 sm:$0xff]   ;;  %v11732_v59 = vld [vmem:[#allocation14 + $0x20] ss:$16 sps:$4 sm:$0xff]  }
 0xed0   :  { %v4734_v61 = vmul.f32 %v7915_v17, %v11344_v55  ;;  %v4596_v55 = vadd.f32 %v11686_v44, %v9773_v41  ;;  %v11724_v44 = vld [vmem:[#allocation14 + $0x24] ss:$16 sps:$4 sm:$0xff]   ;;  %13459 = vst [vmem:[#allocation50_spill] sm:$0xff] %v11732_v59 }
 0xed1   :  { %v7917_v27 = vpop.eup %7916  ;;  %13457 = vst [vmem:[#allocation48_spill] sm:$0xff] %v11724_v44  ;;  %v11738_v17 = vld [vmem:[#allocation14 + $0x44] ss:$16 sps:$4 sm:$0xff]  }
 0xed2   :  { %v11701_v51 = vpop.f32.mrb[140].mxu0  ;;  %v11703_v12 = vpop.f32.mrb[140].mxu1  ;;  %v11709_v39 = vadd.f32 %v4735_v50, %v4734_v61  ;;  %v6669_v37 = vmul.f32 -1.442695, %v4596_v55  ;;  %v11735_v50 = vld [vmem:[#allocation14 + $0x28] ss:$16 sps:$4 sm:$0xff]  }
 0xed3   :  { %v11705_v19 = vpop.f32.mrb[141].mxu0  ;;  %v11707_v18 = vpop.f32.mrb[141].mxu1  ;;  %13460 = vst [vmem:[#allocation51_spill] sm:$0xff] %v11735_v50  ;;  %13461 = vst [vmem:[#allocation60_spill] sm:$0xff] %v11738_v17 }
 0xed4   :  { %v4778_v33 = vpop.f32.mrb[142].mxu0  ;;  %v4819_v5 = vpop.f32.mrb[142].mxu1  ;;  %7918 = vtanh.f32 %v11709_v39 }
 0xed5   :  { %v4779_v24 = vpop.f32.mrb[143].mxu0  ;;  %v4820_v47 = vpop.f32.mrb[143].mxu1  ;;  %7920 = vpow2.f32 %v6669_v37  ;;  %v11744_v33 = vld [vmem:[#allocation14 + $0x40] ss:$16 sps:$4 sm:$0xff]   ;;  %v11747_v5 = vld [vmem:[#allocation14 + $0x48] ss:$16 sps:$4 sm:$0xff]  }
 0xed6   :  { %13463 = vst [vmem:[#allocation52_spill] sm:$0xff] %v11744_v33  ;;  %13464 = vst [vmem:[#allocation53_spill] sm:$0xff] %v11747_v5  ;;  %v11750_v24 = vld [vmem:[#allocation14 + $0x64] ss:$16 sps:$4 sm:$0xff]   ;;  %v11753_v47 = vld [vmem:[#allocation14 + $0x6c] ss:$16 sps:$4 sm:$0xff]   ;;  %7922 = vtanh.f32 %v11698_v43 }
 0xed7   :  { %13465 = vst [vmem:[#allocation54_spill] sm:$0xff] %v11750_v24  ;;  %13466 = vst [vmem:[#allocation55_spill] sm:$0xff] %v11753_v47  ;;  %v11760_v37 = vld [vmem:[#allocation14 + $0x68] ss:$16 sps:$4 sm:$0xff]  }
 0xed8   :  { %13468 = vst [vmem:[#allocation72_spill] sm:$0xff] %v11760_v37 }
 0xede   :  { %v7919_v6 = vpop.eup %7918 }
 0xedf   :  { %v4738_v57 = vmul.f32 %v7919_v6, %v7917_v27  ;;  %v7921_v61 = vpop.eup %7920  ;;  %v11757_v27 = vld [vmem:[#allocation14 + $0x60] ss:$16 sps:$4 sm:$0xff]   ;;  %v11763_v6 = vld [vmem:[#allocation14 + $0x84] ss:$16 sps:$4 sm:$0xff]  }
 0xee0   :  { %v4609_v55 = vadd.f32 1.0, %v7921_v61  ;;  %13467 = vst [vmem:[#allocation56_spill] sm:$0xff] %v11757_v27  ;;  %13469 = vst [vmem:[#allocation73_spill] sm:$0xff] %v11763_v6  ;;  %v11769_v61 = vld [vmem:[#allocation14 + $0x80] ss:$16 sps:$4 sm:$0xff]  }
 0xee1   :  { %v11714_v48 = vpack.c.bf16 %v4738_v57, %v4738_v57  ;;  %v11766_v57 = vld [vmem:[#allocation14 + $0x8c] ss:$16 sps:$4 sm:$0xff]   ;;  %13471 = vst [vmem:[#allocation75_spill] sm:$0xff] %v11769_v61 }
 0xee2   :  { %13470 = vst [vmem:[#allocation74_spill] sm:$0xff] %v11766_v57  ;;  %7924 = vrcp.f32 %v4609_v55  ;;  %v11784_v55 = vld [vmem:[#allocation14 + $0xa8] ss:$16 sps:$4 sm:$0xff]  }
 0xee3   :  { %4855 = vmatmul.mubr.bf16.vlgmr.msra.gmra.mrb[144].mxu0 %v11714_v48  ;;  %4896 = vmatmul.mubr.bf16.vlgmr.msra.gmra.mrb[144].mxu1 %v11714_v48  ;;  %13476 = vst [vmem:[#allocation65_spill] sm:$0xff] %v11784_v55 }
 0xee4   :  { %4935 = vmatpush1.bf16.msra.mxu0 %v11718_v34  ;;  %4976 = vmatpush1.bf16.msra.mxu1 %v11721_v35 }
 0xee5   :  { %4936 = vmatprep.subr.bf16.mxu0 %v11724_v44  ;;  %4977 = vmatprep.subr.bf16.mxu1 %v11727_v13 }
 0xee6   :  { %4966 = vmatprep.mubr.bf16.mxu0 %v12767_v63  ;;  %5007 = vmatprep.mubr.bf16.mxu1 %v12767_v63 }
 0xee8   :  { %4937 = vmatpush1.bf16.msra.mxu0 %v11732_v59  ;;  %4978 = vmatpush1.bf16.msra.mxu1 %v11735_v50 }
 0xee9   :  { %4938 = vmatprep.subr.bf16.mxu0 %v11738_v17  ;;  %4979 = vmatprep.subr.bf16.mxu1 %v11741_v0 }
 0xeec   :  { %4939 = vmatpush1.bf16.msra.mxu0 %v11744_v33  ;;  %4980 = vmatpush1.bf16.msra.mxu1 %v11747_v5  ;;  %v11808_v5 = vld [vmem:[#allocation14 + $0xe8] ss:$16 sps:$4 sm:$0xff]   ;;  %v11811_v33 = vld [vmem:[#allocation12 + $0x4] ss:$16 sps:$4 sm:$0xff]  }
 0xeed   :  { %4940 = vmatprep.subr.bf16.mxu0 %v11750_v24  ;;  %4981 = vmatprep.subr.bf16.mxu1 %v11753_v47  ;;  %v11772_v47 = vld [vmem:[#allocation14 + $0x88] ss:$16 sps:$4 sm:$0xff]   ;;  %v11793_v24 = vld [vmem:[#allocation14 + $0xc0] ss:$16 sps:$4 sm:$0xff]   ;;  %13484 = vst [vmem:[#allocation91_spill] sm:$0xff] %v11808_v5  ;;  %13485 = vst [vmem:[#allocation92_spill] sm:$0xff] %v11811_v33 }
 0xeee   :  { %13472 = vst [vmem:[#allocation57_spill] sm:$0xff] %v11772_v47  ;;  %13479 = vst [vmem:[#allocation86_spill] sm:$0xff] %v11793_v24 }
 0xef0   :  { %4941 = vmatpush1.bf16.msra.mxu0 %v11757_v27  ;;  %4982 = vmatpush1.bf16.msra.mxu1 %v11760_v37  ;;  %v11775_v27 = vld [vmem:[#allocation14 + $0xa4] ss:$16 sps:$4 sm:$0xff]   ;;  %v11778_v37 = vld [vmem:[#allocation14 + $0xac] ss:$16 sps:$4 sm:$0xff]  }
 0xef1   :  { %4942 = vmatprep.subr.bf16.mxu0 %v11763_v6  ;;  %4983 = vmatprep.subr.bf16.mxu1 %v11766_v57  ;;  %13473 = vst [vmem:[#allocation84_spill] sm:$0xff] %v11775_v27  ;;  %13474 = vst [vmem:[#allocation85_spill] sm:$0xff] %v11778_v37  ;;  %v11781_v6 = vld [vmem:[#allocation14 + $0xa0] ss:$16 sps:$4 sm:$0xff]  }
 0xef2   :  { %13475 = vst [vmem:[#allocation64_spill] sm:$0xff] %v11781_v6 }
 0xef4   :  { %4943 = vmatpush1.bf16.msra.mxu0 %v11769_v61  ;;  %4984 = vmatpush1.bf16.msra.mxu1 %v11772_v47  ;;  %v11787_v61 = vld [vmem:[#allocation14 + $0xc4] ss:$16 sps:$4 sm:$0xff]   ;;  %v11790_v47 = vld [vmem:[#allocation14 + $0xcc] ss:$16 sps:$4 sm:$0xff]  }
 0xef5   :  { %4944 = vmatprep.subr.bf16.mxu0 %v11775_v27  ;;  %4985 = vmatprep.subr.bf16.mxu1 %v11778_v37  ;;  %13477 = vst [vmem:[#allocation66_spill] sm:$0xff] %v11787_v61  ;;  %13478 = vst [vmem:[#allocation67_spill] sm:$0xff] %v11790_v47  ;;  %v7923_v27 = vpop.eup %7922  ;;  %v11796_v37 = vld [vmem:[#allocation14 + $0xc8] ss:$16 sps:$4 sm:$0xff]  }
 0xef6   :  { %v7925_v57 = vpop.eup %7924  ;;  %13480 = vst [vmem:[#allocation87_spill] sm:$0xff] %v11796_v37 }
 0xef8   :  { %4945 = vmatpush1.bf16.msra.mxu0 %v11781_v6  ;;  %4986 = vmatpush1.bf16.msra.mxu1 %v11784_v55  ;;  %v11799_v6 = vld [vmem:[#allocation14 + $0xe4] ss:$16 sps:$4 sm:$0xff]   ;;  %v11802_v55 = vld [vmem:[#allocation14 + $0xec] ss:$16 sps:$4 sm:$0xff]  }
 0xef9   :  { %4946 = vmatprep.subr.bf16.mxu0 %v11787_v61  ;;  %4987 = vmatprep.subr.bf16.mxu1 %v11790_v47  ;;  %13481 = vst [vmem:[#allocation88_spill] sm:$0xff] %v11799_v6  ;;  %13482 = vst [vmem:[#allocation89_spill] sm:$0xff] %v11802_v55  ;;  %v4621_v61 = vmul.f32 %v7925_v57, %v7923_v27  ;;  %v11805_v47 = vld [vmem:[#allocation14 + $0xe0] ss:$16 sps:$4 sm:$0xff]   ;;  %v11820_v57 = vld [vmem:[#allocation12 + $0x8] ss:$16 sps:$4 sm:$0xff]  }
 0xefa   :  { %13483 = vst [vmem:[#allocation90_spill] sm:$0xff] %v11805_v47  ;;  %v11817_v27 = vld [vmem:[#allocation12] ss:$16 sps:$4 sm:$0xff]   ;;  %13488 = vst [vmem:[#allocation95_spill] sm:$0xff] %v11820_v57 }
 0xefb   :  { %13487 = vst [vmem:[#allocation94_spill] sm:$0xff] %v11817_v27 }
 0xefc   :  { %4947 = vmatpush1.bf16.msra.mxu0 %v11793_v24  ;;  %4988 = vmatpush1.bf16.msra.mxu1 %v11796_v37  ;;  %v4933_v24 = vpack.c.bf16 %v4621_v61, %v4621_v61  ;;  %v11814_v37 = vld [vmem:[#allocation12 + $0xc] ss:$16 sps:$4 sm:$0xff]  }
 0xefd   :  { %4948 = vmatprep.subr.bf16.mxu0 %v11799_v6  ;;  %4989 = vmatprep.subr.bf16.mxu1 %v11802_v55  ;;  %13486 = vst [vmem:[#allocation93_spill] sm:$0xff] %v11814_v37  ;;  %v11826_v61 = vld [vmem:[#allocation12 + $0x2c] ss:$16 sps:$4 sm:$0xff]  }
 0xefe   :  { %13490 = vst [vmem:[#allocation97_spill] sm:$0xff] %v11826_v61 }
 0xf00   :  { %4949 = vmatpush1.bf16.msra.mxu0 %v11805_v47  ;;  %4990 = vmatpush1.bf16.msra.mxu1 %v11808_v5  ;;  %v11823_v5 = vld [vmem:[#allocation12 + $0x24] ss:$16 sps:$4 sm:$0xff]  }
 0xf01   :  { %5016 = vmatprep.subr.bf16.mxu0 %v11811_v33  ;;  %5057 = vmatprep.subr.bf16.mxu1 %v11814_v37  ;;  %13489 = vst [vmem:[#allocation96_spill] sm:$0xff] %v11823_v5  ;;  %v11846_v37 = vld [vmem:[#allocation12 + $0x48] ss:$16 sps:$4 sm:$0xff]   ;;  %v8487_v33 = vld [vmem:[#allocation8 + $0xc] ss:$16 sps:$4 sm:$0xff]  }
 0xf02   :  { %13496 = vst [vmem:[#allocation103_spill] sm:$0xff] %v11846_v37 }
 0xf03   :  { %4967 = vmatmul.mubr.bf16.vlgmr.msra.gmra.mrb[148].mxu0 %v4933_v24  ;;  %5008 = vmatmul.mubr.bf16.vlgmr.msra.gmra.mrb[148].mxu1 %v4933_v24  ;;  %v11831_v24 = vld [vmem:[#allocation12 + $0x20] ss:$16 sps:$4 sm:$0xff]  }
 0xf04   :  { %5017 = vmatpush1.bf16.msra.mxu0 %v11817_v27  ;;  %5058 = vmatpush1.bf16.msra.mxu1 %v11820_v57  ;;  %13491 = vst [vmem:[#allocation98_spill] sm:$0xff] %v11831_v24  ;;  %v11834_v27 = vld [vmem:[#allocation12 + $0x28] ss:$16 sps:$4 sm:$0xff]   ;;  %v11837_v57 = vld [vmem:[#allocation12 + $0x44] ss:$16 sps:$4 sm:$0xff]  }
 0xf05   :  { %5018 = vmatprep.subr.bf16.mxu0 %v11823_v5  ;;  %5059 = vmatprep.subr.bf16.mxu1 %v11826_v61  ;;  %13492 = vst [vmem:[#allocation99_spill] sm:$0xff] %v11834_v27  ;;  %13493 = vst [vmem:[#allocation101_spill] sm:$0xff] %v11837_v57  ;;  %v11840_v5 = vld [vmem:[#allocation12 + $0x4c] ss:$16 sps:$4 sm:$0xff]   ;;  %v11843_v61 = vld [vmem:[#allocation12 + $0x40] ss:$16 sps:$4 sm:$0xff]  }
 0xf06   :  { %5048 = vmatprep.mubr.bf16.mxu0 %v12767_v63  ;;  %5089 = vmatprep.mubr.bf16.mxu1 %v12767_v63  ;;  %13494 = vst [vmem:[#allocation100_spill] sm:$0xff] %v11840_v5  ;;  %13495 = vst [vmem:[#allocation102_spill] sm:$0xff] %v11843_v61 }
 0xf08   :  { %5019 = vmatpush1.bf16.msra.mxu0 %v11831_v24  ;;  %5060 = vmatpush1.bf16.msra.mxu1 %v11834_v27  ;;  %v11849_v24 = vld [vmem:[#allocation12 + $0x64] ss:$16 sps:$4 sm:$0xff]   ;;  %v11852_v27 = vld [vmem:[#allocation12 + $0x6c] ss:$16 sps:$4 sm:$0xff]  }
 0xf09   :  { %5020 = vmatprep.subr.bf16.mxu0 %v11837_v57  ;;  %5061 = vmatprep.subr.bf16.mxu1 %v11840_v5  ;;  %13497 = vst [vmem:[#allocation105_spill] sm:$0xff] %v11849_v24  ;;  %13498 = vst [vmem:[#allocation104_spill] sm:$0xff] %v11852_v27  ;;  %v11855_v57 = vld [vmem:[#allocation12 + $0x60] ss:$16 sps:$4 sm:$0xff]   ;;  %v11858_v5 = vld [vmem:[#allocation12 + $0x68] ss:$16 sps:$4 sm:$0xff]  }
 0xf0a   :  { %13499 = vst [vmem:[#allocation106_spill] sm:$0xff] %v11855_v57  ;;  %13500 = vst [vmem:[#allocation107_spill] sm:$0xff] %v11858_v5 }
 0xf0c   :  { %5021 = vmatpush1.bf16.msra.mxu0 %v11843_v61  ;;  %5062 = vmatpush1.bf16.msra.mxu1 %v11846_v37  ;;  %v11861_v61 = vld [vmem:[#allocation12 + $0x84] ss:$16 sps:$4 sm:$0xff]   ;;  %v11864_v37 = vld [vmem:[#allocation12 + $0x8c] ss:$16 sps:$4 sm:$0xff]  }
 0xf0d   :  { %5022 = vmatprep.subr.bf16.mxu0 %v11849_v24  ;;  %5063 = vmatprep.subr.bf16.mxu1 %v11852_v27  ;;  %13501 = vst [vmem:[#allocation109_spill] sm:$0xff] %v11861_v61  ;;  %13502 = vst [vmem:[#allocation108_spill] sm:$0xff] %v11864_v37  ;;  %v11867_v24 = vld [vmem:[#allocation12 + $0x80] ss:$16 sps:$4 sm:$0xff]   ;;  %v11870_v27 = vld [vmem:[#allocation12 + $0x88] ss:$16 sps:$4 sm:$0xff]  }
 0xf0e   :  { %13503 = vst [vmem:[#allocation110_spill] sm:$0xff] %v11867_v24  ;;  %13504 = vst [vmem:[#allocation111_spill] sm:$0xff] %v11870_v27 }
 0xf10   :  { %5023 = vmatpush1.bf16.msra.mxu0 %v11855_v57  ;;  %5064 = vmatpush1.bf16.msra.mxu1 %v11858_v5  ;;  %v11873_v57 = vld [vmem:[#allocation12 + $0xa4] ss:$16 sps:$4 sm:$0xff]   ;;  %v11876_v5 = vld [vmem:[#allocation12 + $0xac] ss:$16 sps:$4 sm:$0xff]  }
 0xf11   :  { %5024 = vmatprep.subr.bf16.mxu0 %v11861_v61  ;;  %5065 = vmatprep.subr.bf16.mxu1 %v11864_v37  ;;  %13505 = vst [vmem:[#allocation113_spill] sm:$0xff] %v11873_v57  ;;  %13506 = vst [vmem:[#allocation112_spill] sm:$0xff] %v11876_v5  ;;  %v11879_v61 = vld [vmem:[#allocation12 + $0xa0] ss:$16 sps:$4 sm:$0xff]   ;;  %v11882_v37 = vld [vmem:[#allocation12 + $0xa8] ss:$16 sps:$4 sm:$0xff]  }
 0xf12   :  { %13507 = vst [vmem:[#allocation114_spill] sm:$0xff] %v11879_v61  ;;  %13508 = vst [vmem:[#allocation115_spill] sm:$0xff] %v11882_v37 }
 0xf14   :  { %5025 = vmatpush1.bf16.msra.mxu0 %v11867_v24  ;;  %5066 = vmatpush1.bf16.msra.mxu1 %v11870_v27  ;;  %v11885_v24 = vld [vmem:[#allocation12 + $0xc4] ss:$16 sps:$4 sm:$0xff]   ;;  %v11888_v27 = vld [vmem:[#allocation12 + $0xcc] ss:$16 sps:$4 sm:$0xff]  }
 0xf15   :  { %5026 = vmatprep.subr.bf16.mxu0 %v11873_v57  ;;  %5067 = vmatprep.subr.bf16.mxu1 %v11876_v5  ;;  %13509 = vst [vmem:[#allocation116_spill] sm:$0xff] %v11885_v24  ;;  %13510 = vst [vmem:[#allocation117_spill] sm:$0xff] %v11888_v27  ;;  %v11891_v57 = vld [vmem:[#allocation12 + $0xc0] ss:$16 sps:$4 sm:$0xff]   ;;  %v11894_v5 = vld [vmem:[#allocation12 + $0xc8] ss:$16 sps:$4 sm:$0xff]  }
 0xf16   :  { %13511 = vst [vmem:[#allocation118_spill] sm:$0xff] %v11891_v57  ;;  %13512 = vst [vmem:[#allocation119_spill] sm:$0xff] %v11894_v5 }
 0xf18   :  { %5027 = vmatpush1.bf16.msra.mxu0 %v11879_v61  ;;  %5068 = vmatpush1.bf16.msra.mxu1 %v11882_v37  ;;  %v11897_v61 = vld [vmem:[#allocation12 + $0xe4] ss:$16 sps:$4 sm:$0xff]   ;;  %v11900_v37 = vld [vmem:[#allocation12 + $0xec] ss:$16 sps:$4 sm:$0xff]  }
 0xf19   :  { %5028 = vmatprep.subr.bf16.mxu0 %v11885_v24  ;;  %5069 = vmatprep.subr.bf16.mxu1 %v11888_v27  ;;  %13513 = vst [vmem:[#allocation120_spill] sm:$0xff] %v11897_v61  ;;  %13514 = vst [vmem:[#allocation121_spill] sm:$0xff] %v11900_v37  ;;  %v11903_v24 = vld [vmem:[#allocation12 + $0xe0] ss:$16 sps:$4 sm:$0xff]   ;;  %v11906_v27 = vld [vmem:[#allocation12 + $0xe8] ss:$16 sps:$4 sm:$0xff]  }
 0xf1a   :  { %13515 = vst [vmem:[#allocation122_spill] sm:$0xff] %v11903_v24  ;;  %13516 = vst [vmem:[#allocation123_spill] sm:$0xff] %v11906_v27 }
 0xf1c   :  { %5029 = vmatpush1.bf16.msra.mxu0 %v11891_v57  ;;  %5070 = vmatpush1.bf16.msra.mxu1 %v11894_v5  ;;  %v8486_v57 = vld [vmem:[#allocation8 + $0x4] ss:$16 sps:$4 sm:$0xff]  }
 0xf1d   :  { %5030 = vmatprep.subr.bf16.mxu0 %v11897_v61  ;;  %5071 = vmatprep.subr.bf16.mxu1 %v11900_v37 }
 0xf20   :  { %5031 = vmatpush1.bf16.msra.mxu0 %v11903_v24  ;;  %5072 = vmatpush1.bf16.msra.mxu1 %v11906_v27 }
 0xf21   :  { %5133 = vmatprep.subr.bf16.mxu0 %v8486_v57  ;;  %5174 = vmatprep.subr.bf16.mxu1 %v8487_v33 }
 0xfb6   :  { %v4856_v5 = vpop.f32.mrb[144].mxu0  ;;  %v4897_v47 = vpop.f32.mrb[144].mxu1 }
 0xfb7   :  { %v4857_v61 = vadd.f32 %v4856_v5, %v11701_v51  ;;  %v4898_v55 = vadd.f32 %v4897_v47, %v11703_v12  ;;  %v4858_v6 = vpop.f32.mrb[145].mxu0  ;;  %v4899_v37 = vpop.f32.mrb[145].mxu1 }
 0xfb8   :  { %v4859_v0 = vadd.f32 %v4858_v6, %v11705_v19  ;;  %v4900_v24 = vadd.f32 %v4899_v37, %v11707_v18  ;;  %v4860_v17 = vpop.f32.mrb[146].mxu0  ;;  %v4901_v50 = vpop.f32.mrb[146].mxu1 }
 0xfb9   :  { %v4904_v27 = vadd.f32 %v4857_v61, %v9533_v52  ;;  %v4861_v59 = vpop.f32.mrb[147].mxu0  ;;  %v4902_v57 = vpop.f32.mrb[147].mxu1  ;;  %v4906_v51 = vadd.f32 %v4898_v55, %v9545_v4 }
 0xfba   :  { %v4905_v33 = vadd.f32 %v4859_v0, %v9536_v46  ;;  %v4907_v12 = vadd.f32 %v4900_v24, %v9548_v56 }
 0xfbb   :  { %v6673_v13 = vmul.f32 -1.442695, %v4904_v27  ;;  %v6675_v5 = vmul.f32 -1.442695, %v4906_v51 }
 0xfbc   :  { %v6674_v44 = vmul.f32 -1.442695, %v4905_v33 }
 0xfbd   :  { %7926 = vpow2.f32 %v6673_v13 }
 0xfbe   :  { %7928 = vpow2.f32 %v6674_v44 }
 0xfbf   :  { %7930 = vtanh.f32 %v4907_v12 }
 0xfc0   :  { %7932 = vpow2.f32 %v6675_v5 }
 0xfc7   :  { %v7927_v19 = vpop.eup %7926 }
 0xfc8   :  { %v4917_v47 = vadd.f32 1.0, %v7927_v19  ;;  %v7929_v18 = vpop.eup %7928 }
 0xfc9   :  { %v4918_v50 = vadd.f32 1.0, %v7929_v18  ;;  %v7931_v59 = vpop.eup %7930 }
 0xfca   :  { %7934 = vrcp.f32 %v4917_v47  ;;  %v7933_v17 = vpop.eup %7932 }
 0xfcb   :  { %7936 = vrcp.f32 %v4918_v50  ;;  %v4919_v13 = vadd.f32 1.0, %v7933_v17  ;;  %v8490_v17 = vld [vmem:[#allocation8 + $0x24] ss:$16 sps:$4 sm:$0xff]  }
 0xfcd   :  { %7938 = vrcp.f32 %v4919_v13  ;;  %v8494_v13 = vld [vmem:[#allocation8 + $0x44] ss:$16 sps:$4 sm:$0xff]  }
 0xfd4   :  { %v7935_v0 = vpop.eup %7934 }
 0xfd5   :  { %v4928_v37 = vmul.f32 %v7935_v0, %v7931_v59  ;;  %v7937_v6 = vpop.eup %7936  ;;  %v8489_v59 = vld [vmem:[#allocation8 + $0x8] ss:$16 sps:$4 sm:$0xff]   ;;  %v8491_v0 = vld [vmem:[#allocation8 + $0x2c] ss:$16 sps:$4 sm:$0xff]  }
 0xfd6   :  { %v11917_v44 = vpop.f32.mrb[148].mxu0  ;;  %v11919_v55 = vpop.f32.mrb[148].mxu1  ;;  %v4927_v27 = vmul.f32 %v7937_v6, %v11439_v54  ;;  %v8488_v54 = vld [vmem:[#allocation8] ss:$16 sps:$4 sm:$0xff]   ;;  %v8493_v6 = vld [vmem:[#allocation8 + $0x28] ss:$16 sps:$4 sm:$0xff]  }
 0xfd7   :  { %v11922_v61 = vpop.f32.mrb[149].mxu0  ;;  %v11924_v24 = vpop.f32.mrb[149].mxu1 }
 0xfd8   :  { %v4972_v57 = vpop.f32.mrb[150].mxu0  ;;  %v5013_v33 = vpop.f32.mrb[150].mxu1  ;;  %v11926_v51 = vadd.f32 %v4928_v37, %v4927_v27  ;;  %v8492_v37 = vld [vmem:[#allocation8 + $0x20] ss:$16 sps:$4 sm:$0xff]   ;;  %v8495_v27 = vld [vmem:[#allocation8 + $0x4c] ss:$16 sps:$4 sm:$0xff]  }
 0xfd9   :  { %v4973_v12 = vpop.f32.mrb[151].mxu0  ;;  %v5014_v5 = vpop.f32.mrb[151].mxu1  ;;  %v8496_v57 = vld [vmem:[#allocation8 + $0x40] ss:$16 sps:$4 sm:$0xff]   ;;  %v8497_v33 = vld [vmem:[#allocation8 + $0x48] ss:$16 sps:$4 sm:$0xff]  }
 0xfda   :  { %7940 = vtanh.f32 %v11926_v51  ;;  %v7939_v19 = vpop.eup %7938  ;;  %v8498_v12 = vld [vmem:[#allocation8 + $0x64] ss:$16 sps:$4 sm:$0xff]   ;;  %v8499_v5 = vld [vmem:[#allocation8 + $0x6c] ss:$16 sps:$4 sm:$0xff]  }
 0xfe4   :  { %v7941_v47 = vpop.eup %7940 }
 0xfe5   :  { %v4931_v18 = vmul.f32 %v7941_v47, %v7939_v19  ;;  %v8500_v19 = vld [vmem:[#allocation8 + $0x60] ss:$16 sps:$4 sm:$0xff]   ;;  %v8501_v47 = vld [vmem:[#allocation8 + $0x68] ss:$16 sps:$4 sm:$0xff]  }
 0xfe7   :  { %v11929_v50 = vpack.c.bf16 %v4931_v18, %v4931_v18  ;;  %v8502_v18 = vld [vmem:[#allocation8 + $0x84] ss:$16 sps:$4 sm:$0xff]  }
 0xfe9   :  { %5049 = vmatmul.mubr.bf16.vlgmr.msra.gmra.mrb[152].mxu0 %v11929_v50  ;;  %5090 = vmatmul.mubr.bf16.vlgmr.msra.gmra.mrb[152].mxu1 %v11929_v50 }
 0xfea   :  { %5134 = vmatpush1.bf16.msra.mxu0 %v8488_v54  ;;  %5175 = vmatpush1.bf16.msra.mxu1 %v8489_v59  ;;  %v8503_v54 = vld [vmem:[#allocation8 + $0x8c] ss:$16 sps:$4 sm:$0xff]   ;;  %v8504_v59 = vld [vmem:[#allocation8 + $0x80] ss:$16 sps:$4 sm:$0xff]  }
 0xfeb   :  { %5135 = vmatprep.subr.bf16.mxu0 %v8490_v17  ;;  %5176 = vmatprep.subr.bf16.mxu1 %v8491_v0  ;;  %v8505_v17 = vld [vmem:[#allocation8 + $0x88] ss:$16 sps:$4 sm:$0xff]   ;;  %v8506_v0 = vld [vmem:[#allocation8 + $0xa4] ss:$16 sps:$4 sm:$0xff]  }
 0xfec   :  { %5165 = vmatprep.mubr.bf16.mxu0 %v12767_v63  ;;  %5206 = vmatprep.mubr.bf16.mxu1 %v12767_v63 }
 0xfee   :  { %5136 = vmatpush1.bf16.msra.mxu0 %v8492_v37  ;;  %5177 = vmatpush1.bf16.msra.mxu1 %v8493_v6  ;;  %v8507_v37 = vld [vmem:[#allocation8 + $0xac] ss:$16 sps:$4 sm:$0xff]   ;;  %v8508_v6 = vld [vmem:[#allocation8 + $0xa0] ss:$16 sps:$4 sm:$0xff]  }
 0xfef   :  { %5137 = vmatprep.subr.bf16.mxu0 %v8494_v13  ;;  %5178 = vmatprep.subr.bf16.mxu1 %v8495_v27  ;;  %v8509_v13 = vld [vmem:[#allocation8 + $0xa8] ss:$16 sps:$4 sm:$0xff]   ;;  %v8510_v27 = vld [vmem:[#allocation8 + $0xc4] ss:$16 sps:$4 sm:$0xff]  }
 0xff2   :  { %5138 = vmatpush1.bf16.msra.mxu0 %v8496_v57  ;;  %5179 = vmatpush1.bf16.msra.mxu1 %v8497_v33  ;;  %v8511_v57 = vld [vmem:[#allocation8 + $0xcc] ss:$16 sps:$4 sm:$0xff]   ;;  %v8512_v33 = vld [vmem:[#allocation8 + $0xc0] ss:$16 sps:$4 sm:$0xff]  }
 0xff3   :  { %5139 = vmatprep.subr.bf16.mxu0 %v8498_v12  ;;  %5180 = vmatprep.subr.bf16.mxu1 %v8499_v5  ;;  %v8513_v12 = vld [vmem:[#allocation8 + $0xc8] ss:$16 sps:$4 sm:$0xff]   ;;  %v8514_v5 = vld [vmem:[#allocation8 + $0xe4] ss:$16 sps:$4 sm:$0xff]  }
 0xff6   :  { %5140 = vmatpush1.bf16.msra.mxu0 %v8500_v19  ;;  %5181 = vmatpush1.bf16.msra.mxu1 %v8501_v47  ;;  %v8515_v19 = vld [vmem:[#allocation8 + $0xec] ss:$16 sps:$4 sm:$0xff]   ;;  %v8516_v47 = vld [vmem:[#allocation8 + $0xe0] ss:$16 sps:$4 sm:$0xff]  }
 0xff7   :  { %5141 = vmatprep.subr.bf16.mxu0 %v8502_v18  ;;  %5182 = vmatprep.subr.bf16.mxu1 %v8503_v54  ;;  %v8517_v18 = vld [vmem:[#allocation8 + $0xe8] ss:$16 sps:$4 sm:$0xff]  }
 0xffa   :  { %5142 = vmatpush1.bf16.msra.mxu0 %v8504_v59  ;;  %5183 = vmatpush1.bf16.msra.mxu1 %v8505_v17 }
 0xffb   :  { %5143 = vmatprep.subr.bf16.mxu0 %v8506_v0  ;;  %5184 = vmatprep.subr.bf16.mxu1 %v8507_v37 }
 0xffe   :  { %5144 = vmatpush1.bf16.msra.mxu0 %v8508_v6  ;;  %5185 = vmatpush1.bf16.msra.mxu1 %v8509_v13 }
 0xfff   :  { %5145 = vmatprep.subr.bf16.mxu0 %v8510_v27  ;;  %5186 = vmatprep.subr.bf16.mxu1 %v8511_v57 }
0x1002   :  { %5146 = vmatpush1.bf16.msra.mxu0 %v8512_v33  ;;  %5187 = vmatpush1.bf16.msra.mxu1 %v8513_v12  ;;  %v13551_v12 = vld [vmem:[#allocation25_spill] sm:$0xff] }
0x1003   :  { %5147 = vmatprep.subr.bf16.mxu0 %v8514_v5  ;;  %5188 = vmatprep.subr.bf16.mxu1 %v8515_v19 }
0x1006   :  { %5148 = vmatpush1.bf16.msra.mxu0 %v8516_v47  ;;  %5189 = vmatpush1.bf16.msra.mxu1 %v8517_v18  ;;  %v13552_v18 = vld [vmem:[#allocation26_spill] sm:$0xff] }
0x1007   :  { %5244 = vmatprep.subr.bf16.mxu0 %v11478_v3  ;;  %5285 = vmatprep.subr.bf16.mxu1 %v11481_v45  ;;  %v13517_v3 = vld [vmem:[#allocation156_spill] sm:$0xff]  ;;  %v13518_v45 = vld [vmem:[#allocation157_spill] sm:$0xff] }
0x1009   :  { %5166 = vmatmul.mubr.bf16.vlgmr.msra.gmra.mrb[156].mxu0 %v11714_v48  ;;  %5207 = vmatmul.mubr.bf16.vlgmr.msra.gmra.mrb[156].mxu1 %v11714_v48  ;;  %v13549_v48 = vld [vmem:[#allocation46_spill] sm:$0xff] }
0x100a   :  { %5245 = vmatpush1.bf16.msra.mxu0 %v11486_v42  ;;  %5286 = vmatpush1.bf16.msra.mxu1 %v11489_v38  ;;  %v13519_v42 = vld [vmem:[#allocation158_spill] sm:$0xff]  ;;  %v13520_v38 = vld [vmem:[#allocation159_spill] sm:$0xff] }
0x100b   :  { %5246 = vmatprep.subr.bf16.mxu0 %v11492_v60  ;;  %5287 = vmatprep.subr.bf16.mxu1 %v11495_v58  ;;  %v13521_v60 = vld [vmem:[#allocation160_spill] sm:$0xff]  ;;  %v13522_v58 = vld [vmem:[#allocation161_spill] sm:$0xff] }
0x100c   :  { %5276 = vmatprep.mubr.bf16.mxu0 %v12767_v63  ;;  %5317 = vmatprep.mubr.bf16.mxu1 %v12767_v63 }
0x100e   :  { %5247 = vmatpush1.bf16.msra.mxu0 %v11500_v16  ;;  %5288 = vmatpush1.bf16.msra.mxu1 %v11503_v53  ;;  %v13523_v16 = vld [vmem:[#allocation58_spill] sm:$0xff]  ;;  %v13524_v53 = vld [vmem:[#allocation68_spill] sm:$0xff] }
0x100f   :  { %5248 = vmatprep.subr.bf16.mxu0 %v11506_v9  ;;  %5289 = vmatprep.subr.bf16.mxu1 %v11509_v22  ;;  %v13525_v9 = vld [vmem:[#allocation69_spill] sm:$0xff]  ;;  %v13526_v22 = vld [vmem:[#allocation70_spill] sm:$0xff] }
0x1012   :  { %5249 = vmatpush1.bf16.msra.mxu0 %v11512_v25  ;;  %5290 = vmatpush1.bf16.msra.mxu1 %v11515_v28  ;;  %v13527_v25 = vld [vmem:[#allocation71_spill] sm:$0xff] }
0x1013   :  { %5250 = vmatprep.subr.bf16.mxu0 %v11518_v20  ;;  %5291 = vmatprep.subr.bf16.mxu1 %v11521_v26  ;;  %v13528_v28 = vld [vmem:[#allocation59_spill] sm:$0xff]  ;;  %v13529_v20 = vld [vmem:[#allocation61_spill] sm:$0xff]  ;;  %v13530_v26 = vld [vmem:[#allocation62_spill] sm:$0xff] }
0x1016   :  { %5251 = vmatpush1.bf16.msra.mxu0 %v11524_v10  ;;  %5292 = vmatpush1.bf16.msra.mxu1 %v11527_v29  ;;  %v13531_v10 = vld [vmem:[#allocation28_spill] sm:$0xff]  ;;  %v13532_v29 = vld [vmem:[#allocation29_spill] sm:$0xff] }
0x1017   :  { %5252 = vmatprep.subr.bf16.mxu0 %v11530_v30  ;;  %5293 = vmatprep.subr.bf16.mxu1 %v11533_v1  ;;  %v13533_v30 = vld [vmem:[#allocation30_spill] sm:$0xff]  ;;  %v13534_v1 = vld [vmem:[#allocation31_spill] sm:$0xff] }
0x101a   :  { %5253 = vmatpush1.bf16.msra.mxu0 %v11536_v49  ;;  %5294 = vmatpush1.bf16.msra.mxu1 %v11539_v62  ;;  %v13535_v49 = vld [vmem:[#allocation32_spill] sm:$0xff]  ;;  %v13536_v62 = vld [vmem:[#allocation33_spill] sm:$0xff] }
0x101b   :  { %5254 = vmatprep.subr.bf16.mxu0 %v11542_v15  ;;  %5295 = vmatprep.subr.bf16.mxu1 %v11545_v2  ;;  %v13537_v15 = vld [vmem:[#allocation34_spill] sm:$0xff]  ;;  %v13538_v2 = vld [vmem:[#allocation35_spill] sm:$0xff] }
0x101e   :  { %5255 = vmatpush1.bf16.msra.mxu0 %v11548_v7  ;;  %5296 = vmatpush1.bf16.msra.mxu1 %v11551_v11  ;;  %v13539_v7 = vld [vmem:[#allocation36_spill] sm:$0xff]  ;;  %v13540_v11 = vld [vmem:[#allocation37_spill] sm:$0xff] }
0x101f   :  { %5256 = vmatprep.subr.bf16.mxu0 %v11554_v40  ;;  %5297 = vmatprep.subr.bf16.mxu1 %v11557_v23  ;;  %v13541_v40 = vld [vmem:[#allocation38_spill] sm:$0xff]  ;;  %v13542_v23 = vld [vmem:[#allocation39_spill] sm:$0xff] }
0x1022   :  { %5257 = vmatpush1.bf16.msra.mxu0 %v11560_v8  ;;  %5298 = vmatpush1.bf16.msra.mxu1 %v11563_v21  ;;  %v13543_v8 = vld [vmem:[#allocation40_spill] sm:$0xff]  ;;  %v13544_v21 = vld [vmem:[#allocation41_spill] sm:$0xff] }
0x1023   :  { %5258 = vmatprep.subr.bf16.mxu0 %v11566_v32  ;;  %5299 = vmatprep.subr.bf16.mxu1 %v11569_v14  ;;  %v13545_v32 = vld [vmem:[#allocation42_spill] sm:$0xff]  ;;  %v13546_v14 = vld [vmem:[#allocation43_spill] sm:$0xff] }
0x1026   :  { %5259 = vmatpush1.bf16.msra.mxu0 %v11572_v31  ;;  %5300 = vmatpush1.bf16.msra.mxu1 %v11575_v36  ;;  %v13547_v31 = vld [vmem:[#allocation44_spill] sm:$0xff]  ;;  %v13548_v36 = vld [vmem:[#allocation45_spill] sm:$0xff] }
0x1027   :  { %5326 = vmatprep.subr.bf16.mxu0 %v13517_v3  ;;  %5367 = vmatprep.subr.bf16.mxu1 %v13518_v45 }
0x1029   :  { %5277 = vmatmul.mubr.bf16.vlgmr.msra.gmra.mrb[160].mxu0 %v11929_v50  ;;  %5318 = vmatmul.mubr.bf16.vlgmr.msra.gmra.mrb[160].mxu1 %v11929_v50  ;;  %v13550_v50 = vld [vmem:[#allocation47_spill] sm:$0xff] }
0x102a   :  { %5327 = vmatpush1.bf16.msra.mxu0 %v13519_v42  ;;  %5368 = vmatpush1.bf16.msra.mxu1 %v13520_v38 }
0x102b   :  { %5328 = vmatprep.subr.bf16.mxu0 %v13521_v60  ;;  %5369 = vmatprep.subr.bf16.mxu1 %v13522_v58 }
0x102c   :  { %5358 = vmatprep.mubr.bf16.mxu0 %v12767_v63  ;;  %5399 = vmatprep.mubr.bf16.mxu1 %v12767_v63 }
0x102e   :  { %5329 = vmatpush1.bf16.msra.mxu0 %v13523_v16  ;;  %5370 = vmatpush1.bf16.msra.mxu1 %v13524_v53 }
0x102f   :  { %5330 = vmatprep.subr.bf16.mxu0 %v13525_v9  ;;  %5371 = vmatprep.subr.bf16.mxu1 %v13526_v22 }
0x1032   :  { %5331 = vmatpush1.bf16.msra.mxu0 %v13527_v25  ;;  %5372 = vmatpush1.bf16.msra.mxu1 %v13528_v28 }
0x1033   :  { %5332 = vmatprep.subr.bf16.mxu0 %v13529_v20  ;;  %5373 = vmatprep.subr.bf16.mxu1 %v13530_v26  ;;  %v13554_v20 = vld [vmem:[#allocation80_spill] sm:$0xff] }
0x1036   :  { %5333 = vmatpush1.bf16.msra.mxu0 %v13531_v10  ;;  %5374 = vmatpush1.bf16.msra.mxu1 %v13532_v29  ;;  %v13555_v10 = vld [vmem:[#allocation81_spill] sm:$0xff] }
0x1037   :  { %5334 = vmatprep.subr.bf16.mxu0 %v13533_v30  ;;  %5375 = vmatprep.subr.bf16.mxu1 %v13534_v1 }
0x103a   :  { %5335 = vmatpush1.bf16.msra.mxu0 %v13535_v49  ;;  %5376 = vmatpush1.bf16.msra.mxu1 %v13536_v62  ;;  %v13556_v49 = vld [vmem:[#allocation82_spill] sm:$0xff] }
0x103b   :  { %5336 = vmatprep.subr.bf16.mxu0 %v13537_v15  ;;  %5377 = vmatprep.subr.bf16.mxu1 %v13538_v2  ;;  %v13557_v15 = vld [vmem:[#allocation83_spill] sm:$0xff] }
0x103e   :  { %5337 = vmatpush1.bf16.msra.mxu0 %v13539_v7  ;;  %5378 = vmatpush1.bf16.msra.mxu1 %v13540_v11 }
0x103f   :  { %5338 = vmatprep.subr.bf16.mxu0 %v13541_v40  ;;  %5379 = vmatprep.subr.bf16.mxu1 %v13542_v23 }
0x1042   :  { %5339 = vmatpush1.bf16.msra.mxu0 %v13543_v8  ;;  %5380 = vmatpush1.bf16.msra.mxu1 %v13544_v21 }
0x1043   :  { %5340 = vmatprep.subr.bf16.mxu0 %v13545_v32  ;;  %5381 = vmatprep.subr.bf16.mxu1 %v13546_v14 }
0x1046   :  { %5341 = vmatpush1.bf16.msra.mxu0 %v13547_v31  ;;  %5382 = vmatpush1.bf16.msra.mxu1 %v13548_v36 }
0x1047   :  { %5438 = vmatprep.subr.bf16.mxu0 %v13549_v48  ;;  %5479 = vmatprep.subr.bf16.mxu1 %v13550_v50 }
0x10bc   :  { %v5050_v54 = vpop.f32.mrb[152].mxu0  ;;  %v5091_v59 = vpop.f32.mrb[152].mxu1 }
0x10bd   :  { %v5051_v17 = vadd.f32 %v5050_v54, %v11917_v44  ;;  %v12011_v0 = vadd.f32 %v5091_v59, %v11919_v55  ;;  %v5052_v37 = vpop.f32.mrb[153].mxu0  ;;  %v5093_v6 = vpop.f32.mrb[153].mxu1  ;;  %v13553_v44 = vld [vmem:[#allocation27_spill] sm:$0xff] }
0x10be   :  { %v5053_v13 = vadd.f32 %v5052_v37, %v11922_v61  ;;  %v5094_v27 = vadd.f32 %v5093_v6, %v11924_v24  ;;  %v5054_v57 = vpop.f32.mrb[154].mxu0  ;;  %v5095_v33 = vpop.f32.mrb[154].mxu1 }
0x10bf   :  { %v5098_v5 = vadd.f32 %v5051_v17, %v13551_v12  ;;  %v5055_v19 = vpop.f32.mrb[155].mxu0  ;;  %v5096_v47 = vpop.f32.mrb[155].mxu1 }
0x10c0   :  { %v5099_v3 = vadd.f32 %v5053_v13, %v13552_v18  ;;  %v5101_v55 = vadd.f32 %v5094_v27, %v13553_v44 }
0x10c1   :  { %v6676_v45 = vmul.f32 -1.442695, %v5098_v5 }
0x10c2   :  { %v6677_v42 = vmul.f32 -1.442695, %v5099_v3 }
0x10c3   :  { %7942 = vpow2.f32 %v6676_v45 }
0x10c4   :  { %7944 = vpow2.f32 %v6677_v42 }
0x10c5   :  { %7946 = vtanh.f32 %v5101_v55  ;;  %v5100_v55 = vadd.f32 %v12011_v0, %v9773_v41  ;;  %v13560_v0 = vld [vmem:[#allocation50_spill] sm:$0xff] }
0x10cd   :  { %v7943_v38 = vpop.eup %7942 }
0x10ce   :  { %v5111_v60 = vadd.f32 1.0, %v7943_v38  ;;  %v7945_v58 = vpop.eup %7944 }
0x10cf   :  { %v5112_v61 = vadd.f32 1.0, %v7945_v58  ;;  %v7947_v24 = vpop.eup %7946 }
0x10d0   :  { %7948 = vrcp.f32 %v5111_v60 }
0x10d1   :  { %7950 = vrcp.f32 %v5112_v61 }
0x10da   :  { %v7949_v16 = vpop.eup %7948 }
0x10db   :  { %v5122_v53 = vmul.f32 %v7949_v16, %v7947_v24  ;;  %v7951_v9 = vpop.eup %7950  ;;  %v13558_v24 = vld [vmem:[#allocation48_spill] sm:$0xff]  ;;  %v13559_v16 = vld [vmem:[#allocation49_spill] sm:$0xff] }
0x10dc   :  { %v5167_v22 = vpop.f32.mrb[156].mxu0  ;;  %v5208_v25 = vpop.f32.mrb[156].mxu1  ;;  %v5121_v28 = vmul.f32 %v7951_v9, %v11698_v43  ;;  %v13562_v9 = vld [vmem:[#allocation60_spill] sm:$0xff] }
0x10dd   :  { %v5215_v26 = vadd.f32 %v5167_v22, %v13554_v20  ;;  %v5217_v29 = vadd.f32 %v5208_v25, %v13555_v10  ;;  %v5169_v30 = vpop.f32.mrb[157].mxu0  ;;  %v5210_v1 = vpop.f32.mrb[157].mxu1  ;;  %v13563_v22 = vld [vmem:[#allocation63_spill] sm:$0xff]  ;;  %v13568_v10 = vld [vmem:[#allocation56_spill] sm:$0xff] }
0x10de   :  { %v5216_v62 = vadd.f32 %v5169_v30, %v13556_v49  ;;  %v5218_v2 = vadd.f32 %v5210_v1, %v13557_v15  ;;  %v5171_v7 = vpop.f32.mrb[158].mxu0  ;;  %v5212_v11 = vpop.f32.mrb[158].mxu1  ;;  %v12023_v40 = vadd.f32 %v5122_v53, %v5121_v28  ;;  %v13561_v53 = vld [vmem:[#allocation51_spill] sm:$0xff]  ;;  %v13566_v28 = vld [vmem:[#allocation54_spill] sm:$0xff]  ;;  %v13570_v30 = vld [vmem:[#allocation73_spill] sm:$0xff] }
0x10df   :  { %v6679_v23 = vmul.f32 -1.442695, %v5215_v26  ;;  %v5172_v8 = vpop.f32.mrb[159].mxu0  ;;  %v5213_v21 = vpop.f32.mrb[159].mxu1  ;;  %v6681_v43 = vmul.f32 -1.442695, %v5217_v29 }
0x10e0   :  { %v6680_v32 = vmul.f32 -1.442695, %v5216_v62  ;;  %v13567_v20 = vld [vmem:[#allocation55_spill] sm:$0xff]  ;;  %v13569_v29 = vld [vmem:[#allocation72_spill] sm:$0xff]  ;;  %v13571_v1 = vld [vmem:[#allocation74_spill] sm:$0xff] }
0x10e1   :  { %7952 = vpow2.f32 %v6679_v23  ;;  %v13572_v49 = vld [vmem:[#allocation75_spill] sm:$0xff]  ;;  %v13573_v62 = vld [vmem:[#allocation57_spill] sm:$0xff]  ;;  %v13574_v15 = vld [vmem:[#allocation84_spill] sm:$0xff] }
0x10e2   :  { %7954 = vpow2.f32 %v6680_v32  ;;  %v13576_v7 = vld [vmem:[#allocation64_spill] sm:$0xff]  ;;  %v13577_v11 = vld [vmem:[#allocation65_spill] sm:$0xff]  ;;  %v13578_v23 = vld [vmem:[#allocation66_spill] sm:$0xff] }
0x10e3   :  { %7956 = vtanh.f32 %v5218_v2  ;;  %v13575_v2 = vld [vmem:[#allocation85_spill] sm:$0xff]  ;;  %v13579_v8 = vld [vmem:[#allocation67_spill] sm:$0xff] }
0x10e4   :  { %7958 = vpow2.f32 %v6681_v43  ;;  %v13580_v43 = vld [vmem:[#allocation86_spill] sm:$0xff] }
0x10eb   :  { %v7953_v14 = vpop.eup %7952 }
0x10ec   :  { %v5228_v31 = vadd.f32 1.0, %v7953_v14  ;;  %v7955_v36 = vpop.eup %7954  ;;  %v13581_v14 = vld [vmem:[#allocation87_spill] sm:$0xff] }
0x10ed   :  { %v5229_v48 = vadd.f32 1.0, %v7955_v36  ;;  %v7957_v50 = vpop.eup %7956  ;;  %v13583_v36 = vld [vmem:[#allocation89_spill] sm:$0xff] }
0x10ee   :  { %7960 = vrcp.f32 %v5228_v31  ;;  %v7959_v54 = vpop.eup %7958  ;;  %v13582_v31 = vld [vmem:[#allocation88_spill] sm:$0xff] }
0x10ef   :  { %7962 = vrcp.f32 %v5229_v48  ;;  %v5230_v6 = vadd.f32 1.0, %v7959_v54  ;;  %v13585_v54 = vld [vmem:[#allocation91_spill] sm:$0xff] }
0x10f1   :  { %7964 = vrcp.f32 %v5230_v6  ;;  %v13588_v6 = vld [vmem:[#allocation94_spill] sm:$0xff] }
0x10f8   :  { %v7961_v59 = vpop.eup %7960 }
0x10f9   :  { %v5239_v17 = vmul.f32 %v7961_v59, %v7957_v50  ;;  %v7963_v37 = vpop.eup %7962  ;;  %v13584_v50 = vld [vmem:[#allocation90_spill] sm:$0xff] }
0x10fa   :  { %v5238_v13 = vmul.f32 %v7963_v37, %v11709_v39  ;;  %v6678_v39 = vmul.f32 -1.442695, %v5100_v55  ;;  %v13587_v37 = vld [vmem:[#allocation93_spill] sm:$0xff]  ;;  %v13595_v55 = vld [vmem:[#allocation100_spill] sm:$0xff] }
0x10fb   :  { %v7965_v38 = vpop.eup %7964 }
0x10fc   :  { %v12026_v27 = vpop.f32.mrb[160].mxu0  ;;  %v12028_v57 = vpop.f32.mrb[160].mxu1  ;;  %v5240_v19 = vadd.f32 %v5239_v17, %v5238_v13  ;;  %v13586_v17 = vld [vmem:[#allocation92_spill] sm:$0xff]  ;;  %v13589_v13 = vld [vmem:[#allocation95_spill] sm:$0xff] }
0x10fd   :  { %v12030_v33 = vpop.f32.mrb[161].mxu0  ;;  %v12032_v5 = vpop.f32.mrb[161].mxu1 }
0x10fe   :  { %v5282_v47 = vpop.f32.mrb[162].mxu0  ;;  %v5323_v3 = vpop.f32.mrb[162].mxu1  ;;  %7966 = vtanh.f32 %v5240_v19  ;;  %v13590_v19 = vld [vmem:[#allocation96_spill] sm:$0xff] }
0x10ff   :  { %v5283_v45 = vpop.f32.mrb[163].mxu0  ;;  %v5324_v42 = vpop.f32.mrb[163].mxu1  ;;  %7968 = vpow2.f32 %v6678_v39  ;;  %v13591_v47 = vld [vmem:[#allocation97_spill] sm:$0xff]  ;;  %v13592_v3 = vld [vmem:[#allocation98_spill] sm:$0xff]  ;;  %v13597_v39 = vld [vmem:[#allocation103_spill] sm:$0xff] }
0x1100   :  { %7970 = vtanh.f32 %v12023_v40  ;;  %v13593_v45 = vld [vmem:[#allocation99_spill] sm:$0xff]  ;;  %v13594_v42 = vld [vmem:[#allocation101_spill] sm:$0xff] }
0x1108   :  { %v7967_v60 = vpop.eup %7966 }
0x1109   :  { %v5242_v58 = vmul.f32 %v7967_v60, %v7965_v38  ;;  %v7969_v25 = vpop.eup %7968  ;;  %v13596_v38 = vld [vmem:[#allocation102_spill] sm:$0xff]  ;;  %v13598_v60 = vld [vmem:[#allocation105_spill] sm:$0xff] }
0x110a   :  { %v5113_v26 = vadd.f32 1.0, %v7969_v25  ;;  %v7971_v21 = vpop.eup %7970  ;;  %v13608_v25 = vld [vmem:[#allocation114_spill] sm:$0xff] }
0x110b   :  { %v5243_v61 = vpack.c.bf16 %v5242_v58, %v5242_v58  ;;  %v13599_v58 = vld [vmem:[#allocation104_spill] sm:$0xff] }
0x110c   :  { %7972 = vrcp.f32 %v5113_v26  ;;  %v13613_v26 = vld [vmem:[#allocation119_spill] sm:$0xff] }
0x110d   :  { %5359 = vmatmul.mubr.bf16.vlgmr.msra.gmra.mrb[164].mxu0 %v5243_v61  ;;  %5400 = vmatmul.mubr.bf16.vlgmr.msra.gmra.mrb[164].mxu1 %v5243_v61  ;;  %v13600_v61 = vld [vmem:[#allocation106_spill] sm:$0xff] }
0x110e   :  { %5439 = vmatpush1.bf16.msra.mxu0 %v11718_v34  ;;  %5480 = vmatpush1.bf16.msra.mxu1 %v11721_v35  ;;  %v13564_v34 = vld [vmem:[#allocation52_spill] sm:$0xff]  ;;  %v13565_v35 = vld [vmem:[#allocation53_spill] sm:$0xff] }
0x110f   :  { %5440 = vmatprep.subr.bf16.mxu0 %v13558_v24  ;;  %5481 = vmatprep.subr.bf16.mxu1 %v13559_v16  ;;  %v13601_v24 = vld [vmem:[#allocation107_spill] sm:$0xff]  ;;  %v13603_v16 = vld [vmem:[#allocation108_spill] sm:$0xff] }
0x1110   :  { %5470 = vmatprep.mubr.bf16.mxu0 %v12767_v63  ;;  %5511 = vmatprep.mubr.bf16.mxu1 %v12767_v63 }
0x1112   :  { %5441 = vmatpush1.bf16.msra.mxu0 %v13560_v0  ;;  %5482 = vmatpush1.bf16.msra.mxu1 %v13561_v53  ;;  %v13604_v0 = vld [vmem:[#allocation110_spill] sm:$0xff]  ;;  %v13605_v53 = vld [vmem:[#allocation111_spill] sm:$0xff] }
0x1113   :  { %5442 = vmatprep.subr.bf16.mxu0 %v13562_v9  ;;  %5483 = vmatprep.subr.bf16.mxu1 %v13563_v22  ;;  %v13606_v9 = vld [vmem:[#allocation113_spill] sm:$0xff]  ;;  %v13607_v22 = vld [vmem:[#allocation112_spill] sm:$0xff] }
0x1116   :  { %5443 = vmatpush1.bf16.msra.mxu0 %v13564_v34  ;;  %5484 = vmatpush1.bf16.msra.mxu1 %v13565_v35  ;;  %v7973_v32 = vpop.eup %7972  ;;  %v13609_v34 = vld [vmem:[#allocation115_spill] sm:$0xff]  ;;  %v13610_v35 = vld [vmem:[#allocation116_spill] sm:$0xff] }
0x1117   :  { %5444 = vmatprep.subr.bf16.mxu0 %v13566_v28  ;;  %5485 = vmatprep.subr.bf16.mxu1 %v13567_v20  ;;  %v5125_v48 = vmul.f32 %v7973_v32, %v7971_v21  ;;  %v13611_v28 = vld [vmem:[#allocation117_spill] sm:$0xff]  ;;  %v13612_v20 = vld [vmem:[#allocation118_spill] sm:$0xff] }
0x1119   :  { %v5437_v59 = vpack.c.bf16 %v5125_v48, %v5125_v48 }
0x111a   :  { %5445 = vmatpush1.bf16.msra.mxu0 %v13568_v10  ;;  %5486 = vmatpush1.bf16.msra.mxu1 %v13569_v29  ;;  %v13614_v10 = vld [vmem:[#allocation120_spill] sm:$0xff]  ;;  %v13615_v29 = vld [vmem:[#allocation121_spill] sm:$0xff] }
0x111b   :  { %5446 = vmatprep.subr.bf16.mxu0 %v13570_v30  ;;  %5487 = vmatprep.subr.bf16.mxu1 %v13571_v1  ;;  %v13616_v30 = vld [vmem:[#allocation122_spill] sm:$0xff]  ;;  %v13617_v1 = vld [vmem:[#allocation123_spill] sm:$0xff] }
0x111e   :  { %5447 = vmatpush1.bf16.msra.mxu0 %v13572_v49  ;;  %5488 = vmatpush1.bf16.msra.mxu1 %v13573_v62 }
0x111f   :  { %5448 = vmatprep.subr.bf16.mxu0 %v13574_v15  ;;  %5489 = vmatprep.subr.bf16.mxu1 %v13575_v2 }
0x1122   :  { %5449 = vmatpush1.bf16.msra.mxu0 %v13576_v7  ;;  %5490 = vmatpush1.bf16.msra.mxu1 %v13577_v11 }
0x1123   :  { %5450 = vmatprep.subr.bf16.mxu0 %v13578_v23  ;;  %5491 = vmatprep.subr.bf16.mxu1 %v13579_v8 }
0x1126   :  { %5451 = vmatpush1.bf16.msra.mxu0 %v13580_v43  ;;  %5492 = vmatpush1.bf16.msra.mxu1 %v13581_v14 }
0x1127   :  { %5452 = vmatprep.subr.bf16.mxu0 %v13582_v31  ;;  %5493 = vmatprep.subr.bf16.mxu1 %v13583_v36 }
0x112a   :  { %5453 = vmatpush1.bf16.msra.mxu0 %v13584_v50  ;;  %5494 = vmatpush1.bf16.msra.mxu1 %v13585_v54 }
0x112b   :  { %5520 = vmatprep.subr.bf16.mxu0 %v13586_v17  ;;  %5561 = vmatprep.subr.bf16.mxu1 %v13587_v37 }
0x112d   :  { %5471 = vmatmul.mubr.bf16.vlgmr.msra.gmra.mrb[168].mxu0 %v5437_v59  ;;  %5512 = vmatmul.mubr.bf16.vlgmr.msra.gmra.mrb[168].mxu1 %v5437_v59 }
0x112e   :  { %5521 = vmatpush1.bf16.msra.mxu0 %v13588_v6  ;;  %5562 = vmatpush1.bf16.msra.mxu1 %v13589_v13 }
0x112f   :  { %5522 = vmatprep.subr.bf16.mxu0 %v13590_v19  ;;  %5563 = vmatprep.subr.bf16.mxu1 %v13591_v47 }
0x1130   :  { %5552 = vmatprep.mubr.bf16.mxu0 %v12767_v63  ;;  %5593 = vmatprep.mubr.bf16.mxu1 %v12767_v63  ;;  %v13602_v63 = vld [vmem:[#allocation109_spill] sm:$0xff] }
0x1132   :  { %5523 = vmatpush1.bf16.msra.mxu0 %v13592_v3  ;;  %5564 = vmatpush1.bf16.msra.mxu1 %v13593_v45 }
0x1133   :  { %5524 = vmatprep.subr.bf16.mxu0 %v13594_v42  ;;  %5565 = vmatprep.subr.bf16.mxu1 %v13595_v55 }
0x1136   :  { %5525 = vmatpush1.bf16.msra.mxu0 %v13596_v38  ;;  %5566 = vmatpush1.bf16.msra.mxu1 %v13597_v39 }
0x1137   :  { %5526 = vmatprep.subr.bf16.mxu0 %v13598_v60  ;;  %5567 = vmatprep.subr.bf16.mxu1 %v13599_v58 }
0x113a   :  { %5527 = vmatpush1.bf16.msra.mxu0 %v13600_v61  ;;  %5568 = vmatpush1.bf16.msra.mxu1 %v13601_v24 }
0x113b   :  { %5528 = vmatprep.subr.bf16.mxu0 %v13602_v63  ;;  %5569 = vmatprep.subr.bf16.mxu1 %v13603_v16  ;;  %v5630_v16 = vld [vmem:[#allocation15] sm:$0xff] }
0x113e   :  { %5529 = vmatpush1.bf16.msra.mxu0 %v13604_v0  ;;  %5570 = vmatpush1.bf16.msra.mxu1 %v13605_v53  ;;  %v5631_v0 = vld [vmem:[#allocation15 + $0x8] sm:$0xff]  ;;  %v8766_v53 = vmov 0.0|0.0  }
0x113f   :  { %5530 = vmatprep.subr.bf16.mxu0 %v13606_v9  ;;  %5571 = vmatprep.subr.bf16.mxu1 %v13607_v22  ;;  %v5632_v9 = vld [vmem:[#allocation15 + $0x10] sm:$0xff]  ;;  %v5633_v22 = vld [vmem:[#allocation15 + $0x18] sm:$0xff] }
0x1142   :  { %5531 = vmatpush1.bf16.msra.mxu0 %v13608_v25  ;;  %5572 = vmatpush1.bf16.msra.mxu1 %v13609_v34  ;;  %v7122_v25 = vpack.c.bf16 %v5633_v22, %v5632_v9  ;;  %v5634_v34 = vld [vmem:[#allocation15 + $0x20] sm:$0xff] }
0x1143   :  { %5532 = vmatprep.subr.bf16.mxu0 %v13610_v35  ;;  %5573 = vmatprep.subr.bf16.mxu1 %v13611_v28  ;;  %v5635_v35 = vld [vmem:[#allocation15 + $0x28] sm:$0xff] }
0x1144   :  { %v7125_v28 = vpack.c.bf16 %v5635_v35, %v5634_v34 }
0x1146   :  { %5533 = vmatpush1.bf16.msra.mxu0 %v13612_v20  ;;  %5574 = vmatpush1.bf16.msra.mxu1 %v13613_v26  ;;  %v5636_v20 = vld [vmem:[#allocation15 + $0x30] sm:$0xff]  ;;  %v5637_v26 = vld [vmem:[#allocation15 + $0x38] sm:$0xff] }
0x1147   :  { %5534 = vmatprep.subr.bf16.mxu0 %v13614_v10  ;;  %5575 = vmatprep.subr.bf16.mxu1 %v13615_v29  ;;  %v7128_v10 = vpack.c.bf16 %v5637_v26, %v5636_v20  ;;  %v5638_v29 = vld [vmem:[#allocation15 + $0x40] sm:$0xff] }
0x114a   :  { %5535 = vmatpush1.bf16.msra.mxu0 %v13616_v30  ;;  %5576 = vmatpush1.bf16.msra.mxu1 %v13617_v1  ;;  %v5639_v30 = vld [vmem:[#allocation15 + $0x48] sm:$0xff] }
0x114b   :  { %7118 = vmatprep.subr.bf16.mxu0 %v8766_v53  ;;  %7142 = vmatprep.subr.bf16.mxu1 %v8766_v53  ;;  %v7131_v1 = vpack.c.bf16 %v5639_v30, %v5638_v29 }
0x11e0   :  { %v5360_v49 = vpop.f32.mrb[164].mxu0  ;;  %v5401_v62 = vpop.f32.mrb[164].mxu1 }
0x11e1   :  { %v5361_v15 = vadd.f32 %v5360_v49, %v12026_v27  ;;  %v5402_v2 = vadd.f32 %v5401_v62, %v12028_v57  ;;  %v5362_v7 = vpop.f32.mrb[165].mxu0  ;;  %v5403_v11 = vpop.f32.mrb[165].mxu1  ;;  %v5640_v49 = vld [vmem:[#allocation15 + $0x50] sm:$0xff]  ;;  %v5641_v62 = vld [vmem:[#allocation15 + $0x58] sm:$0xff] }
0x11e2   :  { %v5363_v23 = vadd.f32 %v5362_v7, %v12030_v33  ;;  %v5404_v8 = vadd.f32 %v5403_v11, %v12032_v5  ;;  %v5364_v21 = vpop.f32.mrb[166].mxu0  ;;  %v5405_v32 = vpop.f32.mrb[166].mxu1  ;;  %v5643_v7 = vld [vmem:[#allocation15 + $0x68] sm:$0xff]  ;;  %v8768_v11 = vmov 0.0  }
0x11e3   :  { %v5408_v43 = vadd.f32 %v5361_v15, %v9533_v52  ;;  %v5365_v14 = vpop.f32.mrb[167].mxu0  ;;  %v5406_v31 = vpop.f32.mrb[167].mxu1  ;;  %v5410_v27 = vadd.f32 %v5402_v2, %v9545_v4  ;;  %v7134_v15 = vpack.c.bf16 %v5641_v62, %v5640_v49  ;;  %v5642_v2 = vld [vmem:[#allocation15 + $0x60] sm:$0xff]  ;;  %v5645_v21 = vld [vmem:[#allocation15 + $0x78] sm:$0xff] }
0x11e4   :  { %v5409_v36 = vadd.f32 %v5363_v23, %v9536_v46  ;;  %v5411_v57 = vadd.f32 %v5404_v8, %v9548_v56  ;;  %v7137_v23 = vpack.c.bf16 %v5643_v7, %v5642_v2  ;;  %v5644_v8 = vld [vmem:[#allocation15 + $0x70] sm:$0xff]  ;;  %v5726_v14 = vld [vmem:[#allocation15 + $0x88] sm:$0xff]  ;;  %v5740_v7 = vld [vmem:[#allocation15 + $0xf8] sm:$0xff] }
0x11e5   :  { %v6682_v48 = vmul.f32 -1.442695, %v5408_v43  ;;  %v6684_v54 = vmul.f32 -1.442695, %v5410_v27  ;;  %v7140_v32 = vpack.c.bf16 %v5645_v21, %v5644_v8  ;;  %v5725_v43 = vld [vmem:[#allocation15 + $0x80] sm:$0xff]  ;;  %v5727_v31 = vld [vmem:[#allocation15 + $0x90] sm:$0xff] }
0x11e6   :  { %v6683_v50 = vmul.f32 -1.442695, %v5409_v36  ;;  %v7143_v36 = vpack.c.bf16 %v5726_v14, %v5725_v43  ;;  %v5729_v27 = vld [vmem:[#allocation15 + $0xa0] sm:$0xff]  ;;  %v5739_v2 = vld [vmem:[#allocation15 + $0xf0] sm:$0xff]  ;;  %v5822_v21 = vld [vmem:[#allocation15 + $0x108] sm:$0xff] }
0x11e7   :  { %7974 = vpow2.f32 %v6682_v48  ;;  %v5728_v48 = vld [vmem:[#allocation15 + $0x98] sm:$0xff]  ;;  %v5821_v8 = vld [vmem:[#allocation15 + $0x100] sm:$0xff] }
0x11e8   :  { %7976 = vpow2.f32 %v6683_v50  ;;  %v7146_v50 = vpack.c.bf16 %v5728_v48, %v5727_v31  ;;  %v5824_v43 = vld [vmem:[#allocation15 + $0x118] sm:$0xff]  ;;  %v5825_v31 = vld [vmem:[#allocation15 + $0x120] sm:$0xff] }
0x11e9   :  { %7978 = vtanh.f32 %v5411_v57  ;;  %v5730_v57 = vld [vmem:[#allocation15 + $0xa8] sm:$0xff] }
0x11ea   :  { %7980 = vpow2.f32 %v6684_v54  ;;  %v7149_v54 = vpack.c.bf16 %v5730_v57, %v5729_v27  ;;  %v5828_v27 = vld [vmem:[#allocation15 + $0x138] sm:$0xff] }
0x11f1   :  { %v7975_v33 = vpop.eup %7974 }
0x11f2   :  { %v5421_v59 = vadd.f32 1.0, %v7975_v33  ;;  %v7977_v5 = vpop.eup %7976  ;;  %v5731_v33 = vld [vmem:[#allocation15 + $0xb0] sm:$0xff] }
0x11f3   :  { %v5422_v52 = vadd.f32 1.0, %v7977_v5  ;;  %v7979_v17 = vpop.eup %7978 }
0x11f4   :  { %7982 = vrcp.f32 %v5421_v59  ;;  %v7981_v37 = vpop.eup %7980  ;;  %v5732_v59 = vld [vmem:[#allocation15 + $0xb8] sm:$0xff] }
0x11f5   :  { %7984 = vrcp.f32 %v5422_v52  ;;  %v5423_v19 = vadd.f32 1.0, %v7981_v37  ;;  %v7152_v5 = vpack.c.bf16 %v5732_v59, %v5731_v33  ;;  %v5733_v52 = vld [vmem:[#allocation15 + $0xc0] sm:$0xff]  ;;  %v5830_v33 = vld [vmem:[#allocation15 + $0x148] sm:$0xff] }
0x11f7   :  { %7986 = vrcp.f32 %v5423_v19  ;;  %v5737_v19 = vld [vmem:[#allocation15 + $0xe0] sm:$0xff] }
0x11fe   :  { %v7983_v46 = vpop.eup %7982 }
0x11ff   :  { %v5432_v6 = vmul.f32 %v7983_v46, %v7979_v17  ;;  %v7985_v13 = vpop.eup %7984  ;;  %v5734_v17 = vld [vmem:[#allocation15 + $0xc8] sm:$0xff]  ;;  %v5735_v46 = vld [vmem:[#allocation15 + $0xd0] sm:$0xff] }
0x1200   :  { %v12111_v47 = vpop.f32.mrb[168].mxu0  ;;  %v12113_v4 = vpop.f32.mrb[168].mxu1  ;;  %v5431_v56 = vmul.f32 %v7985_v13, %v11926_v51  ;;  %v7119_v51 = vpack.c.bf16 %v5631_v0, %v5630_v16  ;;  %v7155_v37 = vpack.c.bf16 %v5734_v17, %v5733_v52  ;;  %v5832_v52 = vld [vmem:[#allocation15 + $0x158] sm:$0xff] }
0x1201   :  { %v12116_v3 = vpop.f32.mrb[169].mxu0  ;;  %v12118_v45 = vpop.f32.mrb[169].mxu1 }
0x1202   :  { %v5476_v42 = vpop.f32.mrb[170].mxu0  ;;  %v5517_v55 = vpop.f32.mrb[170].mxu1  ;;  %v5433_v38 = vadd.f32 %v5432_v6, %v5431_v56  ;;  %v5736_v6 = vld [vmem:[#allocation15 + $0xd8] sm:$0xff]  ;;  %v5738_v56 = vld [vmem:[#allocation15 + $0xe8] sm:$0xff] }
0x1203   :  { %v5477_v39 = vpop.f32.mrb[171].mxu0  ;;  %v5518_v60 = vpop.f32.mrb[171].mxu1  ;;  %v7158_v13 = vpack.c.bf16 %v5736_v6, %v5735_v46  ;;  %v7161_v42 = vpack.c.bf16 %v5738_v56, %v5737_v19  ;;  %v5834_v46 = vld [vmem:[#allocation15 + $0x168] sm:$0xff] }
0x1204   :  { %7988 = vtanh.f32 %v5433_v38  ;;  %v7987_v58 = vpop.eup %7986 }
0x120e   :  { %v7989_v61 = vpop.eup %7988 }
0x120f   :  { %v5435_v24 = vmul.f32 %v7989_v61, %v7987_v58 }
0x1211   :  { %v5436_v63 = vpack.c.bf16 %v5435_v24, %v5435_v24 }
0x1213   :  { %5553 = vmatmul.mubr.bf16.vlgmr.msra.gmra.mrb[172].mxu0 %v5436_v63  ;;  %5594 = vmatmul.mubr.bf16.vlgmr.msra.gmra.mrb[172].mxu1 %v5436_v63 }
0x1214   :  { %7120 = vmatpush3.bf16.msra.mxu0 %v7119_v51  ;;  %6870 = vmatprep.mubr.msk.f32.mxu0 %vm8767_vm0, %v8768_v11 }
0x1215   :  { %7121 = vmatprep.subr.bf16.mxu0 %v8766_v53  ;;  %6905 = vmatprep.mubr.msk.f32.mxu1 %vm8767_vm0, %v8768_v11 }
0x1216   :  { %7144 = vmatpush3.bf16.msra.mxu1 %v7143_v36  ;;  %v5826_v36 = vld [vmem:[#allocation15 + $0x128] sm:$0xff] }
0x1217   :  { %7145 = vmatprep.subr.bf16.mxu1 %v8766_v53  ;;  %v7173_v48 = vpack.c.bf16 %v5826_v36, %v5825_v31  ;;  %v6020_v31 = vld [vmem:[#allocation15 + $0x238] sm:$0xff] }
0x1218   :  { %7123 = vmatpush3.bf16.msra.mxu0 %v7122_v25 }
0x1219   :  { %7124 = vmatprep.subr.bf16.mxu0 %v8766_v53 }
0x121a   :  { %7147 = vmatpush3.bf16.msra.mxu1 %v7146_v50  ;;  %v5827_v50 = vld [vmem:[#allocation15 + $0x130] sm:$0xff] }
0x121b   :  { %7148 = vmatprep.subr.bf16.mxu1 %v8766_v53  ;;  %v7176_v57 = vpack.c.bf16 %v5828_v27, %v5827_v50  ;;  %v6022_v50 = vld [vmem:[#allocation15 + $0x248] sm:$0xff] }
0x121c   :  { %7126 = vmatpush3.bf16.msra.mxu0 %v7125_v28 }
0x121d   :  { %7127 = vmatprep.subr.bf16.mxu0 %v8766_v53 }
0x121e   :  { %7150 = vmatpush3.bf16.msra.mxu1 %v7149_v54  ;;  %v5829_v54 = vld [vmem:[#allocation15 + $0x140] sm:$0xff] }
0x121f   :  { %7151 = vmatprep.subr.bf16.mxu1 %v8766_v53  ;;  %v7179_v59 = vpack.c.bf16 %v5830_v33, %v5829_v54  ;;  %v6024_v54 = vld [vmem:[#allocation15 + $0x258] sm:$0xff] }
0x1220   :  { %7129 = vmatpush3.bf16.msra.mxu0 %v7128_v10 }
0x1221   :  { %7130 = vmatprep.subr.bf16.mxu0 %v8766_v53 }
0x1222   :  { %7153 = vmatpush3.bf16.msra.mxu1 %v7152_v5  ;;  %v5831_v5 = vld [vmem:[#allocation15 + $0x150] sm:$0xff] }
0x1223   :  { %7154 = vmatprep.subr.bf16.mxu1 %v8766_v53  ;;  %v7182_v17 = vpack.c.bf16 %v5832_v52, %v5831_v5  ;;  %v6026_v5 = vld [vmem:[#allocation15 + $0x268] sm:$0xff] }
0x1224   :  { %7132 = vmatpush3.bf16.msra.mxu0 %v7131_v1 }
0x1225   :  { %7133 = vmatprep.subr.bf16.mxu0 %v8766_v53 }
0x1226   :  { %7156 = vmatpush3.bf16.msra.mxu1 %v7155_v37  ;;  %v5833_v37 = vld [vmem:[#allocation15 + $0x160] sm:$0xff] }
0x1227   :  { %7157 = vmatprep.subr.bf16.mxu1 %v8766_v53  ;;  %v7185_v6 = vpack.c.bf16 %v5834_v46, %v5833_v37 }
0x1228   :  { %7135 = vmatpush3.bf16.msra.mxu0 %v7134_v15 }
0x1229   :  { %7136 = vmatprep.subr.bf16.mxu0 %v8766_v53 }
0x122a   :  { %7159 = vmatpush3.bf16.msra.mxu1 %v7158_v13  ;;  %v6688_v13 = vld [vmem:[%s12256_s11] ss:$0 sm:$0xff] }
0x122b   :  { %7160 = vmatprep.subr.bf16.mxu1 %v8766_v53 }
0x122c   :  { %7138 = vmatpush3.bf16.msra.mxu0 %v7137_v23  ;;  %v7164_v23 = vpack.c.bf16 %v5740_v7, %v5739_v2  ;;  %v6014_v2 = vld [vmem:[#allocation15 + $0x208] sm:$0xff]  ;;  %v6015_v7 = vld [vmem:[#allocation15 + $0x210] sm:$0xff] }
0x122d   :  { %7139 = vmatprep.subr.bf16.mxu0 %v8766_v53 }
0x122e   :  { %7162 = vmatpush3.bf16.msra.mxu1 %v7161_v42 }
0x122f   :  { %7163 = vmatprep.subr.bf16.mxu1 %v8766_v53 }
0x1230   :  { %7141 = vmatpush3.bf16.msra.mxu0 %v7140_v32  ;;  %v5823_v32 = vld [vmem:[#allocation15 + $0x110] sm:$0xff] }
0x1231   :  { %7166 = vmatprep.subr.bf16.mxu0 %v8766_v53  ;;  %v7170_v14 = vpack.c.bf16 %v5824_v43, %v5823_v32  ;;  %v6017_v32 = vld [vmem:[#allocation15 + $0x220] sm:$0xff] }
0x1232   :  { %7165 = vmatpush3.bf16.msra.mxu1 %v7164_v23 }
0x1233   :  { %7190 = vmatprep.subr.bf16.mxu1 %v8766_v53 }
0x12e6   :  { %v5554_v55 = vpop.f32.mrb[172].mxu0  ;;  %v5595_v38 = vpop.f32.mrb[172].mxu1 }
0x12e7   :  { %v5555_v39 = vadd.f32 %v5554_v55, %v12111_v47  ;;  %v5596_v60 = vadd.f32 %v5595_v38, %v12113_v4  ;;  %v5556_v58 = vpop.f32.mrb[173].mxu0  ;;  %v5597_v61 = vpop.f32.mrb[173].mxu1  ;;  %v5835_v38 = vld [vmem:[#allocation15 + $0x170] sm:$0xff] }
0x12e8   :  { %v5557_v24 = vadd.f32 %v5556_v58, %v12116_v3  ;;  %v5598_v63 = vadd.f32 %v5597_v61, %v12118_v45  ;;  %v5558_v16 = vpop.f32.mrb[174].mxu0  ;;  %v5599_v0 = vpop.f32.mrb[174].mxu1  ;;  %v5917_v58 = vld [vmem:[#allocation15 + $0x180] sm:$0xff]  ;;  %v5918_v61 = vld [vmem:[#allocation15 + $0x188] sm:$0xff] }
0x12e9   :  { %v5602_v51 = vadd.f32 %v5555_v39, %v13551_v12  ;;  %v5559_v9 = vpop.f32.mrb[175].mxu0  ;;  %v5600_v22 = vpop.f32.mrb[175].mxu1  ;;  %v5604_v47 = vadd.f32 %v5596_v60, %v9773_v41  ;;  %v5836_v39 = vld [vmem:[#allocation15 + $0x178] sm:$0xff] }
0x12ea   :  { %v5603_v25 = vadd.f32 %v5557_v24, %v13552_v18  ;;  %v5605_v4 = vadd.f32 %v5598_v63, %v13553_v44  ;;  %v7188_v60 = vpack.c.bf16 %v5836_v39, %v5835_v38  ;;  %v5919_v24 = vld [vmem:[#allocation15 + $0x190] sm:$0xff]  ;;  %v7191_v63 = vpack.c.bf16 %v5918_v61, %v5917_v58  ;;  %v5920_v16 = vld [vmem:[#allocation15 + $0x198] sm:$0xff]  ;;  %v5922_v9 = vld [vmem:[#allocation15 + $0x1a8] sm:$0xff] }
0x12eb   :  { %v6685_v34 = vmul.f32 -1.442695, %v5602_v51  ;;  %v6687_v28 = vmul.f32 -1.442695, %v5604_v47  ;;  %v7194_v0 = vpack.c.bf16 %v5920_v16, %v5919_v24  ;;  %v5921_v51 = vld [vmem:[#allocation15 + $0x1a0] sm:$0xff]  ;;  %v6110_v38 = vld [vmem:[#allocation15 + $0x288] sm:$0xff] }
0x12ec   :  { %v6686_v35 = vmul.f32 -1.442695, %v5603_v25  ;;  %v7197_v22 = vpack.c.bf16 %v5922_v9, %v5921_v51  ;;  %v5923_v25 = vld [vmem:[#allocation15 + $0x1b0] sm:$0xff]  ;;  %v5925_v47 = vld [vmem:[#allocation15 + $0x1c0] sm:$0xff]  ;;  %v6112_v58 = vld [vmem:[#allocation15 + $0x298] sm:$0xff] }
0x12ed   :  { %7990 = vpow2.f32 %v6685_v34  ;;  %v5924_v34 = vld [vmem:[#allocation15 + $0x1b8] sm:$0xff]  ;;  %v6111_v39 = vld [vmem:[#allocation15 + $0x290] sm:$0xff]  ;;  %v6113_v24 = vld [vmem:[#allocation15 + $0x2a0] sm:$0xff] }
0x12ee   :  { %7992 = vpow2.f32 %v6686_v35  ;;  %v7200_v35 = vpack.c.bf16 %v5924_v34, %v5923_v25  ;;  %v7242_v61 = vpack.c.bf16 %v6112_v58, %v6111_v39  ;;  %v6116_v51 = vld [vmem:[#allocation15 + $0x2b8] sm:$0xff]  ;;  %v6118_v25 = vld [vmem:[#allocation15 + $0x2c8] sm:$0xff]  ;;  %v6304_v39 = vld [vmem:[#allocation17 + $0x20] sm:$0xff] }
0x12ef   :  { %7994 = vtanh.f32 %v5605_v4  ;;  %v5926_v4 = vld [vmem:[#allocation15 + $0x1c8] sm:$0xff] }
0x12f0   :  { %7996 = vpow2.f32 %v6687_v28  ;;  %v7203_v28 = vpack.c.bf16 %v5926_v4, %v5925_v47  ;;  %v6120_v47 = vld [vmem:[#allocation15 + $0x2d8] sm:$0xff] }
0x12f7   :  { %v7991_v3 = vpop.eup %7990 }
0x12f8   :  { %v5615_v20 = vadd.f32 1.0, %v7991_v3  ;;  %v7993_v45 = vpop.eup %7992  ;;  %v5927_v3 = vld [vmem:[#allocation15 + $0x1d0] sm:$0xff] }
0x12f9   :  { %v5616_v12 = vadd.f32 1.0, %v7993_v45  ;;  %v7995_v26 = vpop.eup %7994 }
0x12fa   :  { %7998 = vrcp.f32 %v5615_v20  ;;  %v7997_v10 = vpop.eup %7996  ;;  %v5928_v20 = vld [vmem:[#allocation15 + $0x1d8] sm:$0xff] }
0x12fb   :  { %8000 = vrcp.f32 %v5616_v12  ;;  %v5617_v1 = vadd.f32 1.0, %v7997_v10  ;;  %v7206_v45 = vpack.c.bf16 %v5928_v20, %v5927_v3  ;;  %v5929_v12 = vld [vmem:[#allocation15 + $0x1e0] sm:$0xff]  ;;  %v6122_v3 = vld [vmem:[#allocation15 + $0x2e8] sm:$0xff] }
0x12fd   :  { %8002 = vrcp.f32 %v5617_v1 }
0x1304   :  { %v7999_v18 = vpop.eup %7998 }
0x1305   :  { %v5626_v29 = vmul.f32 %v7999_v18, %v7995_v26  ;;  %v8001_v30 = vpop.eup %8000  ;;  %v5930_v26 = vld [vmem:[#allocation15 + $0x1e8] sm:$0xff]  ;;  %v6690_v18 = vld [vmem:[%s12256_s11 + $0x1] ss:$0 sm:$0xff] }
0x1306   :  { %v5625_v49 = vmul.f32 %v8001_v30, %v12023_v40  ;;  %v7167_v40 = vpack.c.bf16 %v5822_v21, %v5821_v8  ;;  %v7209_v10 = vpack.c.bf16 %v5930_v26, %v5929_v12  ;;  %v6016_v8 = vld [vmem:[#allocation15 + $0x218] sm:$0xff] }
0x1307   :  { %v8003_v44 = vpop.eup %8002  ;;  %v7218_v21 = vpack.c.bf16 %v6016_v8, %v6015_v7  ;;  %v6209_v7 = vld [vmem:[#allocation15 + $0x320] sm:$0xff] }
0x1308   :  { %v5627_v41 = vadd.f32 %v5626_v29, %v5625_v49 }
0x130a   :  { %8004 = vtanh.f32 %v5627_v41  ;;  %v5931_v41 = vld [vmem:[#allocation15 + $0x1f0] sm:$0xff] }
0x1314   :  { %v8005_v62 = vpop.eup %8004 }
0x1315   :  { %v5629_v15 = vmul.f32 %v8005_v62, %v8003_v44  ;;  %v5932_v44 = vld [vmem:[#allocation15 + $0x1f8] sm:$0xff] }
0x1316   :  { %v7212_v62 = vpack.c.bf16 %v5932_v44, %v5931_v41  ;;  %v6206_v41 = vld [vmem:[#allocation15 + $0x308] sm:$0xff]  ;;  %v6207_v44 = vld [vmem:[#allocation15 + $0x310] sm:$0xff] }
0x1317   :  { %6871 = vmatmul.mubr.f32.vlgmr.msra.gmra.mrb[176].mxu0 %v5629_v15  ;;  %v6013_v15 = vld [vmem:[#allocation15 + $0x200] sm:$0xff] }
0x1318   :  { %6940 = vmatprep.mubr.msk.f32.mxu0 %vm8767_vm0, %v8768_v11  ;;  %7168 = vmatpush3.bf16.msra.mxu0 %v7167_v40  ;;  %v7215_v23 = vpack.c.bf16 %v6014_v2, %v6013_v15  ;;  %v6018_v40 = vld [vmem:[#allocation15 + $0x228] sm:$0xff]  ;;  %v6208_v15 = vld [vmem:[#allocation15 + $0x318] sm:$0xff] }
0x1319   :  { %7169 = vmatprep.subr.bf16.mxu0 %v8766_v53  ;;  %v7221_v43 = vpack.c.bf16 %v6018_v40, %v6017_v32  ;;  %v7266_v2 = vpack.c.bf16 %v6208_v15, %v6207_v44  ;;  %v6212_v32 = vld [vmem:[#allocation15 + $0x338] sm:$0xff] }
0x131c   :  { %7171 = vmatpush3.bf16.msra.mxu0 %v7170_v14  ;;  %v6019_v14 = vld [vmem:[#allocation15 + $0x230] sm:$0xff] }
0x131d   :  { %7172 = vmatprep.subr.bf16.mxu0 %v8766_v53  ;;  %v7224_v36 = vpack.c.bf16 %v6020_v31, %v6019_v14  ;;  %v6214_v14 = vld [vmem:[#allocation15 + $0x348] sm:$0xff] }
0x1320   :  { %7174 = vmatpush3.bf16.msra.mxu0 %v7173_v48  ;;  %v6021_v48 = vld [vmem:[#allocation15 + $0x240] sm:$0xff] }
0x1321   :  { %7175 = vmatprep.subr.bf16.mxu0 %v8766_v53  ;;  %v7227_v27 = vpack.c.bf16 %v6022_v50, %v6021_v48  ;;  %v6216_v48 = vld [vmem:[#allocation15 + $0x358] sm:$0xff] }
0x1324   :  { %7177 = vmatpush3.bf16.msra.mxu0 %v7176_v57  ;;  %v6023_v57 = vld [vmem:[#allocation15 + $0x250] sm:$0xff] }
0x1325   :  { %7178 = vmatprep.subr.bf16.mxu0 %v8766_v53  ;;  %v7230_v33 = vpack.c.bf16 %v6024_v54, %v6023_v57  ;;  %v6218_v57 = vld [vmem:[#allocation15 + $0x368] sm:$0xff] }
0x1328   :  { %7180 = vmatpush3.bf16.msra.mxu0 %v7179_v59  ;;  %v6025_v59 = vld [vmem:[#allocation15 + $0x260] sm:$0xff] }
0x1329   :  { %7181 = vmatprep.subr.bf16.mxu0 %v8766_v53  ;;  %v7233_v52 = vpack.c.bf16 %v6026_v5, %v6025_v59 }
0x132c   :  { %7183 = vmatpush3.bf16.msra.mxu0 %v7182_v17  ;;  %v6692_v17 = vld [vmem:[%s12256_s11 + $0x2] ss:$0 sm:$0xff] }
0x132d   :  { %7184 = vmatprep.subr.bf16.mxu0 %v8766_v53 }
0x1330   :  { %7186 = vmatpush3.bf16.msra.mxu0 %v7185_v6 }
0x1331   :  { %7187 = vmatprep.subr.bf16.mxu0 %v8766_v53 }
0x1334   :  { %7189 = vmatpush3.bf16.msra.mxu0 %v7188_v60 }
0x1335   :  { %7214 = vmatprep.subr.bf16.mxu0 %v8766_v53 }
0x13ea   :  { %v5719_v19 = vpop.f32.mrb[176].mxu0 }
0x13eb   :  { %v5720_v56 = vadd.f32 %v6688_v13, %v5719_v19  ;;  %v6872_v42 = vpop.f32.mrb[177].mxu0  ;;  %v6027_v19 = vld [vmem:[#allocation15 + $0x270] sm:$0xff] }
0x13ed   :  { %v5723_v55 = vmax.f32 %v5720_v56, 0.0  ;;  %v6028_v56 = vld [vmem:[#allocation15 + $0x278] sm:$0xff] }
0x13ee   :  { %v7236_v42 = vpack.c.bf16 %v6028_v56, %v6027_v19  ;;  %v6301_v19 = vld [vmem:[#allocation17 + $0x8] sm:$0xff]  ;;  %v6302_v56 = vld [vmem:[#allocation17 + $0x10] sm:$0xff] }
0x13ef   :  { %6906 = vmatmul.mubr.f32.vlgmr.msra.gmra.mrb[176].mxu1 %v5723_v55  ;;  %v6109_v55 = vld [vmem:[#allocation15 + $0x280] sm:$0xff] }
0x13f0   :  { %6975 = vmatprep.mubr.msk.f32.mxu1 %vm8767_vm0, %v8768_v11  ;;  %7192 = vmatpush3.bf16.msra.mxu1 %v7191_v63  ;;  %v7239_v60 = vpack.c.bf16 %v6110_v38, %v6109_v55  ;;  %v6114_v63 = vld [vmem:[#allocation15 + $0x2a8] sm:$0xff]  ;;  %v6303_v55 = vld [vmem:[#allocation17 + $0x18] sm:$0xff] }
0x13f1   :  { %7193 = vmatprep.subr.bf16.mxu1 %v8766_v53  ;;  %v7245_v16 = vpack.c.bf16 %v6114_v63, %v6113_v24  ;;  %v7290_v38 = vpack.c.bf16 %v6303_v55, %v6302_v56  ;;  %v6308_v63 = vld [vmem:[#allocation17 + $0x40] sm:$0xff] }
0x13f4   :  { %7195 = vmatpush3.bf16.msra.mxu1 %v7194_v0  ;;  %v6115_v0 = vld [vmem:[#allocation15 + $0x2b0] sm:$0xff] }
0x13f5   :  { %7196 = vmatprep.subr.bf16.mxu1 %v8766_v53  ;;  %v7248_v9 = vpack.c.bf16 %v6116_v51, %v6115_v0  ;;  %v6310_v51 = vld [vmem:[#allocation17 + $0x50] sm:$0xff] }
0x13f8   :  { %7198 = vmatpush3.bf16.msra.mxu1 %v7197_v22  ;;  %v6117_v22 = vld [vmem:[#allocation15 + $0x2c0] sm:$0xff] }
0x13f9   :  { %7199 = vmatprep.subr.bf16.mxu1 %v8766_v53  ;;  %v7251_v34 = vpack.c.bf16 %v6118_v25, %v6117_v22  ;;  %v6312_v25 = vld [vmem:[#allocation17 + $0x60] sm:$0xff] }
0x13fc   :  { %7201 = vmatpush3.bf16.msra.mxu1 %v7200_v35  ;;  %v6119_v35 = vld [vmem:[#allocation15 + $0x2d0] sm:$0xff] }
0x13fd   :  { %7202 = vmatprep.subr.bf16.mxu1 %v8766_v53  ;;  %v7254_v4 = vpack.c.bf16 %v6120_v47, %v6119_v35  ;;  %v6698_v47 = vld [vmem:[%s12256_s11 + $0x5] ss:$0 sm:$0xff] }
0x1400   :  { %7204 = vmatpush3.bf16.msra.mxu1 %v7203_v28  ;;  %v6121_v28 = vld [vmem:[#allocation15 + $0x2e0] sm:$0xff] }
0x1401   :  { %7205 = vmatprep.subr.bf16.mxu1 %v8766_v53  ;;  %v7257_v20 = vpack.c.bf16 %v6122_v3, %v6121_v28 }
0x1404   :  { %7207 = vmatpush3.bf16.msra.mxu1 %v7206_v45  ;;  %v6694_v45 = vld [vmem:[%s12256_s11 + $0x3] ss:$0 sm:$0xff] }
0x1405   :  { %7208 = vmatprep.subr.bf16.mxu1 %v8766_v53 }
0x1408   :  { %7210 = vmatpush3.bf16.msra.mxu1 %v7209_v10 }
0x1409   :  { %7211 = vmatprep.subr.bf16.mxu1 %v8766_v53 }
0x140c   :  { %7213 = vmatpush3.bf16.msra.mxu1 %v7212_v62 }
0x140d   :  { %7238 = vmatprep.subr.bf16.mxu1 %v8766_v53 }
0x14c2   :  { %v5815_v29 = vpop.f32.mrb[176].mxu1 }
0x14c3   :  { %v5816_v30 = vadd.f32 %v6690_v18, %v5815_v29  ;;  %v6907_v1 = vpop.f32.mrb[177].mxu1  ;;  %v6123_v29 = vld [vmem:[#allocation15 + $0x2f0] sm:$0xff] }
0x14c5   :  { %v5819_v49 = vmax.f32 %v5816_v30, 0.0  ;;  %v6124_v30 = vld [vmem:[#allocation15 + $0x2f8] sm:$0xff] }
0x14c6   :  { %v7260_v1 = vpack.c.bf16 %v6124_v30, %v6123_v29 }
0x14c7   :  { %6941 = vmatmul.mubr.f32.vlgmr.msra.gmra.mrb[178].mxu0 %v5819_v49  ;;  %v6205_v49 = vld [vmem:[#allocation15 + $0x300] sm:$0xff] }
0x14c8   :  { %7010 = vmatprep.mubr.msk.f32.mxu0 %vm8767_vm0, %v8768_v11  ;;  %7216 = vmatpush3.bf16.msra.mxu0 %v7215_v23  ;;  %v7263_v62 = vpack.c.bf16 %v6206_v41, %v6205_v49  ;;  %v6210_v23 = vld [vmem:[#allocation15 + $0x328] sm:$0xff] }
0x14c9   :  { %7217 = vmatprep.subr.bf16.mxu0 %v8766_v53  ;;  %v7269_v8 = vpack.c.bf16 %v6210_v23, %v6209_v7 }
0x14cc   :  { %7219 = vmatpush3.bf16.msra.mxu0 %v7218_v21  ;;  %v6211_v21 = vld [vmem:[#allocation15 + $0x330] sm:$0xff] }
0x14cd   :  { %7220 = vmatprep.subr.bf16.mxu0 %v8766_v53  ;;  %v7272_v40 = vpack.c.bf16 %v6212_v32, %v6211_v21 }
0x14d0   :  { %7222 = vmatpush3.bf16.msra.mxu0 %v7221_v43  ;;  %v6213_v43 = vld [vmem:[#allocation15 + $0x340] sm:$0xff] }
0x14d1   :  { %7223 = vmatprep.subr.bf16.mxu0 %v8766_v53  ;;  %v7275_v31 = vpack.c.bf16 %v6214_v14, %v6213_v43 }
0x14d4   :  { %7225 = vmatpush3.bf16.msra.mxu0 %v7224_v36  ;;  %v6215_v36 = vld [vmem:[#allocation15 + $0x350] sm:$0xff] }
0x14d5   :  { %7226 = vmatprep.subr.bf16.mxu0 %v8766_v53  ;;  %v7278_v50 = vpack.c.bf16 %v6216_v48, %v6215_v36 }
0x14d8   :  { %7228 = vmatpush3.bf16.msra.mxu0 %v7227_v27  ;;  %v6217_v27 = vld [vmem:[#allocation15 + $0x360] sm:$0xff] }
0x14d9   :  { %7229 = vmatprep.subr.bf16.mxu0 %v8766_v53  ;;  %v7281_v54 = vpack.c.bf16 %v6218_v57, %v6217_v27 }
0x14dc   :  { %7231 = vmatpush3.bf16.msra.mxu0 %v7230_v33  ;;  %v6696_v33 = vld [vmem:[%s12256_s11 + $0x4] ss:$0 sm:$0xff] }
0x14dd   :  { %7232 = vmatprep.subr.bf16.mxu0 %v8766_v53 }
0x14e0   :  { %7234 = vmatpush3.bf16.msra.mxu0 %v7233_v52 }
0x14e1   :  { %7235 = vmatprep.subr.bf16.mxu0 %v8766_v53 }
0x14e4   :  { %7237 = vmatpush3.bf16.msra.mxu0 %v7236_v42 }
0x14e5   :  { %7262 = vmatprep.subr.bf16.mxu0 %v8766_v53 }
0x159a   :  { %v5911_v37 = vpop.f32.mrb[178].mxu0 }
0x159b   :  { %v5912_v46 = vadd.f32 %v6692_v17, %v5911_v37  ;;  %v6942_v6 = vpop.f32.mrb[179].mxu0  ;;  %v6219_v37 = vld [vmem:[#allocation15 + $0x370] sm:$0xff] }
0x159d   :  { %v5915_v13 = vmax.f32 %v5912_v46, 0.0  ;;  %v6220_v46 = vld [vmem:[#allocation15 + $0x378] sm:$0xff] }
0x159e   :  { %v7284_v6 = vpack.c.bf16 %v6220_v46, %v6219_v37 }
0x159f   :  { %6976 = vmatmul.mubr.f32.vlgmr.msra.gmra.mrb[178].mxu1 %v5915_v13  ;;  %v6300_v13 = vld [vmem:[#allocation17] sm:$0xff] }
0x15a0   :  { %7045 = vmatprep.mubr.msk.f32.mxu1 %vm8767_vm0, %v8768_v11  ;;  %7240 = vmatpush3.bf16.msra.mxu1 %v7239_v60  ;;  %v7287_v42 = vpack.c.bf16 %v6301_v19, %v6300_v13  ;;  %v6305_v60 = vld [vmem:[#allocation17 + $0x28] sm:$0xff] }
0x15a1   :  { %7241 = vmatprep.subr.bf16.mxu1 %v8766_v53  ;;  %v7293_v58 = vpack.c.bf16 %v6305_v60, %v6304_v39 }
0x15a4   :  { %7243 = vmatpush3.bf16.msra.mxu1 %v7242_v61  ;;  %v6307_v61 = vld [vmem:[#allocation17 + $0x38] sm:$0xff] }
0x15a5   :  { %7244 = vmatprep.subr.bf16.mxu1 %v8766_v53 }
0x15a8   :  { %7246 = vmatpush3.bf16.msra.mxu1 %v7245_v16  ;;  %v6309_v16 = vld [vmem:[#allocation17 + $0x48] sm:$0xff] }
0x15a9   :  { %7247 = vmatprep.subr.bf16.mxu1 %v8766_v53  ;;  %v7299_v0 = vpack.c.bf16 %v6309_v16, %v6308_v63 }
0x15ac   :  { %7249 = vmatpush3.bf16.msra.mxu1 %v7248_v9  ;;  %v6311_v9 = vld [vmem:[#allocation17 + $0x58] sm:$0xff] }
0x15ad   :  { %7250 = vmatprep.subr.bf16.mxu1 %v8766_v53  ;;  %v7302_v22 = vpack.c.bf16 %v6311_v9, %v6310_v51 }
0x15b0   :  { %7252 = vmatpush3.bf16.msra.mxu1 %v7251_v34  ;;  %v6313_v34 = vld [vmem:[#allocation17 + $0x68] sm:$0xff] }
0x15b1   :  { %7253 = vmatprep.subr.bf16.mxu1 %v8766_v53  ;;  %v7305_v35 = vpack.c.bf16 %v6313_v34, %v6312_v25 }
0x15b4   :  { %7255 = vmatpush3.bf16.msra.mxu1 %v7254_v4 }
0x15b5   :  { %7256 = vmatprep.subr.bf16.mxu1 %v8766_v53 }
0x15b8   :  { %7258 = vmatpush3.bf16.msra.mxu1 %v7257_v20 }
0x15b9   :  { %7259 = vmatprep.subr.bf16.mxu1 %v8766_v53 }
0x15bc   :  { %7261 = vmatpush3.bf16.msra.mxu1 %v7260_v1  ;;  %v6701_v1 = vld [vmem:[%s12258_s13] ss:$0 sm:$0xff] }
0x15bd   :  { %7286 = vmatprep.subr.bf16.mxu1 %v8766_v53 }
0x1672   :  { %v6007_v12 = vpop.f32.mrb[178].mxu1 }
0x1673   :  { %v6008_v26 = vadd.f32 %v6694_v45, %v6007_v12  ;;  %v6977_v10 = vpop.f32.mrb[179].mxu1  ;;  %v6314_v45 = vld [vmem:[#allocation17 + $0x70] sm:$0xff]  ;;  %v6315_v12 = vld [vmem:[#allocation17 + $0x78] sm:$0xff] }
0x1674   :  { %v6700_v10 = vld [vmem:[%s12256_s11 + $0x6] ss:$0 sm:$0xff] }
0x1675   :  { %v6011_v18 = vmax.f32 %v6008_v26, 0.0  ;;  %v7308_v26 = vpack.c.bf16 %v6315_v12, %v6314_v45 }
0x1677   :  { %7011 = vmatmul.mubr.f32.vlgmr.msra.gmra.mrb[180].mxu0 %v6011_v18 }
0x1678   :  { %7080 = vmatprep.mubr.msk.f32.mxu0 %vm8767_vm0, %v8768_v11  ;;  %7264 = vmatpush3.bf16.msra.mxu0 %v7263_v62 }
0x1679   :  { %7265 = vmatprep.subr.bf16.mxu0 %v8766_v53 }
0x167c   :  { %7267 = vmatpush3.bf16.msra.mxu0 %v7266_v2 }
0x167d   :  { %7268 = vmatprep.subr.bf16.mxu0 %v8766_v53 }
0x1680   :  { %7270 = vmatpush3.bf16.msra.mxu0 %v7269_v8 }
0x1681   :  { %7271 = vmatprep.subr.bf16.mxu0 %v8766_v53 }
0x1684   :  { %7273 = vmatpush3.bf16.msra.mxu0 %v7272_v40 }
0x1685   :  { %7274 = vmatprep.subr.bf16.mxu0 %v8766_v53 }
0x1688   :  { %7276 = vmatpush3.bf16.msra.mxu0 %v7275_v31 }
0x1689   :  { %7277 = vmatprep.subr.bf16.mxu0 %v8766_v53 }
0x168c   :  { %7279 = vmatpush3.bf16.msra.mxu0 %v7278_v50 }
0x168d   :  { %7280 = vmatprep.subr.bf16.mxu0 %v8766_v53 }
0x1690   :  { %7282 = vmatpush3.bf16.msra.mxu0 %v7281_v54 }
0x1691   :  { %7283 = vmatprep.subr.bf16.mxu0 %v8766_v53 }
0x1694   :  { %7285 = vmatpush3.bf16.msra.mxu0 %v7284_v6 }
0x174a   :  { %v6103_v59 = vpop.f32.mrb[180].mxu0 }
0x174b   :  { %v6104_v5 = vadd.f32 %v6696_v33, %v6103_v59  ;;  %v7012_v52 = vpop.f32.mrb[181].mxu0 }
0x174d   :  { %v6107_v17 = vmax.f32 %v6104_v5, 0.0 }
0x174f   :  { %7046 = vmatmul.mubr.f32.vlgmr.msra.gmra.mrb[180].mxu1 %v6107_v17 }
0x1750   :  { %7115 = vmatprep.mubr.msk.f32.mxu1 %vm8767_vm0, %v8768_v11  ;;  %7288 = vmatpush3.bf16.msra.mxu1 %v7287_v42  ;;  %v6306_v11 = vld [vmem:[#allocation17 + $0x30] sm:$0xff] }
0x1751   :  { %7289 = vmatprep.subr.bf16.mxu1 %v8766_v53  ;;  %v7296_v24 = vpack.c.bf16 %v6307_v61, %v6306_v11 }
0x1754   :  { %7291 = vmatpush3.bf16.msra.mxu1 %v7290_v38 }
0x1755   :  { %7292 = vmatprep.subr.bf16.mxu1 %v8766_v53 }
0x1758   :  { %7294 = vmatpush3.bf16.msra.mxu1 %v7293_v58 }
0x1759   :  { %7295 = vmatprep.subr.bf16.mxu1 %v8766_v53 }
0x175c   :  { %7297 = vmatpush3.bf16.msra.mxu1 %v7296_v24 }
0x175d   :  { %7298 = vmatprep.subr.bf16.mxu1 %v8766_v53 }
0x1760   :  { %7300 = vmatpush3.bf16.msra.mxu1 %v7299_v0 }
0x1761   :  { %7301 = vmatprep.subr.bf16.mxu1 %v8766_v53 }
0x1764   :  { %7303 = vmatpush3.bf16.msra.mxu1 %v7302_v22 }
0x1765   :  { %7304 = vmatprep.subr.bf16.mxu1 %v8766_v53 }
0x1768   :  { %7306 = vmatpush3.bf16.msra.mxu1 %v7305_v35 }
0x1769   :  { %7307 = vmatprep.subr.bf16.mxu1 %v8766_v53 }
0x176c   :  { %7309 = vmatpush3.bf16.msra.mxu1 %v7308_v26 }
0x1822   :  { %v6199_v4 = vpop.f32.mrb[180].mxu1 }
0x1823   :  { %v6200_v28 = vadd.f32 %v6698_v47, %v6199_v4  ;;  %v7047_v3 = vpop.f32.mrb[181].mxu1 }
0x1825   :  { %v6203_v20 = vmax.f32 %v6200_v28, 0.0 }
0x1827   :  { %7081 = vmatmul.mubr.f32.vlgmr.msra.gmra.mrb[182].mxu0 %v6203_v20 }
0x18fa   :  { %v6295_v18 = vpop.f32.mrb[182].mxu0 }
0x18fb   :  { %v6296_v29 = vadd.f32 %v6700_v10, %v6295_v18  ;;  %v7082_v53 = vpop.f32.mrb[183].mxu0 }
0x18fd   :  { %v6299_v30 = vmax.f32 %v6296_v29, 0.0 }
0x18ff   :  { %7116 = vmatmul.mubr.f32.vlgmr.msra.gmra.mrb[182].mxu1 %v6299_v30 }
0x19d2   :  { %v6389_v49 = vpop.f32.mrb[182].mxu1 }
0x19d3   :  { %v6390_v41 = vadd.f32 %v6701_v1, %v6389_v49  ;;  %v7117_v44 = vpop.f32.mrb[183].mxu1 }
0x19d5   :  { %6393 = vst [vmem:[#allocation18] sm:$0xff] %v6390_v41 }
0x19d6   :  { %8727 = shalt.err (!%p8724_p6)
}
0x19d7   :  { %s8728_s8 = scalar_lea.hbm %s12259_s14, 128 }
0x19d8   :  { %p8729_p7 = scmp.ne.s32.totalorder %s12259_s14, %s8728_s8  ;;  %p8732_p8 = scmp.lt.u32.totalorder %s8728_s8, %s12259_s14 }
0x19da   :  { %p8734_p9 = pnand %p8732_p8, %p8729_p7 }
0x19dc   :  { %8737 = shalt.err (!%p8734_p9)
}
0x19dd   :  { %6403 = dma.vmem_to_hbm [thread:$0]  %s6401_s25, 128, %s12259_s14, [#allocation5]  }
0x19de   :  { %8748 = dma.done.wait [#allocation5], 128  }
0x19df   :  { %8749 = vsyncadd [#allocation5], 4294967168 }
0x19e0   :  { %6407 = vsyncpa [#allocation4], 1 }
0x19e1   :  { %6408 = vsyncpa [#allocation7], 1 }
0x19e2   :  { %6409 = vsyncpa [#allocation10], 1 }
0x19e3   :  { %6410 = vsyncpa [#allocation13], 1 }
0x19e4   :  { %6411 = vsyncpa [#allocation16], 1 }
0x19e5   :  { %6412 = vsyncpa [#allocation5], 1 }

</bundles_post_ra>
